<compile_context>
chip_gen: v6e
topology: v6e:2x2x1
jax: 0.10.0
libtpu: 0.0.40
codegen_flags: <defaults>
</compile_context>

<pallas_src>
import jax
import jax.numpy as jnp
from jax import lax
from jax.experimental import pallas as pl
from jax.experimental.pallas import tpu as pltpu


_VMEM = pl.BlockSpec(memory_space=pltpu.MemorySpace.VMEM)


def _round_up(n, m):
    return -(-n // m) * m


# ----------------------------------------------------------------------------
# Fused kernel: conv1+ReLU+pool -> conv2+ReLU+pool -> flatten -> fc1/fc2/fc3
# ----------------------------------------------------------------------------
def _make_fused_kernel(B, Cin, H, W, C1, C2, K, MSL2, P2h, P2w):
    HW = H * W
    L1 = B * HW                 # stage-1 GEMM width (flat index m = b*HW + h*W + w)
    LT1 = L1 - (W + 1)          # pooled-max-1 slab width
    LT2 = MSL2 - (2 * W + 2)    # pooled-max-2 slab width

    def kernel(x_ref, w1_ref, b1_ref, w2_ref, b2_ref,
               wf1_ref, bf1_ref, wf2_ref, bf2_ref, wf3_ref, bf3_ref,
               o_ref, p1_ref, p2_ref, f_ref):
        # ---- stage 1: in-VMEM im2col -> lane-dense GEMM -> bias+ReLU -> 2x2 pool ----
        p1_ref[...] = jnp.zeros(p1_ref.shape, p1_ref.dtype)
        for kh in range(K):
            for kw in range(K):
                t = kh * K + kw
                d = kh * W + kw
                for b in range(B):
                    # patch row block (kh,kw,:) for image b: a contiguous lane slice
                    p1_ref[t * Cin:(t + 1) * Cin, b * HW:b * HW + (HW - d)] = (
                        x_ref[b * Cin:(b + 1) * Cin, d:HW])
        a1 = jnp.dot(w1_ref[...], p1_ref[...], preferred_element_type=jnp.float32)
        a1 = jnp.maximum(a1 + b1_ref[...], 0.0)                       # (C1, L1)
        # 2x2 max-pool: window taps sit at lane offsets {0, 1, W, W+1}
        t1 = jnp.maximum(jnp.maximum(a1[:, 0:LT1], a1[:, 1:1 + LT1]),
                         jnp.maximum(a1[:, W:W + LT1], a1[:, W + 1:W + 1 + LT1]))

        # ---- stage 2: pooled grid stays on the stride-2 lattice of the same flat
        #      index space; conv2 tap offsets are simply kh*2W + kw*2 ---------------
        for kh in range(K):
            for kw in range(K):
                t = kh * K + kw
                d = kh * 2 * W + kw * 2
                p2_ref[t * C1:(t + 1) * C1, :] = t1[:, d:d + MSL2]
        a2 = jnp.dot(w2_ref[...], p2_ref[...], preferred_element_type=jnp.float32)
        a2 = jnp.maximum(a2 + b2_ref[...], 0.0)                       # (C2, MSL2)
        t2 = jnp.maximum(jnp.maximum(a2[:, 0:LT2], a2[:, 2:2 + LT2]),
                         jnp.maximum(a2[:, 2 * W:2 * W + LT2],
                                     a2[:, 2 * W + 2:2 * W + 2 + LT2]))

        # ---- flatten: gather the P2h*P2w valid pooled anchors per image -----------
        for q in range(P2h * P2w):
            i2, j2 = q // P2w, q % P2w
            for b in range(B):
                pos = b * HW + i2 * 4 * W + j2 * 4
                f_ref[q * C2:(q + 1) * C2, b:b + 1] = t2[:, pos:pos + 1]

        # ---- fc1+ReLU, fc2+ReLU, fc3 (features are contracted from dim 0 of F) ----
        h = lax.dot_general(f_ref[...], wf1_ref[...],
                            dimension_numbers=(((0,), (0,)), ((), ())),
                            preferred_element_type=jnp.float32)       # (B, F1)
        h = jnp.maximum(h + bf1_ref[...], 0.0)
        h = jnp.maximum(jnp.dot(h, wf2_ref[...], preferred_element_type=jnp.float32)
                        + bf2_ref[...], 0.0)
        o = jnp.dot(h, wf3_ref[...], preferred_element_type=jnp.float32) + bf3_ref[...]
        o_ref[...] = o.astype(o_ref.dtype)

    return kernel


def net_forward(params, x):
    B, Cin, H, W = x.shape
    C1, _, K, _ = params["conv1_w"].shape
    C2 = params["conv2_w"].shape[0]
    F1 = params["fc1_w"].shape[1]
    F2 = params["fc2_w"].shape[1]
    F3 = params["fc3_w"].shape[1]

    OH1, OW1 = H - K + 1, W - K + 1          # conv1 valid output
    P1h, P1w = OH1 // 2, OW1 // 2            # after pool1
    OH2, OW2 = P1h - K + 1, P1w - K + 1      # conv2 valid output
    P2h, P2w = OH2 // 2, OW2 // 2            # after pool2
    NFLAT = C2 * P2h * P2w
    assert params["fc1_w"].shape[0] == NFLAT, (params["fc1_w"].shape, NFLAT)

    HW = H * W
    L1 = B * HW
    LT1 = L1 - (W + 1)
    msl2_min = (B - 1) * HW + (OH2 - 1) * 2 * W + (OW2 - 1) * 2 + 1
    MSL2 = _round_up(msl2_min, 128)          # lane-dense stage-2 GEMM width
    assert MSL2 + (K - 1) * 2 * W + (K - 1) * 2 <= LT1
    LT2 = MSL2 - (2 * W + 2)
    assert (B - 1) * HW + (P2h - 1) * 4 * W + (P2w - 1) * 4 < LT2

    # ---- layout prep: free reshape of the input, tiny constant weight re-layouts --
    x_flat = x.reshape(B * Cin, HW)                                     # (B*Cin, H*W)
    w1r = params["conv1_w"].transpose(0, 2, 3, 1).reshape(C1, Cin * K * K)
    w2r = params["conv2_w"].transpose(0, 2, 3, 1).reshape(C2, C1 * K * K)
    # fc1 rows: torch flatten order (c, i, j) -> kernel gather order (i*P2w + j, c)
    wf1 = (params["fc1_w"].reshape(C2, P2h * P2w, F1)
           .transpose(1, 0, 2).reshape(NFLAT, F1))

    kernel = _make_fused_kernel(B, Cin, H, W, C1, C2, K, MSL2, P2h, P2w)

    K1, K2 = Cin * K * K, C1 * K * K
    flops = 2 * (C1 * K1 * L1 + C2 * K2 * MSL2
                 + B * (NFLAT * F1 + F1 * F2 + F2 * F3))
    bytes_accessed = 4 * (B * Cin * HW + C1 * K1 + C1 + C2 * K2 + C2
                          + NFLAT * F1 + F1 + F1 * F2 + F2 + F2 * F3 + F3 + B * F3)

    return pl.pallas_call(
        kernel,
        out_shape=jax.ShapeDtypeStruct((B, F3), jnp.float32),
        in_specs=[_VMEM] * 11,
        out_specs=_VMEM,
        scratch_shapes=[
            pltpu.VMEM((Cin * K * K, L1), jnp.float32),    # stage-1 patch slab
            pltpu.VMEM((C1 * K * K, MSL2), jnp.float32),   # stage-2 patch slab
            pltpu.VMEM((NFLAT, B), jnp.float32),           # flattened features
        ],
        cost_estimate=pl.CostEstimate(flops=flops, transcendentals=0,
                                      bytes_accessed=bytes_accessed),
    )(x_flat, w1r, params["conv1_b"].reshape(C1, 1),
      w2r, params["conv2_b"].reshape(C2, 1),
      wf1, params["fc1_b"].reshape(1, F1),
      params["fc2_w"], params["fc2_b"].reshape(1, F2),
      params["fc3_w"], params["fc3_b"].reshape(1, F3))


# ----------------------------------------------------------------------------
# Parameters (deterministic, PyTorch default-ish uniform init)
# ----------------------------------------------------------------------------
def init_params(key):
    def uniform(key, shape, fan_in):
        bound = 1.0 / jnp.sqrt(float(fan_in))
        return jax.random.uniform(key, shape, jnp.float32, -bound, bound)

    ks = jax.random.split(key, 10)
    return {
        "conv1_w": uniform(ks[0], (6, 3, 5, 5), 3 * 5 * 5),
        "conv1_b": uniform(ks[1], (6,), 3 * 5 * 5),
        "conv2_w": uniform(ks[2], (16, 6, 5, 5), 6 * 5 * 5),
        "conv2_b": uniform(ks[3], (16,), 6 * 5 * 5),
        # Linear weights stored pre-transposed as (in, out): y = x @ W + b
        "fc1_w": uniform(ks[4], (16 * 5 * 5, 120), 16 * 5 * 5),
        "fc1_b": uniform(ks[5], (1, 120), 16 * 5 * 5),
        "fc2_w": uniform(ks[6], (120, 84), 120),
        "fc2_b": uniform(ks[7], (1, 84), 120),
        "fc3_w": uniform(ks[8], (84, 10), 84),
        "fc3_b": uniform(ks[9], (1, 10), 84),
    }


# Pure-JAX reference mirroring Net.forward, for correctness validation.
def reference_forward(params, x):
    dn = ("NCHW", "OIHW", "NCHW")
    y = lax.conv_general_dilated(x, params["conv1_w"], (1, 1), "VALID",
                                 dimension_numbers=dn)
    y = jnp.maximum(y + params["conv1_b"][None, :, None, None], 0.0)
    y = lax.reduce_window(y, -jnp.inf, lax.max, (1, 1, 2, 2), (1, 1, 2, 2), "VALID")
    y = lax.conv_general_dilated(y, params["conv2_w"], (1, 1), "VALID",
                                 dimension_numbers=dn)
    y = jnp.maximum(y + params["conv2_b"][None, :, None, None], 0.0)
    y = lax.reduce_window(y, -jnp.inf, lax.max, (1, 1, 2, 2), (1, 1, 2, 2), "VALID")
    y = y.reshape(x.shape[0], -1)
    y = jnp.maximum(y @ params["fc1_w"] + params["fc1_b"], 0.0)
    y = jnp.maximum(y @ params["fc2_w"] + params["fc2_b"], 0.0)
    return y @ params["fc3_w"] + params["fc3_b"]


if __name__ == "__main__":
    key = jax.random.PRNGKey(0)
    k_param, k_input = jax.random.split(key)

    params = init_params(k_param)
    # Input must be (B, 3, 32, 32) so that flatten yields 16*5*5 = 400.
    x = jax.random.normal(k_input, (2, 3, 32, 32), dtype=jnp.float32)

    out = jax.block_until_ready(jax.jit(net_forward)(params, x))
    assert out.shape == (2, 10), out.shape

    ref = jax.block_until_ready(jax.jit(reference_forward)(params, x))
    assert jnp.allclose(out, ref, atol=1e-3, rtol=1e-3), (out, ref)

    print("KERNEL_OK")
</pallas_src>

<mosaic_0001>
module attributes {stable_mosaic.version = 11 : i64} {
  func.func @kernel(%arg0: memref<6x1024xf32, #tpu.memory_space<vmem>>, %arg1: memref<6x75xf32, #tpu.memory_space<vmem>>, %arg2: memref<6x1xf32, #tpu.memory_space<vmem>>, %arg3: memref<16x150xf32, #tpu.memory_space<vmem>>, %arg4: memref<16x1xf32, #tpu.memory_space<vmem>>, %arg5: memref<400x120xf32, #tpu.memory_space<vmem>>, %arg6: memref<1x120xf32, #tpu.memory_space<vmem>>, %arg7: memref<120x84xf32, #tpu.memory_space<vmem>>, %arg8: memref<1x84xf32, #tpu.memory_space<vmem>>, %arg9: memref<84x10xf32, #tpu.memory_space<vmem>>, %arg10: memref<1x10xf32, #tpu.memory_space<vmem>>, %arg11: memref<2x10xf32, #tpu.memory_space<vmem>>, %arg12: memref<75x2048xf32, #tpu.memory_space<vmem>>, %arg13: memref<150x1664xf32, #tpu.memory_space<vmem>>, %arg14: memref<400x2xf32, #tpu.memory_space<vmem>>) attributes {dimension_semantics = [], scalar_prefetch = 0 : i64, scratch_operands = 3 : i64, tpu.core_type = #tpu.core_type<tc>} {
    %cst = arith.constant 0.000000e+00 : f32
    %0 = vector.broadcast %cst : f32 to vector<75x2048xf32>
    %c0 = arith.constant 0 : index
    %c0_0 = arith.constant 0 : index
    %1 = vector.load %arg12[%c0, %c0_0] : memref<75x2048xf32, #tpu.memory_space<vmem>>, vector<75x2048xf32>
    tpu.vector_store %arg12[%c0, %c0_0], %0 {strides = array<i32>} : memref<75x2048xf32, #tpu.memory_space<vmem>>, vector<75x2048xf32>,
    %c0_1 = arith.constant 0 : index
    %c0_2 = arith.constant 0 : index
    %2 = vector.load %arg0[%c0_1, %c0_2] : memref<6x1024xf32, #tpu.memory_space<vmem>>, vector<3x1024xf32>
    %c0_3 = arith.constant 0 : index
    %c0_4 = arith.constant 0 : index
    %3 = vector.load %arg12[%c0_3, %c0_4] : memref<75x2048xf32, #tpu.memory_space<vmem>>, vector<3x1024xf32>
    tpu.vector_store %arg12[%c0_3, %c0_4], %2 {strides = array<i32>} : memref<75x2048xf32, #tpu.memory_space<vmem>>, vector<3x1024xf32>,
    %c3 = arith.constant 3 : index
    %c0_5 = arith.constant 0 : index
    %4 = vector.load %arg0[%c3, %c0_5] : memref<6x1024xf32, #tpu.memory_space<vmem>>, vector<3x1024xf32>
    %c0_6 = arith.constant 0 : index
    %c1024 = arith.constant 1024 : index
    %5 = vector.load %arg12[%c0_6, %c1024] : memref<75x2048xf32, #tpu.memory_space<vmem>>, vector<3x1024xf32>
    tpu.vector_store %arg12[%c0_6, %c1024], %4 {strides = array<i32>} : memref<75x2048xf32, #tpu.memory_space<vmem>>, vector<3x1024xf32>,
    %c0_7 = arith.constant 0 : index
    %c1 = arith.constant 1 : index
    %6 = vector.load %arg0[%c0_7, %c1] : memref<6x1024xf32, #tpu.memory_space<vmem>>, vector<3x1023xf32>
    %c3_8 = arith.constant 3 : index
    %c0_9 = arith.constant 0 : index
    %7 = vector.load %arg12[%c3_8, %c0_9] : memref<75x2048xf32, #tpu.memory_space<vmem>>, vector<3x1023xf32>
    tpu.vector_store %arg12[%c3_8, %c0_9], %6 {strides = array<i32>} : memref<75x2048xf32, #tpu.memory_space<vmem>>, vector<3x1023xf32>,
    %c3_10 = arith.constant 3 : index
    %c1_11 = arith.constant 1 : index
    %8 = vector.load %arg0[%c3_10, %c1_11] : memref<6x1024xf32, #tpu.memory_space<vmem>>, vector<3x1023xf32>
    %c3_12 = arith.constant 3 : index
    %c1024_13 = arith.constant 1024 : index
    %9 = vector.load %arg12[%c3_12, %c1024_13] : memref<75x2048xf32, #tpu.memory_space<vmem>>, vector<3x1023xf32>
    tpu.vector_store %arg12[%c3_12, %c1024_13], %8 {strides = array<i32>} : memref<75x2048xf32, #tpu.memory_space<vmem>>, vector<3x1023xf32>,
    %c0_14 = arith.constant 0 : index
    %c2 = arith.constant 2 : index
    %10 = vector.load %arg0[%c0_14, %c2] : memref<6x1024xf32, #tpu.memory_space<vmem>>, vector<3x1022xf32>
    %c6 = arith.constant 6 : index
    %c0_15 = arith.constant 0 : index
    %11 = vector.load %arg12[%c6, %c0_15] : memref<75x2048xf32, #tpu.memory_space<vmem>>, vector<3x1022xf32>
    tpu.vector_store %arg12[%c6, %c0_15], %10 {strides = array<i32>} : memref<75x2048xf32, #tpu.memory_space<vmem>>, vector<3x1022xf32>,
    %c3_16 = arith.constant 3 : index
    %c2_17 = arith.constant 2 : index
    %12 = vector.load %arg0[%c3_16, %c2_17] : memref<6x1024xf32, #tpu.memory_space<vmem>>, vector<3x1022xf32>
    %c6_18 = arith.constant 6 : index
    %c1024_19 = arith.constant 1024 : index
    %13 = vector.load %arg12[%c6_18, %c1024_19] : memref<75x2048xf32, #tpu.memory_space<vmem>>, vector<3x1022xf32>
    tpu.vector_store %arg12[%c6_18, %c1024_19], %12 {strides = array<i32>} : memref<75x2048xf32, #tpu.memory_space<vmem>>, vector<3x1022xf32>,
    %c0_20 = arith.constant 0 : index
    %c3_21 = arith.constant 3 : index
    %14 = vector.load %arg0[%c0_20, %c3_21] : memref<6x1024xf32, #tpu.memory_space<vmem>>, vector<3x1021xf32>
    %c9 = arith.constant 9 : index
    %c0_22 = arith.constant 0 : index
    %15 = vector.load %arg12[%c9, %c0_22] : memref<75x2048xf32, #tpu.memory_space<vmem>>, vector<3x1021xf32>
    tpu.vector_store %arg12[%c9, %c0_22], %14 {strides = array<i32>} : memref<75x2048xf32, #tpu.memory_space<vmem>>, vector<3x1021xf32>,
    %c3_23 = arith.constant 3 : index
    %c3_24 = arith.constant 3 : index
    %16 = vector.load %arg0[%c3_23, %c3_24] : memref<6x1024xf32, #tpu.memory_space<vmem>>, vector<3x1021xf32>
    %c9_25 = arith.constant 9 : index
    %c1024_26 = arith.constant 1024 : index
    %17 = vector.load %arg12[%c9_25, %c1024_26] : memref<75x2048xf32, #tpu.memory_space<vmem>>, vector<3x1021xf32>
    tpu.vector_store %arg12[%c9_25, %c1024_26], %16 {strides = array<i32>} : memref<75x2048xf32, #tpu.memory_space<vmem>>, vector<3x1021xf32>,
    %c0_27 = arith.constant 0 : index
    %c4 = arith.constant 4 : index
    %18 = vector.load %arg0[%c0_27, %c4] : memref<6x1024xf32, #tpu.memory_space<vmem>>, vector<3x1020xf32>
    %c12 = arith.constant 12 : index
    %c0_28 = arith.constant 0 : index
    %19 = vector.load %arg12[%c12, %c0_28] : memref<75x2048xf32, #tpu.memory_space<vmem>>, vector<3x1020xf32>
    tpu.vector_store %arg12[%c12, %c0_28], %18 {strides = array<i32>} : memref<75x2048xf32, #tpu.memory_space<vmem>>, vector<3x1020xf32>,
    %c3_29 = arith.constant 3 : index
    %c4_30 = arith.constant 4 : index
    %20 = vector.load %arg0[%c3_29, %c4_30] : memref<6x1024xf32, #tpu.memory_space<vmem>>, vector<3x1020xf32>
    %c12_31 = arith.constant 12 : index
    %c1024_32 = arith.constant 1024 : index
    %21 = vector.load %arg12[%c12_31, %c1024_32] : memref<75x2048xf32, #tpu.memory_space<vmem>>, vector<3x1020xf32>
    tpu.vector_store %arg12[%c12_31, %c1024_32], %20 {strides = array<i32>} : memref<75x2048xf32, #tpu.memory_space<vmem>>, vector<3x1020xf32>,
    %c0_33 = arith.constant 0 : index
    %c32 = arith.constant 32 : index
    %22 = vector.load %arg0[%c0_33, %c32] : memref<6x1024xf32, #tpu.memory_space<vmem>>, vector<3x992xf32>
    %c15 = arith.constant 15 : index
    %c0_34 = arith.constant 0 : index
    %23 = vector.load %arg12[%c15, %c0_34] : memref<75x2048xf32, #tpu.memory_space<vmem>>, vector<3x992xf32>
    tpu.vector_store %arg12[%c15, %c0_34], %22 {strides = array<i32>} : memref<75x2048xf32, #tpu.memory_space<vmem>>, vector<3x992xf32>,
    %c3_35 = arith.constant 3 : index
    %c32_36 = arith.constant 32 : index
    %24 = vector.load %arg0[%c3_35, %c32_36] : memref<6x1024xf32, #tpu.memory_space<vmem>>, vector<3x992xf32>
    %c15_37 = arith.constant 15 : index
    %c1024_38 = arith.constant 1024 : index
    %25 = vector.load %arg12[%c15_37, %c1024_38] : memref<75x2048xf32, #tpu.memory_space<vmem>>, vector<3x992xf32>
    tpu.vector_store %arg12[%c15_37, %c1024_38], %24 {strides = array<i32>} : memref<75x2048xf32, #tpu.memory_space<vmem>>, vector<3x992xf32>,
    %c0_39 = arith.constant 0 : index
    %c33 = arith.constant 33 : index
    %26 = vector.load %arg0[%c0_39, %c33] : memref<6x1024xf32, #tpu.memory_space<vmem>>, vector<3x991xf32>
    %c18 = arith.constant 18 : index
    %c0_40 = arith.constant 0 : index
    %27 = vector.load %arg12[%c18, %c0_40] : memref<75x2048xf32, #tpu.memory_space<vmem>>, vector<3x991xf32>
    tpu.vector_store %arg12[%c18, %c0_40], %26 {strides = array<i32>} : memref<75x2048xf32, #tpu.memory_space<vmem>>, vector<3x991xf32>,
    %c3_41 = arith.constant 3 : index
    %c33_42 = arith.constant 33 : index
    %28 = vector.load %arg0[%c3_41, %c33_42] : memref<6x1024xf32, #tpu.memory_space<vmem>>, vector<3x991xf32>
    %c18_43 = arith.constant 18 : index
    %c1024_44 = arith.constant 1024 : index
    %29 = vector.load %arg12[%c18_43, %c1024_44] : memref<75x2048xf32, #tpu.memory_space<vmem>>, vector<3x991xf32>
    tpu.vector_store %arg12[%c18_43, %c1024_44], %28 {strides = array<i32>} : memref<75x2048xf32, #tpu.memory_space<vmem>>, vector<3x991xf32>,
    %c0_45 = arith.constant 0 : index
    %c34 = arith.constant 34 : index
    %30 = vector.load %arg0[%c0_45, %c34] : memref<6x1024xf32, #tpu.memory_space<vmem>>, vector<3x990xf32>
    %c21 = arith.constant 21 : index
    %c0_46 = arith.constant 0 : index
    %31 = vector.load %arg12[%c21, %c0_46] : memref<75x2048xf32, #tpu.memory_space<vmem>>, vector<3x990xf32>
    tpu.vector_store %arg12[%c21, %c0_46], %30 {strides = array<i32>} : memref<75x2048xf32, #tpu.memory_space<vmem>>, vector<3x990xf32>,
    %c3_47 = arith.constant 3 : index
    %c34_48 = arith.constant 34 : index
    %32 = vector.load %arg0[%c3_47, %c34_48] : memref<6x1024xf32, #tpu.memory_space<vmem>>, vector<3x990xf32>
    %c21_49 = arith.constant 21 : index
    %c1024_50 = arith.constant 1024 : index
    %33 = vector.load %arg12[%c21_49, %c1024_50] : memref<75x2048xf32, #tpu.memory_space<vmem>>, vector<3x990xf32>
    tpu.vector_store %arg12[%c21_49, %c1024_50], %32 {strides = array<i32>} : memref<75x2048xf32, #tpu.memory_space<vmem>>, vector<3x990xf32>,
    %c0_51 = arith.constant 0 : index
    %c35 = arith.constant 35 : index
    %34 = vector.load %arg0[%c0_51, %c35] : memref<6x1024xf32, #tpu.memory_space<vmem>>, vector<3x989xf32>
    %c24 = arith.constant 24 : index
    %c0_52 = arith.constant 0 : index
    %35 = vector.load %arg12[%c24, %c0_52] : memref<75x2048xf32, #tpu.memory_space<vmem>>, vector<3x989xf32>
    tpu.vector_store %arg12[%c24, %c0_52], %34 {strides = array<i32>} : memref<75x2048xf32, #tpu.memory_space<vmem>>, vector<3x989xf32>,
    %c3_53 = arith.constant 3 : index
    %c35_54 = arith.constant 35 : index
    %36 = vector.load %arg0[%c3_53, %c35_54] : memref<6x1024xf32, #tpu.memory_space<vmem>>, vector<3x989xf32>
    %c24_55 = arith.constant 24 : index
    %c1024_56 = arith.constant 1024 : index
    %37 = vector.load %arg12[%c24_55, %c1024_56] : memref<75x2048xf32, #tpu.memory_space<vmem>>, vector<3x989xf32>
    tpu.vector_store %arg12[%c24_55, %c1024_56], %36 {strides = array<i32>} : memref<75x2048xf32, #tpu.memory_space<vmem>>, vector<3x989xf32>,
    %c0_57 = arith.constant 0 : index
    %c36 = arith.constant 36 : index
    %38 = vector.load %arg0[%c0_57, %c36] : memref<6x1024xf32, #tpu.memory_space<vmem>>, vector<3x988xf32>
    %c27 = arith.constant 27 : index
    %c0_58 = arith.constant 0 : index
    %39 = vector.load %arg12[%c27, %c0_58] : memref<75x2048xf32, #tpu.memory_space<vmem>>, vector<3x988xf32>
    tpu.vector_store %arg12[%c27, %c0_58], %38 {strides = array<i32>} : memref<75x2048xf32, #tpu.memory_space<vmem>>, vector<3x988xf32>,
    %c3_59 = arith.constant 3 : index
    %c36_60 = arith.constant 36 : index
    %40 = vector.load %arg0[%c3_59, %c36_60] : memref<6x1024xf32, #tpu.memory_space<vmem>>, vector<3x988xf32>
    %c27_61 = arith.constant 27 : index
    %c1024_62 = arith.constant 1024 : index
    %41 = vector.load %arg12[%c27_61, %c1024_62] : memref<75x2048xf32, #tpu.memory_space<vmem>>, vector<3x988xf32>
    tpu.vector_store %arg12[%c27_61, %c1024_62], %40 {strides = array<i32>} : memref<75x2048xf32, #tpu.memory_space<vmem>>, vector<3x988xf32>,
    %c0_63 = arith.constant 0 : index
    %c64 = arith.constant 64 : index
    %42 = vector.load %arg0[%c0_63, %c64] : memref<6x1024xf32, #tpu.memory_space<vmem>>, vector<3x960xf32>
    %c30 = arith.constant 30 : index
    %c0_64 = arith.constant 0 : index
    %43 = vector.load %arg12[%c30, %c0_64] : memref<75x2048xf32, #tpu.memory_space<vmem>>, vector<3x960xf32>
    tpu.vector_store %arg12[%c30, %c0_64], %42 {strides = array<i32>} : memref<75x2048xf32, #tpu.memory_space<vmem>>, vector<3x960xf32>,
    %c3_65 = arith.constant 3 : index
    %c64_66 = arith.constant 64 : index
    %44 = vector.load %arg0[%c3_65, %c64_66] : memref<6x1024xf32, #tpu.memory_space<vmem>>, vector<3x960xf32>
    %c30_67 = arith.constant 30 : index
    %c1024_68 = arith.constant 1024 : index
    %45 = vector.load %arg12[%c30_67, %c1024_68] : memref<75x2048xf32, #tpu.memory_space<vmem>>, vector<3x960xf32>
    tpu.vector_store %arg12[%c30_67, %c1024_68], %44 {strides = array<i32>} : memref<75x2048xf32, #tpu.memory_space<vmem>>, vector<3x960xf32>,
    %c0_69 = arith.constant 0 : index
    %c65 = arith.constant 65 : index
    %46 = vector.load %arg0[%c0_69, %c65] : memref<6x1024xf32, #tpu.memory_space<vmem>>, vector<3x959xf32>
    %c33_70 = arith.constant 33 : index
    %c0_71 = arith.constant 0 : index
    %47 = vector.load %arg12[%c33_70, %c0_71] : memref<75x2048xf32, #tpu.memory_space<vmem>>, vector<3x959xf32>
    tpu.vector_store %arg12[%c33_70, %c0_71], %46 {strides = array<i32>} : memref<75x2048xf32, #tpu.memory_space<vmem>>, vector<3x959xf32>,
    %c3_72 = arith.constant 3 : index
    %c65_73 = arith.constant 65 : index
    %48 = vector.load %arg0[%c3_72, %c65_73] : memref<6x1024xf32, #tpu.memory_space<vmem>>, vector<3x959xf32>
    %c33_74 = arith.constant 33 : index
    %c1024_75 = arith.constant 1024 : index
    %49 = vector.load %arg12[%c33_74, %c1024_75] : memref<75x2048xf32, #tpu.memory_space<vmem>>, vector<3x959xf32>
    tpu.vector_store %arg12[%c33_74, %c1024_75], %48 {strides = array<i32>} : memref<75x2048xf32, #tpu.memory_space<vmem>>, vector<3x959xf32>,
    %c0_76 = arith.constant 0 : index
    %c66 = arith.constant 66 : index
    %50 = vector.load %arg0[%c0_76, %c66] : memref<6x1024xf32, #tpu.memory_space<vmem>>, vector<3x958xf32>
    %c36_77 = arith.constant 36 : index
    %c0_78 = arith.constant 0 : index
    %51 = vector.load %arg12[%c36_77, %c0_78] : memref<75x2048xf32, #tpu.memory_space<vmem>>, vector<3x958xf32>
    tpu.vector_store %arg12[%c36_77, %c0_78], %50 {strides = array<i32>} : memref<75x2048xf32, #tpu.memory_space<vmem>>, vector<3x958xf32>,
    %c3_79 = arith.constant 3 : index
    %c66_80 = arith.constant 66 : index
    %52 = vector.load %arg0[%c3_79, %c66_80] : memref<6x1024xf32, #tpu.memory_space<vmem>>, vector<3x958xf32>
    %c36_81 = arith.constant 36 : index
    %c1024_82 = arith.constant 1024 : index
    %53 = vector.load %arg12[%c36_81, %c1024_82] : memref<75x2048xf32, #tpu.memory_space<vmem>>, vector<3x958xf32>
    tpu.vector_store %arg12[%c36_81, %c1024_82], %52 {strides = array<i32>} : memref<75x2048xf32, #tpu.memory_space<vmem>>, vector<3x958xf32>,
    %c0_83 = arith.constant 0 : index
    %c67 = arith.constant 67 : index
    %54 = vector.load %arg0[%c0_83, %c67] : memref<6x1024xf32, #tpu.memory_space<vmem>>, vector<3x957xf32>
    %c39 = arith.constant 39 : index
    %c0_84 = arith.constant 0 : index
    %55 = vector.load %arg12[%c39, %c0_84] : memref<75x2048xf32, #tpu.memory_space<vmem>>, vector<3x957xf32>
    tpu.vector_store %arg12[%c39, %c0_84], %54 {strides = array<i32>} : memref<75x2048xf32, #tpu.memory_space<vmem>>, vector<3x957xf32>,
    %c3_85 = arith.constant 3 : index
    %c67_86 = arith.constant 67 : index
    %56 = vector.load %arg0[%c3_85, %c67_86] : memref<6x1024xf32, #tpu.memory_space<vmem>>, vector<3x957xf32>
    %c39_87 = arith.constant 39 : index
    %c1024_88 = arith.constant 1024 : index
    %57 = vector.load %arg12[%c39_87, %c1024_88] : memref<75x2048xf32, #tpu.memory_space<vmem>>, vector<3x957xf32>
    tpu.vector_store %arg12[%c39_87, %c1024_88], %56 {strides = array<i32>} : memref<75x2048xf32, #tpu.memory_space<vmem>>, vector<3x957xf32>,
    %c0_89 = arith.constant 0 : index
    %c68 = arith.constant 68 : index
    %58 = vector.load %arg0[%c0_89, %c68] : memref<6x1024xf32, #tpu.memory_space<vmem>>, vector<3x956xf32>
    %c42 = arith.constant 42 : index
    %c0_90 = arith.constant 0 : index
    %59 = vector.load %arg12[%c42, %c0_90] : memref<75x2048xf32, #tpu.memory_space<vmem>>, vector<3x956xf32>
    tpu.vector_store %arg12[%c42, %c0_90], %58 {strides = array<i32>} : memref<75x2048xf32, #tpu.memory_space<vmem>>, vector<3x956xf32>,
    %c3_91 = arith.constant 3 : index
    %c68_92 = arith.constant 68 : index
    %60 = vector.load %arg0[%c3_91, %c68_92] : memref<6x1024xf32, #tpu.memory_space<vmem>>, vector<3x956xf32>
    %c42_93 = arith.constant 42 : index
    %c1024_94 = arith.constant 1024 : index
    %61 = vector.load %arg12[%c42_93, %c1024_94] : memref<75x2048xf32, #tpu.memory_space<vmem>>, vector<3x956xf32>
    tpu.vector_store %arg12[%c42_93, %c1024_94], %60 {strides = array<i32>} : memref<75x2048xf32, #tpu.memory_space<vmem>>, vector<3x956xf32>,
    %c0_95 = arith.constant 0 : index
    %c96 = arith.constant 96 : index
    %62 = vector.load %arg0[%c0_95, %c96] : memref<6x1024xf32, #tpu.memory_space<vmem>>, vector<3x928xf32>
    %c45 = arith.constant 45 : index
    %c0_96 = arith.constant 0 : index
    %63 = vector.load %arg12[%c45, %c0_96] : memref<75x2048xf32, #tpu.memory_space<vmem>>, vector<3x928xf32>
    tpu.vector_store %arg12[%c45, %c0_96], %62 {strides = array<i32>} : memref<75x2048xf32, #tpu.memory_space<vmem>>, vector<3x928xf32>,
    %c3_97 = arith.constant 3 : index
    %c96_98 = arith.constant 96 : index
    %64 = vector.load %arg0[%c3_97, %c96_98] : memref<6x1024xf32, #tpu.memory_space<vmem>>, vector<3x928xf32>
    %c45_99 = arith.constant 45 : index
    %c1024_100 = arith.constant 1024 : index
    %65 = vector.load %arg12[%c45_99, %c1024_100] : memref<75x2048xf32, #tpu.memory_space<vmem>>, vector<3x928xf32>
    tpu.vector_store %arg12[%c45_99, %c1024_100], %64 {strides = array<i32>} : memref<75x2048xf32, #tpu.memory_space<vmem>>, vector<3x928xf32>,
    %c0_101 = arith.constant 0 : index
    %c97 = arith.constant 97 : index
    %66 = vector.load %arg0[%c0_101, %c97] : memref<6x1024xf32, #tpu.memory_space<vmem>>, vector<3x927xf32>
    %c48 = arith.constant 48 : index
    %c0_102 = arith.constant 0 : index
    %67 = vector.load %arg12[%c48, %c0_102] : memref<75x2048xf32, #tpu.memory_space<vmem>>, vector<3x927xf32>
    tpu.vector_store %arg12[%c48, %c0_102], %66 {strides = array<i32>} : memref<75x2048xf32, #tpu.memory_space<vmem>>, vector<3x927xf32>,
    %c3_103 = arith.constant 3 : index
    %c97_104 = arith.constant 97 : index
    %68 = vector.load %arg0[%c3_103, %c97_104] : memref<6x1024xf32, #tpu.memory_space<vmem>>, vector<3x927xf32>
    %c48_105 = arith.constant 48 : index
    %c1024_106 = arith.constant 1024 : index
    %69 = vector.load %arg12[%c48_105, %c1024_106] : memref<75x2048xf32, #tpu.memory_space<vmem>>, vector<3x927xf32>
    tpu.vector_store %arg12[%c48_105, %c1024_106], %68 {strides = array<i32>} : memref<75x2048xf32, #tpu.memory_space<vmem>>, vector<3x927xf32>,
    %c0_107 = arith.constant 0 : index
    %c98 = arith.constant 98 : index
    %70 = vector.load %arg0[%c0_107, %c98] : memref<6x1024xf32, #tpu.memory_space<vmem>>, vector<3x926xf32>
    %c51 = arith.constant 51 : index
    %c0_108 = arith.constant 0 : index
    %71 = vector.load %arg12[%c51, %c0_108] : memref<75x2048xf32, #tpu.memory_space<vmem>>, vector<3x926xf32>
    tpu.vector_store %arg12[%c51, %c0_108], %70 {strides = array<i32>} : memref<75x2048xf32, #tpu.memory_space<vmem>>, vector<3x926xf32>,
    %c3_109 = arith.constant 3 : index
    %c98_110 = arith.constant 98 : index
    %72 = vector.load %arg0[%c3_109, %c98_110] : memref<6x1024xf32, #tpu.memory_space<vmem>>, vector<3x926xf32>
    %c51_111 = arith.constant 51 : index
    %c1024_112 = arith.constant 1024 : index
    %73 = vector.load %arg12[%c51_111, %c1024_112] : memref<75x2048xf32, #tpu.memory_space<vmem>>, vector<3x926xf32>
    tpu.vector_store %arg12[%c51_111, %c1024_112], %72 {strides = array<i32>} : memref<75x2048xf32, #tpu.memory_space<vmem>>, vector<3x926xf32>,
    %c0_113 = arith.constant 0 : index
    %c99 = arith.constant 99 : index
    %74 = vector.load %arg0[%c0_113, %c99] : memref<6x1024xf32, #tpu.memory_space<vmem>>, vector<3x925xf32>
    %c54 = arith.constant 54 : index
    %c0_114 = arith.constant 0 : index
    %75 = vector.load %arg12[%c54, %c0_114] : memref<75x2048xf32, #tpu.memory_space<vmem>>, vector<3x925xf32>
    tpu.vector_store %arg12[%c54, %c0_114], %74 {strides = array<i32>} : memref<75x2048xf32, #tpu.memory_space<vmem>>, vector<3x925xf32>,
    %c3_115 = arith.constant 3 : index
    %c99_116 = arith.constant 99 : index
    %76 = vector.load %arg0[%c3_115, %c99_116] : memref<6x1024xf32, #tpu.memory_space<vmem>>, vector<3x925xf32>
    %c54_117 = arith.constant 54 : index
    %c1024_118 = arith.constant 1024 : index
    %77 = vector.load %arg12[%c54_117, %c1024_118] : memref<75x2048xf32, #tpu.memory_space<vmem>>, vector<3x925xf32>
    tpu.vector_store %arg12[%c54_117, %c1024_118], %76 {strides = array<i32>} : memref<75x2048xf32, #tpu.memory_space<vmem>>, vector<3x925xf32>,
    %c0_119 = arith.constant 0 : index
    %c100 = arith.constant 100 : index
    %78 = vector.load %arg0[%c0_119, %c100] : memref<6x1024xf32, #tpu.memory_space<vmem>>, vector<3x924xf32>
    %c57 = arith.constant 57 : index
    %c0_120 = arith.constant 0 : index
    %79 = vector.load %arg12[%c57, %c0_120] : memref<75x2048xf32, #tpu.memory_space<vmem>>, vector<3x924xf32>
    tpu.vector_store %arg12[%c57, %c0_120], %78 {strides = array<i32>} : memref<75x2048xf32, #tpu.memory_space<vmem>>, vector<3x924xf32>,
    %c3_121 = arith.constant 3 : index
    %c100_122 = arith.constant 100 : index
    %80 = vector.load %arg0[%c3_121, %c100_122] : memref<6x1024xf32, #tpu.memory_space<vmem>>, vector<3x924xf32>
    %c57_123 = arith.constant 57 : index
    %c1024_124 = arith.constant 1024 : index
    %81 = vector.load %arg12[%c57_123, %c1024_124] : memref<75x2048xf32, #tpu.memory_space<vmem>>, vector<3x924xf32>
    tpu.vector_store %arg12[%c57_123, %c1024_124], %80 {strides = array<i32>} : memref<75x2048xf32, #tpu.memory_space<vmem>>, vector<3x924xf32>,
    %c0_125 = arith.constant 0 : index
    %c128 = arith.constant 128 : index
    %82 = vector.load %arg0[%c0_125, %c128] : memref<6x1024xf32, #tpu.memory_space<vmem>>, vector<3x896xf32>
    %c60 = arith.constant 60 : index
    %c0_126 = arith.constant 0 : index
    %83 = vector.load %arg12[%c60, %c0_126] : memref<75x2048xf32, #tpu.memory_space<vmem>>, vector<3x896xf32>
    tpu.vector_store %arg12[%c60, %c0_126], %82 {strides = array<i32>} : memref<75x2048xf32, #tpu.memory_space<vmem>>, vector<3x896xf32>,
    %c3_127 = arith.constant 3 : index
    %c128_128 = arith.constant 128 : index
    %84 = vector.load %arg0[%c3_127, %c128_128] : memref<6x1024xf32, #tpu.memory_space<vmem>>, vector<3x896xf32>
    %c60_129 = arith.constant 60 : index
    %c1024_130 = arith.constant 1024 : index
    %85 = vector.load %arg12[%c60_129, %c1024_130] : memref<75x2048xf32, #tpu.memory_space<vmem>>, vector<3x896xf32>
    tpu.vector_store %arg12[%c60_129, %c1024_130], %84 {strides = array<i32>} : memref<75x2048xf32, #tpu.memory_space<vmem>>, vector<3x896xf32>,
    %c0_131 = arith.constant 0 : index
    %c129 = arith.constant 129 : index
    %86 = vector.load %arg0[%c0_131, %c129] : memref<6x1024xf32, #tpu.memory_space<vmem>>, vector<3x895xf32>
    %c63 = arith.constant 63 : index
    %c0_132 = arith.constant 0 : index
    %87 = vector.load %arg12[%c63, %c0_132] : memref<75x2048xf32, #tpu.memory_space<vmem>>, vector<3x895xf32>
    tpu.vector_store %arg12[%c63, %c0_132], %86 {strides = array<i32>} : memref<75x2048xf32, #tpu.memory_space<vmem>>, vector<3x895xf32>,
    %c3_133 = arith.constant 3 : index
    %c129_134 = arith.constant 129 : index
    %88 = vector.load %arg0[%c3_133, %c129_134] : memref<6x1024xf32, #tpu.memory_space<vmem>>, vector<3x895xf32>
    %c63_135 = arith.constant 63 : index
    %c1024_136 = arith.constant 1024 : index
    %89 = vector.load %arg12[%c63_135, %c1024_136] : memref<75x2048xf32, #tpu.memory_space<vmem>>, vector<3x895xf32>
    tpu.vector_store %arg12[%c63_135, %c1024_136], %88 {strides = array<i32>} : memref<75x2048xf32, #tpu.memory_space<vmem>>, vector<3x895xf32>,
    %c0_137 = arith.constant 0 : index
    %c130 = arith.constant 130 : index
    %90 = vector.load %arg0[%c0_137, %c130] : memref<6x1024xf32, #tpu.memory_space<vmem>>, vector<3x894xf32>
    %c66_138 = arith.constant 66 : index
    %c0_139 = arith.constant 0 : index
    %91 = vector.load %arg12[%c66_138, %c0_139] : memref<75x2048xf32, #tpu.memory_space<vmem>>, vector<3x894xf32>
    tpu.vector_store %arg12[%c66_138, %c0_139], %90 {strides = array<i32>} : memref<75x2048xf32, #tpu.memory_space<vmem>>, vector<3x894xf32>,
    %c3_140 = arith.constant 3 : index
    %c130_141 = arith.constant 130 : index
    %92 = vector.load %arg0[%c3_140, %c130_141] : memref<6x1024xf32, #tpu.memory_space<vmem>>, vector<3x894xf32>
    %c66_142 = arith.constant 66 : index
    %c1024_143 = arith.constant 1024 : index
    %93 = vector.load %arg12[%c66_142, %c1024_143] : memref<75x2048xf32, #tpu.memory_space<vmem>>, vector<3x894xf32>
    tpu.vector_store %arg12[%c66_142, %c1024_143], %92 {strides = array<i32>} : memref<75x2048xf32, #tpu.memory_space<vmem>>, vector<3x894xf32>,
    %c0_144 = arith.constant 0 : index
    %c131 = arith.constant 131 : index
    %94 = vector.load %arg0[%c0_144, %c131] : memref<6x1024xf32, #tpu.memory_space<vmem>>, vector<3x893xf32>
    %c69 = arith.constant 69 : index
    %c0_145 = arith.constant 0 : index
    %95 = vector.load %arg12[%c69, %c0_145] : memref<75x2048xf32, #tpu.memory_space<vmem>>, vector<3x893xf32>
    tpu.vector_store %arg12[%c69, %c0_145], %94 {strides = array<i32>} : memref<75x2048xf32, #tpu.memory_space<vmem>>, vector<3x893xf32>,
    %c3_146 = arith.constant 3 : index
    %c131_147 = arith.constant 131 : index
    %96 = vector.load %arg0[%c3_146, %c131_147] : memref<6x1024xf32, #tpu.memory_space<vmem>>, vector<3x893xf32>
    %c69_148 = arith.constant 69 : index
    %c1024_149 = arith.constant 1024 : index
    %97 = vector.load %arg12[%c69_148, %c1024_149] : memref<75x2048xf32, #tpu.memory_space<vmem>>, vector<3x893xf32>
    tpu.vector_store %arg12[%c69_148, %c1024_149], %96 {strides = array<i32>} : memref<75x2048xf32, #tpu.memory_space<vmem>>, vector<3x893xf32>,
    %c0_150 = arith.constant 0 : index
    %c132 = arith.constant 132 : index
    %98 = vector.load %arg0[%c0_150, %c132] : memref<6x1024xf32, #tpu.memory_space<vmem>>, vector<3x892xf32>
    %c72 = arith.constant 72 : index
    %c0_151 = arith.constant 0 : index
    %99 = vector.load %arg12[%c72, %c0_151] : memref<75x2048xf32, #tpu.memory_space<vmem>>, vector<3x892xf32>
    tpu.vector_store %arg12[%c72, %c0_151], %98 {strides = array<i32>} : memref<75x2048xf32, #tpu.memory_space<vmem>>, vector<3x892xf32>,
    %c3_152 = arith.constant 3 : index
    %c132_153 = arith.constant 132 : index
    %100 = vector.load %arg0[%c3_152, %c132_153] : memref<6x1024xf32, #tpu.memory_space<vmem>>, vector<3x892xf32>
    %c72_154 = arith.constant 72 : index
    %c1024_155 = arith.constant 1024 : index
    %101 = vector.load %arg12[%c72_154, %c1024_155] : memref<75x2048xf32, #tpu.memory_space<vmem>>, vector<3x892xf32>
    tpu.vector_store %arg12[%c72_154, %c1024_155], %100 {strides = array<i32>} : memref<75x2048xf32, #tpu.memory_space<vmem>>, vector<3x892xf32>,
    %c0_156 = arith.constant 0 : index
    %c0_157 = arith.constant 0 : index
    %102 = vector.load %arg1[%c0_156, %c0_157] : memref<6x75xf32, #tpu.memory_space<vmem>>, vector<6x75xf32>
    %c0_158 = arith.constant 0 : index
    %c0_159 = arith.constant 0 : index
    %103 = vector.load %arg12[%c0_158, %c0_159] : memref<75x2048xf32, #tpu.memory_space<vmem>>, vector<75x2048xf32>
    %cst_160 = arith.constant dense<0.000000e+00> : vector<6x2048xf32>
    %104 = tpu.matmul %102, %103, %cst_160 {dimension_numbers = #tpu.dot_dimension_numbers<[1], [0], [0], [1], [0, 0, 1, 1], [], []>} : vector<6x75xf32>, vector<75x2048xf32>, vector<6x2048xf32> -> vector<6x2048xf32>
    %c0_161 = arith.constant 0 : index
    %c0_162 = arith.constant 0 : index
    %105 = vector.load %arg2[%c0_161, %c0_162] : memref<6x1xf32, #tpu.memory_space<vmem>>, vector<6x1xf32>
    %106 = vector.broadcast %105 : vector<6x1xf32> to vector<6x2048xf32>
    %107 = arith.addf %104, %106 : vector<6x2048xf32>
    %cst_163 = arith.constant 0.000000e+00 : f32
    %108 = vector.broadcast %cst_163 : f32 to vector<6x2048xf32>
    %109 = arith.maximumf %107, %108 : vector<6x2048xf32>
    %110 = vector.extract_strided_slice %109 {offsets = [0, 0], sizes = [6, 2015], strides = [1, 1]} : vector<6x2048xf32> to vector<6x2015xf32>
    %111 = vector.extract_strided_slice %109 {offsets = [0, 1], sizes = [6, 2015], strides = [1, 1]} : vector<6x2048xf32> to vector<6x2015xf32>
    %112 = arith.maximumf %110, %111 : vector<6x2015xf32>
    %113 = vector.extract_strided_slice %109 {offsets = [0, 32], sizes = [6, 2015], strides = [1, 1]} : vector<6x2048xf32> to vector<6x2015xf32>
    %114 = vector.extract_strided_slice %109 {offsets = [0, 33], sizes = [6, 2015], strides = [1, 1]} : vector<6x2048xf32> to vector<6x2015xf32>
    %115 = arith.maximumf %113, %114 : vector<6x2015xf32>
    %116 = arith.maximumf %112, %115 : vector<6x2015xf32>
    %117 = vector.extract_strided_slice %116 {offsets = [0, 0], sizes = [6, 1664], strides = [1, 1]} : vector<6x2015xf32> to vector<6x1664xf32>
    %c0_164 = arith.constant 0 : index
    %c0_165 = arith.constant 0 : index
    %118 = vector.load %arg13[%c0_164, %c0_165] : memref<150x1664xf32, #tpu.memory_space<vmem>>, vector<6x1664xf32>
    tpu.vector_store %arg13[%c0_164, %c0_165], %117 {strides = array<i32>} : memref<150x1664xf32, #tpu.memory_space<vmem>>, vector<6x1664xf32>,
    %119 = vector.extract_strided_slice %116 {offsets = [0, 2], sizes = [6, 1664], strides = [1, 1]} : vector<6x2015xf32> to vector<6x1664xf32>
    %c6_166 = arith.constant 6 : index
    %c0_167 = arith.constant 0 : index
    %120 = vector.load %arg13[%c6_166, %c0_167] : memref<150x1664xf32, #tpu.memory_space<vmem>>, vector<6x1664xf32>
    tpu.vector_store %arg13[%c6_166, %c0_167], %119 {strides = array<i32>} : memref<150x1664xf32, #tpu.memory_space<vmem>>, vector<6x1664xf32>,
    %121 = vector.extract_strided_slice %116 {offsets = [0, 4], sizes = [6, 1664], strides = [1, 1]} : vector<6x2015xf32> to vector<6x1664xf32>
    %c12_168 = arith.constant 12 : index
    %c0_169 = arith.constant 0 : index
    %122 = vector.load %arg13[%c12_168, %c0_169] : memref<150x1664xf32, #tpu.memory_space<vmem>>, vector<6x1664xf32>
    tpu.vector_store %arg13[%c12_168, %c0_169], %121 {strides = array<i32>} : memref<150x1664xf32, #tpu.memory_space<vmem>>, vector<6x1664xf32>,
    %123 = vector.extract_strided_slice %116 {offsets = [0, 6], sizes = [6, 1664], strides = [1, 1]} : vector<6x2015xf32> to vector<6x1664xf32>
    %c18_170 = arith.constant 18 : index
    %c0_171 = arith.constant 0 : index
    %124 = vector.load %arg13[%c18_170, %c0_171] : memref<150x1664xf32, #tpu.memory_space<vmem>>, vector<6x1664xf32>
    tpu.vector_store %arg13[%c18_170, %c0_171], %123 {strides = array<i32>} : memref<150x1664xf32, #tpu.memory_space<vmem>>, vector<6x1664xf32>,
    %125 = vector.extract_strided_slice %116 {offsets = [0, 8], sizes = [6, 1664], strides = [1, 1]} : vector<6x2015xf32> to vector<6x1664xf32>
    %c24_172 = arith.constant 24 : index
    %c0_173 = arith.constant 0 : index
    %126 = vector.load %arg13[%c24_172, %c0_173] : memref<150x1664xf32, #tpu.memory_space<vmem>>, vector<6x1664xf32>
    tpu.vector_store %arg13[%c24_172, %c0_173], %125 {strides = array<i32>} : memref<150x1664xf32, #tpu.memory_space<vmem>>, vector<6x1664xf32>,
    %127 = vector.extract_strided_slice %116 {offsets = [0, 64], sizes = [6, 1664], strides = [1, 1]} : vector<6x2015xf32> to vector<6x1664xf32>
    %c30_174 = arith.constant 30 : index
    %c0_175 = arith.constant 0 : index
    %128 = vector.load %arg13[%c30_174, %c0_175] : memref<150x1664xf32, #tpu.memory_space<vmem>>, vector<6x1664xf32>
    tpu.vector_store %arg13[%c30_174, %c0_175], %127 {strides = array<i32>} : memref<150x1664xf32, #tpu.memory_space<vmem>>, vector<6x1664xf32>,
    %129 = vector.extract_strided_slice %116 {offsets = [0, 66], sizes = [6, 1664], strides = [1, 1]} : vector<6x2015xf32> to vector<6x1664xf32>
    %c36_176 = arith.constant 36 : index
    %c0_177 = arith.constant 0 : index
    %130 = vector.load %arg13[%c36_176, %c0_177] : memref<150x1664xf32, #tpu.memory_space<vmem>>, vector<6x1664xf32>
    tpu.vector_store %arg13[%c36_176, %c0_177], %129 {strides = array<i32>} : memref<150x1664xf32, #tpu.memory_space<vmem>>, vector<6x1664xf32>,
    %131 = vector.extract_strided_slice %116 {offsets = [0, 68], sizes = [6, 1664], strides = [1, 1]} : vector<6x2015xf32> to vector<6x1664xf32>
    %c42_178 = arith.constant 42 : index
    %c0_179 = arith.constant 0 : index
    %132 = vector.load %arg13[%c42_178, %c0_179] : memref<150x1664xf32, #tpu.memory_space<vmem>>, vector<6x1664xf32>
    tpu.vector_store %arg13[%c42_178, %c0_179], %131 {strides = array<i32>} : memref<150x1664xf32, #tpu.memory_space<vmem>>, vector<6x1664xf32>,
    %133 = vector.extract_strided_slice %116 {offsets = [0, 70], sizes = [6, 1664], strides = [1, 1]} : vector<6x2015xf32> to vector<6x1664xf32>
    %c48_180 = arith.constant 48 : index
    %c0_181 = arith.constant 0 : index
    %134 = vector.load %arg13[%c48_180, %c0_181] : memref<150x1664xf32, #tpu.memory_space<vmem>>, vector<6x1664xf32>
    tpu.vector_store %arg13[%c48_180, %c0_181], %133 {strides = array<i32>} : memref<150x1664xf32, #tpu.memory_space<vmem>>, vector<6x1664xf32>,
    %135 = vector.extract_strided_slice %116 {offsets = [0, 72], sizes = [6, 1664], strides = [1, 1]} : vector<6x2015xf32> to vector<6x1664xf32>
    %c54_182 = arith.constant 54 : index
    %c0_183 = arith.constant 0 : index
    %136 = vector.load %arg13[%c54_182, %c0_183] : memref<150x1664xf32, #tpu.memory_space<vmem>>, vector<6x1664xf32>
    tpu.vector_store %arg13[%c54_182, %c0_183], %135 {strides = array<i32>} : memref<150x1664xf32, #tpu.memory_space<vmem>>, vector<6x1664xf32>,
    %137 = vector.extract_strided_slice %116 {offsets = [0, 128], sizes = [6, 1664], strides = [1, 1]} : vector<6x2015xf32> to vector<6x1664xf32>
    %c60_184 = arith.constant 60 : index
    %c0_185 = arith.constant 0 : index
    %138 = vector.load %arg13[%c60_184, %c0_185] : memref<150x1664xf32, #tpu.memory_space<vmem>>, vector<6x1664xf32>
    tpu.vector_store %arg13[%c60_184, %c0_185], %137 {strides = array<i32>} : memref<150x1664xf32, #tpu.memory_space<vmem>>, vector<6x1664xf32>,
    %139 = vector.extract_strided_slice %116 {offsets = [0, 130], sizes = [6, 1664], strides = [1, 1]} : vector<6x2015xf32> to vector<6x1664xf32>
    %c66_186 = arith.constant 66 : index
    %c0_187 = arith.constant 0 : index
    %140 = vector.load %arg13[%c66_186, %c0_187] : memref<150x1664xf32, #tpu.memory_space<vmem>>, vector<6x1664xf32>
    tpu.vector_store %arg13[%c66_186, %c0_187], %139 {strides = array<i32>} : memref<150x1664xf32, #tpu.memory_space<vmem>>, vector<6x1664xf32>,
    %141 = vector.extract_strided_slice %116 {offsets = [0, 132], sizes = [6, 1664], strides = [1, 1]} : vector<6x2015xf32> to vector<6x1664xf32>
    %c72_188 = arith.constant 72 : index
    %c0_189 = arith.constant 0 : index
    %142 = vector.load %arg13[%c72_188, %c0_189] : memref<150x1664xf32, #tpu.memory_space<vmem>>, vector<6x1664xf32>
    tpu.vector_store %arg13[%c72_188, %c0_189], %141 {strides = array<i32>} : memref<150x1664xf32, #tpu.memory_space<vmem>>, vector<6x1664xf32>,
    %143 = vector.extract_strided_slice %116 {offsets = [0, 134], sizes = [6, 1664], strides = [1, 1]} : vector<6x2015xf32> to vector<6x1664xf32>
    %c78 = arith.constant 78 : index
    %c0_190 = arith.constant 0 : index
    %144 = vector.load %arg13[%c78, %c0_190] : memref<150x1664xf32, #tpu.memory_space<vmem>>, vector<6x1664xf32>
    tpu.vector_store %arg13[%c78, %c0_190], %143 {strides = array<i32>} : memref<150x1664xf32, #tpu.memory_space<vmem>>, vector<6x1664xf32>,
    %145 = vector.extract_strided_slice %116 {offsets = [0, 136], sizes = [6, 1664], strides = [1, 1]} : vector<6x2015xf32> to vector<6x1664xf32>
    %c84 = arith.constant 84 : index
    %c0_191 = arith.constant 0 : index
    %146 = vector.load %arg13[%c84, %c0_191] : memref<150x1664xf32, #tpu.memory_space<vmem>>, vector<6x1664xf32>
    tpu.vector_store %arg13[%c84, %c0_191], %145 {strides = array<i32>} : memref<150x1664xf32, #tpu.memory_space<vmem>>, vector<6x1664xf32>,
    %147 = vector.extract_strided_slice %116 {offsets = [0, 192], sizes = [6, 1664], strides = [1, 1]} : vector<6x2015xf32> to vector<6x1664xf32>
    %c90 = arith.constant 90 : index
    %c0_192 = arith.constant 0 : index
    %148 = vector.load %arg13[%c90, %c0_192] : memref<150x1664xf32, #tpu.memory_space<vmem>>, vector<6x1664xf32>
    tpu.vector_store %arg13[%c90, %c0_192], %147 {strides = array<i32>} : memref<150x1664xf32, #tpu.memory_space<vmem>>, vector<6x1664xf32>,
    %149 = vector.extract_strided_slice %116 {offsets = [0, 194], sizes = [6, 1664], strides = [1, 1]} : vector<6x2015xf32> to vector<6x1664xf32>
    %c96_193 = arith.constant 96 : index
    %c0_194 = arith.constant 0 : index
    %150 = vector.load %arg13[%c96_193, %c0_194] : memref<150x1664xf32, #tpu.memory_space<vmem>>, vector<6x1664xf32>
    tpu.vector_store %arg13[%c96_193, %c0_194], %149 {strides = array<i32>} : memref<150x1664xf32, #tpu.memory_space<vmem>>, vector<6x1664xf32>,
    %151 = vector.extract_strided_slice %116 {offsets = [0, 196], sizes = [6, 1664], strides = [1, 1]} : vector<6x2015xf32> to vector<6x1664xf32>
    %c102 = arith.constant 102 : index
    %c0_195 = arith.constant 0 : index
    %152 = vector.load %arg13[%c102, %c0_195] : memref<150x1664xf32, #tpu.memory_space<vmem>>, vector<6x1664xf32>
    tpu.vector_store %arg13[%c102, %c0_195], %151 {strides = array<i32>} : memref<150x1664xf32, #tpu.memory_space<vmem>>, vector<6x1664xf32>,
    %153 = vector.extract_strided_slice %116 {offsets = [0, 198], sizes = [6, 1664], strides = [1, 1]} : vector<6x2015xf32> to vector<6x1664xf32>
    %c108 = arith.constant 108 : index
    %c0_196 = arith.constant 0 : index
    %154 = vector.load %arg13[%c108, %c0_196] : memref<150x1664xf32, #tpu.memory_space<vmem>>, vector<6x1664xf32>
    tpu.vector_store %arg13[%c108, %c0_196], %153 {strides = array<i32>} : memref<150x1664xf32, #tpu.memory_space<vmem>>, vector<6x1664xf32>,
    %155 = vector.extract_strided_slice %116 {offsets = [0, 200], sizes = [6, 1664], strides = [1, 1]} : vector<6x2015xf32> to vector<6x1664xf32>
    %c114 = arith.constant 114 : index
    %c0_197 = arith.constant 0 : index
    %156 = vector.load %arg13[%c114, %c0_197] : memref<150x1664xf32, #tpu.memory_space<vmem>>, vector<6x1664xf32>
    tpu.vector_store %arg13[%c114, %c0_197], %155 {strides = array<i32>} : memref<150x1664xf32, #tpu.memory_space<vmem>>, vector<6x1664xf32>,
    %157 = vector.extract_strided_slice %116 {offsets = [0, 256], sizes = [6, 1664], strides = [1, 1]} : vector<6x2015xf32> to vector<6x1664xf32>
    %c120 = arith.constant 120 : index
    %c0_198 = arith.constant 0 : index
    %158 = vector.load %arg13[%c120, %c0_198] : memref<150x1664xf32, #tpu.memory_space<vmem>>, vector<6x1664xf32>
    tpu.vector_store %arg13[%c120, %c0_198], %157 {strides = array<i32>} : memref<150x1664xf32, #tpu.memory_space<vmem>>, vector<6x1664xf32>,
    %159 = vector.extract_strided_slice %116 {offsets = [0, 258], sizes = [6, 1664], strides = [1, 1]} : vector<6x2015xf32> to vector<6x1664xf32>
    %c126 = arith.constant 126 : index
    %c0_199 = arith.constant 0 : index
    %160 = vector.load %arg13[%c126, %c0_199] : memref<150x1664xf32, #tpu.memory_space<vmem>>, vector<6x1664xf32>
    tpu.vector_store %arg13[%c126, %c0_199], %159 {strides = array<i32>} : memref<150x1664xf32, #tpu.memory_space<vmem>>, vector<6x1664xf32>,
    %161 = vector.extract_strided_slice %116 {offsets = [0, 260], sizes = [6, 1664], strides = [1, 1]} : vector<6x2015xf32> to vector<6x1664xf32>
    %c132_200 = arith.constant 132 : index
    %c0_201 = arith.constant 0 : index
    %162 = vector.load %arg13[%c132_200, %c0_201] : memref<150x1664xf32, #tpu.memory_space<vmem>>, vector<6x1664xf32>
    tpu.vector_store %arg13[%c132_200, %c0_201], %161 {strides = array<i32>} : memref<150x1664xf32, #tpu.memory_space<vmem>>, vector<6x1664xf32>,
    %163 = vector.extract_strided_slice %116 {offsets = [0, 262], sizes = [6, 1664], strides = [1, 1]} : vector<6x2015xf32> to vector<6x1664xf32>
    %c138 = arith.constant 138 : index
    %c0_202 = arith.constant 0 : index
    %164 = vector.load %arg13[%c138, %c0_202] : memref<150x1664xf32, #tpu.memory_space<vmem>>, vector<6x1664xf32>
    tpu.vector_store %arg13[%c138, %c0_202], %163 {strides = array<i32>} : memref<150x1664xf32, #tpu.memory_space<vmem>>, vector<6x1664xf32>,
    %165 = vector.extract_strided_slice %116 {offsets = [0, 264], sizes = [6, 1664], strides = [1, 1]} : vector<6x2015xf32> to vector<6x1664xf32>
    %c144 = arith.constant 144 : index
    %c0_203 = arith.constant 0 : index
    %166 = vector.load %arg13[%c144, %c0_203] : memref<150x1664xf32, #tpu.memory_space<vmem>>, vector<6x1664xf32>
    tpu.vector_store %arg13[%c144, %c0_203], %165 {strides = array<i32>} : memref<150x1664xf32, #tpu.memory_space<vmem>>, vector<6x1664xf32>,
    %c0_204 = arith.constant 0 : index
    %c0_205 = arith.constant 0 : index
    %167 = vector.load %arg3[%c0_204, %c0_205] : memref<16x150xf32, #tpu.memory_space<vmem>>, vector<16x150xf32>
    %c0_206 = arith.constant 0 : index
    %c0_207 = arith.constant 0 : index
    %168 = vector.load %arg13[%c0_206, %c0_207] : memref<150x1664xf32, #tpu.memory_space<vmem>>, vector<150x1664xf32>
    %cst_208 = arith.constant dense<0.000000e+00> : vector<16x1664xf32>
    %169 = tpu.matmul %167, %168, %cst_208 {dimension_numbers = #tpu.dot_dimension_numbers<[1], [0], [0], [1], [0, 0, 1, 1], [], []>} : vector<16x150xf32>, vector<150x1664xf32>, vector<16x1664xf32> -> vector<16x1664xf32>
    %c0_209 = arith.constant 0 : index
    %c0_210 = arith.constant 0 : index
    %170 = vector.load %arg4[%c0_209, %c0_210] : memref<16x1xf32, #tpu.memory_space<vmem>>, vector<16x1xf32>
    %171 = vector.broadcast %170 : vector<16x1xf32> to vector<16x1664xf32>
    %172 = arith.addf %169, %171 : vector<16x1664xf32>
    %cst_211 = arith.constant 0.000000e+00 : f32
    %173 = vector.broadcast %cst_211 : f32 to vector<16x1664xf32>
    %174 = arith.maximumf %172, %173 : vector<16x1664xf32>
    %175 = vector.extract_strided_slice %174 {offsets = [0, 0], sizes = [16, 1598], strides = [1, 1]} : vector<16x1664xf32> to vector<16x1598xf32>
    %176 = vector.extract_strided_slice %174 {offsets = [0, 2], sizes = [16, 1598], strides = [1, 1]} : vector<16x1664xf32> to vector<16x1598xf32>
    %177 = arith.maximumf %175, %176 : vector<16x1598xf32>
    %178 = vector.extract_strided_slice %174 {offsets = [0, 64], sizes = [16, 1598], strides = [1, 1]} : vector<16x1664xf32> to vector<16x1598xf32>
    %179 = vector.extract_strided_slice %174 {offsets = [0, 66], sizes = [16, 1598], strides = [1, 1]} : vector<16x1664xf32> to vector<16x1598xf32>
    %180 = arith.maximumf %178, %179 : vector<16x1598xf32>
    %181 = arith.maximumf %177, %180 : vector<16x1598xf32>
    %182 = vector.extract_strided_slice %181 {offsets = [0, 0], sizes = [16, 1], strides = [1, 1]} : vector<16x1598xf32> to vector<16x1xf32>
    %c0_212 = arith.constant 0 : index
    %c0_213 = arith.constant 0 : index
    %183 = vector.load %arg14[%c0_212, %c0_213] : memref<400x2xf32, #tpu.memory_space<vmem>>, vector<16x1xf32>
    tpu.vector_store %arg14[%c0_212, %c0_213], %182 {strides = array<i32>} : memref<400x2xf32, #tpu.memory_space<vmem>>, vector<16x1xf32>,
    %184 = vector.extract_strided_slice %181 {offsets = [0, 1024], sizes = [16, 1], strides = [1, 1]} : vector<16x1598xf32> to vector<16x1xf32>
    %c0_214 = arith.constant 0 : index
    %c1_215 = arith.constant 1 : index
    %185 = vector.load %arg14[%c0_214, %c1_215] : memref<400x2xf32, #tpu.memory_space<vmem>>, vector<16x1xf32>
    tpu.vector_store %arg14[%c0_214, %c1_215], %184 {strides = array<i32>} : memref<400x2xf32, #tpu.memory_space<vmem>>, vector<16x1xf32>,
    %186 = vector.extract_strided_slice %181 {offsets = [0, 4], sizes = [16, 1], strides = [1, 1]} : vector<16x1598xf32> to vector<16x1xf32>
    %c16 = arith.constant 16 : index
    %c0_216 = arith.constant 0 : index
    %187 = vector.load %arg14[%c16, %c0_216] : memref<400x2xf32, #tpu.memory_space<vmem>>, vector<16x1xf32>
    tpu.vector_store %arg14[%c16, %c0_216], %186 {strides = array<i32>} : memref<400x2xf32, #tpu.memory_space<vmem>>, vector<16x1xf32>,
    %188 = vector.extract_strided_slice %181 {offsets = [0, 1028], sizes = [16, 1], strides = [1, 1]} : vector<16x1598xf32> to vector<16x1xf32>
    %c16_217 = arith.constant 16 : index
    %c1_218 = arith.constant 1 : index
    %189 = vector.load %arg14[%c16_217, %c1_218] : memref<400x2xf32, #tpu.memory_space<vmem>>, vector<16x1xf32>
    tpu.vector_store %arg14[%c16_217, %c1_218], %188 {strides = array<i32>} : memref<400x2xf32, #tpu.memory_space<vmem>>, vector<16x1xf32>,
    %190 = vector.extract_strided_slice %181 {offsets = [0, 8], sizes = [16, 1], strides = [1, 1]} : vector<16x1598xf32> to vector<16x1xf32>
    %c32_219 = arith.constant 32 : index
    %c0_220 = arith.constant 0 : index
    %191 = vector.load %arg14[%c32_219, %c0_220] : memref<400x2xf32, #tpu.memory_space<vmem>>, vector<16x1xf32>
    tpu.vector_store %arg14[%c32_219, %c0_220], %190 {strides = array<i32>} : memref<400x2xf32, #tpu.memory_space<vmem>>, vector<16x1xf32>,
    %192 = vector.extract_strided_slice %181 {offsets = [0, 1032], sizes = [16, 1], strides = [1, 1]} : vector<16x1598xf32> to vector<16x1xf32>
    %c32_221 = arith.constant 32 : index
    %c1_222 = arith.constant 1 : index
    %193 = vector.load %arg14[%c32_221, %c1_222] : memref<400x2xf32, #tpu.memory_space<vmem>>, vector<16x1xf32>
    tpu.vector_store %arg14[%c32_221, %c1_222], %192 {strides = array<i32>} : memref<400x2xf32, #tpu.memory_space<vmem>>, vector<16x1xf32>,
    %194 = vector.extract_strided_slice %181 {offsets = [0, 12], sizes = [16, 1], strides = [1, 1]} : vector<16x1598xf32> to vector<16x1xf32>
    %c48_223 = arith.constant 48 : index
    %c0_224 = arith.constant 0 : index
    %195 = vector.load %arg14[%c48_223, %c0_224] : memref<400x2xf32, #tpu.memory_space<vmem>>, vector<16x1xf32>
    tpu.vector_store %arg14[%c48_223, %c0_224], %194 {strides = array<i32>} : memref<400x2xf32, #tpu.memory_space<vmem>>, vector<16x1xf32>,
    %196 = vector.extract_strided_slice %181 {offsets = [0, 1036], sizes = [16, 1], strides = [1, 1]} : vector<16x1598xf32> to vector<16x1xf32>
    %c48_225 = arith.constant 48 : index
    %c1_226 = arith.constant 1 : index
    %197 = vector.load %arg14[%c48_225, %c1_226] : memref<400x2xf32, #tpu.memory_space<vmem>>, vector<16x1xf32>
    tpu.vector_store %arg14[%c48_225, %c1_226], %196 {strides = array<i32>} : memref<400x2xf32, #tpu.memory_space<vmem>>, vector<16x1xf32>,
    %198 = vector.extract_strided_slice %181 {offsets = [0, 16], sizes = [16, 1], strides = [1, 1]} : vector<16x1598xf32> to vector<16x1xf32>
    %c64_227 = arith.constant 64 : index
    %c0_228 = arith.constant 0 : index
    %199 = vector.load %arg14[%c64_227, %c0_228] : memref<400x2xf32, #tpu.memory_space<vmem>>, vector<16x1xf32>
    tpu.vector_store %arg14[%c64_227, %c0_228], %198 {strides = array<i32>} : memref<400x2xf32, #tpu.memory_space<vmem>>, vector<16x1xf32>,
    %200 = vector.extract_strided_slice %181 {offsets = [0, 1040], sizes = [16, 1], strides = [1, 1]} : vector<16x1598xf32> to vector<16x1xf32>
    %c64_229 = arith.constant 64 : index
    %c1_230 = arith.constant 1 : index
    %201 = vector.load %arg14[%c64_229, %c1_230] : memref<400x2xf32, #tpu.memory_space<vmem>>, vector<16x1xf32>
    tpu.vector_store %arg14[%c64_229, %c1_230], %200 {strides = array<i32>} : memref<400x2xf32, #tpu.memory_space<vmem>>, vector<16x1xf32>,
    %202 = vector.extract_strided_slice %181 {offsets = [0, 128], sizes = [16, 1], strides = [1, 1]} : vector<16x1598xf32> to vector<16x1xf32>
    %c80 = arith.constant 80 : index
    %c0_231 = arith.constant 0 : index
    %203 = vector.load %arg14[%c80, %c0_231] : memref<400x2xf32, #tpu.memory_space<vmem>>, vector<16x1xf32>
    tpu.vector_store %arg14[%c80, %c0_231], %202 {strides = array<i32>} : memref<400x2xf32, #tpu.memory_space<vmem>>, vector<16x1xf32>,
    %204 = vector.extract_strided_slice %181 {offsets = [0, 1152], sizes = [16, 1], strides = [1, 1]} : vector<16x1598xf32> to vector<16x1xf32>
    %c80_232 = arith.constant 80 : index
    %c1_233 = arith.constant 1 : index
    %205 = vector.load %arg14[%c80_232, %c1_233] : memref<400x2xf32, #tpu.memory_space<vmem>>, vector<16x1xf32>
    tpu.vector_store %arg14[%c80_232, %c1_233], %204 {strides = array<i32>} : memref<400x2xf32, #tpu.memory_space<vmem>>, vector<16x1xf32>,
    %206 = vector.extract_strided_slice %181 {offsets = [0, 132], sizes = [16, 1], strides = [1, 1]} : vector<16x1598xf32> to vector<16x1xf32>
    %c96_234 = arith.constant 96 : index
    %c0_235 = arith.constant 0 : index
    %207 = vector.load %arg14[%c96_234, %c0_235] : memref<400x2xf32, #tpu.memory_space<vmem>>, vector<16x1xf32>
    tpu.vector_store %arg14[%c96_234, %c0_235], %206 {strides = array<i32>} : memref<400x2xf32, #tpu.memory_space<vmem>>, vector<16x1xf32>,
    %208 = vector.extract_strided_slice %181 {offsets = [0, 1156], sizes = [16, 1], strides = [1, 1]} : vector<16x1598xf32> to vector<16x1xf32>
    %c96_236 = arith.constant 96 : index
    %c1_237 = arith.constant 1 : index
    %209 = vector.load %arg14[%c96_236, %c1_237] : memref<400x2xf32, #tpu.memory_space<vmem>>, vector<16x1xf32>
    tpu.vector_store %arg14[%c96_236, %c1_237], %208 {strides = array<i32>} : memref<400x2xf32, #tpu.memory_space<vmem>>, vector<16x1xf32>,
    %210 = vector.extract_strided_slice %181 {offsets = [0, 136], sizes = [16, 1], strides = [1, 1]} : vector<16x1598xf32> to vector<16x1xf32>
    %c112 = arith.constant 112 : index
    %c0_238 = arith.constant 0 : index
    %211 = vector.load %arg14[%c112, %c0_238] : memref<400x2xf32, #tpu.memory_space<vmem>>, vector<16x1xf32>
    tpu.vector_store %arg14[%c112, %c0_238], %210 {strides = array<i32>} : memref<400x2xf32, #tpu.memory_space<vmem>>, vector<16x1xf32>,
    %212 = vector.extract_strided_slice %181 {offsets = [0, 1160], sizes = [16, 1], strides = [1, 1]} : vector<16x1598xf32> to vector<16x1xf32>
    %c112_239 = arith.constant 112 : index
    %c1_240 = arith.constant 1 : index
    %213 = vector.load %arg14[%c112_239, %c1_240] : memref<400x2xf32, #tpu.memory_space<vmem>>, vector<16x1xf32>
    tpu.vector_store %arg14[%c112_239, %c1_240], %212 {strides = array<i32>} : memref<400x2xf32, #tpu.memory_space<vmem>>, vector<16x1xf32>,
    %214 = vector.extract_strided_slice %181 {offsets = [0, 140], sizes = [16, 1], strides = [1, 1]} : vector<16x1598xf32> to vector<16x1xf32>
    %c128_241 = arith.constant 128 : index
    %c0_242 = arith.constant 0 : index
    %215 = vector.load %arg14[%c128_241, %c0_242] : memref<400x2xf32, #tpu.memory_space<vmem>>, vector<16x1xf32>
    tpu.vector_store %arg14[%c128_241, %c0_242], %214 {strides = array<i32>} : memref<400x2xf32, #tpu.memory_space<vmem>>, vector<16x1xf32>,
    %216 = vector.extract_strided_slice %181 {offsets = [0, 1164], sizes = [16, 1], strides = [1, 1]} : vector<16x1598xf32> to vector<16x1xf32>
    %c128_243 = arith.constant 128 : index
    %c1_244 = arith.constant 1 : index
    %217 = vector.load %arg14[%c128_243, %c1_244] : memref<400x2xf32, #tpu.memory_space<vmem>>, vector<16x1xf32>
    tpu.vector_store %arg14[%c128_243, %c1_244], %216 {strides = array<i32>} : memref<400x2xf32, #tpu.memory_space<vmem>>, vector<16x1xf32>,
    %218 = vector.extract_strided_slice %181 {offsets = [0, 144], sizes = [16, 1], strides = [1, 1]} : vector<16x1598xf32> to vector<16x1xf32>
    %c144_245 = arith.constant 144 : index
    %c0_246 = arith.constant 0 : index
    %219 = vector.load %arg14[%c144_245, %c0_246] : memref<400x2xf32, #tpu.memory_space<vmem>>, vector<16x1xf32>
    tpu.vector_store %arg14[%c144_245, %c0_246], %218 {strides = array<i32>} : memref<400x2xf32, #tpu.memory_space<vmem>>, vector<16x1xf32>,
    %220 = vector.extract_strided_slice %181 {offsets = [0, 1168], sizes = [16, 1], strides = [1, 1]} : vector<16x1598xf32> to vector<16x1xf32>
    %c144_247 = arith.constant 144 : index
    %c1_248 = arith.constant 1 : index
    %221 = vector.load %arg14[%c144_247, %c1_248] : memref<400x2xf32, #tpu.memory_space<vmem>>, vector<16x1xf32>
    tpu.vector_store %arg14[%c144_247, %c1_248], %220 {strides = array<i32>} : memref<400x2xf32, #tpu.memory_space<vmem>>, vector<16x1xf32>,
    %222 = vector.extract_strided_slice %181 {offsets = [0, 256], sizes = [16, 1], strides = [1, 1]} : vector<16x1598xf32> to vector<16x1xf32>
    %c160 = arith.constant 160 : index
    %c0_249 = arith.constant 0 : index
    %223 = vector.load %arg14[%c160, %c0_249] : memref<400x2xf32, #tpu.memory_space<vmem>>, vector<16x1xf32>
    tpu.vector_store %arg14[%c160, %c0_249], %222 {strides = array<i32>} : memref<400x2xf32, #tpu.memory_space<vmem>>, vector<16x1xf32>,
    %224 = vector.extract_strided_slice %181 {offsets = [0, 1280], sizes = [16, 1], strides = [1, 1]} : vector<16x1598xf32> to vector<16x1xf32>
    %c160_250 = arith.constant 160 : index
    %c1_251 = arith.constant 1 : index
    %225 = vector.load %arg14[%c160_250, %c1_251] : memref<400x2xf32, #tpu.memory_space<vmem>>, vector<16x1xf32>
    tpu.vector_store %arg14[%c160_250, %c1_251], %224 {strides = array<i32>} : memref<400x2xf32, #tpu.memory_space<vmem>>, vector<16x1xf32>,
    %226 = vector.extract_strided_slice %181 {offsets = [0, 260], sizes = [16, 1], strides = [1, 1]} : vector<16x1598xf32> to vector<16x1xf32>
    %c176 = arith.constant 176 : index
    %c0_252 = arith.constant 0 : index
    %227 = vector.load %arg14[%c176, %c0_252] : memref<400x2xf32, #tpu.memory_space<vmem>>, vector<16x1xf32>
    tpu.vector_store %arg14[%c176, %c0_252], %226 {strides = array<i32>} : memref<400x2xf32, #tpu.memory_space<vmem>>, vector<16x1xf32>,
    %228 = vector.extract_strided_slice %181 {offsets = [0, 1284], sizes = [16, 1], strides = [1, 1]} : vector<16x1598xf32> to vector<16x1xf32>
    %c176_253 = arith.constant 176 : index
    %c1_254 = arith.constant 1 : index
    %229 = vector.load %arg14[%c176_253, %c1_254] : memref<400x2xf32, #tpu.memory_space<vmem>>, vector<16x1xf32>
    tpu.vector_store %arg14[%c176_253, %c1_254], %228 {strides = array<i32>} : memref<400x2xf32, #tpu.memory_space<vmem>>, vector<16x1xf32>,
    %230 = vector.extract_strided_slice %181 {offsets = [0, 264], sizes = [16, 1], strides = [1, 1]} : vector<16x1598xf32> to vector<16x1xf32>
    %c192 = arith.constant 192 : index
    %c0_255 = arith.constant 0 : index
    %231 = vector.load %arg14[%c192, %c0_255] : memref<400x2xf32, #tpu.memory_space<vmem>>, vector<16x1xf32>
    tpu.vector_store %arg14[%c192, %c0_255], %230 {strides = array<i32>} : memref<400x2xf32, #tpu.memory_space<vmem>>, vector<16x1xf32>,
    %232 = vector.extract_strided_slice %181 {offsets = [0, 1288], sizes = [16, 1], strides = [1, 1]} : vector<16x1598xf32> to vector<16x1xf32>
    %c192_256 = arith.constant 192 : index
    %c1_257 = arith.constant 1 : index
    %233 = vector.load %arg14[%c192_256, %c1_257] : memref<400x2xf32, #tpu.memory_space<vmem>>, vector<16x1xf32>
    tpu.vector_store %arg14[%c192_256, %c1_257], %232 {strides = array<i32>} : memref<400x2xf32, #tpu.memory_space<vmem>>, vector<16x1xf32>,
    %234 = vector.extract_strided_slice %181 {offsets = [0, 268], sizes = [16, 1], strides = [1, 1]} : vector<16x1598xf32> to vector<16x1xf32>
    %c208 = arith.constant 208 : index
    %c0_258 = arith.constant 0 : index
    %235 = vector.load %arg14[%c208, %c0_258] : memref<400x2xf32, #tpu.memory_space<vmem>>, vector<16x1xf32>
    tpu.vector_store %arg14[%c208, %c0_258], %234 {strides = array<i32>} : memref<400x2xf32, #tpu.memory_space<vmem>>, vector<16x1xf32>,
    %236 = vector.extract_strided_slice %181 {offsets = [0, 1292], sizes = [16, 1], strides = [1, 1]} : vector<16x1598xf32> to vector<16x1xf32>
    %c208_259 = arith.constant 208 : index
    %c1_260 = arith.constant 1 : index
    %237 = vector.load %arg14[%c208_259, %c1_260] : memref<400x2xf32, #tpu.memory_space<vmem>>, vector<16x1xf32>
    tpu.vector_store %arg14[%c208_259, %c1_260], %236 {strides = array<i32>} : memref<400x2xf32, #tpu.memory_space<vmem>>, vector<16x1xf32>,
    %238 = vector.extract_strided_slice %181 {offsets = [0, 272], sizes = [16, 1], strides = [1, 1]} : vector<16x1598xf32> to vector<16x1xf32>
    %c224 = arith.constant 224 : index
    %c0_261 = arith.constant 0 : index
    %239 = vector.load %arg14[%c224, %c0_261] : memref<400x2xf32, #tpu.memory_space<vmem>>, vector<16x1xf32>
    tpu.vector_store %arg14[%c224, %c0_261], %238 {strides = array<i32>} : memref<400x2xf32, #tpu.memory_space<vmem>>, vector<16x1xf32>,
    %240 = vector.extract_strided_slice %181 {offsets = [0, 1296], sizes = [16, 1], strides = [1, 1]} : vector<16x1598xf32> to vector<16x1xf32>
    %c224_262 = arith.constant 224 : index
    %c1_263 = arith.constant 1 : index
    %241 = vector.load %arg14[%c224_262, %c1_263] : memref<400x2xf32, #tpu.memory_space<vmem>>, vector<16x1xf32>
    tpu.vector_store %arg14[%c224_262, %c1_263], %240 {strides = array<i32>} : memref<400x2xf32, #tpu.memory_space<vmem>>, vector<16x1xf32>,
    %242 = vector.extract_strided_slice %181 {offsets = [0, 384], sizes = [16, 1], strides = [1, 1]} : vector<16x1598xf32> to vector<16x1xf32>
    %c240 = arith.constant 240 : index
    %c0_264 = arith.constant 0 : index
    %243 = vector.load %arg14[%c240, %c0_264] : memref<400x2xf32, #tpu.memory_space<vmem>>, vector<16x1xf32>
    tpu.vector_store %arg14[%c240, %c0_264], %242 {strides = array<i32>} : memref<400x2xf32, #tpu.memory_space<vmem>>, vector<16x1xf32>,
    %244 = vector.extract_strided_slice %181 {offsets = [0, 1408], sizes = [16, 1], strides = [1, 1]} : vector<16x1598xf32> to vector<16x1xf32>
    %c240_265 = arith.constant 240 : index
    %c1_266 = arith.constant 1 : index
    %245 = vector.load %arg14[%c240_265, %c1_266] : memref<400x2xf32, #tpu.memory_space<vmem>>, vector<16x1xf32>
    tpu.vector_store %arg14[%c240_265, %c1_266], %244 {strides = array<i32>} : memref<400x2xf32, #tpu.memory_space<vmem>>, vector<16x1xf32>,
    %246 = vector.extract_strided_slice %181 {offsets = [0, 388], sizes = [16, 1], strides = [1, 1]} : vector<16x1598xf32> to vector<16x1xf32>
    %c256 = arith.constant 256 : index
    %c0_267 = arith.constant 0 : index
    %247 = vector.load %arg14[%c256, %c0_267] : memref<400x2xf32, #tpu.memory_space<vmem>>, vector<16x1xf32>
    tpu.vector_store %arg14[%c256, %c0_267], %246 {strides = array<i32>} : memref<400x2xf32, #tpu.memory_space<vmem>>, vector<16x1xf32>,
    %248 = vector.extract_strided_slice %181 {offsets = [0, 1412], sizes = [16, 1], strides = [1, 1]} : vector<16x1598xf32> to vector<16x1xf32>
    %c256_268 = arith.constant 256 : index
    %c1_269 = arith.constant 1 : index
    %249 = vector.load %arg14[%c256_268, %c1_269] : memref<400x2xf32, #tpu.memory_space<vmem>>, vector<16x1xf32>
    tpu.vector_store %arg14[%c256_268, %c1_269], %248 {strides = array<i32>} : memref<400x2xf32, #tpu.memory_space<vmem>>, vector<16x1xf32>,
    %250 = vector.extract_strided_slice %181 {offsets = [0, 392], sizes = [16, 1], strides = [1, 1]} : vector<16x1598xf32> to vector<16x1xf32>
    %c272 = arith.constant 272 : index
    %c0_270 = arith.constant 0 : index
    %251 = vector.load %arg14[%c272, %c0_270] : memref<400x2xf32, #tpu.memory_space<vmem>>, vector<16x1xf32>
    tpu.vector_store %arg14[%c272, %c0_270], %250 {strides = array<i32>} : memref<400x2xf32, #tpu.memory_space<vmem>>, vector<16x1xf32>,
    %252 = vector.extract_strided_slice %181 {offsets = [0, 1416], sizes = [16, 1], strides = [1, 1]} : vector<16x1598xf32> to vector<16x1xf32>
    %c272_271 = arith.constant 272 : index
    %c1_272 = arith.constant 1 : index
    %253 = vector.load %arg14[%c272_271, %c1_272] : memref<400x2xf32, #tpu.memory_space<vmem>>, vector<16x1xf32>
    tpu.vector_store %arg14[%c272_271, %c1_272], %252 {strides = array<i32>} : memref<400x2xf32, #tpu.memory_space<vmem>>, vector<16x1xf32>,
    %254 = vector.extract_strided_slice %181 {offsets = [0, 396], sizes = [16, 1], strides = [1, 1]} : vector<16x1598xf32> to vector<16x1xf32>
    %c288 = arith.constant 288 : index
    %c0_273 = arith.constant 0 : index
    %255 = vector.load %arg14[%c288, %c0_273] : memref<400x2xf32, #tpu.memory_space<vmem>>, vector<16x1xf32>
    tpu.vector_store %arg14[%c288, %c0_273], %254 {strides = array<i32>} : memref<400x2xf32, #tpu.memory_space<vmem>>, vector<16x1xf32>,
    %256 = vector.extract_strided_slice %181 {offsets = [0, 1420], sizes = [16, 1], strides = [1, 1]} : vector<16x1598xf32> to vector<16x1xf32>
    %c288_274 = arith.constant 288 : index
    %c1_275 = arith.constant 1 : index
    %257 = vector.load %arg14[%c288_274, %c1_275] : memref<400x2xf32, #tpu.memory_space<vmem>>, vector<16x1xf32>
    tpu.vector_store %arg14[%c288_274, %c1_275], %256 {strides = array<i32>} : memref<400x2xf32, #tpu.memory_space<vmem>>, vector<16x1xf32>,
    %258 = vector.extract_strided_slice %181 {offsets = [0, 400], sizes = [16, 1], strides = [1, 1]} : vector<16x1598xf32> to vector<16x1xf32>
    %c304 = arith.constant 304 : index
    %c0_276 = arith.constant 0 : index
    %259 = vector.load %arg14[%c304, %c0_276] : memref<400x2xf32, #tpu.memory_space<vmem>>, vector<16x1xf32>
    tpu.vector_store %arg14[%c304, %c0_276], %258 {strides = array<i32>} : memref<400x2xf32, #tpu.memory_space<vmem>>, vector<16x1xf32>,
    %260 = vector.extract_strided_slice %181 {offsets = [0, 1424], sizes = [16, 1], strides = [1, 1]} : vector<16x1598xf32> to vector<16x1xf32>
    %c304_277 = arith.constant 304 : index
    %c1_278 = arith.constant 1 : index
    %261 = vector.load %arg14[%c304_277, %c1_278] : memref<400x2xf32, #tpu.memory_space<vmem>>, vector<16x1xf32>
    tpu.vector_store %arg14[%c304_277, %c1_278], %260 {strides = array<i32>} : memref<400x2xf32, #tpu.memory_space<vmem>>, vector<16x1xf32>,
    %262 = vector.extract_strided_slice %181 {offsets = [0, 512], sizes = [16, 1], strides = [1, 1]} : vector<16x1598xf32> to vector<16x1xf32>
    %c320 = arith.constant 320 : index
    %c0_279 = arith.constant 0 : index
    %263 = vector.load %arg14[%c320, %c0_279] : memref<400x2xf32, #tpu.memory_space<vmem>>, vector<16x1xf32>
    tpu.vector_store %arg14[%c320, %c0_279], %262 {strides = array<i32>} : memref<400x2xf32, #tpu.memory_space<vmem>>, vector<16x1xf32>,
    %264 = vector.extract_strided_slice %181 {offsets = [0, 1536], sizes = [16, 1], strides = [1, 1]} : vector<16x1598xf32> to vector<16x1xf32>
    %c320_280 = arith.constant 320 : index
    %c1_281 = arith.constant 1 : index
    %265 = vector.load %arg14[%c320_280, %c1_281] : memref<400x2xf32, #tpu.memory_space<vmem>>, vector<16x1xf32>
    tpu.vector_store %arg14[%c320_280, %c1_281], %264 {strides = array<i32>} : memref<400x2xf32, #tpu.memory_space<vmem>>, vector<16x1xf32>,
    %266 = vector.extract_strided_slice %181 {offsets = [0, 516], sizes = [16, 1], strides = [1, 1]} : vector<16x1598xf32> to vector<16x1xf32>
    %c336 = arith.constant 336 : index
    %c0_282 = arith.constant 0 : index
    %267 = vector.load %arg14[%c336, %c0_282] : memref<400x2xf32, #tpu.memory_space<vmem>>, vector<16x1xf32>
    tpu.vector_store %arg14[%c336, %c0_282], %266 {strides = array<i32>} : memref<400x2xf32, #tpu.memory_space<vmem>>, vector<16x1xf32>,
    %268 = vector.extract_strided_slice %181 {offsets = [0, 1540], sizes = [16, 1], strides = [1, 1]} : vector<16x1598xf32> to vector<16x1xf32>
    %c336_283 = arith.constant 336 : index
    %c1_284 = arith.constant 1 : index
    %269 = vector.load %arg14[%c336_283, %c1_284] : memref<400x2xf32, #tpu.memory_space<vmem>>, vector<16x1xf32>
    tpu.vector_store %arg14[%c336_283, %c1_284], %268 {strides = array<i32>} : memref<400x2xf32, #tpu.memory_space<vmem>>, vector<16x1xf32>,
    %270 = vector.extract_strided_slice %181 {offsets = [0, 520], sizes = [16, 1], strides = [1, 1]} : vector<16x1598xf32> to vector<16x1xf32>
    %c352 = arith.constant 352 : index
    %c0_285 = arith.constant 0 : index
    %271 = vector.load %arg14[%c352, %c0_285] : memref<400x2xf32, #tpu.memory_space<vmem>>, vector<16x1xf32>
    tpu.vector_store %arg14[%c352, %c0_285], %270 {strides = array<i32>} : memref<400x2xf32, #tpu.memory_space<vmem>>, vector<16x1xf32>,
    %272 = vector.extract_strided_slice %181 {offsets = [0, 1544], sizes = [16, 1], strides = [1, 1]} : vector<16x1598xf32> to vector<16x1xf32>
    %c352_286 = arith.constant 352 : index
    %c1_287 = arith.constant 1 : index
    %273 = vector.load %arg14[%c352_286, %c1_287] : memref<400x2xf32, #tpu.memory_space<vmem>>, vector<16x1xf32>
    tpu.vector_store %arg14[%c352_286, %c1_287], %272 {strides = array<i32>} : memref<400x2xf32, #tpu.memory_space<vmem>>, vector<16x1xf32>,
    %274 = vector.extract_strided_slice %181 {offsets = [0, 524], sizes = [16, 1], strides = [1, 1]} : vector<16x1598xf32> to vector<16x1xf32>
    %c368 = arith.constant 368 : index
    %c0_288 = arith.constant 0 : index
    %275 = vector.load %arg14[%c368, %c0_288] : memref<400x2xf32, #tpu.memory_space<vmem>>, vector<16x1xf32>
    tpu.vector_store %arg14[%c368, %c0_288], %274 {strides = array<i32>} : memref<400x2xf32, #tpu.memory_space<vmem>>, vector<16x1xf32>,
    %276 = vector.extract_strided_slice %181 {offsets = [0, 1548], sizes = [16, 1], strides = [1, 1]} : vector<16x1598xf32> to vector<16x1xf32>
    %c368_289 = arith.constant 368 : index
    %c1_290 = arith.constant 1 : index
    %277 = vector.load %arg14[%c368_289, %c1_290] : memref<400x2xf32, #tpu.memory_space<vmem>>, vector<16x1xf32>
    tpu.vector_store %arg14[%c368_289, %c1_290], %276 {strides = array<i32>} : memref<400x2xf32, #tpu.memory_space<vmem>>, vector<16x1xf32>,
    %278 = vector.extract_strided_slice %181 {offsets = [0, 528], sizes = [16, 1], strides = [1, 1]} : vector<16x1598xf32> to vector<16x1xf32>
    %c384 = arith.constant 384 : index
    %c0_291 = arith.constant 0 : index
    %279 = vector.load %arg14[%c384, %c0_291] : memref<400x2xf32, #tpu.memory_space<vmem>>, vector<16x1xf32>
    tpu.vector_store %arg14[%c384, %c0_291], %278 {strides = array<i32>} : memref<400x2xf32, #tpu.memory_space<vmem>>, vector<16x1xf32>,
    %280 = vector.extract_strided_slice %181 {offsets = [0, 1552], sizes = [16, 1], strides = [1, 1]} : vector<16x1598xf32> to vector<16x1xf32>
    %c384_292 = arith.constant 384 : index
    %c1_293 = arith.constant 1 : index
    %281 = vector.load %arg14[%c384_292, %c1_293] : memref<400x2xf32, #tpu.memory_space<vmem>>, vector<16x1xf32>
    tpu.vector_store %arg14[%c384_292, %c1_293], %280 {strides = array<i32>} : memref<400x2xf32, #tpu.memory_space<vmem>>, vector<16x1xf32>,
    %c0_294 = arith.constant 0 : index
    %c0_295 = arith.constant 0 : index
    %282 = vector.load %arg14[%c0_294, %c0_295] : memref<400x2xf32, #tpu.memory_space<vmem>>, vector<400x2xf32>
    %c0_296 = arith.constant 0 : index
    %c0_297 = arith.constant 0 : index
    %283 = vector.load %arg5[%c0_296, %c0_297] : memref<400x120xf32, #tpu.memory_space<vmem>>, vector<400x120xf32>
    %cst_298 = arith.constant dense<0.000000e+00> : vector<2x120xf32>
    %284 = tpu.matmul %282, %283, %cst_298 {dimension_numbers = #tpu.dot_dimension_numbers<[0], [0], [1], [1], [0, 1, 1, 1], [], []>} : vector<400x2xf32>, vector<400x120xf32>, vector<2x120xf32> -> vector<2x120xf32>
    %c0_299 = arith.constant 0 : index
    %c0_300 = arith.constant 0 : index
    %285 = vector.load %arg6[%c0_299, %c0_300] : memref<1x120xf32, #tpu.memory_space<vmem>>, vector<1x120xf32>
    %286 = vector.broadcast %285 : vector<1x120xf32> to vector<2x120xf32>
    %287 = arith.addf %284, %286 : vector<2x120xf32>
    %cst_301 = arith.constant 0.000000e+00 : f32
    %288 = vector.broadcast %cst_301 : f32 to vector<2x120xf32>
    %289 = arith.maximumf %287, %288 : vector<2x120xf32>
    %c0_302 = arith.constant 0 : index
    %c0_303 = arith.constant 0 : index
    %290 = vector.load %arg7[%c0_302, %c0_303] : memref<120x84xf32, #tpu.memory_space<vmem>>, vector<120x84xf32>
    %cst_304 = arith.constant dense<0.000000e+00> : vector<2x84xf32>
    %291 = tpu.matmul %289, %290, %cst_304 {dimension_numbers = #tpu.dot_dimension_numbers<[1], [0], [0], [1], [0, 0, 1, 1], [], []>} : vector<2x120xf32>, vector<120x84xf32>, vector<2x84xf32> -> vector<2x84xf32>
    %c0_305 = arith.constant 0 : index
    %c0_306 = arith.constant 0 : index
    %292 = vector.load %arg8[%c0_305, %c0_306] : memref<1x84xf32, #tpu.memory_space<vmem>>, vector<1x84xf32>
    %293 = vector.broadcast %292 : vector<1x84xf32> to vector<2x84xf32>
    %294 = arith.addf %291, %293 : vector<2x84xf32>
    %cst_307 = arith.constant 0.000000e+00 : f32
    %295 = vector.broadcast %cst_307 : f32 to vector<2x84xf32>
    %296 = arith.maximumf %294, %295 : vector<2x84xf32>
    %c0_308 = arith.constant 0 : index
    %c0_309 = arith.constant 0 : index
    %297 = vector.load %arg9[%c0_308, %c0_309] : memref<84x10xf32, #tpu.memory_space<vmem>>, vector<84x10xf32>
    %cst_310 = arith.constant dense<0.000000e+00> : vector<2x10xf32>
    %298 = tpu.matmul %296, %297, %cst_310 {dimension_numbers = #tpu.dot_dimension_numbers<[1], [0], [0], [1], [0, 0, 1, 1], [], []>} : vector<2x84xf32>, vector<84x10xf32>, vector<2x10xf32> -> vector<2x10xf32>
    %c0_311 = arith.constant 0 : index
    %c0_312 = arith.constant 0 : index
    %299 = vector.load %arg10[%c0_311, %c0_312] : memref<1x10xf32, #tpu.memory_space<vmem>>, vector<1x10xf32>
    %300 = vector.broadcast %299 : vector<1x10xf32> to vector<2x10xf32>
    %301 = arith.addf %298, %300 : vector<2x10xf32>
    %c0_313 = arith.constant 0 : index
    %c0_314 = arith.constant 0 : index
    %302 = vector.load %arg11[%c0_313, %c0_314] : memref<2x10xf32, #tpu.memory_space<vmem>>, vector<2x10xf32>
    tpu.vector_store %arg11[%c0_313, %c0_314], %301 {strides = array<i32>} : memref<2x10xf32, #tpu.memory_space<vmem>>, vector<2x10xf32>,
    return
  }
}

</mosaic_0001>

<bundles_post_ra>
// kernel: net_forward.1
= control target key start
LH: loop header
LB: loop body
LE: loop exit
PB: predicated region body
PF: predicated region fallthrough
CT: control target
= control target key end

     0   :  { %s13626_s0 = inlined_call_operand.vmem [shape: f32[6,1024], index: 0, kind: input, shape index: {}]   ;;  %s13627_s1 = inlined_call_operand.vmem [shape: f32[6,75], index: 1, kind: input, shape index: {}]   ;;  %s13628_s2 = inlined_call_operand.vmem [shape: f32[6,1], index: 2, kind: input, shape index: {}]   ;;  %s13629_s3 = inlined_call_operand.vmem [shape: f32[16,150], index: 3, kind: input, shape index: {}]   ;;  %s13630_s4 = inlined_call_operand.vmem [shape: f32[16,1], index: 4, kind: input, shape index: {}]   ;;  %s13631_s5 = inlined_call_operand.vmem [shape: f32[400,120], index: 5, kind: input, shape index: {}]   ;;  %s13632_s6 = inlined_call_operand.vmem [shape: f32[1,120], index: 6, kind: input, shape index: {}]   ;;  %s13633_s7 = inlined_call_operand.vmem [shape: f32[120,84], index: 7, kind: input, shape index: {}]   ;;  %s13634_s8 = inlined_call_operand.vmem [shape: f32[1,84], index: 8, kind: input, shape index: {}]   ;;  %s13635_s9 = inlined_call_operand.vmem [shape: f32[84,10], index: 9, kind: input, shape index: {}]   ;;  %s13636_s10 = inlined_call_operand.vmem [shape: f32[1,10], index: 10, kind: input, shape index: {}]   ;;  %s13637_s11 = inlined_call_operand.hbm [shape: f32[2,10], index: 11, kind: output, shape index: {}]  }
   0x1   :  { %13717 = sst [smem:[#allocation8_spill]] %s13630_s4 }
   0x2   :  { %13718 = sst [smem:[#allocation9_spill]] %s13631_s5 }
   0x3   :  { %13719 = sst [smem:[#allocation10_spill]] %s13632_s6 }
   0x4   :  { %13720 = sst [smem:[#allocation11_spill]] %s13633_s7 }
   0x5   :  { %13721 = sst [smem:[#allocation12_spill]] %s13634_s8 }
   0x6   :  { %13722 = sst [smem:[#allocation13_spill]] %s13635_s9 }
   0x7   :  { %13723 = sst [smem:[#allocation14_spill]] %s13636_s10 }
   0x8   :  { %13724 = sst [smem:[#allocation15_spill]] %s13637_s11 }
   0x9   :  { %v3150_v0 = vld [vmem:[%s13626_s0 + $0x8] sm:$0x7]  ;;  %v3151_v1 = vld [vmem:[%s13626_s0 + $0x10] sm:$0x7]  ;;  %s13664_s21 = smov 124   ;;  %s13662_s30 = smov 127  }
   0xa   :  { %3164 = vrot.lane.b32.xlu1 %v3150_v0, %s13664_s21  ;;  %3166 = vrot.lane.b32.xlu0 %v3151_v1, %s13664_s21  ;;  %v3152_v2 = vld [vmem:[%s13626_s0 + $0x18] sm:$0x7]  ;;  %v2803_v3 = vld [vmem:[%s13626_s0 + $0x10] sm:$0x7]  ;;  %s13678_s16 = smov 126   ;;  %s13676_s22 = smov 125  }
   0xb   :  { %v2817_v4 = vrot.slane %v2803_v3, 1  ;;  %v2804_v5 = vld [vmem:[%s13626_s0 + $0x18] sm:$0x7]  ;;  %v2929_v6 = vld [vmem:[%s13626_s0 + $0x10] sm:$0x7]  ;;  %s13660_s18 = smov 29  }
   0xc   :  { %v2818_v7 = vrot.slane %v2804_v5, 1  ;;  %v2943_v8 = vrot.slane %v2929_v6, 6  ;;  %v2930_v9 = vld [vmem:[%s13626_s0 + $0x18] sm:$0x7]  ;;  %v3040_v10 = vld [vmem:[%s13626_s0 + $0x10] sm:$0x7] }
   0xd   :  { %v2944_v11 = vrot.slane %v2930_v9, 6  ;;  %v3054_v12 = vrot.slane %v3040_v10, 3  ;;  %v3041_v13 = vld [vmem:[%s13626_s0 + $0x18] sm:$0x7]  ;;  %v2802_v14 = vld [vmem:[%s13626_s0 + $0x8] sm:$0x7] }
   0xe   :  { %3168 = vrot.lane.b32.xlu0 %v3152_v2, %s13664_s21  ;;  %2825 = vrot.lane.b32.xlu1 %v2817_v4, %s13662_s30  ;;  %v3055_v15 = vrot.slane %v3041_v13, 3  ;;  %v2816_v16 = vrot.slane %v2802_v14, 1  ;;  %v2928_v17 = vld [vmem:[%s13626_s0 + $0x8] sm:$0x7]  ;;  %v2461_v22 = vld [vmem:[%s13626_s0 + $0x10] sm:$0x7] }
   0xf   :  { %v3039_v18 = vld [vmem:[%s13626_s0 + $0x8] sm:$0x7]  ;;  %v2942_v19 = vrot.slane %v2928_v17, 6  ;;  %v2477_v24 = vrot.slane %v2461_v22, 2  ;;  %v2606_v26 = vld [vmem:[%s13626_s0 + $0x10] sm:$0x7] }
  0x10   :  { %v3053_v20 = vrot.slane %v3039_v18, 3  ;;  %v2460_v21 = vld [vmem:[%s13626_s0 + $0x8] sm:$0x7]  ;;  %v2622_v28 = vrot.slane %v2606_v26, 7  ;;  %v8366_v29 = vld [vmem:[%s13626_s0] sm:$0x7] }
  0x11   :  { %v2476_v23 = vrot.slane %v2460_v21, 2  ;;  %v2605_v25 = vld [vmem:[%s13626_s0 + $0x8] sm:$0x7]  ;;  %v8371_v30 = vld [vmem:[%s13626_s0] sm:$0x7]  ;;  %s13658_s25 = smov 28  }
  0x12   :  { %2827 = vrot.lane.b32.xlu0 %v2818_v7, %s13662_s30  ;;  %2951 = vrot.lane.b32.xlu1 %v2943_v8, %s13678_s16  ;;  %v2621_v27 = vrot.slane %v2605_v25, 7  ;;  %v2475_v31 = vrot.slane %v8366_v29, 2  ;;  %v2620_v32 = vrot.slane %v8371_v30, 7  ;;  %v8214_v33 = vmov 0.0   ;;  %v2220_v34 = vld [vmem:[%s13626_s0 + $0x8] sm:$0x7] }
  0x13   :  { %183 = vst [vmem:[#allocation2 + $0x480] sm:$0x7] %v8214_v33  ;;  %39 = vst [vmem:[#allocation2] sm:$0xff] %v8214_v33  ;;  %3538 = vmatprep.mubr.f32.mxu1 %v8214_v33  ;;  %3680 = vmatprep.mubr.f32.mxu0 %v8214_v33  ;;  %v2221_v35 = vld [vmem:[%s13626_s0 + $0x10] sm:$0x7]  ;;  %s13656_s24 = smov 31  }
  0x14   :  { %40 = vst [vmem:[#allocation2 + $0x8] sm:$0xff] %v8214_v33  ;;  %41 = vst [vmem:[#allocation2 + $0x10] sm:$0xff] %v8214_v33  ;;  %v2733_v36 = vld [vmem:[%s13626_s0 + $0x10] sm:$0x7]  ;;  %v2340_v37 = vld [vmem:[%s13626_s0 + $0x8] sm:$0x7] }
  0x15   :  { %42 = vst [vmem:[#allocation2 + $0x18] sm:$0xff] %v8214_v33  ;;  %43 = vst [vmem:[#allocation2 + $0x20] sm:$0xff] %v8214_v33  ;;  %v2341_v38 = vld [vmem:[%s13626_s0 + $0x10] sm:$0x7]  ;;  %v2747_v39 = vrot.slane %v2733_v36, 4  ;;  %v2356_v41 = vrot.slane %v2340_v37, 5 }
  0x16   :  { %2953 = vrot.lane.b32.xlu0 %v2944_v11, %s13678_s16  ;;  %3062 = vrot.lane.b32.xlu1 %v3054_v12, %s13676_s22  ;;  %44 = vst [vmem:[#allocation2 + $0x28] sm:$0xff] %v8214_v33  ;;  %45 = vst [vmem:[#allocation2 + $0x30] sm:$0xff] %v8214_v33  ;;  %v2732_v40 = vld [vmem:[%s13626_s0 + $0x8] sm:$0x7]  ;;  %v2357_v42 = vrot.slane %v2341_v38, 5  ;;  %s13654_s28 = smov 30  }
  0x17   :  { %46 = vst [vmem:[#allocation2 + $0x38] sm:$0xff] %v8214_v33  ;;  %47 = vst [vmem:[#allocation2 + $0x40] sm:$0xff] %v8214_v33  ;;  %v2746_v43 = vrot.slane %v2732_v40, 4  ;;  %v2339_v44 = vld [vmem:[%s13626_s0] sm:$0x7]  ;;  %s13642_s27 = smov 61  }
  0x18   :  { %48 = vst [vmem:[#allocation2 + $0x48] sm:$0xff] %v8214_v33  ;;  %49 = vst [vmem:[#allocation2 + $0x50] sm:$0xff] %v8214_v33  ;;  %v2355_v45 = vrot.slane %v2339_v44, 5  ;;  %v2219_v46 = vld [vmem:[%s13626_s0] sm:$0x7] }
  0x19   :  { %50 = vst [vmem:[#allocation2 + $0x58] sm:$0xff] %v8214_v33  ;;  %51 = vst [vmem:[#allocation2 + $0x60] sm:$0xff] %v8214_v33  ;;  %v1819_v47 = vld [vmem:[%s13626_s0 + $0x8] sm:$0x7]  ;;  %v1820_v48 = vld [vmem:[%s13626_s0 + $0x10] sm:$0x7] }
  0x1a   :  { %3064 = vrot.lane.b32.xlu0 %v3055_v15, %s13676_s22  ;;  %2823 = vrot.lane.b32.xlu1 %v2816_v16, %s13662_s30  ;;  %52 = vst [vmem:[#allocation2 + $0x68] sm:$0xff] %v8214_v33  ;;  %53 = vst [vmem:[#allocation2 + $0x70] sm:$0xff] %v8214_v33  ;;  %v1835_v49 = vrot.slane %v1819_v47, 1  ;;  %v1836_v50 = vrot.slane %v1820_v48, 1  ;;  %v1964_v51 = vld [vmem:[%s13626_s0 + $0x8] sm:$0x7] }
  0x1b   :  { %54 = vst [vmem:[#allocation2 + $0x78] sm:$0xff] %v8214_v33  ;;  %55 = vst [vmem:[#allocation2 + $0x80] sm:$0xff] %v8214_v33  ;;  %v1965_v52 = vld [vmem:[%s13626_s0 + $0x10] sm:$0x7]  ;;  %v1980_v53 = vrot.slane %v1964_v51, 6 }
  0x1c   :  { %56 = vst [vmem:[#allocation2 + $0x88] sm:$0xff] %v8214_v33  ;;  %57 = vst [vmem:[#allocation2 + $0x90] sm:$0xff] %v8214_v33  ;;  %v1981_v54 = vrot.slane %v1965_v52, 6 }
  0x1d   :  { %58 = vst [vmem:[#allocation2 + $0x98] sm:$0xff] %v8214_v33  ;;  %59 = vst [vmem:[#allocation2 + $0xa0] sm:$0xff] %v8214_v33 }
  0x1e   :  { %2949 = vrot.lane.b32.xlu0 %v2942_v19, %s13678_s16  ;;  %3060 = vrot.lane.b32.xlu1 %v3053_v20, %s13676_s22  ;;  %60 = vst [vmem:[#allocation2 + $0xa8] sm:$0xff] %v8214_v33  ;;  %61 = vst [vmem:[#allocation2 + $0xb0] sm:$0xff] %v8214_v33 }
  0x1f   :  { %62 = vst [vmem:[#allocation2 + $0xb8] sm:$0xff] %v8214_v33  ;;  %63 = vst [vmem:[#allocation2 + $0xc0] sm:$0xff] %v8214_v33 }
  0x20   :  { %64 = vst [vmem:[#allocation2 + $0xc8] sm:$0xff] %v8214_v33  ;;  %65 = vst [vmem:[#allocation2 + $0xd0] sm:$0xff] %v8214_v33 }
  0x21   :  { %66 = vst [vmem:[#allocation2 + $0xd8] sm:$0xff] %v8214_v33  ;;  %67 = vst [vmem:[#allocation2 + $0xe0] sm:$0xff] %v8214_v33 }
  0x22   :  { %2485 = vrot.lane.b32.xlu0 %v2476_v23, %s13660_s18  ;;  %2487 = vrot.lane.b32.xlu1 %v2477_v24, %s13660_s18  ;;  %68 = vst [vmem:[#allocation2 + $0xe8] sm:$0xff] %v8214_v33  ;;  %69 = vst [vmem:[#allocation2 + $0xf0] sm:$0xff] %v8214_v33 }
  0x23   :  { %70 = vst [vmem:[#allocation2 + $0xf8] sm:$0xff] %v8214_v33  ;;  %71 = vst [vmem:[#allocation2 + $0x100] sm:$0xff] %v8214_v33 }
  0x24   :  { %72 = vst [vmem:[#allocation2 + $0x108] sm:$0xff] %v8214_v33  ;;  %73 = vst [vmem:[#allocation2 + $0x110] sm:$0xff] %v8214_v33 }
  0x25   :  { %74 = vst [vmem:[#allocation2 + $0x118] sm:$0xff] %v8214_v33  ;;  %75 = vst [vmem:[#allocation2 + $0x120] sm:$0xff] %v8214_v33 }
  0x26   :  { %2630 = vrot.lane.b32.xlu0 %v2621_v27, %s13658_s25  ;;  %2632 = vrot.lane.b32.xlu1 %v2622_v28, %s13658_s25  ;;  %76 = vst [vmem:[#allocation2 + $0x128] sm:$0xff] %v8214_v33  ;;  %77 = vst [vmem:[#allocation2 + $0x130] sm:$0xff] %v8214_v33 }
  0x27   :  { %78 = vst [vmem:[#allocation2 + $0x138] sm:$0xff] %v8214_v33  ;;  %79 = vst [vmem:[#allocation2 + $0x140] sm:$0xff] %v8214_v33 }
  0x28   :  { %80 = vst [vmem:[#allocation2 + $0x148] sm:$0xff] %v8214_v33  ;;  %81 = vst [vmem:[#allocation2 + $0x150] sm:$0xff] %v8214_v33 }
  0x29   :  { %82 = vst [vmem:[#allocation2 + $0x158] sm:$0xff] %v8214_v33  ;;  %83 = vst [vmem:[#allocation2 + $0x160] sm:$0xff] %v8214_v33 }
  0x2a   :  { %84 = vst [vmem:[#allocation2 + $0x168] sm:$0xff] %v8214_v33  ;;  %85 = vst [vmem:[#allocation2 + $0x170] sm:$0xff] %v8214_v33  ;;  %2483 = vrot.lane.b32.xlu0 %v2475_v31, %s13660_s18  ;;  %2628 = vrot.lane.b32.xlu1 %v2620_v32, %s13658_s25 }
  0x2b   :  { %86 = vst [vmem:[#allocation2 + $0x178] sm:$0xff] %v8214_v33  ;;  %87 = vst [vmem:[#allocation2 + $0x180] sm:$0xff] %v8214_v33 }
  0x2c   :  { %88 = vst [vmem:[#allocation2 + $0x188] sm:$0xff] %v8214_v33  ;;  %89 = vst [vmem:[#allocation2 + $0x190] sm:$0xff] %v8214_v33 }
  0x2d   :  { %90 = vst [vmem:[#allocation2 + $0x198] sm:$0xff] %v8214_v33  ;;  %91 = vst [vmem:[#allocation2 + $0x1a0] sm:$0xff] %v8214_v33 }
  0x2e   :  { %92 = vst [vmem:[#allocation2 + $0x1a8] sm:$0xff] %v8214_v33  ;;  %93 = vst [vmem:[#allocation2 + $0x1b0] sm:$0xff] %v8214_v33  ;;  %2237 = vrot.lane.b32.xlu0 %v2220_v34, %s13656_s24  ;;  %2239 = vrot.lane.b32.xlu1 %v2221_v35, %s13656_s24 }
  0x2f   :  { %94 = vst [vmem:[#allocation2 + $0x1b8] sm:$0xff] %v8214_v33  ;;  %95 = vst [vmem:[#allocation2 + $0x1c0] sm:$0xff] %v8214_v33 }
  0x30   :  { %96 = vst [vmem:[#allocation2 + $0x1c8] sm:$0xff] %v8214_v33  ;;  %97 = vst [vmem:[#allocation2 + $0x1d0] sm:$0xff] %v8214_v33 }
  0x31   :  { %98 = vst [vmem:[#allocation2 + $0x1d8] sm:$0xff] %v8214_v33  ;;  %99 = vst [vmem:[#allocation2 + $0x1e0] sm:$0xff] %v8214_v33 }
  0x32   :  { %100 = vst [vmem:[#allocation2 + $0x1e8] sm:$0xff] %v8214_v33  ;;  %101 = vst [vmem:[#allocation2 + $0x1f0] sm:$0xff] %v8214_v33  ;;  %2365 = vrot.lane.b32.xlu0 %v2356_v41, %s13654_s28  ;;  %2367 = vrot.lane.b32.xlu1 %v2357_v42, %s13654_s28 }
  0x33   :  { %102 = vst [vmem:[#allocation2 + $0x1f8] sm:$0xff] %v8214_v33  ;;  %103 = vst [vmem:[#allocation2 + $0x200] sm:$0xff] %v8214_v33 }
  0x34   :  { %104 = vst [vmem:[#allocation2 + $0x208] sm:$0xff] %v8214_v33  ;;  %105 = vst [vmem:[#allocation2 + $0x210] sm:$0xff] %v8214_v33 }
  0x35   :  { %106 = vst [vmem:[#allocation2 + $0x218] sm:$0xff] %v8214_v33  ;;  %107 = vst [vmem:[#allocation2 + $0x220] sm:$0xff] %v8214_v33 }
  0x36   :  { %108 = vst [vmem:[#allocation2 + $0x228] sm:$0xff] %v8214_v33  ;;  %109 = vst [vmem:[#allocation2 + $0x230] sm:$0xff] %v8214_v33  ;;  %2235 = vrot.lane.b32.xlu0 %v2219_v46, %s13656_s24  ;;  %2363 = vrot.lane.b32.xlu1 %v2355_v45, %s13654_s28 }
  0x37   :  { %110 = vst [vmem:[#allocation2 + $0x238] sm:$0xff] %v8214_v33  ;;  %111 = vst [vmem:[#allocation2 + $0x240] sm:$0xff] %v8214_v33 }
  0x38   :  { %112 = vst [vmem:[#allocation2 + $0x248] sm:$0xff] %v8214_v33  ;;  %113 = vst [vmem:[#allocation2 + $0x250] sm:$0xff] %v8214_v33 }
  0x39   :  { %114 = vst [vmem:[#allocation2 + $0x258] sm:$0xff] %v8214_v33  ;;  %115 = vst [vmem:[#allocation2 + $0x260] sm:$0xff] %v8214_v33 }
  0x3a   :  { %116 = vst [vmem:[#allocation2 + $0x268] sm:$0xff] %v8214_v33  ;;  %117 = vst [vmem:[#allocation2 + $0x270] sm:$0xff] %v8214_v33  ;;  %1844 = vrot.lane.b32.xlu0 %v1835_v49, %s13642_s27  ;;  %1846 = vrot.lane.b32.xlu1 %v1836_v50, %s13642_s27 }
  0x3b   :  { %118 = vst [vmem:[#allocation2 + $0x278] sm:$0xff] %v8214_v33  ;;  %119 = vst [vmem:[#allocation2 + $0x280] sm:$0xff] %v8214_v33 }
  0x3c   :  { %120 = vst [vmem:[#allocation2 + $0x288] sm:$0xff] %v8214_v33  ;;  %121 = vst [vmem:[#allocation2 + $0x290] sm:$0xff] %v8214_v33 }
  0x3d   :  { %122 = vst [vmem:[#allocation2 + $0x298] sm:$0xff] %v8214_v33  ;;  %123 = vst [vmem:[#allocation2 + $0x2a0] sm:$0xff] %v8214_v33 }
  0x3e   :  { %124 = vst [vmem:[#allocation2 + $0x2a8] sm:$0xff] %v8214_v33  ;;  %125 = vst [vmem:[#allocation2 + $0x2b0] sm:$0xff] %v8214_v33 }
  0x3f   :  { %126 = vst [vmem:[#allocation2 + $0x2b8] sm:$0xff] %v8214_v33  ;;  %127 = vst [vmem:[#allocation2 + $0x2c0] sm:$0xff] %v8214_v33 }
  0x40   :  { %128 = vst [vmem:[#allocation2 + $0x2c8] sm:$0xff] %v8214_v33  ;;  %129 = vst [vmem:[#allocation2 + $0x2d0] sm:$0xff] %v8214_v33 }
  0x41   :  { %130 = vst [vmem:[#allocation2 + $0x2d8] sm:$0xff] %v8214_v33  ;;  %131 = vst [vmem:[#allocation2 + $0x2e0] sm:$0xff] %v8214_v33 }
  0x42   :  { %132 = vst [vmem:[#allocation2 + $0x2e8] sm:$0xff] %v8214_v33  ;;  %133 = vst [vmem:[#allocation2 + $0x2f0] sm:$0xff] %v8214_v33 }
  0x43   :  { %134 = vst [vmem:[#allocation2 + $0x2f8] sm:$0xff] %v8214_v33  ;;  %135 = vst [vmem:[#allocation2 + $0x300] sm:$0xff] %v8214_v33 }
  0x44   :  { %136 = vst [vmem:[#allocation2 + $0x308] sm:$0xff] %v8214_v33  ;;  %137 = vst [vmem:[#allocation2 + $0x310] sm:$0xff] %v8214_v33 }
  0x45   :  { %138 = vst [vmem:[#allocation2 + $0x318] sm:$0xff] %v8214_v33  ;;  %139 = vst [vmem:[#allocation2 + $0x320] sm:$0xff] %v8214_v33 }
  0x46   :  { %140 = vst [vmem:[#allocation2 + $0x328] sm:$0xff] %v8214_v33  ;;  %141 = vst [vmem:[#allocation2 + $0x330] sm:$0xff] %v8214_v33 }
  0x47   :  { %142 = vst [vmem:[#allocation2 + $0x338] sm:$0xff] %v8214_v33  ;;  %143 = vst [vmem:[#allocation2 + $0x340] sm:$0xff] %v8214_v33 }
  0x48   :  { %144 = vst [vmem:[#allocation2 + $0x348] sm:$0xff] %v8214_v33  ;;  %145 = vst [vmem:[#allocation2 + $0x350] sm:$0xff] %v8214_v33 }
  0x49   :  { %146 = vst [vmem:[#allocation2 + $0x358] sm:$0xff] %v8214_v33  ;;  %147 = vst [vmem:[#allocation2 + $0x360] sm:$0xff] %v8214_v33 }
  0x4a   :  { %148 = vst [vmem:[#allocation2 + $0x368] sm:$0xff] %v8214_v33  ;;  %149 = vst [vmem:[#allocation2 + $0x370] sm:$0xff] %v8214_v33 }
  0x4b   :  { %150 = vst [vmem:[#allocation2 + $0x378] sm:$0xff] %v8214_v33  ;;  %151 = vst [vmem:[#allocation2 + $0x380] sm:$0xff] %v8214_v33 }
  0x4c   :  { %152 = vst [vmem:[#allocation2 + $0x388] sm:$0xff] %v8214_v33  ;;  %153 = vst [vmem:[#allocation2 + $0x390] sm:$0xff] %v8214_v33 }
  0x4d   :  { %154 = vst [vmem:[#allocation2 + $0x398] sm:$0xff] %v8214_v33  ;;  %155 = vst [vmem:[#allocation2 + $0x3a0] sm:$0xff] %v8214_v33 }
  0x4e   :  { %156 = vst [vmem:[#allocation2 + $0x3a8] sm:$0xff] %v8214_v33  ;;  %157 = vst [vmem:[#allocation2 + $0x3b0] sm:$0xff] %v8214_v33 }
  0x4f   :  { %158 = vst [vmem:[#allocation2 + $0x3b8] sm:$0xff] %v8214_v33  ;;  %159 = vst [vmem:[#allocation2 + $0x3c0] sm:$0xff] %v8214_v33 }
  0x50   :  { %160 = vst [vmem:[#allocation2 + $0x3c8] sm:$0xff] %v8214_v33  ;;  %161 = vst [vmem:[#allocation2 + $0x3d0] sm:$0xff] %v8214_v33 }
  0x51   :  { %162 = vst [vmem:[#allocation2 + $0x3d8] sm:$0xff] %v8214_v33  ;;  %163 = vst [vmem:[#allocation2 + $0x3e0] sm:$0xff] %v8214_v33 }
  0x52   :  { %164 = vst [vmem:[#allocation2 + $0x3e8] sm:$0xff] %v8214_v33  ;;  %165 = vst [vmem:[#allocation2 + $0x3f0] sm:$0xff] %v8214_v33 }
  0x53   :  { %166 = vst [vmem:[#allocation2 + $0x3f8] sm:$0xff] %v8214_v33  ;;  %167 = vst [vmem:[#allocation2 + $0x400] sm:$0xff] %v8214_v33 }
  0x54   :  { %168 = vst [vmem:[#allocation2 + $0x408] sm:$0xff] %v8214_v33  ;;  %169 = vst [vmem:[#allocation2 + $0x410] sm:$0xff] %v8214_v33 }
  0x55   :  { %170 = vst [vmem:[#allocation2 + $0x418] sm:$0xff] %v8214_v33  ;;  %171 = vst [vmem:[#allocation2 + $0x420] sm:$0xff] %v8214_v33 }
  0x56   :  { %172 = vst [vmem:[#allocation2 + $0x428] sm:$0xff] %v8214_v33  ;;  %173 = vst [vmem:[#allocation2 + $0x430] sm:$0xff] %v8214_v33 }
  0x57   :  { %174 = vst [vmem:[#allocation2 + $0x438] sm:$0xff] %v8214_v33  ;;  %175 = vst [vmem:[#allocation2 + $0x440] sm:$0xff] %v8214_v33 }
  0x58   :  { %176 = vst [vmem:[#allocation2 + $0x448] sm:$0xff] %v8214_v33  ;;  %177 = vst [vmem:[#allocation2 + $0x450] sm:$0xff] %v8214_v33 }
  0x59   :  { %178 = vst [vmem:[#allocation2 + $0x458] sm:$0xff] %v8214_v33  ;;  %179 = vst [vmem:[#allocation2 + $0x460] sm:$0xff] %v8214_v33 }
  0x5a   :  { %180 = vst [vmem:[#allocation2 + $0x468] sm:$0xff] %v8214_v33  ;;  %181 = vst [vmem:[#allocation2 + $0x470] sm:$0xff] %v8214_v33 }
  0x5b   :  { %184 = vst [vmem:[#allocation2 + $0x488] sm:$0x7] %v8214_v33  ;;  %185 = vst [vmem:[#allocation2 + $0x490] sm:$0x7] %v8214_v33 }
  0x5c   :  { %186 = vst [vmem:[#allocation2 + $0x498] sm:$0x7] %v8214_v33  ;;  %187 = vst [vmem:[#allocation2 + $0x4a0] sm:$0x7] %v8214_v33 }
  0x5d   :  { %188 = vst [vmem:[#allocation2 + $0x4a8] sm:$0x7] %v8214_v33  ;;  %189 = vst [vmem:[#allocation2 + $0x4b0] sm:$0x7] %v8214_v33 }
  0x5e   :  { %190 = vst [vmem:[#allocation2 + $0x4b8] sm:$0x7] %v8214_v33  ;;  %191 = vst [vmem:[#allocation2 + $0x4c0] sm:$0x7] %v8214_v33 }
  0x5f   :  { %192 = vst [vmem:[#allocation2 + $0x4c8] sm:$0x7] %v8214_v33  ;;  %193 = vst [vmem:[#allocation2 + $0x4d0] sm:$0x7] %v8214_v33 }
  0x60   :  { %194 = vst [vmem:[#allocation2 + $0x4d8] sm:$0x7] %v8214_v33  ;;  %195 = vst [vmem:[#allocation2 + $0x4e0] sm:$0x7] %v8214_v33 }
  0x61   :  { %196 = vst [vmem:[#allocation2 + $0x4e8] sm:$0x7] %v8214_v33  ;;  %197 = vst [vmem:[#allocation2 + $0x4f0] sm:$0x7] %v8214_v33 }
  0x62   :  { %198 = vst [vmem:[#allocation2 + $0x4f8] sm:$0x7] %v8214_v33  ;;  %2761 = vst [vmem:[#allocation2 + $0x388] sm:$0x70] %v2747_v39 }
  0x63   :  { %2760 = vst [vmem:[#allocation2 + $0x380] sm:$0x70] %v2746_v43 }
  0x64   :  { %16 = vsyncpa [#allocation6], 0  ;;  %v2092_v55 = vld [vmem:[%s13626_s0 + $0x8] sm:$0x7]  ;;  %v2093_v56 = vld [vmem:[%s13626_s0 + $0x10] sm:$0x7] }
  0x65   :  { %s13638_s15 = smov 60   ;;  %v2108_v57 = vrot.slane %v2092_v55, 3  ;;  %v2109_v58 = vrot.slane %v2093_v56, 3  ;;  %v1818_v59 = vld [vmem:[%s13626_s0] sm:$0x7]  ;;  %s13640_s26 = smov 32  }
  0x66   :  { %1989 = vrot.lane.b32.xlu0 %v1980_v53, %s13638_s15  ;;  %1991 = vrot.lane.b32.xlu1 %v1981_v54, %s13638_s15  ;;  %v1963_v60 = vld [vmem:[%s13626_s0] sm:$0x7]  ;;  %v1834_v61 = vrot.slane %v1818_v59, 1  ;;  %v1418_v0 = vld [vmem:[%s13626_s0 + $0x8] sm:$0x7]  ;;  %s13644_s29 = smov 64  }
  0x67   :  { %v1979_v62 = vrot.slane %v1963_v60, 6  ;;  %v2091_v63 = vld [vmem:[%s13626_s0] sm:$0x7]  ;;  %v1434_v2 = vrot.slane %v1418_v0, 2  ;;  %v1419_v3 = vld [vmem:[%s13626_s0 + $0x10] sm:$0x7] }
  0x68   :  { %v2107_v1 = vrot.slane %v2091_v63, 3  ;;  %v1563_v4 = vld [vmem:[%s13626_s0 + $0x8] sm:$0x7]  ;;  %v1435_v5 = vrot.slane %v1419_v3, 2  ;;  %v1564_v7 = vld [vmem:[%s13626_s0 + $0x10] sm:$0x7] }
  0x69   :  { %v1579_v6 = vrot.slane %v1563_v4, 7  ;;  %v1691_v8 = vld [vmem:[%s13626_s0 + $0x8] sm:$0x7]  ;;  %s13652_s17 = smov 63   ;;  %v1580_v9 = vrot.slane %v1564_v7, 7  ;;  %s13646_s12 = smov 62  }
  0x6a   :  { %2117 = vrot.lane.b32.xlu0 %v2108_v57, %s13640_s26  ;;  %2119 = vrot.lane.b32.xlu1 %v2109_v58, %s13640_s26  ;;  %v1707_v10 = vrot.slane %v1691_v8, 4  ;;  %v1692_v11 = vld [vmem:[%s13626_s0 + $0x10] sm:$0x7]  ;;  %v1417_v12 = vld [vmem:[%s13626_s0] sm:$0x7]  ;;  %s13648_s20 = smov 92  }
  0x6b   :  { %v1708_v13 = vrot.slane %v1692_v11, 4  ;;  %v1433_v14 = vrot.slane %v1417_v12, 2  ;;  %v1562_v15 = vld [vmem:[%s13626_s0] sm:$0x7]  ;;  %v1178_v19 = vld [vmem:[%s13626_s0 + $0x8] sm:$0x7] }
  0x6c   :  { %v1690_v16 = vld [vmem:[%s13626_s0] sm:$0x7]  ;;  %v1578_v17 = vrot.slane %v1562_v15, 7  ;;  %v1179_v20 = vld [vmem:[%s13626_s0 + $0x10] sm:$0x7]  ;;  %vm13680_vm0 = vcmask 1014784  }
  0x6d   :  { %v1706_v18 = vrot.slane %v1690_v16, 4  ;;  %v1298_v21 = vld [vmem:[%s13626_s0 + $0x8] sm:$0x7]  ;;  %v1299_v22 = vld [vmem:[%s13626_s0 + $0x10] sm:$0x7]  ;;  %vm295_vm1 = vcmask 1039360  }
  0x6e   :  { %1842 = vrot.lane.b32.xlu0 %v1834_v61, %s13642_s27  ;;  %1987 = vrot.lane.b32.xlu1 %v1979_v62, %s13638_s15  ;;  %v1314_v23 = vrot.slane %v1298_v21, 5  ;;  %v1315_v24 = vrot.slane %v1299_v22, 5  ;;  %v1297_v25 = vld [vmem:[%s13626_s0] sm:$0x7]  ;;  %v777_v28 = vld [vmem:[%s13626_s0 + $0x8] sm:$0x7] }
  0x6f   :  { %v1313_v26 = vrot.slane %v1297_v25, 5  ;;  %v1177_v27 = vld [vmem:[%s13626_s0] sm:$0x7]  ;;  %v778_v29 = vld [vmem:[%s13626_s0 + $0x10] sm:$0x7]  ;;  %v793_v30 = vrot.slane %v777_v28, 1 }
  0x70   :  { %v794_v31 = vrot.slane %v778_v29, 1  ;;  %v922_v32 = vld [vmem:[%s13626_s0 + $0x8] sm:$0x7]  ;;  %v923_v33 = vld [vmem:[%s13626_s0 + $0x10] sm:$0x7]  ;;  %s13674_s15 = smov 96  }
  0x71   :  { %v938_v34 = vrot.slane %v922_v32, 6  ;;  %v939_v35 = vrot.slane %v923_v33, 6  ;;  %v1050_v36 = vld [vmem:[%s13626_s0 + $0x8] sm:$0x7]  ;;  %v1051_v37 = vld [vmem:[%s13626_s0 + $0x10] sm:$0x7] }
  0x72   :  { %2115 = vrot.lane.b32.xlu0 %v2107_v1, %s13640_s26  ;;  %1443 = vrot.lane.b32.xlu1 %v1434_v2, %s13644_s29  ;;  %s13672_s26 = smov 95   ;;  %v1066_v38 = vrot.slane %v1050_v36, 3  ;;  %v1067_v39 = vrot.slane %v1051_v37, 3  ;;  %v776_v40 = vld [vmem:[%s13626_s0] sm:$0x7]  ;;  %vm415_vm2 = vcmask 1031168  }
  0x73   :  { %v921_v41 = vld [vmem:[%s13626_s0] sm:$0x7]  ;;  %v200_v42 = vld [vmem:[%s13626_s0 + $0x8] sm:$0x7]  ;;  %v792_v43 = vrot.slane %v776_v40, 1  ;;  %vm3425_vm3 = vcmask 1042432  }
  0x74   :  { %208 = vst [vmem:[#allocation2 + $0x8] sm:$0x7] %v200_v42  ;;  %v937_v44 = vrot.slane %v921_v41, 6  ;;  %v1049_v45 = vld [vmem:[%s13626_s0] sm:$0x7]  ;;  %vm560_vm4 = vcmask 1022976  }
  0x75   :  { %v376_v46 = vld [vmem:[%s13626_s0 + $0x8] sm:$0x7]  ;;  %v1065_v47 = vrot.slane %v1049_v45, 3  ;;  %v377_v49 = vld [vmem:[%s13626_s0 + $0x10] sm:$0x7]  ;;  %vm2499_vm5 = vcmask 236544  }
  0x76   :  { %1445 = vrot.lane.b32.xlu0 %v1435_v5, %s13644_s29  ;;  %1588 = vrot.lane.b32.xlu1 %v1579_v6, %s13652_s17  ;;  %v392_v48 = vrot.slane %v376_v46, 2  ;;  %v521_v50 = vld [vmem:[%s13626_s0 + $0x8] sm:$0x7]  ;;  %v393_v51 = vrot.slane %v377_v49, 2  ;;  %v199_v53 = vld [vmem:[%s13626_s0] sm:$0x7] }
  0x77   :  { %v537_v52 = vrot.slane %v521_v50, 7  ;;  %v522_v54 = vld [vmem:[%s13626_s0 + $0x10] sm:$0x7]  ;;  %v649_v55 = vld [vmem:[%s13626_s0 + $0x8] sm:$0x7]  ;;  %vm2644_vm6 = vcmask 228352  }
  0x78   :  { %207 = vst [vmem:[#allocation2] sm:$0x7] %v199_v53  ;;  %v538_v59 = vrot.slane %v522_v54, 7  ;;  %v665_v60 = vrot.slane %v649_v55, 4  ;;  %v650_v61 = vld [vmem:[%s13626_s0 + $0x10] sm:$0x7] }
  0x79   :  { %v375_v62 = vld [vmem:[%s13626_s0] sm:$0x7]  ;;  %v666_v2 = vrot.slane %v650_v61, 4  ;;  %v257_v11 = vld [vmem:[%s13626_s0 + $0x10] sm:$0x7]  ;;  %vm2251_vm7 = vcmask 252928  }
  0x7a   :  { %1590 = vrot.lane.b32.xlu0 %v1580_v9, %s13652_s17  ;;  %1716 = vrot.lane.b32.xlu1 %v1707_v10, %s13646_s12  ;;  %v391_v3 = vrot.slane %v375_v62, 2  ;;  %v520_v4 = vld [vmem:[%s13626_s0] sm:$0x7]  ;;  %v256_v12 = vld [vmem:[%s13626_s0 + $0x8] sm:$0x7]  ;;  %vm13699_vm8 = vcmask 244736  }
  0x7b   :  { %v648_v5 = vld [vmem:[%s13626_s0] sm:$0x7]  ;;  %v536_v9 = vrot.slane %v520_v4, 7  ;;  %v3154_v37 = vld [vmem:[%s13626_s0 + $0x28] sm:$0x7]  ;;  %vm1858_vm9 = vcmask 498688  }
  0x7c   :  { %v3165_v56 = vpop.permute.xlu1 %3164  ;;  %v3167_v57 = vpop.permute.xlu0 %3166  ;;  %v664_v10 = vrot.slane %v648_v5, 4  ;;  %v255_v22 = vld [vmem:[%s13626_s0] sm:$0x7]  ;;  %v2462_v54 = vld [vmem:[%s13626_s0 + $0x18] sm:$0x7]  ;;  %vm13704_vm10 = vcmask 490496  }
  0x7d   :  { %v3178_v58 = vsel %vm13680_vm0, %v3165_v56, %v3167_v57  ;;  %v2735_v28 = vld [vmem:[%s13626_s0 + $0x20] sm:$0x7]  ;;  %v3043_v55 = vld [vmem:[%s13626_s0 + $0x28] sm:$0x7]  ;;  %v2607_v62 = vld [vmem:[%s13626_s0 + $0x18] sm:$0x7] }
  0x7e   :  { %1718 = vrot.lane.b32.xlu0 %v1708_v13, %s13646_s12  ;;  %1441 = vrot.lane.b32.xlu1 %v1433_v14, %s13644_s29  ;;  %s13650_s29 = smov 93   ;;  %3191 = vst [vmem:[#allocation2 + $0x480] sm:$0x7] %v3178_v58  ;;  %v2734_v13 = vld [vmem:[%s13626_s0 + $0x18] sm:$0x7]  ;;  %v3057_v61 = vrot.slane %v3043_v55, 3 }
  0x7f   :  { %v2748_v16 = vrot.slane %v2734_v13, 4  ;;  %v3153_v29 = vld [vmem:[%s13626_s0 + $0x20] sm:$0x7]  ;;  %v2623_v5 = vrot.slane %v2607_v62, 7  ;;  %vm13682_vm11 = vcmask 261120   ;;  %s13726_s23 = smov 60  }
  0x80   :  { %v8737_v63 = vpop.permute.xlu0 %3168  ;;  %v2826_v0 = vpop.permute.xlu1 %2825  ;;  %v3042_v46 = vld [vmem:[%s13626_s0 + $0x20] sm:$0x7]  ;;  %s13727_s14 = smov 32   ;;  %vm13683_vm12 = vcmask 523264   ;;  %vm13667_vm13 = vcmask 515072   ;;  %s13730_s27 = smov 62  }
  0x81   :  { %v3179_v1 = vsel %vm13680_vm0, %v3167_v57, %v8737_v63  ;;  %2762 = vst [vmem:[#allocation2 + $0x390] sm:$0x70] %v2748_v16  ;;  %v2342_v16 = vld [vmem:[%s13626_s0 + $0x18] sm:$0x7]  ;;  %vm13666_vm14 = vcmask 506880   ;;  %vm13669_vm15 = vcmask 760832  }
  0x82   :  { %1586 = vrot.lane.b32.xlu0 %v1578_v17, %s13652_s17  ;;  %1714 = vrot.lane.b32.xlu1 %v1706_v18, %s13646_s12  ;;  %3192 = vst [vmem:[#allocation2 + $0x488] sm:$0x7] %v3179_v1  ;;  %s13725_s12 = smov 61   ;;  %s13728_s17 = smov 64  }
  0x83   :  { %s13735_s13 = smov 125   ;;  %s13746_s10 = smov 96  }
  0x84   :  { %v8749_v6 = vpop.permute.xlu0 %2827  ;;  %v2952_v7 = vpop.permute.xlu1 %2951  ;;  %s13749_s8 = smov 126   ;;  %s13940_s4 = sld [smem:[#allocation8_spill]] }
  0x85   :  { %v2838_v8 = vsel %vm295_vm1, %v2826_v0, %v8749_v6  ;;  %v3399_v21 = vld [vmem:[#allocation2 + $0x480] sm:$0x7]  ;;  %s8238_s9 = smov 121  }
  0x86   :  { %1195 = vrot.lane.b32.xlu0 %v1178_v19, %s13650_s29  ;;  %1197 = vrot.lane.b32.xlu1 %v1179_v20, %s13650_s29  ;;  %2851 = vst [vmem:[#allocation2 + $0x408] ss:$-124 sps:$4 sm:$0x83] %v2838_v8   ;;  %v273_v19 = vrot.slane %v257_v11, 5  ;;  %v272_v20 = vrot.slane %v256_v12, 5 }
  0x87   :  { %v2608_v8 = vld [vmem:[%s13626_s0 + $0x20] sm:$0x7] }
  0x88   :  { %v8764_v14 = vpop.permute.xlu0 %2953  ;;  %v3063_v15 = vpop.permute.xlu1 %3062  ;;  %v2624_v13 = vrot.slane %v2608_v8, 7 }
  0x89   :  { %v2964_v17 = vsel %vm415_vm2, %v2952_v7, %v8764_v14  ;;  %v3400_v18 = vld [vmem:[#allocation2 + $0x488] sm:$0x7] }
  0x8a   :  { %1323 = vrot.lane.b32.xlu0 %v1314_v23, %s13648_s20  ;;  %1325 = vrot.lane.b32.xlu1 %v1315_v24, %s13648_s20  ;;  %2977 = vst [vmem:[#allocation2 + $0x408] sm:$0x1c] %v2964_v17 }
  0x8b   :  { %7923 = vmatprep.subr.msk.mxu1 %vm3425_vm3, %v3400_v18 }
  0x8c   :  { %7924 = vmatpush1.msk.msra.mxu1 %vm3425_vm3, %v3399_v21  ;;  %v8775_v23 = vpop.permute.xlu0 %3064  ;;  %v2824_v24 = vpop.permute.xlu1 %2823  ;;  %v2358_v21 = vrot.slane %v2342_v16, 5 }
  0x8d   :  { %v3075_v25 = vsel %vm560_vm4, %v3063_v15, %v8775_v23 }
  0x8e   :  { %1193 = vrot.lane.b32.xlu0 %v1177_v27, %s13650_s29  ;;  %1321 = vrot.lane.b32.xlu1 %v1313_v26, %s13648_s20  ;;  %s13670_s20 = smov 94   ;;  %v2837_v26 = vsel %vm295_vm1, %v2824_v24, %v2826_v0  ;;  %3088 = vst [vmem:[#allocation2 + $0x408] sm:$0xe0] %v3075_v25  ;;  %v271_v27 = vrot.slane %v255_v22, 5  ;;  %v2463_v0 = vld [vmem:[%s13626_s0 + $0x20] sm:$0x7] }
  0x8f   :  { %2850 = vst [vmem:[#allocation2 + $0x400] ss:$-124 sps:$4 sm:$0x83] %v2837_v26   ;;  %v2223_v22 = vld [vmem:[%s13626_s0 + $0x20] sm:$0x7]  ;;  %s13738_s29 = smov 31  }
  0x90   :  { %v2950_v32 = vpop.permute.xlu0 %2949  ;;  %v3061_v33 = vpop.permute.xlu1 %3060  ;;  %v1821_v24 = vld [vmem:[%s13626_s0 + $0x18] sm:$0x7]  ;;  %v2343_v25 = vld [vmem:[%s13626_s0 + $0x20] sm:$0x7] }
  0x92   :  { %802 = vrot.lane.b32.xlu0 %v793_v30, %s13674_s15  ;;  %804 = vrot.lane.b32.xlu1 %v794_v31, %s13674_s15  ;;  %v2805_v30 = vld [vmem:[%s13626_s0 + $0x20] sm:$0x7]  ;;  %v2749_v31 = vrot.slane %v2735_v28, 4 }
  0x93   :  { %v2819_v36 = vrot.slane %v2805_v30, 1  ;;  %v1837_v30 = vrot.slane %v1821_v24, 1 }
  0x94   :  { %2763 = vst [vmem:[#allocation2 + $0x398] sm:$0x70] %v2749_v31  ;;  %v2486_v40 = vpop.permute.xlu0 %2485  ;;  %v8804_v41 = vpop.permute.xlu1 %2487  ;;  %v2359_v31 = vrot.slane %v2343_v25, 5 }
  0x95   :  { %v2501_v42 = vsel %vm2499_vm5, %v2486_v40, %v8804_v41 }
  0x96   :  { %947 = vrot.lane.b32.xlu0 %v938_v34, %s13672_s26  ;;  %949 = vrot.lane.b32.xlu1 %v939_v35, %s13672_s26  ;;  %v2963_v34 = vsel %vm415_vm2, %v2950_v32, %v2952_v7  ;;  %v3074_v35 = vsel %vm560_vm4, %v3061_v33, %v3063_v15  ;;  %2516 = vst [vmem:[#allocation2 + $0x388] ss:$-124 sps:$4 sm:$0xc1] %v2501_v42   ;;  %v2479_v7 = vrot.slane %v2463_v0, 2  ;;  %v2222_v15 = vld [vmem:[%s13626_s0 + $0x18] sm:$0x7] }
  0x97   :  { %2976 = vst [vmem:[#allocation2 + $0x400] sm:$0x1c] %v2963_v34  ;;  %3087 = vst [vmem:[#allocation2 + $0x400] sm:$0xe0] %v3074_v35  ;;  %v1966_v32 = vld [vmem:[%s13626_s0 + $0x18] sm:$0x7] }
  0x98   :  { %v8816_v49 = vpop.permute.xlu1 %2632  ;;  %v1822_v33 = vld [vmem:[%s13626_s0 + $0x20] sm:$0x7] }
  0x99   :  { %v1967_v42 = vld [vmem:[%s13626_s0 + $0x20] sm:$0x7] }
  0x9a   :  { %1075 = vrot.lane.b32.xlu0 %v1066_v38, %s13670_s20  ;;  %1077 = vrot.lane.b32.xlu1 %v1067_v39, %s13670_s20  ;;  %v2931_v38 = vld [vmem:[%s13626_s0 + $0x20] sm:$0x7]  ;;  %v2806_v39 = vld [vmem:[%s13626_s0 + $0x28] sm:$0x7] }
  0x9b   :  { %v2820_v45 = vrot.slane %v2806_v39, 1  ;;  %v1838_v39 = vrot.slane %v1822_v33, 1 }
  0x9c   :  { %v2629_v57 = vpop.permute.xlu1 %2628 }
  0x9e   :  { %800 = vrot.lane.b32.xlu0 %v792_v43, %s13674_s15  ;;  %945 = vrot.lane.b32.xlu1 %v937_v44, %s13672_s26  ;;  %v3384_v43 = vld [vmem:[#allocation2 + $0x408] sm:$0xff]  ;;  %v2945_v44 = vrot.slane %v2931_v38, 6  ;;  %v1982_v38 = vrot.slane %v1966_v32, 6 }
  0x9f   :  { %3488 = vmatprep.subr.mxu1 %v3384_v43 }
  0xa2   :  { %1073 = vrot.lane.b32.xlu0 %v1065_v47, %s13670_s20  ;;  %401 = vrot.lane.b32.xlu1 %v392_v48, %s13678_s16  ;;  %v2932_v47 = vld [vmem:[%s13626_s0 + $0x28] sm:$0x7]  ;;  %v2631_v48 = vpop.permute.xlu0 %2630 }
  0xa3   :  { %v2646_v50 = vsel %vm2644_vm6, %v2631_v48, %v8816_v49  ;;  %v2946_v53 = vrot.slane %v2932_v47, 6  ;;  %v1983_v47 = vrot.slane %v1967_v42, 6 }
  0xa4   :  { %2661 = vst [vmem:[#allocation2 + $0x388] sm:$0xe] %v2646_v50  ;;  %v2095_v50 = vld [vmem:[%s13626_s0 + $0x20] sm:$0x7] }
  0xa6   :  { %403 = vrot.lane.b32.xlu0 %v393_v51, %s13678_s16  ;;  %546 = vrot.lane.b32.xlu1 %v537_v52, %s13676_s22  ;;  %v3383_v51 = vld [vmem:[#allocation2 + $0x400] sm:$0xff]  ;;  %v3056_v52 = vrot.slane %v3042_v46, 3  ;;  %v2484_v56 = vpop.permute.xlu0 %2483 }
  0xa7   :  { %3489 = vmatpush1.msra.mxu1 %v3383_v51  ;;  %v2500_v58 = vsel %vm2499_vm5, %v2484_v56, %v2486_v40  ;;  %v2094_v40 = vld [vmem:[%s13626_s0 + $0x18] sm:$0x7]  ;;  %v2111_v56 = vrot.slane %v2095_v50, 3 }
  0xa8   :  { %2515 = vst [vmem:[#allocation2 + $0x380] ss:$-124 sps:$4 sm:$0xc1] %v2500_v58   ;;  %v2110_v46 = vrot.slane %v2094_v40, 3  ;;  %v1421_v58 = vld [vmem:[%s13626_s0 + $0x20] sm:$0x7] }
  0xa9   :  { %v1052_v50 = vld [vmem:[%s13626_s0 + $0x18] sm:$0x7] }
  0xaa   :  { %548 = vrot.lane.b32.xlu0 %v538_v59, %s13676_s22  ;;  %674 = vrot.lane.b32.xlu1 %v665_v60, %s13664_s21  ;;  %v2645_v59 = vsel %vm2644_vm6, %v2629_v57, %v2631_v48  ;;  %v2478_v60 = vrot.slane %v2462_v54, 2  ;;  %v2238_v1 = vpop.permute.xlu0 %2237  ;;  %v1420_v48 = vld [vmem:[%s13626_s0 + $0x18] sm:$0x7] }
  0xab   :  { %2660 = vst [vmem:[#allocation2 + $0x380] sm:$0xe] %v2645_v59  ;;  %v3368_v4 = vld [vmem:[#allocation2 + $0x388] sm:$0xff]  ;;  %v1436_v55 = vrot.slane %v1420_v48, 2  ;;  %v1565_v57 = vld [vmem:[%s13626_s0 + $0x18] sm:$0x7] }
  0xac   :  { %3490 = vmatprep.subr.mxu1 %v3368_v4  ;;  %v1581_v0 = vrot.slane %v1565_v57, 7  ;;  %v1566_v4 = vld [vmem:[%s13626_s0 + $0x20] sm:$0x7] }
  0xae   :  { %676 = vrot.lane.b32.xlu0 %v666_v2, %s13664_s21  ;;  %399 = vrot.lane.b32.xlu1 %v391_v3, %s13678_s16  ;;  %v8838_v2 = vpop.permute.xlu1 %2239 }
  0xaf   :  { %v2253_v3 = vsel %vm2251_vm7, %v2238_v1, %v8838_v2 }
  0xb0   :  { %2268 = vst [vmem:[#allocation2 + $0x308] sm:$0x7] %v2253_v3  ;;  %v1693_v3 = vld [vmem:[%s13626_s0 + $0x18] sm:$0x7] }
  0xb2   :  { %544 = vrot.lane.b32.xlu0 %v536_v9, %s13676_s22  ;;  %672 = vrot.lane.b32.xlu1 %v664_v10, %s13664_s21  ;;  %v2366_v9 = vpop.permute.xlu0 %2365  ;;  %v8847_v10 = vpop.permute.xlu1 %2367  ;;  %v3367_v12 = vld [vmem:[#allocation2 + $0x380] sm:$0xff] }
  0xb3   :  { %v2381_v11 = vsel %vm13699_vm8, %v2366_v9, %v8847_v10  ;;  %3491 = vmatpush1.msra.mxu1 %v3367_v12  ;;  %v1694_v12 = vld [vmem:[%s13626_s0 + $0x20] sm:$0x7] }
  0xb4   :  { %2396 = vst [vmem:[#allocation2 + $0x308] sm:$0x38] %v2381_v11  ;;  %v1582_v11 = vrot.slane %v1566_v4, 7 }
  0xb6   :  { %283 = vrot.lane.b32.xlu1 %v273_v19, %s13662_s30  ;;  %281 = vrot.lane.b32.xlu0 %v272_v20, %s13662_s30  ;;  %v2236_v17 = vpop.permute.xlu0 %2235  ;;  %v2364_v18 = vpop.permute.xlu1 %2363 }
  0xb7   :  { %v2252_v19 = vsel %vm2251_vm7, %v2236_v17, %v2238_v1  ;;  %v2380_v20 = vsel %vm13699_vm8, %v2364_v18, %v2366_v9  ;;  %v1437_v1 = vrot.slane %v1421_v58, 2  ;;  %v1709_v9 = vrot.slane %v1693_v3, 4  ;;  %v202_v58 = vld [vmem:[%s13626_s0 + $0x18] sm:$0x7] }
  0xb8   :  { %2267 = vst [vmem:[#allocation2 + $0x300] sm:$0x7] %v2252_v19  ;;  %2395 = vst [vmem:[#allocation2 + $0x300] sm:$0x38] %v2380_v20  ;;  %v1710_v18 = vrot.slane %v1694_v12, 4 }
  0xb9   :  { %v1180_v19 = vld [vmem:[%s13626_s0 + $0x18] sm:$0x7]  ;;  %210 = vst [vmem:[#allocation2 + $0x18] sm:$0x7] %v202_v58 }
  0xba   :  { %3170 = vrot.lane.b32.xlu1 %v3153_v29, %s13664_s21  ;;  %279 = vrot.lane.b32.xlu0 %v271_v27, %s13662_s30  ;;  %v1845_v26 = vpop.permute.xlu0 %1844  ;;  %v8872_v27 = vpop.permute.xlu1 %1846  ;;  %v1300_v20 = vld [vmem:[%s13626_s0 + $0x18] sm:$0x7] }
  0xbb   :  { %v1860_v28 = vsel %vm1858_vm9, %v1845_v26, %v8872_v27  ;;  %v3352_v29 = vld [vmem:[#allocation2 + $0x308] sm:$0xff] }
  0xbc   :  { %1875 = vst [vmem:[#allocation2 + $0x288] ss:$-124 sps:$4 sm:$0x83] %v1860_v28   ;;  %3492 = vmatprep.subr.mxu1 %v3352_v29  ;;  %v1181_v28 = vld [vmem:[%s13626_s0 + $0x20] sm:$0x7] }
  0xbd   :  { %v779_v29 = vld [vmem:[%s13626_s0 + $0x18] sm:$0x7] }
  0xbe   :  { %2829 = vrot.lane.b32.xlu1 %v2819_v36, %s13662_s30  ;;  %3172 = vrot.lane.b32.xlu0 %v3154_v37, %s13664_s21  ;;  %s13732_s21 = smov 92  }
  0xbf   :  { %v3351_v37 = vld [vmem:[#allocation2 + $0x300] sm:$0xff] }
  0xc0   :  { %3493 = vmatpush1.msra.mxu1 %v3351_v37 }
  0xc2   :  { %2955 = vrot.lane.b32.xlu1 %v2945_v44, %s13678_s16  ;;  %2831 = vrot.lane.b32.xlu0 %v2820_v45, %s13662_s30  ;;  %s13737_s30 = smov 28  }
  0xc6   :  { %3066 = vrot.lane.b32.xlu1 %v3056_v52, %s13676_s22  ;;  %2957 = vrot.lane.b32.xlu0 %v2946_v53, %s13678_s16 }
  0xca   :  { %2489 = vrot.lane.b32.xlu1 %v2478_v60, %s13660_s18  ;;  %3068 = vrot.lane.b32.xlu0 %v3057_v61, %s13676_s22 }
  0xce   :  { %2634 = vrot.lane.b32.xlu1 %v2623_v5, %s13658_s25  ;;  %2491 = vrot.lane.b32.xlu0 %v2479_v7, %s13660_s18  ;;  %s13734_s18 = smov 127  }
  0xd2   :  { %2241 = vrot.lane.b32.xlu1 %v2222_v15, %s13656_s24  ;;  %2636 = vrot.lane.b32.xlu0 %v2624_v13, %s13658_s25  ;;  %s13731_s25 = smov 93  }
  0xd6   :  { %2369 = vrot.lane.b32.xlu1 %v2358_v21, %s13654_s28  ;;  %2243 = vrot.lane.b32.xlu0 %v2223_v22, %s13656_s24  ;;  %s13733_s24 = smov 124  }
  0xd8   :  { %v1990_v34 = vpop.permute.xlu0 %1989  ;;  %v8884_v35 = vpop.permute.xlu1 %1991 }
  0xd9   :  { %v2005_v36 = vsel %vm13704_vm10, %v1990_v34, %v8884_v35 }
  0xda   :  { %2020 = vst [vmem:[#allocation2 + $0x288] sm:$0x1c] %v2005_v36  ;;  %1848 = vrot.lane.b32.xlu1 %v1837_v30, %s13725_s12  ;;  %2371 = vrot.lane.b32.xlu0 %v2359_v31, %s13654_s28  ;;  %s13729_s28 = smov 63   ;;  %v1301_v30 = vld [vmem:[%s13626_s0 + $0x20] sm:$0x7]  ;;  %v795_v36 = vrot.slane %v779_v29, 1 }
  0xdb   :  { %v1317_v37 = vrot.slane %v1301_v30, 5  ;;  %v2736_v29 = vld [vmem:[%s13626_s0 + $0x28] sm:$0x7]  ;;  %v258_v30 = vld [vmem:[%s13626_s0 + $0x18] sm:$0x7] }
  0xdc   :  { %v2118_v43 = vpop.permute.xlu0 %2117  ;;  %v8896_v44 = vpop.permute.xlu1 %2119 }
  0xdd   :  { %v2133_v45 = vsel %vm13682_vm11, %v2118_v43, %v8896_v44 }
  0xde   :  { %2148 = vst [vmem:[#allocation2 + $0x288] sm:$0xe0] %v2133_v45  ;;  %1993 = vrot.lane.b32.xlu1 %v1982_v38, %s13726_s23  ;;  %1850 = vrot.lane.b32.xlu0 %v1838_v39, %s13725_s12  ;;  %v924_v38 = vld [vmem:[%s13626_s0 + $0x18] sm:$0x7]  ;;  %v780_v39 = vld [vmem:[%s13626_s0 + $0x20] sm:$0x7] }
  0xdf   :  { %v796_v48 = vrot.slane %v780_v39, 1  ;;  %v259_v39 = vld [vmem:[%s13626_s0 + $0x20] sm:$0x7] }
  0xe0   :  { %v1843_v51 = vpop.permute.xlu0 %1842  ;;  %v1988_v52 = vpop.permute.xlu1 %1987 }
  0xe1   :  { %v1859_v53 = vsel %vm1858_vm9, %v1843_v51, %v1845_v26  ;;  %v2004_v54 = vsel %vm13704_vm10, %v1988_v52, %v1990_v34  ;;  %v1316_v26 = vrot.slane %v1300_v20, 5  ;;  %v925_v51 = vld [vmem:[%s13626_s0 + $0x20] sm:$0x7] }
  0xe2   :  { %1874 = vst [vmem:[#allocation2 + $0x280] ss:$-124 sps:$4 sm:$0x83] %v1859_v53   ;;  %2019 = vst [vmem:[#allocation2 + $0x280] sm:$0x1c] %v2004_v54  ;;  %2121 = vrot.lane.b32.xlu1 %v2110_v46, %s13727_s14  ;;  %1995 = vrot.lane.b32.xlu0 %v1983_v47, %s13726_s23  ;;  %v940_v47 = vrot.slane %v924_v38, 6 }
  0xe3   :  { %v941_v57 = vrot.slane %v925_v51, 6  ;;  %v3155_v51 = vld [vmem:[%s13626_s0 + $0x30] sm:$0x7] }
  0xe4   :  { %v2116_v59 = vpop.permute.xlu0 %2115  ;;  %v1444_v60 = vpop.permute.xlu1 %1443 }
  0xe5   :  { %v2132_v61 = vsel %vm13682_vm11, %v2116_v59, %v2118_v43  ;;  %v3336_v62 = vld [vmem:[#allocation2 + $0x288] sm:$0xff]  ;;  %v201_v43 = vld [vmem:[%s13626_s0 + $0x10] sm:$0x7]  ;;  %v378_v59 = vld [vmem:[%s13626_s0 + $0x18] sm:$0x7] }
  0xe6   :  { %2147 = vst [vmem:[#allocation2 + $0x280] sm:$0xe0] %v2132_v61  ;;  %1447 = vrot.lane.b32.xlu1 %v1436_v55, %s13728_s17  ;;  %2123 = vrot.lane.b32.xlu0 %v2111_v56, %s13727_s14  ;;  %209 = vst [vmem:[#allocation2 + $0x10] sm:$0x7] %v201_v43  ;;  %v1068_v56 = vrot.slane %v1052_v50, 3  ;;  %v394_v3 = vrot.slane %v378_v59, 2 }
  0xe7   :  { %3494 = vmatprep.subr.mxu1 %v3336_v62  ;;  %v2738_v50 = vld [vmem:[%s13626_s0 + $0x38] sm:$0x7] }
  0xe8   :  { %v8927_v5 = vpop.permute.xlu0 %1445  ;;  %v1589_v7 = vpop.permute.xlu1 %1588 }
  0xe9   :  { %v1459_v8 = vsel %vm13683_vm12, %v1444_v60, %v8927_v5 }
  0xea   :  { %1474 = vst [vmem:[#allocation2 + $0x208] ss:$-124 sps:$4 sm:$0xc1] %v1459_v8   ;;  %1592 = vrot.lane.b32.xlu1 %v1581_v0, %s13729_s28  ;;  %1449 = vrot.lane.b32.xlu0 %v1437_v1, %s13728_s17  ;;  %v379_v8 = vld [vmem:[%s13626_s0 + $0x20] sm:$0x7] }
  0xec   :  { %v8936_v13 = vpop.permute.xlu0 %1590  ;;  %v1717_v15 = vpop.permute.xlu1 %1716 }
  0xed   :  { %v1604_v16 = vsel %vm13667_vm13, %v1589_v7, %v8936_v13  ;;  %v3335_v17 = vld [vmem:[#allocation2 + $0x280] sm:$0xff] }
  0xee   :  { %1619 = vst [vmem:[#allocation2 + $0x208] sm:$0xe] %v1604_v16  ;;  %1720 = vrot.lane.b32.xlu1 %v1709_v9, %s13730_s27  ;;  %1594 = vrot.lane.b32.xlu0 %v1582_v11, %s13729_s28 }
  0xef   :  { %3495 = vmatpush1.msra.mxu1 %v3335_v17  ;;  %v395_v17 = vrot.slane %v379_v8, 2 }
  0xf0   :  { %v8948_v21 = vpop.permute.xlu0 %1718  ;;  %v1442_v22 = vpop.permute.xlu1 %1441 }
  0xf1   :  { %v1732_v24 = vsel %vm13666_vm14, %v1717_v15, %v8948_v21  ;;  %v1458_v25 = vsel %vm13683_vm12, %v1442_v22, %v1444_v60  ;;  %v1053_v60 = vld [vmem:[%s13626_s0 + $0x20] sm:$0x7] }
  0xf2   :  { %1747 = vst [vmem:[#allocation2 + $0x208] sm:$0x70] %v1732_v24  ;;  %1473 = vst [vmem:[#allocation2 + $0x200] ss:$-124 sps:$4 sm:$0xc1] %v1458_v25   ;;  %1199 = vrot.lane.b32.xlu1 %v1180_v19, %s13731_s25  ;;  %1722 = vrot.lane.b32.xlu0 %v1710_v18, %s13730_s27  ;;  %v1069_v4 = vrot.slane %v1053_v60, 3 }
  0xf3   :  { %v651_v18 = vld [vmem:[%s13626_s0 + $0x18] sm:$0x7]  ;;  %v524_v19 = vld [vmem:[%s13626_s0 + $0x20] sm:$0x7] }
  0xf4   :  { %v1587_v31 = vpop.permute.xlu0 %1586  ;;  %v1715_v32 = vpop.permute.xlu1 %1714 }
  0xf5   :  { %v1603_v33 = vsel %vm13667_vm13, %v1587_v31, %v1589_v7  ;;  %v1731_v34 = vsel %vm13666_vm14, %v1715_v32, %v1717_v15  ;;  %vm13668_vm14 = vcmask 752640   ;;  %vm816_vm13 = vcmask 785408   ;;  %v523_v7 = vld [vmem:[%s13626_s0 + $0x18] sm:$0x7]  ;;  %v652_v31 = vld [vmem:[%s13626_s0 + $0x20] sm:$0x7] }
  0xf6   :  { %1618 = vst [vmem:[#allocation2 + $0x200] sm:$0xe] %v1603_v33  ;;  %1746 = vst [vmem:[#allocation2 + $0x200] sm:$0x70] %v1731_v34  ;;  %1327 = vrot.lane.b32.xlu1 %v1316_v26, %s13732_s21  ;;  %1201 = vrot.lane.b32.xlu0 %v1181_v28, %s13731_s25  ;;  %v539_v16 = vrot.slane %v523_v7, 7  ;;  %v667_v26 = vrot.slane %v651_v18, 4 }
  0xf7   :  { %v540_v28 = vrot.slane %v524_v19, 7  ;;  %v2750_v32 = vrot.slane %v2736_v29, 4  ;;  %v668_v38 = vrot.slane %v652_v31, 4 }
  0xf8   :  { %v1196_v40 = vpop.permute.xlu0 %1195  ;;  %v8974_v42 = vpop.permute.xlu1 %1197 }
  0xf9   :  { %v1211_v45 = vsel %vm13669_vm15, %v1196_v40, %v8974_v42  ;;  %v3320_v46 = vld [vmem:[#allocation2 + $0x208] sm:$0xff]  ;;  %2764 = vst [vmem:[#allocation2 + $0x3a0] sm:$0x70] %v2750_v32 }
  0xfa   :  { %1226 = vst [vmem:[#allocation2 + $0x188] sm:$0x7] %v1211_v45  ;;  %806 = vrot.lane.b32.xlu1 %v795_v36, %s13674_s15  ;;  %1329 = vrot.lane.b32.xlu0 %v1317_v37, %s13732_s21  ;;  %v274_v37 = vrot.slane %v258_v30, 5 }
  0xfb   :  { %3496 = vmatprep.subr.mxu1 %v3320_v46 }
  0xfc   :  { %v1324_v52 = vpop.permute.xlu0 %1323  ;;  %v8989_v53 = vpop.permute.xlu1 %1325 }
  0xfd   :  { %v1339_v54 = vsel %vm13668_vm14, %v1324_v52, %v8989_v53  ;;  %v3319_v55 = vld [vmem:[#allocation2 + $0x200] sm:$0xff] }
  0xfe   :  { %1354 = vst [vmem:[#allocation2 + $0x188] sm:$0x38] %v1339_v54  ;;  %951 = vrot.lane.b32.xlu1 %v940_v47, %s13672_s26  ;;  %808 = vrot.lane.b32.xlu0 %v796_v48, %s13674_s15  ;;  %v275_v47 = vrot.slane %v259_v39, 5  ;;  %v2737_v48 = vld [vmem:[%s13626_s0 + $0x30] sm:$0x7]  ;;  %s13736_s15 = smov 29  }
  0xff   :  { %3497 = vmatpush1.msra.mxu1 %v3319_v55  ;;  %v2751_v54 = vrot.slane %v2737_v48, 4  ;;  %v2752_v55 = vrot.slane %v2738_v50, 4 }
 0x100   :  { %v1194_v61 = vpop.permute.xlu0 %1193  ;;  %v1322_v62 = vpop.permute.xlu1 %1321 }
 0x101   :  { %v1210_v0 = vsel %vm13669_vm15, %v1194_v61, %v1196_v40  ;;  %v1338_v1 = vsel %vm13668_vm14, %v1322_v62, %v1324_v52  ;;  %vm13688_vm14 = vcmask 777216   ;;  %vm13687_vm15 = vcmask 769024   ;;  %v2807_v52 = vld [vmem:[%s13626_s0 + $0x30] sm:$0x7]  ;;  %2765 = vst [vmem:[#allocation2 + $0x3a8] sm:$0x70] %v2751_v54 }
 0x102   :  { %1225 = vst [vmem:[#allocation2 + $0x180] sm:$0x7] %v1210_v0  ;;  %1353 = vst [vmem:[#allocation2 + $0x180] sm:$0x38] %v1338_v1  ;;  %1079 = vrot.lane.b32.xlu1 %v1068_v56, %s13670_s20  ;;  %953 = vrot.lane.b32.xlu0 %v941_v57, %s13672_s26  ;;  %v2821_v60 = vrot.slane %v2807_v52, 1  ;;  %s13739_s26 = smov 30  }
 0x103   :  { %2766 = vst [vmem:[#allocation2 + $0x3b0] sm:$0x70] %v2752_v55  ;;  %v3156_v61 = vld [vmem:[%s13626_s0 + $0x38] sm:$0x7]  ;;  %v2933_v62 = vld [vmem:[%s13626_s0 + $0x30] sm:$0x7] }
 0x104   :  { %v803_v9 = vpop.permute.xlu0 %802  ;;  %v9014_v11 = vpop.permute.xlu1 %804  ;;  %v2808_v0 = vld [vmem:[%s13626_s0 + $0x38] sm:$0x7]  ;;  %v2947_v7 = vrot.slane %v2933_v62, 6  ;;  %v2224_v54 = vld [vmem:[%s13626_s0 + $0x28] sm:$0x7] }
 0x105   :  { %v818_v12 = vsel %vm816_vm13, %v803_v9, %v9014_v11  ;;  %v3304_v15 = vld [vmem:[#allocation2 + $0x188] sm:$0xff]  ;;  %v2822_v8 = vrot.slane %v2808_v0, 1  ;;  %v2225_v62 = vld [vmem:[%s13626_s0 + $0x30] sm:$0x7]  ;;  %v2466_v0 = vld [vmem:[%s13626_s0 + $0x38] sm:$0x7] }
 0x106   :  { %833 = vst [vmem:[#allocation2 + $0x108] ss:$-124 sps:$4 sm:$0x83] %v818_v12   ;;  %405 = vrot.lane.b32.xlu1 %v394_v3, %s13678_s16  ;;  %1081 = vrot.lane.b32.xlu0 %v1069_v4, %s13670_s20  ;;  %v2934_v12 = vld [vmem:[%s13626_s0 + $0x38] sm:$0x7] }
 0x107   :  { %3498 = vmatprep.subr.mxu1 %v3304_v15  ;;  %v2344_v55 = vld [vmem:[%s13626_s0 + $0x28] sm:$0x7] }
 0x108   :  { %v948_v20 = vpop.permute.xlu0 %947  ;;  %v9026_v22 = vpop.permute.xlu1 %949 }
 0x109   :  { %v963_v24 = vsel %vm13688_vm14, %v948_v20, %v9026_v22  ;;  %v3303_v25 = vld [vmem:[#allocation2 + $0x180] sm:$0xff] }
 0x10a   :  { %978 = vst [vmem:[#allocation2 + $0x108] sm:$0x1c] %v963_v24  ;;  %550 = vrot.lane.b32.xlu1 %v539_v16, %s13676_s22  ;;  %407 = vrot.lane.b32.xlu0 %v395_v17, %s13678_s16  ;;  %v2464_v24 = vld [vmem:[%s13626_s0 + $0x28] sm:$0x7] }
 0x10b   :  { %3499 = vmatpush1.msra.mxu1 %v3303_v25  ;;  %v3045_v25 = vld [vmem:[%s13626_s0 + $0x38] sm:$0x7]  ;;  %v2480_v31 = vrot.slane %v2464_v24, 2 }
 0x10c   :  { %v1076_v33 = vpop.permute.xlu0 %1075  ;;  %v9041_v34 = vpop.permute.xlu1 %1077  ;;  %v3059_v32 = vrot.slane %v3045_v25, 3 }
 0x10d   :  { %v1091_v36 = vsel %vm13687_vm15, %v1076_v33, %v9041_v34 }
 0x10e   :  { %1106 = vst [vmem:[#allocation2 + $0x108] sm:$0xe0] %v1091_v36  ;;  %678 = vrot.lane.b32.xlu1 %v667_v26, %s13733_s24  ;;  %552 = vrot.lane.b32.xlu0 %v540_v28, %s13676_s22  ;;  %v2465_v36 = vld [vmem:[%s13626_s0 + $0x30] sm:$0x7]  ;;  %s13747_s22 = smov 95  }
 0x110   :  { %v801_v40 = vpop.permute.xlu0 %800  ;;  %v946_v43 = vpop.permute.xlu1 %945 }
 0x111   :  { %v817_v45 = vsel %vm816_vm13, %v801_v40, %v803_v9  ;;  %v962_v46 = vsel %vm13688_vm14, %v946_v43, %v948_v20  ;;  %v3044_v9 = vld [vmem:[%s13626_s0 + $0x30] sm:$0x7]  ;;  %v2948_v20 = vrot.slane %v2934_v12, 6  ;;  %v2482_v12 = vrot.slane %v2466_v0, 2 }
 0x112   :  { %832 = vst [vmem:[#allocation2 + $0x100] ss:$-124 sps:$4 sm:$0x83] %v817_v45   ;;  %977 = vst [vmem:[#allocation2 + $0x100] sm:$0x1c] %v962_v46  ;;  %285 = vrot.lane.b32.xlu1 %v274_v37, %s13734_s18  ;;  %680 = vrot.lane.b32.xlu0 %v668_v38, %s13733_s24  ;;  %v3058_v19 = vrot.slane %v3044_v9, 3 }
 0x113   :  { %v2481_v45 = vrot.slane %v2465_v36, 2  ;;  %v2610_v46 = vld [vmem:[%s13626_s0 + $0x30] sm:$0x7] }
 0x114   :  { %v1074_v56 = vpop.permute.xlu0 %1073  ;;  %v402_v57 = vpop.permute.xlu1 %401  ;;  %v2626_v52 = vrot.slane %v2610_v46, 7  ;;  %v1969_v46 = vld [vmem:[%s13626_s0 + $0x30] sm:$0x7] }
 0x115   :  { %v1090_v58 = vsel %vm13687_vm15, %v1074_v56, %v1076_v33  ;;  %v3288_v59 = vld [vmem:[#allocation2 + $0x108] sm:$0xff] }
 0x116   :  { %1105 = vst [vmem:[#allocation2 + $0x100] sm:$0xe0] %v1090_v58  ;;  %3174 = vrot.lane.b32.xlu1 %v3155_v51, %s13733_s24  ;;  %287 = vrot.lane.b32.xlu0 %v275_v47, %s13734_s18  ;;  %v2609_v33 = vld [vmem:[%s13626_s0 + $0x28] sm:$0x7] }
 0x117   :  { %3500 = vmatprep.subr.mxu1 %v3288_v59  ;;  %v2625_v43 = vrot.slane %v2609_v33, 7 }
 0x118   :  { %v9078_v1 = vpop.permute.xlu0 %403  ;;  %v547_v3 = vpop.permute.xlu1 %546 }
 0x119   :  { %v417_v4 = vsel %vm415_vm2, %v402_v57, %v9078_v1 }
 0x11a   :  { %432 = vst [vmem:[#allocation2 + $0x88] ss:$-124 sps:$4 sm:$0xc1] %v417_v4   ;;  %2833 = vrot.lane.b32.xlu1 %v2821_v60, %s13734_s18  ;;  %3176 = vrot.lane.b32.xlu0 %v3156_v61, %s13733_s24  ;;  %v2360_v61 = vrot.slane %v2344_v55, 5  ;;  %v1985_v55 = vrot.slane %v1969_v46, 6 }
 0x11c   :  { %v9090_v15 = vpop.permute.xlu0 %548  ;;  %v675_v16 = vpop.permute.xlu1 %674 }
 0x11d   :  { %v562_v17 = vsel %vm560_vm4, %v547_v3, %v9090_v15  ;;  %v3287_v18 = vld [vmem:[#allocation2 + $0x100] sm:$0xff] }
 0x11e   :  { %577 = vst [vmem:[#allocation2 + $0x88] sm:$0xe] %v562_v17  ;;  %2959 = vrot.lane.b32.xlu1 %v2947_v7, %s13678_s16  ;;  %2835 = vrot.lane.b32.xlu0 %v2822_v8, %s13734_s18  ;;  %v1823_v17 = vld [vmem:[%s13626_s0 + $0x28] sm:$0x7] }
 0x11f   :  { %3501 = vmatpush1.msra.mxu1 %v3287_v18 }
 0x120   :  { %v9102_v26 = vpop.permute.xlu0 %676  ;;  %v400_v28 = vpop.permute.xlu1 %399 }
 0x121   :  { %v690_v29 = vsel %vm13680_vm0, %v675_v16, %v9102_v26  ;;  %v416_v30 = vsel %vm415_vm2, %v400_v28, %v402_v57  ;;  %v9171_v28 = vld [vmem:[%s13627_s1] sm:$0x3f] }
 0x122   :  { %705 = vst [vmem:[#allocation2 + $0x88] sm:$0x70] %v690_v29  ;;  %431 = vst [vmem:[#allocation2 + $0x80] ss:$-124 sps:$4 sm:$0xc1] %v416_v30   ;;  %3070 = vrot.lane.b32.xlu1 %v3058_v19, %s13735_s13  ;;  %2961 = vrot.lane.b32.xlu0 %v2948_v20, %s13678_s16  ;;  %v1839_v29 = vrot.slane %v1823_v17, 1 }
 0x123   :  { %v1567_v17 = vld [vmem:[%s13626_s0 + $0x28] sm:$0x7]  ;;  %s13748_s16 = smov 94  }
 0x124   :  { %v545_v37 = vpop.permute.xlu0 %544  ;;  %v673_v38 = vpop.permute.xlu1 %672 }
 0x125   :  { %v561_v39 = vsel %vm560_vm4, %v545_v37, %v547_v3  ;;  %v689_v40 = vsel %vm13680_vm0, %v673_v38, %v675_v16 }
 0x126   :  { %576 = vst [vmem:[#allocation2 + $0x80] sm:$0xe] %v561_v39  ;;  %704 = vst [vmem:[#allocation2 + $0x80] sm:$0x70] %v689_v40  ;;  %2493 = vrot.lane.b32.xlu1 %v2480_v31, %s13736_s15  ;;  %3072 = vrot.lane.b32.xlu0 %v3059_v32, %s13735_s13  ;;  %v1824_v31 = vld [vmem:[%s13626_s0 + $0x30] sm:$0x7] }
 0x127   :  { %v9189_v39 = vld [vmem:[#allocation2 + $0x20] sm:$0xff] }
 0x128   :  { %v9122_v47 = vpop.permute.xlu1 %283  ;;  %v282_v48 = vpop.permute.xlu0 %281 }
 0x129   :  { %v297_v50 = vsel %vm295_vm1, %v282_v48, %v9122_v47  ;;  %v3272_v51 = vld [vmem:[#allocation2 + $0x88] sm:$0xff] }
 0x12a   :  { %312 = vst [vmem:[#allocation2 + $0x8] sm:$0x38] %v297_v50  ;;  %2638 = vrot.lane.b32.xlu1 %v2625_v43, %s13737_s30  ;;  %2495 = vrot.lane.b32.xlu0 %v2481_v45, %s13736_s15  ;;  %v1840_v43 = vrot.slane %v1824_v31, 1 }
 0x12b   :  { %3502 = vmatprep.subr.mxu1 %v3272_v51 }
 0x12c   :  { %v3171_v56 = vpop.permute.xlu1 %3170  ;;  %v280_v57 = vpop.permute.xlu0 %279 }
 0x12d   :  { %v3180_v58 = vsel %vm13680_vm0, %v8737_v63, %v3171_v56  ;;  %v296_v59 = vsel %vm295_vm1, %v280_v57, %v282_v48  ;;  %v3271_v60 = vld [vmem:[#allocation2 + $0x80] sm:$0xff]  ;;  %v2345_v63 = vld [vmem:[%s13626_s0 + $0x30] sm:$0x7] }
 0x12e   :  { %3193 = vst [vmem:[#allocation2 + $0x490] sm:$0x7] %v3180_v58  ;;  %311 = vst [vmem:[#allocation2] sm:$0x38] %v296_v59  ;;  %2245 = vrot.lane.b32.xlu1 %v2224_v54, %s13738_s29  ;;  %2640 = vrot.lane.b32.xlu0 %v2626_v52, %s13737_s30  ;;  %v2361_v16 = vrot.slane %v2345_v63, 5 }
 0x12f   :  { %3503 = vmatpush1.msra.mxu1 %v3271_v60 }
 0x130   :  { %v2830_v3 = vpop.permute.xlu1 %2829  ;;  %v9148_v4 = vpop.permute.xlu0 %3172 }
 0x131   :  { %v2839_v7 = vsel %vm295_vm1, %v8749_v6, %v2830_v3  ;;  %v3181_v8 = vsel %vm13680_vm0, %v3171_v56, %v9148_v4  ;;  %v3256_v9 = vld [vmem:[#allocation2 + $0x8] sm:$0xff]  ;;  %v2611_v6 = vld [vmem:[%s13626_s0 + $0x38] sm:$0x7]  ;;  %vm3421_vm0 = vcmask 613376   ;;  %v2097_v56 = vld [vmem:[%s13626_s0 + $0x30] sm:$0x7] }
 0x132   :  { %2852 = vst [vmem:[#allocation2 + $0x410] ss:$-124 sps:$4 sm:$0x83] %v2839_v7   ;;  %3194 = vst [vmem:[#allocation2 + $0x498] sm:$0x7] %v3181_v8  ;;  %2373 = vrot.lane.b32.xlu1 %v2360_v61, %s13739_s26  ;;  %2247 = vrot.lane.b32.xlu0 %v2225_v62, %s13738_s29  ;;  %v2627_v30 = vrot.slane %v2611_v6, 7 }
 0x133   :  { %3504 = vmatprep.subr.mxu1 %v3256_v9  ;;  %v2113_v60 = vrot.slane %v2097_v56, 3  ;;  %v2226_v61 = vld [vmem:[%s13626_s0 + $0x38] sm:$0x7]  ;;  %v1422_v62 = vld [vmem:[%s13626_s0 + $0x28] sm:$0x7] }
 0x134   :  { %v2956_v18 = vpop.permute.xlu1 %2955  ;;  %v9162_v19 = vpop.permute.xlu0 %2831  ;;  %v1438_v9 = vrot.slane %v1422_v62, 2  ;;  %v1970_v56 = vld [vmem:[%s13626_s0 + $0x38] sm:$0x7] }
 0x135   :  { %v2965_v20 = vsel %vm415_vm2, %v8764_v14, %v2956_v18  ;;  %v2840_v24 = vsel %vm295_vm1, %v2830_v3, %v9162_v19  ;;  %v3255_v25 = vld [vmem:[#allocation2] sm:$0xff]  ;;  %v1968_v14 = vld [vmem:[%s13626_s0 + $0x28] sm:$0x7]  ;;  %v3401_v45 = vld [vmem:[#allocation2 + $0x490] sm:$0x7]  ;;  %v1986_v62 = vrot.slane %v1970_v56, 6 }
 0x136   :  { %2978 = vst [vmem:[#allocation2 + $0x410] sm:$0x1c] %v2965_v20  ;;  %2853 = vst [vmem:[#allocation2 + $0x418] ss:$-124 sps:$4 sm:$0x83] %v2840_v24   ;;  %2497 = vrot.lane.b32.xlu1 %v2482_v12, %s13736_s15  ;;  %2375 = vrot.lane.b32.xlu0 %v2361_v16, %s13739_s26  ;;  %v1984_v40 = vrot.slane %v1968_v14, 6 }
 0x137   :  { %3505 = vmatpush1.msra.mxu1 %v3255_v25  ;;  %v1583_v25 = vrot.slane %v1567_v17, 7  ;;  %v1568_v14 = vld [vmem:[%s13626_s0 + $0x30] sm:$0x7] }
 0x138   :  { %v3067_v32 = vpop.permute.xlu1 %3066  ;;  %v9181_v33 = vpop.permute.xlu0 %2957  ;;  %7925 = vmatmul.mubr.msk.f32.vlgmr.msra.gmra.mxu1 %vm3421_vm0, %v9171_v28 }
 0x139   :  { %v3076_v36 = vsel %vm560_vm4, %v8775_v23, %v3067_v32  ;;  %v2966_v37 = vsel %vm415_vm2, %v2956_v18, %v9181_v33  ;;  %v3402_v38 = vld [vmem:[#allocation2 + $0x498] sm:$0x7]  ;;  %3609 = vmatprep.mubr.f32.mxu1 %v9189_v39  ;;  %v2096_v23 = vld [vmem:[%s13626_s0 + $0x28] sm:$0x7] }
 0x13a   :  { %3089 = vst [vmem:[#allocation2 + $0x410] sm:$0xe0] %v3076_v36  ;;  %2979 = vst [vmem:[#allocation2 + $0x418] sm:$0x1c] %v2966_v37  ;;  %1852 = vrot.lane.b32.xlu1 %v1839_v29, %s13725_s12  ;;  %2642 = vrot.lane.b32.xlu0 %v2627_v30, %s13737_s30  ;;  %v2112_v54 = vrot.slane %v2096_v23, 3 }
 0x13b   :  { %7926 = vmatprep.subr.msk.mxu1 %vm3425_vm3, %v3402_v38  ;;  %v1695_v30 = vld [vmem:[%s13626_s0 + $0x28] sm:$0x7] }
 0x13c   :  { %7927 = vmatpush1.msk.msra.mxu1 %vm3425_vm3, %v3401_v45  ;;  %v2490_v48 = vpop.permute.xlu1 %2489  ;;  %v9202_v50 = vpop.permute.xlu0 %3068  ;;  %v1711_v38 = vrot.slane %v1695_v30, 4  ;;  %v1825_v45 = vld [vmem:[%s13626_s0 + $0x38] sm:$0x7] }
 0x13d   :  { %v2502_v51 = vsel %vm2499_vm5, %v8804_v41, %v2490_v48  ;;  %v3077_v52 = vsel %vm560_vm4, %v3067_v32, %v9202_v50 }
 0x13e   :  { %2517 = vst [vmem:[#allocation2 + $0x390] ss:$-124 sps:$4 sm:$0xc1] %v2502_v51   ;;  %3090 = vst [vmem:[#allocation2 + $0x418] sm:$0xe0] %v3077_v52  ;;  %1997 = vrot.lane.b32.xlu1 %v1984_v40, %s13726_s23  ;;  %1854 = vrot.lane.b32.xlu0 %v1840_v43, %s13725_s12  ;;  %v1584_v40 = vrot.slane %v1568_v14, 7 }
 0x13f   :  { %v1841_v52 = vrot.slane %v1825_v45, 1 }
 0x140   :  { %v2635_v57 = vpop.permute.xlu1 %2634  ;;  %v9213_v58 = vpop.permute.xlu0 %2491 }
 0x141   :  { %v2647_v41 = vsel %vm2644_vm6, %v8816_v49, %v2635_v57  ;;  %v2503_v59 = vsel %vm2499_vm5, %v2490_v48, %v9213_v58  ;;  %v2346_v49 = vld [vmem:[%s13626_s0 + $0x38] sm:$0x7]  ;;  %v3385_v16 = vld [vmem:[#allocation2 + $0x410] sm:$0xff] }
 0x142   :  { %2662 = vst [vmem:[#allocation2 + $0x390] sm:$0xe] %v2647_v41  ;;  %2518 = vst [vmem:[#allocation2 + $0x398] ss:$-124 sps:$4 sm:$0xc1] %v2503_v59   ;;  %2125 = vrot.lane.b32.xlu1 %v2112_v54, %s13727_s14  ;;  %1999 = vrot.lane.b32.xlu0 %v1985_v55, %s13726_s23  ;;  %v2362_v12 = vrot.slane %v2346_v49, 5 }
 0x143   :  { %v2098_v55 = vld [vmem:[%s13626_s0 + $0x38] sm:$0x7] }
 0x144   :  { %v2242_v0 = vpop.permute.xlu1 %2241  ;;  %v9230_v63 = vpop.permute.xlu0 %2636 }
 0x145   :  { %v2254_v3 = vsel %vm2251_vm7, %v8838_v2, %v2242_v0  ;;  %v2648_v7 = vsel %vm2644_vm6, %v2635_v57, %v9230_v63  ;;  %v3386_v8 = vld [vmem:[#allocation2 + $0x418] sm:$0xff]  ;;  %v1423_v2 = vld [vmem:[%s13626_s0 + $0x30] sm:$0x7] }
 0x146   :  { %2269 = vst [vmem:[#allocation2 + $0x310] sm:$0x7] %v2254_v3  ;;  %2663 = vst [vmem:[#allocation2 + $0x398] sm:$0xe] %v2648_v7  ;;  %2249 = vrot.lane.b32.xlu1 %v2226_v61, %s13738_s29  ;;  %2127 = vrot.lane.b32.xlu0 %v2113_v60, %s13727_s14  ;;  %v1439_v29 = vrot.slane %v1423_v2, 2  ;;  %v2114_v61 = vrot.slane %v2098_v55, 3 }
 0x147   :  { %3559 = vmatprep.subr.mxu1 %v3386_v8  ;;  %v1183_v8 = vld [vmem:[%s13626_s0 + $0x30] sm:$0x7] }
 0x148   :  { %3560 = vmatpush1.msra.mxu1 %v3385_v16  ;;  %v2370_v6 = vpop.permute.xlu1 %2369  ;;  %v9244_v18 = vpop.permute.xlu0 %2243 }
 0x149   :  { %v2382_v20 = vsel %vm13699_vm8, %v8847_v10, %v2370_v6  ;;  %v2255_v24 = vsel %vm2251_vm7, %v2242_v0, %v9244_v18  ;;  %v3369_v43 = vld [vmem:[#allocation2 + $0x390] sm:$0xff] }
 0x14a   :  { %2397 = vst [vmem:[#allocation2 + $0x310] sm:$0x38] %v2382_v20  ;;  %2270 = vst [vmem:[#allocation2 + $0x318] sm:$0x7] %v2255_v24  ;;  %1451 = vrot.lane.b32.xlu1 %v1438_v9, %s13728_s17  ;;  %2377 = vrot.lane.b32.xlu0 %v2362_v12, %s13739_s26  ;;  %v1182_v9 = vld [vmem:[%s13626_s0 + $0x28] sm:$0x7] }
 0x14b   :  { %v1302_v12 = vld [vmem:[%s13626_s0 + $0x28] sm:$0x7] }
 0x14c   :  { %v1849_v10 = vpop.permute.xlu1 %1848  ;;  %v9258_v31 = vpop.permute.xlu0 %2371  ;;  %v1318_v24 = vrot.slane %v1302_v12, 5  ;;  %v1055_v12 = vld [vmem:[%s13626_s0 + $0x30] sm:$0x7] }
 0x14d   :  { %v1861_v32 = vsel %vm1858_vm9, %v8872_v27, %v1849_v10  ;;  %v2383_v36 = vsel %vm13699_vm8, %v2370_v6, %v9258_v31  ;;  %v3370_v37 = vld [vmem:[#allocation2 + $0x398] sm:$0xff]  ;;  %v1696_v27 = vld [vmem:[%s13626_s0 + $0x30] sm:$0x7] }
 0x14e   :  { %1876 = vst [vmem:[#allocation2 + $0x290] ss:$-124 sps:$4 sm:$0x83] %v1861_v32   ;;  %2398 = vst [vmem:[#allocation2 + $0x318] sm:$0x38] %v2383_v36  ;;  %1596 = vrot.lane.b32.xlu1 %v1583_v25, %s13729_s28  ;;  %1453 = vrot.lane.b32.xlu0 %v1439_v29, %s13728_s17  ;;  %v1712_v54 = vrot.slane %v1696_v27, 4 }
 0x14f   :  { %3561 = vmatprep.subr.mxu1 %v3370_v37  ;;  %v1569_v25 = vld [vmem:[%s13626_s0 + $0x38] sm:$0x7] }
 0x150   :  { %3562 = vmatpush1.msra.mxu1 %v3369_v43  ;;  %v1994_v23 = vpop.permute.xlu1 %1993  ;;  %v9272_v46 = vpop.permute.xlu0 %1850  ;;  %v1424_v29 = vld [vmem:[%s13626_s0 + $0x38] sm:$0x7]  ;;  %v1585_v36 = vrot.slane %v1569_v25, 7 }
 0x151   :  { %v2006_v48 = vsel %vm13704_vm10, %v8884_v35, %v1994_v23  ;;  %v1862_v51 = vsel %vm1858_vm9, %v1849_v10, %v9272_v46  ;;  %v3353_v49 = vld [vmem:[#allocation2 + $0x310] sm:$0xff]  ;;  %v1440_v37 = vrot.slane %v1424_v29, 2  ;;  %v1184_v25 = vld [vmem:[%s13626_s0 + $0x38] sm:$0x7] }
 0x152   :  { %2021 = vst [vmem:[#allocation2 + $0x290] sm:$0x1c] %v2006_v48  ;;  %1877 = vst [vmem:[#allocation2 + $0x298] ss:$-124 sps:$4 sm:$0x83] %v1862_v51   ;;  %1724 = vrot.lane.b32.xlu1 %v1711_v38, %s13730_s27  ;;  %1598 = vrot.lane.b32.xlu0 %v1584_v40, %s13729_s28 }
 0x153   :  { %v781_v40 = vld [vmem:[%s13626_s0 + $0x28] sm:$0x7]  ;;  %v1304_v29 = vld [vmem:[%s13626_s0 + $0x38] sm:$0x7] }
 0x154   :  { %v2122_v35 = vpop.permute.xlu1 %2121  ;;  %v9286_v57 = vpop.permute.xlu0 %1995  ;;  %v797_v48 = vrot.slane %v781_v40, 1 }
 0x155   :  { %v2134_v41 = vsel %vm13682_vm11, %v8896_v44, %v2122_v35  ;;  %v2007_v59 = vsel %vm13704_vm10, %v1994_v23, %v9286_v57  ;;  %v3354_v60 = vld [vmem:[#allocation2 + $0x318] sm:$0xff] }
 0x156   :  { %2149 = vst [vmem:[#allocation2 + $0x290] sm:$0xe0] %v2134_v41  ;;  %2022 = vst [vmem:[#allocation2 + $0x298] sm:$0x1c] %v2007_v59  ;;  %1856 = vrot.lane.b32.xlu1 %v1841_v52, %s13725_s12  ;;  %1726 = vrot.lane.b32.xlu0 %v1712_v54, %s13730_s27  ;;  %v926_v52 = vld [vmem:[%s13626_s0 + $0x28] sm:$0x7] }
 0x157   :  { %3563 = vmatprep.subr.mxu1 %v3354_v60  ;;  %v782_v54 = vld [vmem:[%s13626_s0 + $0x30] sm:$0x7]  ;;  %v942_v41 = vrot.slane %v926_v52, 6  ;;  %v1054_v60 = vld [vmem:[%s13626_s0 + $0x28] sm:$0x7] }
 0x158   :  { %3564 = vmatpush1.msra.mxu1 %v3353_v49  ;;  %v1448_v0 = vpop.permute.xlu1 %1447  ;;  %v9294_v3 = vpop.permute.xlu0 %2123  ;;  %v798_v59 = vrot.slane %v782_v54, 1  ;;  %v203_v49 = vld [vmem:[%s13626_s0 + $0x20] sm:$0x7]  ;;  %v653_v54 = vld [vmem:[%s13626_s0 + $0x28] sm:$0x7] }
 0x159   :  { %v1460_v44 = vsel %vm13683_vm12, %v8927_v5, %v1448_v0  ;;  %v2135_v7 = vsel %vm13682_vm11, %v2122_v35, %v9294_v3  ;;  %v1303_v5 = vld [vmem:[%s13626_s0 + $0x30] sm:$0x7]  ;;  %vm13740_vm11 = vcmask 515072   ;;  %211 = vst [vmem:[#allocation2 + $0x20] sm:$0x7] %v203_v49 }
 0x15a   :  { %1475 = vst [vmem:[#allocation2 + $0x210] ss:$-124 sps:$4 sm:$0xc1] %v1460_v44   ;;  %2150 = vst [vmem:[#allocation2 + $0x298] sm:$0xe0] %v2135_v7  ;;  %2129 = vrot.lane.b32.xlu1 %v2114_v61, %s13727_s14  ;;  %2001 = vrot.lane.b32.xlu0 %v1986_v62, %s13726_s23  ;;  %v1319_v20 = vrot.slane %v1303_v5, 5 }
 0x15b   :  { %v927_v61 = vld [vmem:[%s13626_s0 + $0x30] sm:$0x7] }
 0x15c   :  { %v1593_v16 = vpop.permute.xlu1 %1592  ;;  %v9314_v17 = vpop.permute.xlu0 %1449 }
 0x15d   :  { %v1605_v2 = vsel %vm13740_vm11, %v8936_v13, %v1593_v16  ;;  %v1461_v6 = vsel %vm13683_vm12, %v1448_v0, %v9314_v17  ;;  %vm13741_vm11 = vcmask 506880   ;;  %vm13742_vm12 = vcmask 515072   ;;  %v3337_v38 = vld [vmem:[#allocation2 + $0x290] sm:$0xff] }
 0x15e   :  { %1620 = vst [vmem:[#allocation2 + $0x210] sm:$0xe] %v1605_v2  ;;  %1476 = vst [vmem:[#allocation2 + $0x218] ss:$-124 sps:$4 sm:$0xc1] %v1461_v6   ;;  %1205 = vrot.lane.b32.xlu1 %v1183_v8, %s13731_s25  ;;  %1203 = vrot.lane.b32.xlu0 %v1182_v9, %s13731_s25  ;;  %v1070_v8 = vrot.slane %v1054_v60, 3 }
 0x15f   :  { %v943_v9 = vrot.slane %v927_v61, 6  ;;  %v783_v61 = vld [vmem:[%s13626_s0 + $0x38] sm:$0x7] }
 0x160   :  { %v1721_v13 = vpop.permute.xlu1 %1720  ;;  %v9328_v30 = vpop.permute.xlu0 %1594 }
 0x161   :  { %v1733_v14 = vsel %vm13741_vm11, %v8948_v21, %v1721_v13  ;;  %v1606_v10 = vsel %vm13742_vm12, %v1593_v16, %v9328_v30  ;;  %v3338_v32 = vld [vmem:[#allocation2 + $0x298] sm:$0xff]  ;;  %vm13743_vm12 = vcmask 760832  }
 0x162   :  { %1748 = vst [vmem:[#allocation2 + $0x210] sm:$0x70] %v1733_v14  ;;  %1621 = vst [vmem:[#allocation2 + $0x218] sm:$0xe] %v1606_v10  ;;  %1333 = vrot.lane.b32.xlu1 %v1319_v20, %s13732_s21  ;;  %1331 = vrot.lane.b32.xlu0 %v1318_v24, %s13732_s21  ;;  %v1697_v21 = vld [vmem:[%s13626_s0 + $0x38] sm:$0x7] }
 0x163   :  { %3565 = vmatprep.subr.mxu1 %v3338_v32  ;;  %v1713_v51 = vrot.slane %v1697_v21, 4  ;;  %v1071_v20 = vrot.slane %v1055_v12, 3  ;;  %v204_v24 = vld [vmem:[%s13626_s0 + $0x28] sm:$0x7]  ;;  %v1056_v12 = vld [vmem:[%s13626_s0 + $0x38] sm:$0x7] }
 0x164   :  { %3566 = vmatpush1.msra.mxu1 %v3337_v38  ;;  %v1200_v43 = vpop.permute.xlu1 %1199  ;;  %v9342_v45 = vpop.permute.xlu0 %1722  ;;  %212 = vst [vmem:[#allocation2 + $0x28] sm:$0x7] %v204_v24  ;;  %v1320_v38 = vrot.slane %v1304_v29, 5  ;;  %v525_v21 = vld [vmem:[%s13626_s0 + $0x28] sm:$0x7]  ;;  %v1072_v24 = vrot.slane %v1056_v12, 3 }
 0x165   :  { %v1212_v27 = vsel %vm13743_vm12, %v8974_v42, %v1200_v43  ;;  %v1734_v23 = vsel %vm13741_vm11, %v1721_v13, %v9342_v45  ;;  %vm13744_vm12 = vcmask 752640   ;;  %vm13745_vm11 = vcmask 760832   ;;  %v206_v29 = vld [vmem:[%s13626_s0 + $0x38] sm:$0x7]  ;;  %v2768_v12 = vld [vmem:[%s13626_s0 + $0x10] sm:$0x38] }
 0x166   :  { %1227 = vst [vmem:[#allocation2 + $0x190] sm:$0x7] %v1212_v27  ;;  %1749 = vst [vmem:[#allocation2 + $0x218] sm:$0x70] %v1734_v23  ;;  %1600 = vrot.lane.b32.xlu1 %v1585_v36, %s13729_s28  ;;  %1455 = vrot.lane.b32.xlu0 %v1440_v37, %s13728_s17 }
 0x167   :  { %214 = vst [vmem:[#allocation2 + $0x38] sm:$0x7] %v206_v29 }
 0x168   :  { %v1328_v42 = vpop.permute.xlu1 %1327  ;;  %v9356_v55 = vpop.permute.xlu0 %1201 }
 0x169   :  { %v1340_v56 = vsel %vm13744_vm12, %v8989_v53, %v1328_v42  ;;  %v1213_v35 = vsel %vm13745_vm11, %v1200_v43, %v9356_v55  ;;  %v3321_v5 = vld [vmem:[#allocation2 + $0x210] sm:$0xff]  ;;  %vm13750_vm11 = vcmask 1014784  }
 0x16a   :  { %1355 = vst [vmem:[#allocation2 + $0x190] sm:$0x38] %v1340_v56  ;;  %1228 = vst [vmem:[#allocation2 + $0x198] sm:$0x7] %v1213_v35  ;;  %810 = vrot.lane.b32.xlu1 %v797_v48, %s13746_s10  ;;  %1728 = vrot.lane.b32.xlu0 %v1713_v51, %s13730_s27  ;;  %v541_v51 = vrot.slane %v525_v21, 7 }
 0x16b   :  { %v527_v21 = vld [vmem:[%s13626_s0 + $0x38] sm:$0x7] }
 0x16c   :  { %v807_v53 = vpop.permute.xlu1 %806  ;;  %v9370_v62 = vpop.permute.xlu0 %1329 }
 0x16d   :  { %v819_v0 = vsel %vm816_vm13, %v9014_v11, %v807_v53  ;;  %v1341_v44 = vsel %vm13744_vm12, %v1328_v42, %v9370_v62  ;;  %v3322_v7 = vld [vmem:[#allocation2 + $0x218] sm:$0xff]  ;;  %v526_v42 = vld [vmem:[%s13626_s0 + $0x30] sm:$0x7]  ;;  %vm13751_vm12 = vmmov %vm13750_vm11 }
 0x16e   :  { %834 = vst [vmem:[#allocation2 + $0x110] ss:$-124 sps:$4 sm:$0x83] %v819_v0   ;;  %1356 = vst [vmem:[#allocation2 + $0x198] sm:$0x38] %v1341_v44  ;;  %955 = vrot.lane.b32.xlu1 %v942_v41, %s13747_s22  ;;  %812 = vrot.lane.b32.xlu0 %v798_v59, %s13746_s10  ;;  %v669_v59 = vrot.slane %v653_v54, 4 }
 0x16f   :  { %3567 = vmatprep.subr.mxu1 %v3322_v7  ;;  %v542_v60 = vrot.slane %v526_v42, 7 }
 0x170   :  { %3568 = vmatpush1.msra.mxu1 %v3321_v5  ;;  %v952_v11 = vpop.permute.xlu1 %951  ;;  %v9384_v16 = vpop.permute.xlu0 %808 }
 0x171   :  { %v964_v2 = vsel %vm13688_vm14, %v9026_v22, %v952_v11  ;;  %v820_v6 = vsel %vm816_vm13, %v807_v53, %v9384_v16  ;;  %v380_v22 = vld [vmem:[%s13626_s0 + $0x28] sm:$0x7]  ;;  %v3305_v40 = vld [vmem:[#allocation2 + $0x190] sm:$0xff] }
 0x172   :  { %979 = vst [vmem:[#allocation2 + $0x110] sm:$0x1c] %v964_v2  ;;  %835 = vst [vmem:[#allocation2 + $0x118] ss:$-124 sps:$4 sm:$0x83] %v820_v6   ;;  %1083 = vrot.lane.b32.xlu1 %v1070_v8, %s13748_s16  ;;  %957 = vrot.lane.b32.xlu0 %v943_v9, %s13747_s22  ;;  %v396_v37 = vrot.slane %v380_v22, 2 }
 0x173   :  { %v654_v53 = vld [vmem:[%s13626_s0 + $0x30] sm:$0x7]  ;;  %v799_v8 = vrot.slane %v783_v61, 1 }
 0x174   :  { %v1080_v13 = vpop.permute.xlu1 %1079  ;;  %v9404_v14 = vpop.permute.xlu0 %953  ;;  %v670_v9 = vrot.slane %v654_v53, 4  ;;  %v205_v22 = vld [vmem:[%s13626_s0 + $0x30] sm:$0x7]  ;;  %v3406_v53 = vld [vmem:[#allocation2 + $0x4b8] sm:$0x7] }
 0x175   :  { %v1092_v10 = vsel %vm13687_vm15, %v9041_v34, %v1080_v13  ;;  %v965_v32 = vsel %vm13688_vm14, %v952_v11, %v9404_v14  ;;  %v3306_v36 = vld [vmem:[#allocation2 + $0x198] sm:$0xff]  ;;  %v381_v34 = vld [vmem:[%s13626_s0 + $0x30] sm:$0x7]  ;;  %213 = vst [vmem:[#allocation2 + $0x30] sm:$0x7] %v205_v22  ;;  %vm13689_vm14 = vcmask 1033216  }
 0x176   :  { %1107 = vst [vmem:[#allocation2 + $0x110] sm:$0xe0] %v1092_v10  ;;  %980 = vst [vmem:[#allocation2 + $0x118] sm:$0x1c] %v965_v32  ;;  %1207 = vrot.lane.b32.xlu1 %v1184_v25, %s13731_s25  ;;  %1085 = vrot.lane.b32.xlu0 %v1071_v20, %s13748_s16  ;;  %v397_v52 = vrot.slane %v381_v34, 2 }
 0x177   :  { %3569 = vmatprep.subr.mxu1 %v3306_v36 }
 0x178   :  { %3570 = vmatpush1.msra.mxu1 %v3305_v40  ;;  %v406_v43 = vpop.permute.xlu1 %405  ;;  %v9418_v27 = vpop.permute.xlu0 %1081 }
 0x179   :  { %v418_v23 = vsel %vm415_vm2, %v9078_v1, %v406_v43  ;;  %v1093_v48 = vsel %vm13687_vm15, %v1080_v13, %v9418_v27  ;;  %v260_v13 = vld [vmem:[%s13626_s0 + $0x28] sm:$0x7]  ;;  %vm13692_vm15 = vcmask 1039367  }
 0x17a   :  { %433 = vst [vmem:[#allocation2 + $0x90] ss:$-124 sps:$4 sm:$0xc1] %v418_v23   ;;  %1108 = vst [vmem:[#allocation2 + $0x118] sm:$0xe0] %v1093_v48  ;;  %409 = vrot.lane.b32.xlu1 %v396_v37, %s13749_s8  ;;  %1335 = vrot.lane.b32.xlu0 %v1320_v38, %s13732_s21  ;;  %v276_v40 = vrot.slane %v260_v13, 5 }
 0x17c   :  { %v551_v1 = vpop.permute.xlu1 %550  ;;  %v9432_v56 = vpop.permute.xlu0 %407 }
 0x17d   :  { %v563_v35 = vsel %vm560_vm4, %v9090_v15, %v551_v1  ;;  %v419_v41 = vsel %vm415_vm2, %v406_v43, %v9432_v56  ;;  %v3289_v5 = vld [vmem:[#allocation2 + $0x110] sm:$0xff] }
 0x17e   :  { %578 = vst [vmem:[#allocation2 + $0x90] sm:$0xe] %v563_v35  ;;  %434 = vst [vmem:[#allocation2 + $0x98] ss:$-124 sps:$4 sm:$0xc1] %v419_v41   ;;  %554 = vrot.lane.b32.xlu1 %v541_v51, %s13735_s13  ;;  %411 = vrot.lane.b32.xlu0 %v397_v52, %s13749_s8  ;;  %v543_v52 = vrot.slane %v527_v21, 7 }
 0x17f   :  { %v655_v41 = vld [vmem:[%s13626_s0 + $0x38] sm:$0x7] }
 0x180   :  { %v679_v15 = vpop.permute.xlu1 %678  ;;  %v9446_v49 = vpop.permute.xlu0 %552 }
 0x181   :  { %v691_v0 = vsel %vm13750_vm11, %v9102_v26, %v679_v15  ;;  %v564_v44 = vsel %vm560_vm4, %v551_v1, %v9446_v49  ;;  %v3290_v7 = vld [vmem:[#allocation2 + $0x118] sm:$0xff] }
 0x182   :  { %706 = vst [vmem:[#allocation2 + $0x90] sm:$0x70] %v691_v0  ;;  %579 = vst [vmem:[#allocation2 + $0x98] sm:$0xe] %v564_v44  ;;  %682 = vrot.lane.b32.xlu1 %v669_v59, %s13733_s24  ;;  %556 = vrot.lane.b32.xlu0 %v542_v60, %s13735_s13  ;;  %v928_v26 = vld [vmem:[%s13626_s0 + $0x38] sm:$0x7] }
 0x183   :  { %3571 = vmatprep.subr.mxu1 %v3290_v7  ;;  %v944_v25 = vrot.slane %v928_v26, 6  ;;  %v671_v44 = vrot.slane %v655_v41, 4 }
 0x184   :  { %3572 = vmatpush1.msra.mxu1 %v3289_v5  ;;  %v286_v11 = vpop.permute.xlu1 %285  ;;  %v9460_v2 = vpop.permute.xlu0 %680  ;;  %v3200_v5 = vld [vmem:[%s13626_s0 + $0x10] sm:$0x38] }
 0x185   :  { %v298_v6 = vsel %vm295_vm1, %v9122_v47, %v286_v11  ;;  %v692_v20 = vsel %vm13751_vm12, %v679_v15, %v9460_v2  ;;  %v261_v47 = vld [vmem:[%s13626_s0 + $0x30] sm:$0x7]  ;;  %vm13696_vm12 = vcmask 1009664  }
 0x186   :  { %313 = vst [vmem:[#allocation2 + $0x10] sm:$0x38] %v298_v6  ;;  %707 = vst [vmem:[#allocation2 + $0x98] sm:$0x70] %v692_v20  ;;  %814 = vrot.lane.b32.xlu1 %v799_v8, %s13746_s10  ;;  %684 = vrot.lane.b32.xlu0 %v670_v9, %s13733_s24  ;;  %v277_v38 = vrot.slane %v261_v47, 5  ;;  %v2782_v20 = vrot.slane %v2768_v12, 7 }
 0x187   :  { %v3199_v47 = vld [vmem:[%s13626_s0 + $0x8] sm:$0x38] }
 0x188   :  { %v3175_v10 = vpop.permute.xlu1 %3174  ;;  %v9480_v32 = vpop.permute.xlu0 %287  ;;  %2796 = vst [vmem:[#allocation2 + $0x3c8] sm:$0x70] %v2782_v20 }
 0x189   :  { %v3182_v36 = vsel %vm13750_vm11, %v9148_v4, %v3175_v10  ;;  %v299_v37 = vsel %vm295_vm1, %v286_v11, %v9480_v32  ;;  %v382_v4 = vld [vmem:[%s13626_s0 + $0x38] sm:$0x7]  ;;  %v3273_v42 = vld [vmem:[#allocation2 + $0x90] sm:$0xff] }
 0x18a   :  { %3195 = vst [vmem:[#allocation2 + $0x4a0] sm:$0x7] %v3182_v36  ;;  %314 = vst [vmem:[#allocation2 + $0x18] sm:$0x38] %v299_v37  ;;  %1087 = vrot.lane.b32.xlu1 %v1072_v24, %s13748_s16  ;;  %959 = vrot.lane.b32.xlu0 %v944_v25, %s13747_s22  ;;  %v398_v54 = vrot.slane %v382_v4, 2  ;;  %v3214_v25 = vrot.slane %v3200_v5, 3 }
 0x18b   :  { %v3213_v37 = vrot.slane %v3199_v47, 3 }
 0x18c   :  { %v2834_v34 = vpop.permute.xlu1 %2833  ;;  %v3177_v43 = vpop.permute.xlu0 %3176 }
 0x18d   :  { %v2841_v23 = vsel %vm295_vm1, %v9162_v19, %v2834_v34  ;;  %v3183_v48 = vsel %vm13750_vm11, %v3175_v10, %v3177_v43  ;;  %3198 = vst.msk [vmem:[#allocation2 + $0x4b0] sm:$0x7] %vm13696_vm12, %v3177_v43  ;;  %v3274_v51 = vld [vmem:[#allocation2 + $0x98] sm:$0xff]  ;;  %vm13691_vm11 = vcmask 1028098   ;;  %v3257_v0 = vld [vmem:[#allocation2 + $0x10] sm:$0xff]  ;;  %vm13753_vm12 = vcmask 523264  }
 0x18e   :  { %2854 = vst [vmem:[#allocation2 + $0x420] ss:$-124 sps:$4 sm:$0x83] %v2841_v23   ;;  %3196 = vst [vmem:[#allocation2 + $0x4a8] sm:$0x7] %v3183_v48  ;;  %291 = vrot.lane.b32.xlu1 %v277_v38, %s13734_s18  ;;  %289 = vrot.lane.b32.xlu0 %v276_v40, %s13734_s18 }
 0x18f   :  { %3573 = vmatprep.subr.mxu1 %v3274_v51  ;;  %v262_v19 = vld [vmem:[%s13626_s0 + $0x38] sm:$0x7]  ;;  %v2985_v38 = vld [vmem:[%s13626_s0 + $0x10] sm:$0x38] }
 0x190   :  { %3574 = vmatpush1.msra.mxu1 %v3273_v42  ;;  %v2960_v1 = vpop.permute.xlu1 %2959  ;;  %v2836_v35 = vpop.permute.xlu0 %2835  ;;  %v278_v15 = vrot.slane %v262_v19, 5  ;;  %v2999_v23 = vrot.slane %v2985_v38, 1  ;;  %v3096_v51 = vld [vmem:[%s13626_s0 + $0x10] sm:$0x38] }
 0x191   :  { %v2967_v59 = vsel %vm415_vm2, %v9181_v33, %v2960_v1  ;;  %v2842_v60 = vsel %vm295_vm1, %v2834_v34, %v2836_v35  ;;  %2857 = vst.msk [vmem:[#allocation2 + $0x3b0] sm:$0x80] %vm13692_vm15, %v2836_v35  ;;  %v3258_v61 = vld [vmem:[#allocation2 + $0x18] sm:$0xff]  ;;  %vm13693_vm15 = vcmask 224257  }
 0x192   :  { %2865 = vst.msk [vmem:[#allocation2 + $0x430] sm:$0x3] %vm13689_vm14, %v2836_v35  ;;  %2980 = vst [vmem:[#allocation2 + $0x420] sm:$0x1c] %v2967_v59  ;;  %558 = vrot.lane.b32.xlu1 %v543_v52, %s13735_s13  ;;  %413 = vrot.lane.b32.xlu0 %v398_v54, %s13749_s8  ;;  %v3201_v33 = vld [vmem:[%s13626_s0 + $0x18] sm:$0x38] }
 0x193   :  { %2855 = vst [vmem:[#allocation2 + $0x428] ss:$-124 sps:$4 sm:$0x83] %v2842_v60   ;;  %3575 = vmatprep.subr.mxu1 %v3258_v61  ;;  %vm13690_vm14 = vcmask 1022981   ;;  %v3215_v24 = vrot.slane %v3201_v33, 3  ;;  %v3110_v59 = vrot.slane %v3096_v51, 6 }
 0x194   :  { %3576 = vmatpush1.msra.mxu1 %v3257_v0  ;;  %v3071_v7 = vpop.permute.xlu1 %3070  ;;  %v2962_v8 = vpop.permute.xlu0 %2961  ;;  %v3405_v9 = vld [vmem:[#allocation2 + $0x4b0] sm:$0x7]  ;;  %v2866_v61 = vld [vmem:[%s13626_s0 + $0x8] sm:$0x38]  ;;  %v2533_v51 = vld [vmem:[%s13626_s0] sm:$0x38] }
 0x195   :  { %v3078_v26 = vsel %vm560_vm4, %v9202_v50, %v3071_v7  ;;  %v2968_v11 = vsel %vm415_vm2, %v2960_v1, %v2962_v8  ;;  %2983 = vst.msk [vmem:[#allocation2 + $0x430] sm:$0x1c] %vm13691_vm11, %v2962_v8  ;;  %7932 = vmatprep.subr.msk.mxu1 %vm3425_vm3, %v3406_v53  ;;  %7928 = vmatmul.mubr.msk.f32.vlgmr.msra.gmra.mxu1 %vm3421_vm0, %v9171_v28  ;;  %v3404_v6 = vld [vmem:[#allocation2 + $0x4a8] sm:$0x7]  ;;  %v3403_v50 = vld [vmem:[#allocation2 + $0x4a0] sm:$0x7] }
 0x196   :  { %3091 = vst [vmem:[#allocation2 + $0x420] sm:$0xe0] %v3078_v26  ;;  %2981 = vst [vmem:[#allocation2 + $0x428] sm:$0x1c] %v2968_v11  ;;  %7933 = vmatpush1.msk.msra.mxu1 %vm3425_vm3, %v3405_v9  ;;  %293 = vrot.lane.b32.xlu1 %v278_v15, %s13734_s18  ;;  %v2867_v28 = vld [vmem:[%s13626_s0 + $0x10] sm:$0x38] }
 0x197   :  { %686 = vrot.lane.b32.xlu0 %v671_v44, %s13733_s24  ;;  %7929 = vmatprep.subr.msk.mxu0 %vm3425_vm3, %v3404_v6  ;;  %v2881_v36 = vrot.slane %v2867_v28, 4  ;;  %v3097_v15 = vld [vmem:[%s13626_s0 + $0x18] sm:$0x38]  ;;  %vm13694_vm11 = vcmask 229376   ;;  %v2880_v33 = vrot.slane %v2866_v61, 4 }
 0x198   :  { %7930 = vmatpush1.msk.msra.mxu0 %vm3425_vm3, %v3403_v50  ;;  %v2494_v22 = vpop.permute.xlu1 %2493  ;;  %v3073_v29 = vpop.permute.xlu0 %3072  ;;  %3701 = vmatprep.subr.mxu1 %v9189_v39  ;;  %v3095_v8 = vld [vmem:[%s13626_s0 + $0x8] sm:$0x38]  ;;  %v2535_v50 = vld [vmem:[%s13626_s0 + $0x10] sm:$0x38] }
 0x199   :  { %v2504_v13 = vsel %vm2499_vm5, %v9213_v58, %v2494_v22  ;;  %v3079_v10 = vsel %vm560_vm4, %v3071_v7, %v3073_v29  ;;  %3094 = vst.msk [vmem:[#allocation2 + $0x430] sm:$0xe0] %vm13690_vm14, %v3073_v29  ;;  %3751 = vmatprep.mubr.f32.mxu1 %v9189_v39  ;;  %v2767_v58 = vld [vmem:[%s13626_s0 + $0x8] sm:$0x38]  ;;  %v2868_v39 = vld [vmem:[%s13626_s0 + $0x18] sm:$0x38] }
 0x19a   :  { %2519 = vst [vmem:[#allocation2 + $0x3a0] ss:$-124 sps:$4 sm:$0xc1] %v2504_v13   ;;  %3092 = vst [vmem:[#allocation2 + $0x428] sm:$0xe0] %v3079_v10  ;;  %3224 = vrot.lane.b32.xlu1 %v3215_v24, %s13733_s24  ;;  %v2781_v4 = vrot.slane %v2767_v58, 7 }
 0x19b   :  { %3222 = vrot.lane.b32.xlu0 %v3214_v25, %s13733_s24  ;;  %v2882_v48 = vrot.slane %v2868_v39, 4  ;;  %vm13695_vm14 = vcmask 236550   ;;  %v3111_v7 = vrot.slane %v3097_v15, 6  ;;  %v3109_v20 = vrot.slane %v3095_v8, 6 }
 0x19c   :  { %v2639_v40 = vpop.permute.xlu1 %2638  ;;  %v2496_v21 = vpop.permute.xlu0 %2495  ;;  %2795 = vst [vmem:[#allocation2 + $0x3c0] sm:$0x70] %v2781_v4  ;;  %v2551_v13 = vrot.slane %v2535_v50, 5 }
 0x19d   :  { %v2649_v34 = vsel %vm2644_vm6, %v9230_v63, %v2639_v40  ;;  %v2505_v43 = vsel %vm2499_vm5, %v2494_v22, %v2496_v21  ;;  %v2986_v63 = vld [vmem:[%s13626_s0 + $0x18] sm:$0x38]  ;;  %v3387_v41 = vld [vmem:[#allocation2 + $0x420] sm:$0xff]  ;;  %v2534_v22 = vld [vmem:[%s13626_s0 + $0x8] sm:$0x38] }
 0x19e   :  { %2664 = vst [vmem:[#allocation2 + $0x3a0] sm:$0xe] %v2649_v34  ;;  %2520 = vst [vmem:[#allocation2 + $0x3a8] ss:$-124 sps:$4 sm:$0xc1] %v2505_v43   ;;  %2889 = vrot.lane.b32.xlu1 %v2881_v36, %s13734_s18  ;;  %v3000_v60 = vrot.slane %v2986_v63, 1 }
 0x19f   :  { %3220 = vrot.lane.b32.xlu0 %v3213_v37, %s13733_s24  ;;  %v2550_v10 = vrot.slane %v2534_v22, 5  ;;  %v2671_v36 = vld [vmem:[%s13626_s0 + $0x10] sm:$0x38]  ;;  %v2669_v43 = vld [vmem:[%s13626_s0] sm:$0x38] }
 0x1a0   :  { %v2246_v52 = vpop.permute.xlu1 %2245  ;;  %v2641_v54 = vpop.permute.xlu0 %2640  ;;  %v3389_v42 = vld [vmem:[#allocation2 + $0x430] sm:$0xff]  ;;  %v2687_v4 = vrot.slane %v2671_v36, 2  ;;  %v2685_v63 = vrot.slane %v2669_v43, 2 }
 0x1a1   :  { %v2256_v19 = vsel %vm2251_vm7, %v9244_v18, %v2246_v52  ;;  %v2650_v1 = vsel %vm2644_vm6, %v2639_v40, %v2641_v54  ;;  %3702 = vmatpush1.msra.mxu1 %v3389_v42  ;;  %v3388_v35 = vld [vmem:[#allocation2 + $0x428] sm:$0xff] }
 0x1a2   :  { %2271 = vst [vmem:[#allocation2 + $0x320] sm:$0x7] %v2256_v19  ;;  %2665 = vst [vmem:[#allocation2 + $0x3a8] sm:$0xe] %v2650_v1  ;;  %3007 = vrot.lane.b32.xlu1 %v2999_v23, %s13749_s8  ;;  %3630 = vmatprep.subr.mxu0 %v3388_v35  ;;  %v2549_v19 = vrot.slane %v2533_v51, 5 }
 0x1a3   :  { %2891 = vrot.lane.b32.xlu0 %v2882_v48, %s13734_s18  ;;  %3631 = vmatpush1.msra.mxu0 %v3387_v41  ;;  %v2278_v1 = vld [vmem:[%s13626_s0 + $0x10] sm:$0x38]  ;;  %v2277_v41 = vld [vmem:[%s13626_s0 + $0x8] sm:$0x38] }
 0x1a4   :  { %v2374_v18 = vpop.permute.xlu1 %2373  ;;  %v9576_v53 = vpop.permute.xlu0 %2247  ;;  %v2294_v61 = vrot.slane %v2278_v1, 3 }
 0x1a5   :  { %v2384_v0 = vsel %vm13699_vm8, %v9258_v31, %v2374_v18  ;;  %v2257_v44 = vsel %vm2251_vm7, %v2246_v52, %v9576_v53  ;;  %v2984_v31 = vld [vmem:[%s13626_s0 + $0x8] sm:$0x38]  ;;  %v3371_v6 = vld [vmem:[#allocation2 + $0x3a0] sm:$0xff] }
 0x1a6   :  { %2399 = vst [vmem:[#allocation2 + $0x320] sm:$0x38] %v2384_v0  ;;  %2272 = vst [vmem:[#allocation2 + $0x328] sm:$0x7] %v2257_v44  ;;  %3118 = vrot.lane.b32.xlu1 %v3110_v59, %s13735_s13  ;;  %v2998_v24 = vrot.slane %v2984_v31, 1 }
 0x1a7   :  { %3009 = vrot.lane.b32.xlu0 %v3000_v60, %s13749_s8 }
 0x1a8   :  { %v2498_v9 = vpop.permute.xlu1 %2497  ;;  %v9590_v5 = vpop.permute.xlu0 %2375 }
 0x1a9   :  { %v2506_v12 = vsel %vm2499_vm5, %v2496_v21, %v2498_v9  ;;  %2523 = vst.msk [vmem:[#allocation2 + $0x338] sm:$0xc0] %vm13695_vm14, %v2498_v9  ;;  %v2385_v26 = vsel %vm13699_vm8, %v2374_v18, %v9590_v5  ;;  %v3372_v11 = vld [vmem:[#allocation2 + $0x3a8] sm:$0xff]  ;;  %vm13697_vm14 = vcmask 242691   ;;  %v2293_v18 = vrot.slane %v2277_v41, 3 }
 0x1aa   :  { %2532 = vst.msk [vmem:[#allocation2 + $0x3b8] sm:$0x1] %vm13694_vm11, %v2498_v9  ;;  %2521 = vst [vmem:[#allocation2 + $0x3b0] ss:$-124 sps:$4 sm:$0xc1] %v2506_v12   ;;  %2887 = vrot.lane.b32.xlu1 %v2880_v33, %s13734_s18  ;;  %3632 = vmatprep.subr.mxu0 %v3372_v11  ;;  %vm13698_vm11 = vcmask 247808  }
 0x1ab   :  { %2400 = vst [vmem:[#allocation2 + $0x328] sm:$0x38] %v2385_v26  ;;  %3120 = vrot.lane.b32.xlu0 %v3111_v7, %s13735_s13  ;;  %3633 = vmatpush1.msra.mxu0 %v3371_v6  ;;  %v2406_v33 = vld [vmem:[%s13626_s0 + $0x10] sm:$0x38]  ;;  %v2276_v9 = vld [vmem:[%s13626_s0] sm:$0x38] }
 0x1ac   :  { %v1853_v25 = vpop.permute.xlu1 %1852  ;;  %v2643_v28 = vpop.permute.xlu0 %2642  ;;  %v2404_v11 = vld [vmem:[%s13626_s0] sm:$0x38]  ;;  %v2292_v6 = vrot.slane %v2276_v9, 3  ;;  %v1493_v9 = vld [vmem:[%s13626_s0 + $0x10] sm:$0x38] }
 0x1ad   :  { %v1863_v29 = vsel %vm1858_vm9, %v9272_v46, %v1853_v25  ;;  %v2651_v47 = vsel %vm2644_vm6, %v2641_v54, %v2643_v28  ;;  %2668 = vst.msk [vmem:[#allocation2 + $0x3b8] sm:$0xe] %vm13693_vm15, %v2643_v28  ;;  %v2670_v46 = vld [vmem:[%s13626_s0 + $0x8] sm:$0x38]  ;;  %v3355_v39 = vld [vmem:[#allocation2 + $0x320] sm:$0xff]  ;;  %vm13752_vm15 = vcmask 261120  }
 0x1ae   :  { %1878 = vst [vmem:[#allocation2 + $0x2a0] ss:$-124 sps:$4 sm:$0x83] %v1863_v29   ;;  %2666 = vst [vmem:[#allocation2 + $0x3b0] sm:$0xe] %v2651_v47  ;;  %3116 = vrot.lane.b32.xlu1 %v3109_v20, %s13735_s13  ;;  %v2686_v34 = vrot.slane %v2670_v46, 2 }
 0x1af   :  { %3005 = vrot.lane.b32.xlu0 %v2998_v24, %s13749_s8 }
 0x1b0   :  { %v1998_v37 = vpop.permute.xlu1 %1997  ;;  %v9617_v38 = vpop.permute.xlu0 %1854 }
 0x1b1   :  { %v2008_v58 = vsel %vm13704_vm10, %v9286_v57, %v1998_v37  ;;  %v1864_v40 = vsel %vm1858_vm9, %v1853_v25, %v9617_v38  ;;  %v1893_v25 = vld [vmem:[%s13626_s0 + $0x8] sm:$0x38] }
 0x1b2   :  { %v3356_v21 = vld [vmem:[#allocation2 + $0x328] sm:$0xff]  ;;  %2023 = vst [vmem:[#allocation2 + $0x2a0] sm:$0x1c] %v2008_v58  ;;  %1879 = vst [vmem:[#allocation2 + $0x2a8] ss:$-124 sps:$4 sm:$0x83] %v1864_v40   ;;  %2561 = vrot.lane.b32.xlu1 %v2551_v13, %s13736_s15 }
 0x1b3   :  { %3634 = vmatprep.subr.mxu0 %v3356_v21  ;;  %2559 = vrot.lane.b32.xlu0 %v2550_v10, %s13736_s15  ;;  %v1909_v13 = vrot.slane %v1893_v25, 4 }
 0x1b4   :  { %3635 = vmatpush1.msra.mxu0 %v3355_v39  ;;  %v2126_v57 = vpop.permute.xlu1 %2125  ;;  %v9631_v23 = vpop.permute.xlu0 %1999  ;;  %v3374_v48 = vld [vmem:[#allocation2 + $0x3b8] sm:$0xff] }
 0x1b5   :  { %v2136_v52 = vsel %vm13752_vm15, %v9294_v3, %v2126_v57  ;;  %v2009_v54 = vsel %vm13704_vm10, %v1998_v37, %v9631_v23  ;;  %3703 = vmatprep.subr.mxu1 %v3374_v48  ;;  %v3373_v42 = vld [vmem:[#allocation2 + $0x3b0] sm:$0xff]  ;;  %v2029_v37 = vld [vmem:[%s13626_s0 + $0x8] sm:$0x38] }
 0x1b6   :  { %2151 = vst [vmem:[#allocation2 + $0x2a0] sm:$0xe0] %v2136_v52  ;;  %2024 = vst [vmem:[#allocation2 + $0x2a8] sm:$0x1c] %v2009_v54  ;;  %2697 = vrot.lane.b32.xlu1 %v2687_v4, %s13737_s30  ;;  %3704 = vmatpush1.msra.mxu1 %v3373_v42  ;;  %v2045_v21 = vrot.slane %v2029_v37, 1 }
 0x1b7   :  { %2695 = vrot.lane.b32.xlu0 %v2686_v34, %s13737_s30  ;;  %v2157_v34 = vld [vmem:[%s13626_s0 + $0x8] sm:$0x38]  ;;  %v2028_v52 = vld [vmem:[%s13626_s0] sm:$0x38] }
 0x1b8   :  { %v2250_v3 = vpop.permute.xlu1 %2249  ;;  %v9645_v35 = vpop.permute.xlu0 %2127  ;;  %v2173_v51 = vrot.slane %v2157_v34, 6 }
 0x1b9   :  { %v2258_v59 = vsel %vm2251_vm7, %v9576_v53, %v2250_v3  ;;  %2275 = vst.msk [vmem:[#allocation2 + $0x338] sm:$0x7] %vm13698_vm11, %v2250_v3  ;;  %v2137_v60 = vsel %vm13752_vm15, %v2126_v57, %v9645_v35  ;;  %vm13755_vm15 = vcmask 523264   ;;  %vm13702_vm11 = vcmask 492544  }
 0x1ba   :  { %2273 = vst [vmem:[#allocation2 + $0x330] sm:$0x7] %v2258_v59  ;;  %2152 = vst [vmem:[#allocation2 + $0x2a8] sm:$0xe0] %v2137_v60  ;;  %2693 = vrot.lane.b32.xlu1 %v2685_v63, %s13737_s30  ;;  %v1492_v59 = vld [vmem:[%s13626_s0 + $0x8] sm:$0x38] }
 0x1bb   :  { %2557 = vrot.lane.b32.xlu0 %v2549_v19, %s13736_s15 }
 0x1bc   :  { %v1452_v15 = vpop.permute.xlu1 %1451  ;;  %v2378_v0 = vpop.permute.xlu0 %2377 }
 0x1bd   :  { %v1462_v44 = vsel %vm13753_vm12, %v9314_v17, %v1452_v15  ;;  %v2386_v53 = vsel %vm13699_vm8, %v9590_v5, %v2378_v0  ;;  %2403 = vst.msk [vmem:[#allocation2 + $0x338] sm:$0x38] %vm13697_vm14, %v2378_v0  ;;  %v2405_v17 = vld [vmem:[%s13626_s0 + $0x8] sm:$0x38]  ;;  %vm13754_vm12 = vcmask 515072   ;;  %v3339_v26 = vld [vmem:[#allocation2 + $0x2a0] sm:$0xff] }
 0x1be   :  { %1477 = vst [vmem:[#allocation2 + $0x220] ss:$-124 sps:$4 sm:$0xc1] %v1462_v44   ;;  %2401 = vst [vmem:[#allocation2 + $0x330] sm:$0x38] %v2386_v53  ;;  %2304 = vrot.lane.b32.xlu1 %v2294_v61, %s13738_s29  ;;  %vm13703_vm14 = vcmask 498695  }
 0x1bf   :  { %2302 = vrot.lane.b32.xlu0 %v2293_v18, %s13738_s29  ;;  %vm13700_vm8 = vcmask 487426   ;;  %v2156_v18 = vld [vmem:[%s13626_s0] sm:$0x38]  ;;  %v1508_v53 = vrot.slane %v1492_v59, 5 }
 0x1c0   :  { %v1597_v7 = vpop.permute.xlu1 %1596  ;;  %v9667_v8 = vpop.permute.xlu0 %1453 }
 0x1c1   :  { %v1607_v5 = vsel %vm13754_vm12, %v9328_v30, %v1597_v7  ;;  %v1463_v31 = vsel %vm13755_vm15, %v1452_v15, %v9667_v8  ;;  %v3340_v12 = vld [vmem:[#allocation2 + $0x2a8] sm:$0xff]  ;;  %v1894_v30 = vld [vmem:[%s13626_s0 + $0x10] sm:$0x38]  ;;  %vm13756_vm12 = vcmask 506880   ;;  %vm13757_vm15 = vcmask 515072  }
 0x1c2   :  { %1622 = vst [vmem:[#allocation2 + $0x220] sm:$0xe] %v1607_v5  ;;  %1478 = vst [vmem:[#allocation2 + $0x228] ss:$-124 sps:$4 sm:$0xc1] %v1463_v31   ;;  %2424 = vrot.lane.b32.xlu1 %v2406_v33, %s13739_s26  ;;  %3636 = vmatprep.subr.mxu0 %v3340_v12  ;;  %v1910_v47 = vrot.slane %v1894_v30, 4 }
 0x1c3   :  { %2422 = vrot.lane.b32.xlu0 %v2405_v17, %s13739_s26  ;;  %3637 = vmatpush1.msra.mxu0 %v3339_v26  ;;  %v2172_v33 = vrot.slane %v2156_v18, 6  ;;  %v1509_v26 = vrot.slane %v1493_v9, 5 }
 0x1c4   :  { %v1725_v20 = vpop.permute.xlu1 %1724  ;;  %v9687_v24 = vpop.permute.xlu0 %1598  ;;  %v3358_v50 = vld [vmem:[#allocation2 + $0x338] sm:$0xff] }
 0x1c5   :  { %v1735_v28 = vsel %vm13756_vm12, %v9342_v45, %v1725_v20  ;;  %v1608_v22 = vsel %vm13757_vm15, %v1597_v7, %v9687_v24  ;;  %3705 = vmatprep.subr.mxu1 %v3358_v50  ;;  %v3357_v29 = vld [vmem:[#allocation2 + $0x330] sm:$0xff]  ;;  %vm13701_vm15 = vcmask 261125  }
 0x1c6   :  { %1750 = vst [vmem:[#allocation2 + $0x220] sm:$0x70] %v1735_v28  ;;  %1623 = vst [vmem:[#allocation2 + $0x228] sm:$0xe] %v1608_v22  ;;  %2420 = vrot.lane.b32.xlu1 %v2404_v11, %s13739_s26  ;;  %3706 = vmatpush1.msra.mxu1 %v3357_v29  ;;  %v2030_v45 = vld [vmem:[%s13626_s0 + $0x10] sm:$0x38] }
 0x1c7   :  { %2300 = vrot.lane.b32.xlu0 %v2292_v6, %s13738_s29  ;;  %v2046_v40 = vrot.slane %v2030_v45, 1  ;;  %v1756_v11 = vld [vmem:[%s13626_s0 + $0x8] sm:$0x38] }
 0x1c8   :  { %v1857_v10 = vpop.permute.xlu1 %1856  ;;  %v9701_v36 = vpop.permute.xlu0 %1726  ;;  %v1772_v28 = vrot.slane %v1756_v11, 7 }
 0x1c9   :  { %v1865_v46 = vsel %vm1858_vm9, %v9617_v38, %v1857_v10  ;;  %1882 = vst.msk [vmem:[#allocation2 + $0x238] sm:$0x80] %vm13703_vm14, %v1857_v10  ;;  %v1736_v58 = vsel %vm13756_vm12, %v1725_v20, %v9701_v36  ;;  %v2158_v38 = vld [vmem:[%s13626_s0 + $0x10] sm:$0x38]  ;;  %vm13758_vm12 = vcmask 261120   ;;  %vm13706_vm14 = vcmask 516096  }
 0x1ca   :  { %1891 = vst.msk [vmem:[#allocation2 + $0x2b8] sm:$0x3] %vm13702_vm11, %v1857_v10  ;;  %1880 = vst [vmem:[#allocation2 + $0x2b0] ss:$-124 sps:$4 sm:$0x83] %v1865_v46   ;;  %1920 = vrot.lane.b32.xlu1 %v1910_v47, %s13725_s12  ;;  %v2174_v48 = vrot.slane %v2158_v38, 6 }
 0x1cb   :  { %1751 = vst [vmem:[#allocation2 + $0x228] sm:$0x70] %v1736_v58  ;;  %1918 = vrot.lane.b32.xlu0 %v1909_v13, %s13725_s12  ;;  %vm13709_vm11 = vcmask 523270   ;;  %v1757_v13 = vld [vmem:[%s13626_s0 + $0x10] sm:$0x38] }
 0x1cc   :  { %v2130_v39 = vpop.permute.xlu1 %2129  ;;  %v2002_v4 = vpop.permute.xlu0 %2001  ;;  %v1773_v37 = vrot.slane %v1757_v13, 7  ;;  %v1491_v46 = vld [vmem:[%s13626_s0] sm:$0x38] }
 0x1cd   :  { %v2138_v43 = vsel %vm13758_vm12, %v9645_v35, %v2130_v39  ;;  %2155 = vst.msk [vmem:[#allocation2 + $0x2b8] sm:$0xe0] %vm13701_vm15, %v2130_v39  ;;  %v2010_v57 = vsel %vm13704_vm10, %v9631_v23, %v2002_v4  ;;  %v1892_v23 = vld [vmem:[%s13626_s0] sm:$0x38]  ;;  %vm13759_vm12 = vcmask 760832   ;;  %v2044_v35 = vrot.slane %v2028_v52, 1 }
 0x1ce   :  { %2027 = vst.msk [vmem:[#allocation2 + $0x2b8] sm:$0x1c] %vm13700_vm8, %v2002_v4  ;;  %2153 = vst [vmem:[#allocation2 + $0x2b0] sm:$0xe0] %v2138_v43  ;;  %2056 = vrot.lane.b32.xlu1 %v2046_v40, %s13726_s23  ;;  %v3323_v3 = vld [vmem:[#allocation2 + $0x220] sm:$0xff]  ;;  %v1908_v41 = vrot.slane %v1892_v23, 4 }
 0x1cf   :  { %2025 = vst [vmem:[#allocation2 + $0x2b0] sm:$0x1c] %v2010_v57  ;;  %2054 = vrot.lane.b32.xlu0 %v2045_v21, %s13726_s23  ;;  %vm13760_vm8 = vmmov %vm13759_vm12  ;;  %vm1625_vm15 = vcmask 510977   ;;  %vm13705_vm10 = vcmask 505860   ;;  %v1507_v34 = vrot.slane %v1491_v46, 5 }
 0x1d0   :  { %v9731_v54 = vpop.permute.xlu1 %1205  ;;  %v1204_v42 = vpop.permute.xlu0 %1203  ;;  %v1755_v57 = vld [vmem:[%s13626_s0] sm:$0x38] }
 0x1d1   :  { %v1214_v63 = vsel %vm13759_vm12, %v9356_v55, %v1204_v42  ;;  %v1215_v19 = vsel %vm13760_vm8, %v1204_v42, %v9731_v54  ;;  %vm13761_vm8 = vcmask 752640   ;;  %v1771_v23 = vrot.slane %v1755_v57, 7 }
 0x1d2   :  { %v3324_v1 = vld [vmem:[#allocation2 + $0x228] sm:$0xff]  ;;  %1229 = vst [vmem:[#allocation2 + $0x1a0] sm:$0x7] %v1214_v63  ;;  %1230 = vst [vmem:[#allocation2 + $0x1a8] sm:$0x7] %v1215_v19  ;;  %2184 = vrot.lane.b32.xlu1 %v2174_v48, %s13727_s14 }
 0x1d3   :  { %3638 = vmatprep.subr.mxu0 %v3324_v1  ;;  %2182 = vrot.lane.b32.xlu0 %v2173_v51, %s13727_s14  ;;  %vm13762_vm12 = vmmov %vm13761_vm8  ;;  %v1627_v51 = vld [vmem:[%s13626_s0] sm:$0x38]  ;;  %v1236_v19 = vld [vmem:[%s13626_s0 + $0x10] sm:$0x38] }
 0x1d4   :  { %3639 = vmatpush1.msra.mxu0 %v3323_v3  ;;  %v9745_v55 = vpop.permute.xlu1 %1333  ;;  %v1332_v60 = vpop.permute.xlu0 %1331  ;;  %v1643_v63 = vrot.slane %v1627_v51, 2  ;;  %v1235_v3 = vld [vmem:[%s13626_s0 + $0x8] sm:$0x38] }
 0x1d5   :  { %v3342_v61 = vld [vmem:[#allocation2 + $0x2b8] sm:$0xff]  ;;  %v1342_v15 = vsel %vm13761_vm8, %v9370_v62, %v1332_v60  ;;  %v1343_v0 = vsel %vm13762_vm12, %v1332_v60, %v9745_v55  ;;  %v1628_v62 = vld [vmem:[%s13626_s0 + $0x8] sm:$0x38]  ;;  %vm13763_vm8 = vcmask 515072   ;;  %vm13764_vm12 = vcmask 523264  }
 0x1d6   :  { %3707 = vmatprep.subr.mxu1 %v3342_v61  ;;  %v3341_v44 = vld [vmem:[#allocation2 + $0x2b0] sm:$0xff]  ;;  %1357 = vst [vmem:[#allocation2 + $0x1a0] sm:$0x38] %v1342_v15  ;;  %1358 = vst [vmem:[#allocation2 + $0x1a8] sm:$0x38] %v1343_v0  ;;  %2052 = vrot.lane.b32.xlu1 %v2044_v35, %s13726_s23  ;;  %v1644_v12 = vrot.slane %v1628_v62, 2 }
 0x1d7   :  { %3708 = vmatpush1.msra.mxu1 %v3341_v44  ;;  %1916 = vrot.lane.b32.xlu0 %v1908_v41, %s13725_s12  ;;  %v2769_v35 = vld [vmem:[%s13626_s0 + $0x18] sm:$0x38]  ;;  %v2770_v41 = vld [vmem:[%s13626_s0 + $0x20] sm:$0x38]  ;;  %v1252_v15 = vrot.slane %v1236_v19, 3  ;;  %v1251_v0 = vrot.slane %v1235_v3, 3 }
 0x1d8   :  { %v1601_v7 = vpop.permute.xlu1 %1600  ;;  %v1456_v17 = vpop.permute.xlu0 %1455  ;;  %v2783_v61 = vrot.slane %v2769_v35, 7  ;;  %v2784_v18 = vrot.slane %v2770_v41, 7  ;;  %v851_v51 = vld [vmem:[%s13626_s0 + $0x8] sm:$0x38] }
 0x1d9   :  { %v1609_v5 = vsel %vm13763_vm8, %v9687_v24, %v1601_v7  ;;  %1626 = vst.msk [vmem:[#allocation2 + $0x238] sm:$0xe] %vm1625_vm15, %v1601_v7  ;;  %v1464_v31 = vsel %vm13764_vm12, %v9667_v8, %v1456_v17  ;;  %v1629_v8 = vld [vmem:[%s13626_s0 + $0x10] sm:$0x38]  ;;  %vm13765_vm8 = vcmask 506880   ;;  %vm13766_vm12 = vcmask 777216  }
 0x1da   :  { %1481 = vst.msk [vmem:[#allocation2 + $0x1b8] sm:$0xc0] %vm13709_vm11, %v1456_v17  ;;  %1624 = vst [vmem:[#allocation2 + $0x230] sm:$0xe] %v1609_v5  ;;  %1517 = vrot.lane.b32.xlu1 %v1508_v53, %s13728_s17  ;;  %v1645_v22 = vrot.slane %v1629_v8, 2  ;;  %vm13711_vm11 = vcmask 774146  }
 0x1db   :  { %1490 = vst.msk [vmem:[#allocation2 + $0x238] sm:$0x1] %vm13706_vm14, %v1456_v17  ;;  %1479 = vst [vmem:[#allocation2 + $0x230] ss:$-124 sps:$4 sm:$0xc1] %v1464_v31   ;;  %2180 = vrot.lane.b32.xlu0 %v2172_v33, %s13727_s14  ;;  %vm13707_vm14 = vcmask 750595  }
 0x1dc   :  { %v811_v6 = vpop.permute.xlu1 %810  ;;  %v1729_v30 = vpop.permute.xlu0 %1728  ;;  %2797 = vst [vmem:[#allocation2 + $0x3d0] sm:$0x70] %v2783_v61  ;;  %2798 = vst [vmem:[#allocation2 + $0x3d8] sm:$0x70] %v2784_v18  ;;  %v1364_v7 = vld [vmem:[%s13626_s0 + $0x10] sm:$0x38] }
 0x1dd   :  { %v821_v20 = vsel %vm816_vm13, %v9384_v16, %v811_v6  ;;  %v1737_v24 = vsel %vm13765_vm8, %v9701_v36, %v1729_v30  ;;  %1754 = vst.msk [vmem:[#allocation2 + $0x238] sm:$0x70] %vm13705_vm10, %v1729_v30  ;;  %v3308_v50 = vld [vmem:[#allocation2 + $0x1a8] sm:$0xff]  ;;  %v3307_v25 = vld [vmem:[#allocation2 + $0x1a0] sm:$0xff]  ;;  %vm13767_vm8 = vcmask 769024   ;;  %vm13708_vm10 = vcmask 755712  }
 0x1de   :  { %836 = vst [vmem:[#allocation2 + $0x120] ss:$-124 sps:$4 sm:$0x83] %v821_v20   ;;  %1752 = vst [vmem:[#allocation2 + $0x230] sm:$0x70] %v1737_v24  ;;  %1653 = vrot.lane.b32.xlu1 %v1644_v12, %s13729_s28  ;;  %3640 = vmatprep.subr.mxu0 %v3308_v50  ;;  %v867_v19 = vrot.slane %v851_v51, 4 }
 0x1df   :  { %1519 = vrot.lane.b32.xlu0 %v1509_v26, %s13728_s17  ;;  %3641 = vmatpush1.msra.mxu0 %v3307_v25  ;;  %v3202_v16 = vld [vmem:[%s13626_s0 + $0x20] sm:$0x38]  ;;  %v1363_v31 = vld [vmem:[%s13626_s0 + $0x8] sm:$0x38]  ;;  %v451_v51 = vld [vmem:[%s13626_s0 + $0x10] sm:$0x38] }
 0x1e0   :  { %v956_v29 = vpop.permute.xlu1 %955  ;;  %v9787_v47 = vpop.permute.xlu0 %812  ;;  %v3216_v36 = vrot.slane %v3202_v16, 3  ;;  %v2869_v12 = vld [vmem:[%s13626_s0 + $0x20] sm:$0x38]  ;;  %v987_v3 = vld [vmem:[%s13626_s0 + $0x8] sm:$0x38] }
 0x1e1   :  { %v966_v45 = vsel %vm13766_vm12, %v9404_v14, %v956_v29  ;;  %v822_v10 = vsel %vm816_vm13, %v811_v6, %v9787_v47  ;;  %v3203_v14 = vld [vmem:[%s13626_s0 + $0x28] sm:$0x38]  ;;  %v2883_v8 = vrot.slane %v2869_v12, 4  ;;  %v2987_v50 = vld [vmem:[%s13626_s0 + $0x20] sm:$0x38] }
 0x1e2   :  { %981 = vst [vmem:[#allocation2 + $0x120] sm:$0x1c] %v966_v45  ;;  %837 = vst [vmem:[#allocation2 + $0x128] ss:$-124 sps:$4 sm:$0x83] %v822_v10   ;;  %1781 = vrot.lane.b32.xlu1 %v1772_v28, %s13730_s27  ;;  %v3217_v43 = vrot.slane %v3203_v14, 3 }
 0x1e3   :  { %1655 = vrot.lane.b32.xlu0 %v1645_v22, %s13729_s28  ;;  %v3001_v16 = vrot.slane %v2987_v50, 1  ;;  %v3098_v45 = vld [vmem:[%s13626_s0 + $0x20] sm:$0x38]  ;;  %v2672_v50 = vld [vmem:[%s13626_s0 + $0x18] sm:$0x38] }
 0x1e4   :  { %v1084_v58 = vpop.permute.xlu1 %1083  ;;  %v9801_v40 = vpop.permute.xlu0 %957  ;;  %v3326_v21 = vld [vmem:[#allocation2 + $0x238] sm:$0xff]  ;;  %v3112_v46 = vrot.slane %v3098_v45, 6  ;;  %v1234_v14 = vld [vmem:[%s13626_s0] sm:$0x38] }
 0x1e5   :  { %v1094_v38 = vsel %vm13767_vm8, %v9418_v27, %v1084_v58  ;;  %v967_v39 = vsel %vm13766_vm12, %v956_v29, %v9801_v40  ;;  %3709 = vmatprep.subr.mxu1 %v3326_v21  ;;  %v3325_v4 = vld [vmem:[#allocation2 + $0x230] sm:$0xff]  ;;  %vm13768_vm8 = vcmask 760832   ;;  %vm13769_vm12 = vcmask 769024   ;;  %v3099_v29 = vld [vmem:[%s13626_s0 + $0x28] sm:$0x38] }
 0x1e6   :  { %1109 = vst [vmem:[#allocation2 + $0x120] sm:$0xe0] %v1094_v38  ;;  %982 = vst [vmem:[#allocation2 + $0x128] sm:$0x1c] %v967_v39  ;;  %3226 = vrot.lane.b32.xlu1 %v3216_v36, %s13733_s24  ;;  %3710 = vmatpush1.msra.mxu1 %v3325_v4  ;;  %v850_v45 = vld [vmem:[%s13626_s0] sm:$0x38] }
 0x1e7   :  { %1783 = vrot.lane.b32.xlu0 %v1773_v37, %s13730_s27  ;;  %v3113_v37 = vrot.slane %v3099_v29, 6  ;;  %v2688_v29 = vrot.slane %v2672_v50, 2  ;;  %v713_v50 = vld [vmem:[%s13626_s0] sm:$0x38] }
 0x1e8   :  { %v1208_v27 = vpop.permute.xlu1 %1207  ;;  %v9815_v48 = vpop.permute.xlu0 %1085 }
 0x1e9   :  { %v1216_v52 = vsel %vm13768_vm8, %v9731_v54, %v1208_v27  ;;  %1233 = vst.msk [vmem:[#allocation2 + $0x1b8] sm:$0x7] %vm13708_vm10, %v1208_v27  ;;  %v1095_v42 = vsel %vm13769_vm12, %v1084_v58, %v9815_v48  ;;  %vm13770_vm8 = vcmask 752640   ;;  %vm13771_vm12 = vcmask 1014784  }
 0x1ea   :  { %1231 = vst [vmem:[#allocation2 + $0x1b0] sm:$0x7] %v1216_v52  ;;  %1110 = vst [vmem:[#allocation2 + $0x128] sm:$0xe0] %v1095_v42  ;;  %1515 = vrot.lane.b32.xlu1 %v1507_v34, %s13728_s17  ;;  %vm13712_vm10 = vcmask 769029  }
 0x1eb   :  { %3228 = vrot.lane.b32.xlu0 %v3217_v43, %s13733_s24  ;;  %v1362_v34 = vld [vmem:[%s13626_s0] sm:$0x38]  ;;  %v852_v43 = vld [vmem:[%s13626_s0 + $0x10] sm:$0x38] }
 0x1ec   :  { %v410_v1 = vpop.permute.xlu1 %409  ;;  %v1336_v54 = vpop.permute.xlu0 %1335 }
 0x1ed   :  { %v420_v59 = vsel %vm415_vm2, %v9432_v56, %v410_v1  ;;  %v1344_v60 = vsel %vm13770_vm8, %v9745_v55, %v1336_v54  ;;  %1361 = vst.msk [vmem:[#allocation2 + $0x1b8] sm:$0x38] %vm13707_vm14, %v1336_v54  ;;  %v3291_v62 = vld [vmem:[#allocation2 + $0x120] sm:$0xff]  ;;  %vm13713_vm8 = vcmask 785415   ;;  %vm13710_vm14 = vcmask 779264  }
 0x1ee   :  { %435 = vst [vmem:[#allocation2 + $0xa0] ss:$-124 sps:$4 sm:$0xc1] %v420_v59   ;;  %1359 = vst [vmem:[#allocation2 + $0x1b0] sm:$0x38] %v1344_v60  ;;  %1779 = vrot.lane.b32.xlu1 %v1771_v23, %s13730_s27 }
 0x1ef   :  { %1651 = vrot.lane.b32.xlu0 %v1643_v63, %s13729_s28  ;;  %v868_v63 = vrot.slane %v852_v43, 4 }
 0x1f0   :  { %v555_v44 = vpop.permute.xlu1 %554  ;;  %v9846_v53 = vpop.permute.xlu0 %411 }
 0x1f1   :  { %v565_v56 = vsel %vm560_vm4, %v9446_v49, %v555_v44  ;;  %v421_v55 = vsel %vm415_vm2, %v410_v1, %v9846_v53  ;;  %v3292_v33 = vld [vmem:[#allocation2 + $0x128] sm:$0xff]  ;;  %v988_v1 = vld [vmem:[%s13626_s0 + $0x10] sm:$0x38] }
 0x1f2   :  { %580 = vst [vmem:[#allocation2 + $0xa0] sm:$0xe] %v565_v56  ;;  %436 = vst [vmem:[#allocation2 + $0xa8] ss:$-124 sps:$4 sm:$0xc1] %v421_v55   ;;  %1262 = vrot.lane.b32.xlu1 %v1252_v15, %s13731_s25  ;;  %3642 = vmatprep.subr.mxu0 %v3292_v33  ;;  %v1004_v18 = vrot.slane %v988_v1, 1 }
 0x1f3   :  { %1260 = vrot.lane.b32.xlu0 %v1251_v0, %s13731_s25  ;;  %3643 = vmatpush1.msra.mxu0 %v3291_v62  ;;  %v2870_v49 = vld [vmem:[%s13626_s0 + $0x28] sm:$0x38]  ;;  %v1003_v15 = vrot.slane %v987_v3, 1  ;;  %v1116_v0 = vld [vmem:[%s13626_s0 + $0x10] sm:$0x38]  ;;  %v8176_v33 = vld [vmem:[#allocation2 + $0x40] sm:$0xff] }
 0x1f4   :  { %v683_v17 = vpop.permute.xlu1 %682  ;;  %v9860_v9 = vpop.permute.xlu0 %556  ;;  %v3310_v5 = vld [vmem:[#allocation2 + $0x1b8] sm:$0xff]  ;;  %v2884_v30 = vrot.slane %v2870_v49, 4  ;;  %v8175_v56 = vld [vmem:[%s13627_s1] sm:$0x3f]  ;;  %v714_v1 = vld [vmem:[%s13626_s0 + $0x8] sm:$0x38] }
 0x1f5   :  { %v693_v26 = vsel %vm13771_vm12, %v9460_v2, %v683_v17  ;;  %v566_v11 = vsel %vm560_vm4, %v555_v44, %v9860_v9  ;;  %3711 = vmatprep.subr.mxu1 %v3310_v5  ;;  %v3309_v6 = vld [vmem:[#allocation2 + $0x1b0] sm:$0xff]  ;;  %v2988_v2 = vld [vmem:[%s13626_s0 + $0x28] sm:$0x38]  ;;  %v2536_v5 = vld [vmem:[%s13626_s0 + $0x18] sm:$0x38] }
 0x1f6   :  { %708 = vst [vmem:[#allocation2 + $0xa0] sm:$0x70] %v693_v26  ;;  %581 = vst [vmem:[#allocation2 + $0xa8] sm:$0xe] %v566_v11  ;;  %1382 = vrot.lane.b32.xlu1 %v1364_v7, %s13732_s21  ;;  %3712 = vmatpush1.msra.mxu1 %v3309_v6  ;;  %v3002_v22 = vrot.slane %v2988_v2, 1  ;;  %v1132_v7 = vrot.slane %v1116_v0, 6 }
 0x1f7   :  { %1380 = vrot.lane.b32.xlu0 %v1363_v31, %s13732_s21  ;;  %v2673_v2 = vld [vmem:[%s13626_s0 + $0x20] sm:$0x38]  ;;  %v587_v3 = vld [vmem:[%s13626_s0 + $0x10] sm:$0x38] }
 0x1f8   :  { %v815_v20 = vpop.permute.xlu1 %814  ;;  %v9877_v24 = vpop.permute.xlu0 %684  ;;  %v715_v0 = vld [vmem:[%s13626_s0 + $0x10] sm:$0x38] }
 0x1f9   :  { %v823_v25 = vsel %vm816_vm13, %v9787_v47, %v815_v20  ;;  %840 = vst.msk [vmem:[#allocation2 + $0xb8] sm:$0x80] %vm13713_vm8, %v815_v20  ;;  %v694_v28 = vsel %vm13771_vm12, %v683_v17, %v9877_v24  ;;  %vm13772_vm12 = vcmask 769024   ;;  %vm13715_vm8 = vcmask 1013764   ;;  %v2537_v17 = vld [vmem:[%s13626_s0 + $0x20] sm:$0x38] }
 0x1fa   :  { %849 = vst.msk [vmem:[#allocation2 + $0x138] sm:$0x3] %vm13710_vm14, %v815_v20  ;;  %838 = vst [vmem:[#allocation2 + $0x130] ss:$-124 sps:$4 sm:$0x83] %v823_v25   ;;  %2895 = vrot.lane.b32.xlu1 %v2884_v30, %s13734_s18  ;;  %vm13773_vm14 = vcmask 777216  }
 0x1fb   :  { %709 = vst [vmem:[#allocation2 + $0xa8] sm:$0x70] %v694_v28  ;;  %2893 = vrot.lane.b32.xlu0 %v2883_v8, %s13734_s18  ;;  %v2553_v6 = vrot.slane %v2537_v17, 5  ;;  %v2552_v8 = vrot.slane %v2536_v5, 5 }
 0x1fc   :  { %v1088_v47 = vpop.permute.xlu1 %1087  ;;  %v960_v13 = vpop.permute.xlu0 %959 }
 0x1fd   :  { %v1096_v10 = vsel %vm13772_vm12, %v9815_v48, %v1088_v47  ;;  %1113 = vst.msk [vmem:[#allocation2 + $0x138] sm:$0xe0] %vm13712_vm10, %v1088_v47  ;;  %v968_v36 = vsel %vm13773_vm14, %v9801_v40, %v960_v13  ;;  %v3275_v4 = vld [vmem:[#allocation2 + $0xa0] sm:$0xff]  ;;  %vm583_vm14 = vcmask 1018881   ;;  %vm438_vm12 = vcmask 1031174  }
 0x1fe   :  { %985 = vst.msk [vmem:[#allocation2 + $0x138] sm:$0x1c] %vm13711_vm11, %v960_v13  ;;  %1111 = vst [vmem:[#allocation2 + $0x130] sm:$0xe0] %v1096_v10  ;;  %3013 = vrot.lane.b32.xlu1 %v3002_v22, %s13749_s8  ;;  %vm13714_vm11 = vcmask 1024000   ;;  %vm13716_vm10 = vcmask 1037315  }
 0x1ff   :  { %983 = vst [vmem:[#allocation2 + $0x130] sm:$0x1c] %v968_v36  ;;  %3011 = vrot.lane.b32.xlu0 %v3001_v16, %s13749_s8  ;;  %v2689_v16 = vrot.slane %v2673_v2, 2  ;;  %v986_v47 = vld [vmem:[%s13626_s0] sm:$0x38] }
 0x200   :  { %v292_v58 = vpop.permute.xlu1 %291  ;;  %v290_v21 = vpop.permute.xlu0 %289  ;;  %v216_v36 = vld [vmem:[%s13626_s0 + $0x8] sm:$0x38] }
 0x201   :  { %v300_v38 = vsel %vm295_vm1, %v9480_v32, %v290_v21  ;;  %v301_v40 = vsel %vm295_vm1, %v290_v21, %v292_v58  ;;  %v1250_v32 = vrot.slane %v1234_v14, 3  ;;  %v232_v21 = vrot.slane %v216_v36, 3 }
 0x202   :  { %v3276_v39 = vld [vmem:[#allocation2 + $0xa8] sm:$0xff]  ;;  %315 = vst [vmem:[#allocation2 + $0x20] sm:$0x38] %v300_v38  ;;  %316 = vst [vmem:[#allocation2 + $0x28] sm:$0x38] %v301_v40  ;;  %3124 = vrot.lane.b32.xlu1 %v3113_v37, %s13735_s13  ;;  %v866_v14 = vrot.slane %v850_v45, 4 }
 0x203   :  { %3644 = vmatprep.subr.mxu0 %v3276_v39  ;;  %3122 = vrot.lane.b32.xlu0 %v3112_v46, %s13735_s13  ;;  %v450_v38 = vld [vmem:[%s13626_s0 + $0x8] sm:$0x38]  ;;  %v1114_v39 = vld [vmem:[%s13626_s0] sm:$0x38]  ;;  %248 = vst [vmem:[#allocation2 + $0x48] sm:$0x7] %v232_v21 }
 0x204   :  { %3645 = vmatpush1.msra.mxu0 %v3275_v4  ;;  %v559_v57 = vpop.permute.xlu1 %558  ;;  %v414_v27 = vpop.permute.xlu0 %413  ;;  %v466_v43 = vrot.slane %v450_v38, 5  ;;  %v729_v45 = vrot.slane %v713_v50, 7  ;;  %v1896_v38 = vld [vmem:[%s13626_s0 + $0x20] sm:$0x38] }
 0x205   :  { %v3294_v48 = vld [vmem:[#allocation2 + $0x138] sm:$0xff]  ;;  %v567_v52 = vsel %vm560_vm4, %v9860_v9, %v559_v57  ;;  %584 = vst.msk [vmem:[#allocation2 + $0xb8] sm:$0xe] %vm583_vm14, %v559_v57  ;;  %v422_v42 = vsel %vm415_vm2, %v9846_v53, %v414_v27  ;;  %v1115_v53 = vld [vmem:[%s13626_s0 + $0x8] sm:$0x38]  ;;  %v1130_v57 = vrot.slane %v1114_v39, 6 }
 0x206   :  { %439 = vst.msk [vmem:[#allocation2 + $0x38] sm:$0xc0] %vm438_vm12, %v414_v27  ;;  %3713 = vmatprep.subr.mxu1 %v3294_v48  ;;  %v3293_v23 = vld [vmem:[#allocation2 + $0x130] sm:$0xff]  ;;  %582 = vst [vmem:[#allocation2 + $0xb0] sm:$0xe] %v567_v52  ;;  %1378 = vrot.lane.b32.xlu1 %v1362_v34, %s13732_s21  ;;  %v1131_v49 = vrot.slane %v1115_v53, 6 }
 0x207   :  { %448 = vst.msk [vmem:[#allocation2 + $0xb8] sm:$0x1] %vm13714_vm11, %v414_v27  ;;  %437 = vst [vmem:[#allocation2 + $0xb0] ss:$-124 sps:$4 sm:$0xc1] %v422_v42   ;;  %3714 = vmatpush1.msra.mxu1 %v3293_v23  ;;  %1258 = vrot.lane.b32.xlu0 %v1250_v32, %s13731_s25  ;;  %vm13774_vm11 = vcmask 1014784  }
 0x208   :  { %v294_v54 = vpop.permute.xlu1 %293  ;;  %v586_v27 = vld [vmem:[%s13626_s0 + $0x8] sm:$0x38]  ;;  %v215_v53 = vld [vmem:[%s13626_s0] sm:$0x38] }
 0x209   :  { %v302_v35 = vsel %vm295_vm1, %v292_v58, %v294_v54  ;;  %319 = vst.msk [vmem:[#allocation2 + $0x38] sm:$0x38] %vm13716_vm10, %v294_v54  ;;  %v687_v41 = vpop.permute.xlu0 %686  ;;  %v3260_v59 = vld [vmem:[#allocation2 + $0x28] sm:$0xff]  ;;  %v3259_v60 = vld [vmem:[#allocation2 + $0x20] sm:$0xff]  ;;  %v1002_v58 = vrot.slane %v986_v47, 1  ;;  %vm13826_vm10 = vcmask 515072  }
 0x20a   :  { %317 = vst [vmem:[#allocation2 + $0x30] sm:$0x38] %v302_v35  ;;  %v695_v61 = vsel %vm13774_vm11, %v9877_v24, %v687_v41  ;;  %712 = vst.msk [vmem:[#allocation2 + $0xb8] sm:$0x70] %vm13715_vm8, %v687_v41  ;;  %878 = vrot.lane.b32.xlu1 %v868_v63, %s13746_s10  ;;  %3646 = vmatprep.subr.mxu0 %v3260_v59  ;;  %v602_v63 = vrot.slane %v586_v27, 2  ;;  %v1912_v27 = vrot.slane %v1896_v38, 4 }
 0x20b   :  { %710 = vst [vmem:[#allocation2 + $0xb0] sm:$0x70] %v695_v61  ;;  %876 = vrot.lane.b32.xlu0 %v867_v19, %s13746_s10  ;;  %3647 = vmatpush1.msra.mxu0 %v3259_v60  ;;  %vm13775_vm8 = vmmov %vm13774_vm11  ;;  %v467_v19 = vrot.slane %v451_v51, 5  ;;  %v730_v60 = vrot.slane %v714_v1, 7  ;;  %v603_v61 = vrot.slane %v587_v3, 2 }
 0x20c   :  { %v9946_v44 = vpop.permute.xlu1 %3224  ;;  %7931 = vmatmul.mubr.msk.f32.vlgmr.msra.gmra.mxu0 %vm3421_vm0, %v8175_v56  ;;  %v321_v39 = vld [vmem:[%s13626_s0 + $0x8] sm:$0x38]  ;;  %v2032_v51 = vld [vmem:[%s13626_s0 + $0x20] sm:$0x38] }
 0x20d   :  { %v3223_v55 = vpop.permute.xlu0 %3222  ;;  %3822 = vmatprep.mubr.f32.mxu0 %v8176_v33  ;;  %v2048_v1 = vrot.slane %v2032_v51, 1 }
 0x20e   :  { %v3235_v62 = vsel %vm13774_vm11, %v3223_v55, %v9946_v44  ;;  %1014 = vrot.lane.b32.xlu1 %v1004_v18, %s13747_s22  ;;  %v2279_v18 = vld [vmem:[%s13626_s0 + $0x18] sm:$0x38] }
 0x20f   :  { %3248 = vst [vmem:[#allocation2 + $0x4c8] sm:$0x7] %v3235_v62  ;;  %1012 = vrot.lane.b32.xlu0 %v1003_v15, %s13747_s22 }
 0x210   :  { %v2890_v9 = vpop.permute.xlu1 %2889  ;;  %v3262_v30 = vld [vmem:[#allocation2 + $0x38] sm:$0xff] }
 0x211   :  { %v3221_v31 = vpop.permute.xlu0 %3220  ;;  %v3278_v12 = vld [vmem:[#allocation2 + $0xb8] sm:$0xff]  ;;  %v3261_v24 = vld [vmem:[#allocation2 + $0x30] sm:$0xff] }
 0x212   :  { %v3234_v26 = vsel %vm13775_vm8, %v3221_v31, %v3223_v55  ;;  %3715 = vmatprep.subr.mxu1 %v3278_v12  ;;  %1142 = vrot.lane.b32.xlu1 %v1132_v7, %s13748_s16  ;;  %v3277_v11 = vld [vmem:[#allocation2 + $0xb0] sm:$0xff]  ;;  %v231_v55 = vrot.slane %v215_v53, 3  ;;  %v2295_v7 = vrot.slane %v2279_v18, 3  ;;  %vm13776_vm8 = vcmask 244736   ;;  %v1494_v53 = vld [vmem:[%s13626_s0 + $0x18] sm:$0x38] }
 0x213   :  { %3247 = vst [vmem:[#allocation2 + $0x4c0] sm:$0x7] %v3234_v26  ;;  %1140 = vrot.lane.b32.xlu0 %v1131_v49, %s13748_s16  ;;  %3716 = vmatpush1.msra.mxu1 %v3277_v11  ;;  %v731_v49 = vrot.slane %v715_v0, 7  ;;  %v2407_v26 = vld [vmem:[%s13626_s0 + $0x18] sm:$0x38]  ;;  %vm13777_vm11 = vmmov %vm13776_vm8 }
 0x214   :  { %3717 = vmatprep.subr.mxu1 %v3262_v30  ;;  %v3008_v20 = vpop.permute.xlu1 %3007  ;;  %247 = vst [vmem:[#allocation2 + $0x40] sm:$0x7] %v231_v55 }
 0x215   :  { %v9974_v25 = vpop.permute.xlu0 %2891  ;;  %3718 = vmatpush1.msra.mxu1 %v3261_v24 }
 0x216   :  { %v2902_v28 = vsel %vm295_vm1, %v2890_v9, %v9974_v25  ;;  %2565 = vrot.lane.b32.xlu1 %v2553_v6, %s13736_s15  ;;  %v3408_v22 = vld [vmem:[#allocation2 + $0x4c8] sm:$0x7]  ;;  %7934 = vmatmul.mubr.msk.f32.vlgmr.msra.gmra.mxu1 %vm3421_vm0, %v8175_v56  ;;  %v449_v6 = vld [vmem:[%s13626_s0] sm:$0x38] }
 0x217   :  { %2915 = vst [vmem:[#allocation2 + $0x448] ss:$-124 sps:$4 sm:$0x83] %v2902_v28   ;;  %2563 = vrot.lane.b32.xlu0 %v2552_v8, %s13736_s15  ;;  %7935 = vmatprep.subr.msk.mxu0 %vm3425_vm3, %v3408_v22  ;;  %v465_v24 = vrot.slane %v449_v6, 5  ;;  %v2408_v22 = vld [vmem:[%s13626_s0 + $0x20] sm:$0x38] }
 0x218   :  { %v3119_v13 = vpop.permute.xlu1 %3118  ;;  %3893 = vmatprep.mubr.f32.mxu1 %v8176_v33 }
 0x219   :  { %v9988_v10 = vpop.permute.xlu0 %3009 }
 0x21a   :  { %v3020_v37 = vsel %vm415_vm2, %v3008_v20, %v9988_v10  ;;  %2701 = vrot.lane.b32.xlu1 %v2689_v16, %s13737_s30  ;;  %v3407_v46 = vld [vmem:[#allocation2 + $0x4c0] sm:$0x7]  ;;  %v585_v16 = vld [vmem:[%s13626_s0] sm:$0x38] }
 0x21b   :  { %3033 = vst [vmem:[#allocation2 + $0x448] sm:$0x1c] %v3020_v37  ;;  %2699 = vrot.lane.b32.xlu0 %v2688_v29, %s13737_s30  ;;  %7936 = vmatpush1.msk.msra.mxu0 %vm3425_vm3, %v3407_v46  ;;  %v601_v36 = vrot.slane %v585_v16, 2 }
 0x21c   :  { %v2888_v40 = vpop.permute.xlu1 %2887 }
 0x21d   :  { %v2901_v4 = vsel %vm295_vm1, %v2888_v40, %v2890_v9  ;;  %v10005_v34 = vpop.permute.xlu0 %3120  ;;  %v2280_v9 = vld [vmem:[%s13626_s0 + $0x20] sm:$0x38] }
 0x21e   :  { %2914 = vst [vmem:[#allocation2 + $0x440] ss:$-124 sps:$4 sm:$0x83] %v2901_v4   ;;  %v3131_v32 = vsel %vm560_vm4, %v3119_v13, %v10005_v34  ;;  %1010 = vrot.lane.b32.xlu1 %v1002_v58, %s13747_s22  ;;  %v2296_v11 = vrot.slane %v2280_v9, 3  ;;  %v1895_v4 = vld [vmem:[%s13626_s0 + $0x18] sm:$0x38] }
 0x21f   :  { %3144 = vst [vmem:[#allocation2 + $0x448] sm:$0xe0] %v3131_v32  ;;  %874 = vrot.lane.b32.xlu0 %v866_v14, %s13746_s10  ;;  %v322_v14 = vld [vmem:[%s13626_s0 + $0x10] sm:$0x38]  ;;  %v320_v9 = vld [vmem:[%s13626_s0] sm:$0x38] }
 0x220   :  { %v3117_v48 = vpop.permute.xlu1 %3116 }
 0x221   :  { %v3130_v52 = vsel %vm560_vm4, %v3117_v48, %v3119_v13  ;;  %v3006_v42 = vpop.permute.xlu0 %3005  ;;  %v1911_v48 = vrot.slane %v1895_v4, 4 }
 0x222   :  { %3143 = vst [vmem:[#allocation2 + $0x440] sm:$0xe0] %v3130_v52  ;;  %v3019_v23 = vsel %vm415_vm2, %v3006_v42, %v3008_v20  ;;  %475 = vrot.lane.b32.xlu1 %v466_v43, %s13749_s8  ;;  %v2031_v42 = vld [vmem:[%s13626_s0 + $0x18] sm:$0x38] }
 0x223   :  { %3032 = vst [vmem:[#allocation2 + $0x440] sm:$0x1c] %v3019_v23  ;;  %1138 = vrot.lane.b32.xlu0 %v1130_v57, %s13748_s16  ;;  %v2047_v3 = vrot.slane %v2031_v42, 1 }
 0x224   :  { %v10024_v54 = vpop.permute.xlu1 %2561 }
 0x225   :  { %v2560_v35 = vpop.permute.xlu0 %2559 }
 0x226   :  { %v2574_v41 = vsel %vm2499_vm5, %v2560_v35, %v10024_v54  ;;  %611 = vrot.lane.b32.xlu1 %v602_v63, %s13735_s13  ;;  %v3392_v59 = vld [vmem:[#allocation2 + $0x448] sm:$0xff] }
 0x227   :  { %2589 = vst [vmem:[#allocation2 + $0x3c8] ss:$-124 sps:$4 sm:$0xc1] %v2574_v41   ;;  %477 = vrot.lane.b32.xlu0 %v467_v19, %s13749_s8  ;;  %3772 = vmatprep.subr.mxu0 %v3392_v59  ;;  %v2159_v59 = vld [vmem:[%s13626_s0 + $0x18] sm:$0x38] }
 0x228   :  { %v10036_v15 = vpop.permute.xlu1 %2697  ;;  %v2175_v0 = vrot.slane %v2159_v59, 6 }
 0x229   :  { %v2696_v56 = vpop.permute.xlu0 %2695 }
 0x22a   :  { %v2710_v33 = vsel %vm2644_vm6, %v2696_v56, %v10036_v15  ;;  %739 = vrot.lane.b32.xlu1 %v730_v60, %s13733_s24  ;;  %v3391_v62 = vld [vmem:[#allocation2 + $0x440] sm:$0xff] }
 0x22b   :  { %2725 = vst [vmem:[#allocation2 + $0x3c8] sm:$0xe] %v2710_v33  ;;  %613 = vrot.lane.b32.xlu0 %v603_v61, %s13735_s13  ;;  %3773 = vmatpush1.msra.mxu0 %v3391_v62 }
 0x22c   :  { %v2694_v17 = vpop.permute.xlu1 %2693 }
 0x22d   :  { %v2709_v5 = vsel %vm2644_vm6, %v2694_v17, %v2696_v56  ;;  %v2558_v31 = vpop.permute.xlu0 %2557 }
 0x22e   :  { %2724 = vst [vmem:[#allocation2 + $0x3c0] sm:$0xe] %v2709_v5  ;;  %v2573_v12 = vsel %vm2499_vm5, %v2558_v31, %v2560_v35  ;;  %2306 = vrot.lane.b32.xlu1 %v2295_v7, %s13738_s29  ;;  %v2160_v35 = vld [vmem:[%s13626_s0 + $0x20] sm:$0x38]  ;;  %v1510_v7 = vrot.slane %v1494_v53, 5 }
 0x22f   :  { %2588 = vst [vmem:[#allocation2 + $0x3c0] ss:$-124 sps:$4 sm:$0xc1] %v2573_v12   ;;  %741 = vrot.lane.b32.xlu0 %v731_v49, %s13733_s24  ;;  %v2176_v18 = vrot.slane %v2160_v35, 6  ;;  %v1630_v49 = vld [vmem:[%s13626_s0 + $0x18] sm:$0x38] }
 0x230   :  { %v10061_v30 = vpop.permute.xlu1 %2304  ;;  %v1495_v5 = vld [vmem:[%s13626_s0 + $0x20] sm:$0x38] }
 0x231   :  { %v2303_v8 = vpop.permute.xlu0 %2302  ;;  %v1511_v6 = vrot.slane %v1495_v5, 5 }
 0x232   :  { %v2317_v2 = vsel %vm2251_vm7, %v2303_v8, %v10061_v30  ;;  %2426 = vrot.lane.b32.xlu1 %v2407_v26, %s13739_s26  ;;  %v3376_v20 = vld [vmem:[#allocation2 + $0x3c8] sm:$0xff] }
 0x233   :  { %2332 = vst [vmem:[#allocation2 + $0x348] sm:$0x7] %v2317_v2  ;;  %2308 = vrot.lane.b32.xlu0 %v2296_v11, %s13738_s29  ;;  %3774 = vmatprep.subr.mxu0 %v3376_v20  ;;  %v1646_v11 = vrot.slane %v1630_v49, 2  ;;  %v1631_v20 = vld [vmem:[%s13626_s0 + $0x20] sm:$0x38] }
 0x234   :  { %v10070_v28 = vpop.permute.xlu1 %2424  ;;  %v1647_v16 = vrot.slane %v1631_v20, 2 }
 0x235   :  { %v2423_v29 = vpop.permute.xlu0 %2422 }
 0x236   :  { %v2437_v47 = vsel %vm13776_vm8, %v2423_v29, %v10070_v28  ;;  %473 = vrot.lane.b32.xlu1 %v465_v24, %s13749_s8  ;;  %v3375_v13 = vld [vmem:[#allocation2 + $0x3c0] sm:$0xff]  ;;  %vm13778_vm8 = vcmask 490496  }
 0x237   :  { %2452 = vst [vmem:[#allocation2 + $0x348] sm:$0x38] %v2437_v47  ;;  %2428 = vrot.lane.b32.xlu0 %v2408_v22, %s13739_s26  ;;  %3775 = vmatpush1.msra.mxu0 %v3375_v13  ;;  %v1759_v13 = vld [vmem:[%s13626_s0 + $0x20] sm:$0x38] }
 0x238   :  { %v2421_v37 = vpop.permute.xlu1 %2420 }
 0x239   :  { %v2436_v46 = vsel %vm13777_vm11, %v2421_v37, %v2423_v29  ;;  %v2301_v58 = vpop.permute.xlu0 %2300  ;;  %vm13779_vm11 = vcmask 261120   ;;  %v1237_v29 = vld [vmem:[%s13626_s0 + $0x18] sm:$0x38] }
 0x23a   :  { %2451 = vst [vmem:[#allocation2 + $0x340] sm:$0x38] %v2436_v46  ;;  %v2316_v21 = vsel %vm2251_vm7, %v2301_v58, %v2303_v8  ;;  %737 = vrot.lane.b32.xlu1 %v729_v45, %s13733_s24  ;;  %v1758_v8 = vld [vmem:[%s13626_s0 + $0x18] sm:$0x38]  ;;  %v1253_v46 = vrot.slane %v1237_v29, 3  ;;  %v1775_v58 = vrot.slane %v1759_v13, 7 }
 0x23b   :  { %2331 = vst [vmem:[#allocation2 + $0x340] sm:$0x7] %v2316_v21  ;;  %609 = vrot.lane.b32.xlu0 %v601_v36, %s13735_s13  ;;  %v1774_v22 = vrot.slane %v1758_v8, 7 }
 0x23c   :  { %v10092_v40 = vpop.permute.xlu1 %1920 }
 0x23d   :  { %v1919_v32 = vpop.permute.xlu0 %1918 }
 0x23e   :  { %v1933_v43 = vsel %vm1858_vm9, %v1919_v32, %v10092_v40  ;;  %340 = vrot.lane.b32.xlu1 %v322_v14, %s13734_s18  ;;  %v3360_v57 = vld [vmem:[#allocation2 + $0x348] sm:$0xff]  ;;  %v1238_v14 = vld [vmem:[%s13626_s0 + $0x20] sm:$0x38] }
 0x23f   :  { %1948 = vst [vmem:[#allocation2 + $0x2c8] ss:$-124 sps:$4 sm:$0x83] %v1933_v43   ;;  %338 = vrot.lane.b32.xlu0 %v321_v39, %s13734_s18  ;;  %3776 = vmatprep.subr.mxu0 %v3360_v57  ;;  %v1254_v43 = vrot.slane %v1238_v14, 3 }
 0x240   :  { %v10107_v52 = vpop.permute.xlu1 %2056 }
 0x241   :  { %v2055_v23 = vpop.permute.xlu0 %2054 }
 0x242   :  { %v2069_v63 = vsel %vm13778_vm8, %v2055_v23, %v10107_v52  ;;  %1924 = vrot.lane.b32.xlu1 %v1912_v27, %s13725_s12  ;;  %v3359_v19 = vld [vmem:[#allocation2 + $0x340] sm:$0xff] }
 0x243   :  { %2084 = vst [vmem:[#allocation2 + $0x2c8] sm:$0x1c] %v2069_v63  ;;  %1922 = vrot.lane.b32.xlu0 %v1911_v48, %s13725_s12  ;;  %3777 = vmatpush1.msra.mxu0 %v3359_v19  ;;  %v1366_v19 = vld [vmem:[%s13626_s0 + $0x20] sm:$0x38] }
 0x244   :  { %v10119_v41 = vpop.permute.xlu1 %2184 }
 0x245   :  { %v2183_v60 = vpop.permute.xlu0 %2182 }
 0x246   :  { %v2197_v61 = vsel %vm13779_vm11, %v2183_v60, %v10119_v41  ;;  %2060 = vrot.lane.b32.xlu1 %v2048_v1, %s13726_s23  ;;  %v854_v1 = vld [vmem:[%s13626_s0 + $0x20] sm:$0x38] }
 0x247   :  { %2212 = vst [vmem:[#allocation2 + $0x2c8] sm:$0xe0] %v2197_v61  ;;  %2058 = vrot.lane.b32.xlu0 %v2047_v3, %s13726_s23  ;;  %v217_v3 = vld [vmem:[%s13626_s0 + $0x10] sm:$0x38]  ;;  %v870_v53 = vrot.slane %v854_v1, 4 }
 0x248   :  { %v2053_v56 = vpop.permute.xlu1 %2052  ;;  %v323_v1 = vld [vmem:[%s13626_s0 + $0x18] sm:$0x38] }
 0x249   :  { %v2068_v55 = vsel %vm13778_vm8, %v2053_v56, %v2055_v23  ;;  %v1917_v33 = vpop.permute.xlu0 %1916  ;;  %vm13780_vm8 = vcmask 523264   ;;  %v989_v23 = vld [vmem:[%s13626_s0 + $0x18] sm:$0x38] }
 0x24a   :  { %2083 = vst [vmem:[#allocation2 + $0x2c0] sm:$0x1c] %v2068_v55  ;;  %v1932_v62 = vsel %vm1858_vm9, %v1917_v33, %v1919_v32  ;;  %2188 = vrot.lane.b32.xlu1 %v2176_v18, %s13727_s14  ;;  %v1365_v32 = vld [vmem:[%s13626_s0 + $0x18] sm:$0x38]  ;;  %v990_v33 = vld [vmem:[%s13626_s0 + $0x20] sm:$0x38] }
 0x24b   :  { %1947 = vst [vmem:[#allocation2 + $0x2c0] ss:$-124 sps:$4 sm:$0x83] %v1932_v62   ;;  %2186 = vrot.lane.b32.xlu0 %v2175_v0, %s13727_s14  ;;  %v1005_v0 = vrot.slane %v989_v23, 1  ;;  %v1117_v56 = vld [vmem:[%s13626_s0 + $0x18] sm:$0x38] }
 0x24c   :  { %v1518_v17 = vpop.permute.xlu1 %1517 }
 0x24d   :  { %v2181_v31 = vpop.permute.xlu0 %2180 }
 0x24e   :  { %v2196_v12 = vsel %vm13779_vm11, %v2181_v31, %v2183_v60  ;;  %1521 = vrot.lane.b32.xlu1 %v1510_v7, %s13728_s17  ;;  %v3344_v26 = vld [vmem:[#allocation2 + $0x2c8] sm:$0xff]  ;;  %vm13781_vm11 = vcmask 515072   ;;  %v233_v60 = vrot.slane %v217_v3, 3  ;;  %v1006_v31 = vrot.slane %v990_v33, 1 }
 0x24f   :  { %2211 = vst [vmem:[#allocation2 + $0x2c0] sm:$0xe0] %v2196_v12  ;;  %336 = vrot.lane.b32.xlu0 %v320_v9, %s13734_s18  ;;  %3778 = vmatprep.subr.mxu0 %v3344_v26  ;;  %v218_v9 = vld [vmem:[%s13626_s0 + $0x18] sm:$0x38] }
 0x250   :  { %v1654_v2 = vpop.permute.xlu1 %1653  ;;  %249 = vst [vmem:[#allocation2 + $0x50] sm:$0x7] %v233_v60  ;;  %v452_v12 = vld [vmem:[%s13626_s0 + $0x18] sm:$0x38]  ;;  %v234_v26 = vrot.slane %v218_v9, 3 }
 0x251   :  { %v10153_v24 = vpop.permute.xlu0 %1519 }
 0x252   :  { %v1532_v50 = vsel %vm13780_vm8, %v1518_v17, %v10153_v24  ;;  %1657 = vrot.lane.b32.xlu1 %v1646_v11, %s13729_s28  ;;  %vm13782_vm8 = vcmask 1014784   ;;  %250 = vst [vmem:[#allocation2 + $0x58] sm:$0x7] %v234_v26 }
 0x253   :  { %1547 = vst [vmem:[#allocation2 + $0x248] ss:$-124 sps:$4 sm:$0xc1] %v1532_v50   ;;  %1523 = vrot.lane.b32.xlu0 %v1511_v6, %s13728_s17  ;;  %v1118_v6 = vld [vmem:[%s13626_s0 + $0x20] sm:$0x38]  ;;  %v468_v50 = vrot.slane %v452_v12, 5 }
 0x254   :  { %v1782_v47 = vpop.permute.xlu1 %1781 }
 0x255   :  { %v10165_v45 = vpop.permute.xlu0 %1655 }
 0x256   :  { %v1668_v36 = vsel %vm13781_vm11, %v1654_v2, %v10165_v45  ;;  %1785 = vrot.lane.b32.xlu1 %v1774_v22, %s13730_s27  ;;  %v3343_v37 = vld [vmem:[#allocation2 + $0x2c0] sm:$0xff]  ;;  %vm13783_vm11 = vcmask 506880   ;;  %v1134_v22 = vrot.slane %v1118_v6, 6 }
 0x257   :  { %1683 = vst [vmem:[#allocation2 + $0x248] sm:$0xe] %v1668_v36  ;;  %1659 = vrot.lane.b32.xlu0 %v1647_v16, %s13729_s28  ;;  %3779 = vmatpush1.msra.mxu0 %v3343_v37  ;;  %v588_v16 = vld [vmem:[%s13626_s0 + $0x18] sm:$0x38] }
 0x258   :  { %v3227_v21 = vpop.permute.xlu1 %3226 }
 0x259   :  { %v3236_v38 = vsel %vm13782_vm8, %v9946_v44, %v3227_v21  ;;  %v10176_v39 = vpop.permute.xlu0 %1783  ;;  %v853_v44 = vld [vmem:[%s13626_s0 + $0x18] sm:$0x38]  ;;  %vm13784_vm8 = vcmask 523264  }
 0x25a   :  { %3249 = vst [vmem:[#allocation2 + $0x4d0] sm:$0x7] %v3236_v38  ;;  %v1796_v4 = vsel %vm13783_vm11, %v1782_v47, %v10176_v39  ;;  %1264 = vrot.lane.b32.xlu1 %v1253_v46, %s13731_s25  ;;  %vm13785_vm11 = vcmask 1014784   ;;  %v869_v42 = vrot.slane %v853_v44, 4  ;;  %v604_v46 = vrot.slane %v588_v16, 2 }
 0x25b   :  { %1811 = vst [vmem:[#allocation2 + $0x248] sm:$0x70] %v1796_v4  ;;  %1787 = vrot.lane.b32.xlu0 %v1775_v58, %s13730_s27 }
 0x25c   :  { %v1516_v57 = vpop.permute.xlu1 %1515 }
 0x25d   :  { %v1531_v27 = vsel %vm13784_vm8, %v1516_v57, %v1518_v17  ;;  %v10189_v48 = vpop.permute.xlu0 %3228  ;;  %vm13786_vm8 = vcmask 506880   ;;  %v1133_v17 = vrot.slane %v1117_v56, 6  ;;  %v2871_v56 = vld [vmem:[%s13626_s0 + $0x30] sm:$0x38] }
 0x25e   :  { %1546 = vst [vmem:[#allocation2 + $0x240] ss:$-124 sps:$4 sm:$0xc1] %v1531_v27   ;;  %v3237_v51 = vsel %vm13785_vm11, %v3227_v21, %v10189_v48  ;;  %1384 = vrot.lane.b32.xlu1 %v1365_v32, %s13732_s21  ;;  %vm13787_vm11 = vcmask 515072   ;;  %v716_v21 = vld [vmem:[%s13626_s0 + $0x18] sm:$0x38] }
 0x25f   :  { %3250 = vst [vmem:[#allocation2 + $0x4d8] sm:$0x7] %v3237_v51  ;;  %1266 = vrot.lane.b32.xlu0 %v1254_v43, %s13731_s25  ;;  %v732_v44 = vrot.slane %v716_v21, 7  ;;  %v2771_v27 = vld [vmem:[%s13626_s0 + $0x28] sm:$0x38]  ;;  %v2885_v26 = vrot.slane %v2871_v56, 4 }
 0x260   :  { %v1780_v63 = vpop.permute.xlu1 %1779 }
 0x261   :  { %v1795_v35 = vsel %vm13786_vm8, %v1780_v63, %v1782_v47  ;;  %v1652_v59 = vpop.permute.xlu0 %1651  ;;  %vm13788_vm8 = vcmask 760832   ;;  %v3409_v5 = vld [vmem:[#allocation2 + $0x4d0] sm:$0x7]  ;;  %v453_v47 = vld [vmem:[%s13626_s0 + $0x20] sm:$0x38] }
 0x262   :  { %1810 = vst [vmem:[#allocation2 + $0x240] sm:$0x70] %v1795_v35  ;;  %v1667_v61 = vsel %vm13787_vm11, %v1652_v59, %v1654_v2  ;;  %880 = vrot.lane.b32.xlu1 %v869_v42, %s13746_s10  ;;  %v3328_v18 = vld [vmem:[#allocation2 + $0x248] sm:$0xff]  ;;  %vm13789_vm11 = vcmask 752640   ;;  %v469_v58 = vrot.slane %v453_v47, 5  ;;  %v2785_v42 = vrot.slane %v2771_v27, 7 }
 0x263   :  { %1682 = vst [vmem:[#allocation2 + $0x240] sm:$0xe] %v1667_v61  ;;  %1386 = vrot.lane.b32.xlu0 %v1366_v19, %s13732_s21  ;;  %3780 = vmatprep.subr.mxu0 %v3328_v18  ;;  %v3204_v35 = vld [vmem:[%s13626_s0 + $0x30] sm:$0x38] }
 0x264   :  { %v10214_v55 = vpop.permute.xlu1 %1262  ;;  %2799 = vst [vmem:[#allocation2 + $0x3e0] sm:$0x70] %v2785_v42  ;;  %v3218_v18 = vrot.slane %v3204_v35, 3 }
 0x265   :  { %v10219_v62 = vpop.permute.xlu0 %1260 }
 0x266   :  { %v1275_v7 = vsel %vm13788_vm8, %v10219_v62, %v10214_v55  ;;  %1016 = vrot.lane.b32.xlu1 %v1005_v0, %s13747_s22  ;;  %v3410_v49 = vld [vmem:[#allocation2 + $0x4d8] sm:$0x7]  ;;  %vm13790_vm8 = vmmov %vm13789_vm11  ;;  %v2772_v0 = vld [vmem:[%s13626_s0 + $0x30] sm:$0x38] }
 0x267   :  { %1290 = vst [vmem:[#allocation2 + $0x1c8] sm:$0x7] %v1275_v7  ;;  %882 = vrot.lane.b32.xlu0 %v870_v53, %s13746_s10  ;;  %7938 = vmatprep.subr.msk.mxu1 %vm3425_vm3, %v3410_v49  ;;  %v2773_v53 = vld [vmem:[%s13626_s0 + $0x38] sm:$0x38]  ;;  %v2786_v33 = vrot.slane %v2772_v0, 7 }
 0x268   :  { %7939 = vmatpush1.msk.msra.mxu1 %vm3425_vm3, %v3409_v5  ;;  %v10234_v11 = vpop.permute.xlu1 %1382  ;;  %v324_v49 = vld [vmem:[%s13626_s0 + $0x20] sm:$0x38] }
 0x269   :  { %v1381_v8 = vpop.permute.xlu0 %1380  ;;  %2800 = vst [vmem:[#allocation2 + $0x3e8] sm:$0x70] %v2786_v33 }
 0x26a   :  { %v1395_v2 = vsel %vm13789_vm11, %v1381_v8, %v10234_v11  ;;  %1144 = vrot.lane.b32.xlu1 %v1133_v17, %s13748_s16  ;;  %v3327_v20 = vld [vmem:[#allocation2 + $0x240] sm:$0xff]  ;;  %vm13791_vm11 = vcmask 760832   ;;  %v3205_v17 = vld [vmem:[%s13626_s0 + $0x38] sm:$0x38] }
 0x26b   :  { %1410 = vst [vmem:[#allocation2 + $0x1c8] sm:$0x38] %v1395_v2  ;;  %1018 = vrot.lane.b32.xlu0 %v1006_v31, %s13747_s22  ;;  %3781 = vmatpush1.msra.mxu0 %v3327_v20  ;;  %v3219_v6 = vrot.slane %v3205_v17, 3  ;;  %v2872_v20 = vld [vmem:[%s13626_s0 + $0x38] sm:$0x38] }
 0x26c   :  { %v10246_v29 = vpop.permute.xlu1 %2895  ;;  %v2282_v17 = vld [vmem:[%s13626_s0 + $0x30] sm:$0x38] }
 0x26d   :  { %v2894_v13 = vpop.permute.xlu0 %2893 }
 0x26e   :  { %v2903_v36 = vsel %vm295_vm1, %v9974_v25, %v2894_v13  ;;  %v2904_v37 = vsel %vm295_vm1, %v2894_v13, %v10246_v29  ;;  %479 = vrot.lane.b32.xlu1 %v468_v50, %s13749_s8  ;;  %v589_v25 = vld [vmem:[%s13626_s0 + $0x20] sm:$0x38]  ;;  %v8228_v13 = vmov 0  }
 0x26f   :  { %2916 = vst [vmem:[#allocation2 + $0x450] ss:$-124 sps:$4 sm:$0x83] %v2903_v36   ;;  %2917 = vst [vmem:[#allocation2 + $0x458] ss:$-124 sps:$4 sm:$0x83] %v2904_v37   ;;  %1146 = vrot.lane.b32.xlu0 %v1134_v22, %s13748_s16  ;;  %8136 = vset.pattern.permute.xlu1 %v8228_v13 }
 0x270   :  { %v10260_v14 = vpop.permute.xlu1 %3013  ;;  %v605_v57 = vrot.slane %v589_v25, 2  ;;  %8135 = vset.pattern.permute.xlu0 %v8228_v13  ;;  %v2886_v36 = vrot.slane %v2872_v20, 4  ;;  %v3100_v37 = vld [vmem:[%s13626_s0 + $0x30] sm:$0x38] }
 0x271   :  { %v3012_v38 = vpop.permute.xlu0 %3011 }
 0x272   :  { %v3021_v4 = vsel %vm415_vm2, %v9988_v10, %v3012_v38  ;;  %v3022_v32 = vsel %vm415_vm2, %v3012_v38, %v10260_v14  ;;  %615 = vrot.lane.b32.xlu1 %v604_v46, %s13735_s13  ;;  %v3312_v43 = vld [vmem:[#allocation2 + $0x1c8] sm:$0xff]  ;;  %v717_v10 = vld [vmem:[%s13626_s0 + $0x20] sm:$0x38]  ;;  %v3114_v38 = vrot.slane %v3100_v37, 6  ;;  %v1898_v37 = vld [vmem:[%s13626_s0 + $0x30] sm:$0x38] }
 0x273   :  { %3034 = vst [vmem:[#allocation2 + $0x450] sm:$0x1c] %v3021_v4  ;;  %3035 = vst [vmem:[#allocation2 + $0x458] sm:$0x1c] %v3022_v32  ;;  %481 = vrot.lane.b32.xlu0 %v469_v58, %s13749_s8  ;;  %3782 = vmatprep.subr.mxu0 %v3312_v43  ;;  %v733_v3 = vrot.slane %v717_v10, 7 }
 0x274   :  { %v10274_v51 = vpop.permute.xlu1 %3124  ;;  %v2990_v58 = vld [vmem:[%s13626_s0 + $0x38] sm:$0x38]  ;;  %v2538_v32 = vld [vmem:[%s13626_s0 + $0x28] sm:$0x38] }
 0x275   :  { %v3123_v23 = vpop.permute.xlu0 %3122  ;;  %v3004_v4 = vrot.slane %v2990_v58, 1  ;;  %v2554_v42 = vrot.slane %v2538_v32, 5  ;;  %v2161_v32 = vld [vmem:[%s13626_s0 + $0x28] sm:$0x38] }
 0x276   :  { %v3132_v63 = vsel %vm560_vm4, %v10005_v34, %v3123_v23  ;;  %v3133_v19 = vsel %vm560_vm4, %v3123_v23, %v10274_v51  ;;  %743 = vrot.lane.b32.xlu1 %v732_v44, %s13733_s24  ;;  %v3101_v44 = vld [vmem:[%s13626_s0 + $0x38] sm:$0x38] }
 0x277   :  { %3145 = vst [vmem:[#allocation2 + $0x450] sm:$0xe0] %v3132_v63  ;;  %3146 = vst [vmem:[#allocation2 + $0x458] sm:$0xe0] %v3133_v19  ;;  %617 = vrot.lane.b32.xlu0 %v605_v57, %s13735_s13  ;;  %v3115_v23 = vrot.slane %v3101_v44, 6 }
 0x278   :  { %v1379_v34 = vpop.permute.xlu1 %1378  ;;  %v2674_v63 = vld [vmem:[%s13626_s0 + $0x28] sm:$0x38] }
 0x279   :  { %v1394_v59 = vsel %vm13790_vm8, %v1379_v34, %v1381_v8  ;;  %v1259_v60 = vpop.permute.xlu0 %1258  ;;  %v2989_v8 = vld [vmem:[%s13626_s0 + $0x30] sm:$0x38]  ;;  %vm13792_vm8 = vcmask 777216  }
 0x27a   :  { %1409 = vst [vmem:[#allocation2 + $0x1c0] sm:$0x38] %v1394_v59  ;;  %v1274_v61 = vsel %vm13791_vm11, %v1259_v60, %v10219_v62  ;;  %342 = vrot.lane.b32.xlu1 %v323_v1, %s13734_s18  ;;  %v2787_v62 = vrot.slane %v2773_v53, 7  ;;  %v3003_v47 = vrot.slane %v2989_v8, 1  ;;  %vm13793_vm11 = vcmask 769024  }
 0x27b   :  { %1289 = vst [vmem:[#allocation2 + $0x1c0] sm:$0x7] %v1274_v61  ;;  %745 = vrot.lane.b32.xlu0 %v733_v3, %s13733_s24  ;;  %v2690_v59 = vrot.slane %v2674_v63, 2  ;;  %v2281_v61 = vld [vmem:[%s13626_s0 + $0x28] sm:$0x38] }
 0x27c   :  { %v10305_v7 = vpop.permute.xlu1 %878  ;;  %2801 = vst [vmem:[#allocation2 + $0x3f0] sm:$0x70] %v2787_v62  ;;  %v2297_v33 = vrot.slane %v2281_v61, 3  ;;  %v1897_v8 = vld [vmem:[%s13626_s0 + $0x28] sm:$0x38] }
 0x27d   :  { %v10313_v9 = vpop.permute.xlu0 %876  ;;  %v1632_v61 = vld [vmem:[%s13626_s0 + $0x28] sm:$0x38] }
 0x27e   :  { %v891_v5 = vsel %vm816_vm13, %v10313_v9, %v10305_v7  ;;  %3230 = vrot.lane.b32.xlu1 %v3218_v18, %s13733_s24  ;;  %v3394_v31 = vld [vmem:[#allocation2 + $0x458] sm:$0xff]  ;;  %v3393_v12 = vld [vmem:[#allocation2 + $0x450] sm:$0xff] }
 0x27f   :  { %906 = vst [vmem:[#allocation2 + $0x148] ss:$-124 sps:$4 sm:$0x83] %v891_v5   ;;  %344 = vrot.lane.b32.xlu0 %v324_v49, %s13734_s18  ;;  %3843 = vmatprep.subr.mxu1 %v3394_v31 }
 0x280   :  { %3844 = vmatpush1.msra.mxu1 %v3393_v12  ;;  %v10323_v2 = vpop.permute.xlu1 %1014 }
 0x281   :  { %v1013_v50 = vpop.permute.xlu0 %1012 }
 0x282   :  { %v1027_v22 = vsel %vm13792_vm8, %v1013_v50, %v10323_v2  ;;  %2897 = vrot.lane.b32.xlu1 %v2885_v26, %s13734_s18  ;;  %v3311_v16 = vld [vmem:[#allocation2 + $0x1c0] sm:$0xff] }
 0x283   :  { %1042 = vst [vmem:[#allocation2 + $0x148] sm:$0x1c] %v1027_v22  ;;  %3232 = vrot.lane.b32.xlu0 %v3219_v6, %s13733_s24  ;;  %3783 = vmatpush1.msra.mxu0 %v3311_v16  ;;  %v2298_v6 = vrot.slane %v2282_v17, 3  ;;  %v1913_v16 = vrot.slane %v1897_v8, 4  ;;  %v1760_v17 = vld [vmem:[%s13626_s0 + $0x28] sm:$0x38] }
 0x284   :  { %v10335_v46 = vpop.permute.xlu1 %1142  ;;  %v1239_v8 = vld [vmem:[%s13626_s0 + $0x28] sm:$0x38] }
 0x285   :  { %v1141_v21 = vpop.permute.xlu0 %1140 }
 0x286   :  { %v1155_v25 = vsel %vm13793_vm11, %v1141_v21, %v10335_v46  ;;  %3015 = vrot.lane.b32.xlu1 %v3003_v47, %s13749_s8  ;;  %v2033_v47 = vld [vmem:[%s13626_s0 + $0x28] sm:$0x38] }
 0x287   :  { %1170 = vst [vmem:[#allocation2 + $0x148] sm:$0xe0] %v1155_v25  ;;  %2899 = vrot.lane.b32.xlu0 %v2886_v36, %s13734_s18  ;;  %v2410_v36 = vld [vmem:[%s13626_s0 + $0x30] sm:$0x38] }
 0x288   :  { %v10347_v43 = vpop.permute.xlu1 %2565 }
 0x289   :  { %v2564_v57 = vpop.permute.xlu0 %2563 }
 0x28a   :  { %v2575_v27 = vsel %vm2499_vm5, %v10024_v54, %v2564_v57  ;;  %v2576_v10 = vsel %vm2499_vm5, %v2564_v57, %v10347_v43  ;;  %3126 = vrot.lane.b32.xlu1 %v3114_v38, %s13735_s13  ;;  %v2539_v54 = vld [vmem:[%s13626_s0 + $0x30] sm:$0x38]  ;;  %v2049_v38 = vrot.slane %v2033_v47, 1 }
 0x28b   :  { %2590 = vst [vmem:[#allocation2 + $0x3d0] ss:$-124 sps:$4 sm:$0xc1] %v2575_v27   ;;  %2591 = vst [vmem:[#allocation2 + $0x3d8] ss:$-124 sps:$4 sm:$0xc1] %v2576_v10   ;;  %3017 = vrot.lane.b32.xlu0 %v3004_v4, %s13749_s8 }
 0x28c   :  { %v10361_v19 = vpop.permute.xlu1 %2701  ;;  %v2555_v60 = vrot.slane %v2539_v54, 5  ;;  %v1914_v4 = vrot.slane %v1898_v37, 4  ;;  %v2034_v57 = vld [vmem:[%s13626_s0 + $0x30] sm:$0x38]  ;;  %v1496_v54 = vld [vmem:[%s13626_s0 + $0x28] sm:$0x38] }
 0x28d   :  { %v2700_v1 = vpop.permute.xlu0 %2699  ;;  %v2050_v63 = vrot.slane %v2034_v57, 1 }
 0x28e   :  { %v2711_v3 = vsel %vm2644_vm6, %v10036_v15, %v2700_v1  ;;  %v2712_v35 = vsel %vm2644_vm6, %v2700_v1, %v10361_v19  ;;  %2567 = vrot.lane.b32.xlu1 %v2554_v42, %s13736_s15  ;;  %v3296_v34 = vld [vmem:[#allocation2 + $0x148] sm:$0xff]  ;;  %v2675_v15 = vld [vmem:[%s13626_s0 + $0x30] sm:$0x38] }
 0x28f   :  { %2726 = vst [vmem:[#allocation2 + $0x3d0] sm:$0xe] %v2711_v3  ;;  %2727 = vst [vmem:[#allocation2 + $0x3d8] sm:$0xe] %v2712_v35  ;;  %3128 = vrot.lane.b32.xlu0 %v3115_v23, %s13735_s13  ;;  %3784 = vmatprep.subr.mxu0 %v3296_v34  ;;  %v2691_v62 = vrot.slane %v2675_v15, 2  ;;  %v2177_v23 = vrot.slane %v2161_v32, 6 }
 0x290   :  { %v1011_v18 = vpop.permute.xlu1 %1010 }
 0x291   :  { %v1026_v0 = vsel %vm13792_vm8, %v1011_v18, %v1013_v50  ;;  %v875_v53 = vpop.permute.xlu0 %874  ;;  %vm13794_vm8 = vcmask 1014784  }
 0x292   :  { %1041 = vst [vmem:[#allocation2 + $0x140] sm:$0x1c] %v1026_v0  ;;  %v890_v56 = vsel %vm816_vm13, %v875_v53, %v10313_v9  ;;  %2703 = vrot.lane.b32.xlu1 %v2690_v59, %s13737_s30  ;;  %v2409_v9 = vld [vmem:[%s13626_s0 + $0x28] sm:$0x38]  ;;  %v1512_v59 = vrot.slane %v1496_v54, 5 }
 0x293   :  { %905 = vst [vmem:[#allocation2 + $0x140] ss:$-124 sps:$4 sm:$0x83] %v890_v56   ;;  %2569 = vrot.lane.b32.xlu0 %v2555_v60, %s13736_s15 }
 0x294   :  { %v476_v49 = vpop.permute.xlu1 %475 }
 0x295   :  { %v1139_v5 = vpop.permute.xlu0 %1138 }
 0x296   :  { %v1154_v31 = vsel %vm13793_vm11, %v1139_v5, %v1141_v21  ;;  %2310 = vrot.lane.b32.xlu1 %v2297_v33, %s13738_s29  ;;  %v3378_v12 = vld [vmem:[#allocation2 + $0x3d8] sm:$0xff]  ;;  %v3377_v26 = vld [vmem:[#allocation2 + $0x3d0] sm:$0xff]  ;;  %vm13795_vm11 = vcmask 244736   ;;  %v1648_v33 = vrot.slane %v1632_v61, 2 }
 0x297   :  { %1169 = vst [vmem:[#allocation2 + $0x140] sm:$0xe0] %v1154_v31  ;;  %2705 = vrot.lane.b32.xlu0 %v2691_v62, %s13737_s30  ;;  %3845 = vmatprep.subr.mxu1 %v3378_v12  ;;  %v1633_v5 = vld [vmem:[%s13626_s0 + $0x30] sm:$0x38] }
 0x298   :  { %3846 = vmatpush1.msra.mxu1 %v3377_v26  ;;  %v10395_v20 = vpop.permute.xlu1 %611 }
 0x299   :  { %v10397_v50 = vpop.permute.xlu0 %477 }
 0x29a   :  { %v490_v22 = vsel %vm415_vm2, %v476_v49, %v10397_v50  ;;  %2430 = vrot.lane.b32.xlu1 %v2409_v9, %s13739_s26  ;;  %v1776_v9 = vrot.slane %v1760_v17, 7 }
 0x29b   :  { %505 = vst [vmem:[#allocation2 + $0xc8] ss:$-124 sps:$4 sm:$0xc1] %v490_v22   ;;  %2312 = vrot.lane.b32.xlu0 %v2298_v6, %s13738_s29  ;;  %v1649_v6 = vrot.slane %v1633_v5, 2 }
 0x29c   :  { %v740_v13 = vpop.permute.xlu1 %739 }
 0x29d   :  { %v10412_v58 = vpop.permute.xlu0 %613 }
 0x29e   :  { %v626_v21 = vsel %vm560_vm4, %v10395_v20, %v10412_v58  ;;  %1926 = vrot.lane.b32.xlu1 %v1913_v16, %s13725_s12  ;;  %v3295_v25 = vld [vmem:[#allocation2 + $0x140] sm:$0xff]  ;;  %v1761_v16 = vld [vmem:[%s13626_s0 + $0x30] sm:$0x38] }
 0x29f   :  { %641 = vst [vmem:[#allocation2 + $0xc8] sm:$0xe] %v626_v21  ;;  %2432 = vrot.lane.b32.xlu0 %v2410_v36, %s13739_s26  ;;  %3785 = vmatpush1.msra.mxu0 %v3295_v25  ;;  %v1255_v36 = vrot.slane %v1239_v8, 3  ;;  %v1777_v21 = vrot.slane %v1761_v16, 7 }
 0x2a0   :  { %v2307_v44 = vpop.permute.xlu1 %2306 }
 0x2a1   :  { %v2318_v27 = vsel %vm2251_vm7, %v10061_v30, %v2307_v44  ;;  %v10427_v10 = vpop.permute.xlu0 %741  ;;  %v2162_v30 = vld [vmem:[%s13626_s0 + $0x30] sm:$0x38] }
 0x2a2   :  { %2333 = vst [vmem:[#allocation2 + $0x350] sm:$0x7] %v2318_v27  ;;  %v754_v42 = vsel %vm13794_vm8, %v740_v13, %v10427_v10  ;;  %2062 = vrot.lane.b32.xlu1 %v2049_v38, %s13726_s23  ;;  %v2178_v60 = vrot.slane %v2162_v30, 6  ;;  %vm13796_vm8 = vmmov %vm13795_vm11  ;;  %v1240_v38 = vld [vmem:[%s13626_s0 + $0x30] sm:$0x38] }
 0x2a3   :  { %769 = vst [vmem:[#allocation2 + $0xc8] sm:$0x70] %v754_v42  ;;  %1928 = vrot.lane.b32.xlu0 %v1914_v4, %s13725_s12  ;;  %v1367_v27 = vld [vmem:[%s13626_s0 + $0x28] sm:$0x38]  ;;  %v1256_v42 = vrot.slane %v1240_v38, 3 }
 0x2a4   :  { %v2427_v1 = vpop.permute.xlu1 %2426 }
 0x2a5   :  { %v2438_v3 = vsel %vm13795_vm11, %v10070_v28, %v2427_v1  ;;  %v10441_v35 = vpop.permute.xlu0 %2308  ;;  %v1497_v28 = vld [vmem:[%s13626_s0 + $0x30] sm:$0x38]  ;;  %vm13797_vm11 = vcmask 1014784  }
 0x2a6   :  { %2453 = vst [vmem:[#allocation2 + $0x350] sm:$0x38] %v2438_v3  ;;  %v2319_v34 = vsel %vm2251_vm7, %v2307_v44, %v10441_v35  ;;  %2190 = vrot.lane.b32.xlu1 %v2177_v23, %s13727_s14  ;;  %v1513_v62 = vrot.slane %v1497_v28, 5 }
 0x2a7   :  { %2334 = vst [vmem:[#allocation2 + $0x358] sm:$0x7] %v2319_v34  ;;  %2064 = vrot.lane.b32.xlu0 %v2050_v63, %s13726_s23  ;;  %v991_v34 = vld [vmem:[%s13626_s0 + $0x28] sm:$0x38] }
 0x2a8   :  { %v474_v18 = vpop.permute.xlu1 %473 }
 0x2a9   :  { %v489_v15 = vsel %vm415_vm2, %v474_v18, %v476_v49  ;;  %v10454_v0 = vpop.permute.xlu0 %2428 }
 0x2aa   :  { %504 = vst [vmem:[#allocation2 + $0xc0] ss:$-124 sps:$4 sm:$0xc1] %v489_v15   ;;  %v2439_v53 = vsel %vm13796_vm8, %v2427_v1, %v10454_v0  ;;  %1525 = vrot.lane.b32.xlu1 %v1512_v59, %s13728_s17  ;;  %v3280_v56 = vld [vmem:[#allocation2 + $0xc8] sm:$0xff]  ;;  %vm13798_vm8 = vcmask 490496   ;;  %v1007_v15 = vrot.slane %v991_v34, 1 }
 0x2ab   :  { %2454 = vst [vmem:[#allocation2 + $0x358] sm:$0x38] %v2439_v53  ;;  %2192 = vrot.lane.b32.xlu0 %v2178_v60, %s13727_s14  ;;  %3786 = vmatprep.subr.mxu0 %v3280_v56  ;;  %v856_v60 = vld [vmem:[%s13626_s0 + $0x30] sm:$0x38]  ;;  %v1119_v56 = vld [vmem:[%s13626_s0 + $0x28] sm:$0x38] }
 0x2ac   :  { %v738_v49 = vpop.permute.xlu1 %737  ;;  %v872_v53 = vrot.slane %v856_v60, 4 }
 0x2ad   :  { %v753_v31 = vsel %vm13797_vm11, %v738_v49, %v740_v13  ;;  %v610_v12 = vpop.permute.xlu0 %609  ;;  %v3361_v37 = vld [vmem:[#allocation2 + $0x350] sm:$0xff]  ;;  %vm13799_vm11 = vmmov %vm13798_vm8 }
 0x2ae   :  { %768 = vst [vmem:[#allocation2 + $0xc0] sm:$0x70] %v753_v31  ;;  %v625_v26 = vsel %vm560_vm4, %v610_v12, %v10395_v20  ;;  %1661 = vrot.lane.b32.xlu1 %v1648_v33, %s13729_s28  ;;  %v1135_v12 = vrot.slane %v1119_v56, 6 }
 0x2af   :  { %640 = vst [vmem:[#allocation2 + $0xc0] sm:$0xe] %v625_v26  ;;  %1527 = vrot.lane.b32.xlu0 %v1513_v62, %s13728_s17  ;;  %v219_v62 = vld [vmem:[%s13626_s0 + $0x20] sm:$0x38] }
 0x2b0   :  { %v10474_v22 = vpop.permute.xlu1 %340  ;;  %v235_v5 = vrot.slane %v219_v62, 3 }
 0x2b1   :  { %v339_v47 = vpop.permute.xlu0 %338 }
 0x2b2   :  { %v353_v20 = vsel %vm295_vm1, %v339_v47, %v10474_v22  ;;  %1789 = vrot.lane.b32.xlu1 %v1776_v9, %s13730_s27  ;;  %v3362_v13 = vld [vmem:[#allocation2 + $0x358] sm:$0xff]  ;;  %251 = vst [vmem:[#allocation2 + $0x60] sm:$0x7] %v235_v5 }
 0x2b3   :  { %368 = vst [vmem:[#allocation2 + $0x48] sm:$0x38] %v353_v20  ;;  %1663 = vrot.lane.b32.xlu0 %v1649_v6, %s13729_s28  ;;  %3847 = vmatprep.subr.mxu1 %v3362_v13  ;;  %v2540_v9 = vld [vmem:[%s13626_s0 + $0x38] sm:$0x38] }
 0x2b4   :  { %3848 = vmatpush1.msra.mxu1 %v3361_v37  ;;  %v10483_v25 = vpop.permute.xlu1 %1924  ;;  %v220_v37 = vld [vmem:[%s13626_s0 + $0x28] sm:$0x38] }
 0x2b5   :  { %v1923_v4 = vpop.permute.xlu0 %1922  ;;  %v236_v38 = vrot.slane %v220_v37, 3  ;;  %v2411_v37 = vld [vmem:[%s13626_s0 + $0x38] sm:$0x38] }
 0x2b6   :  { %v1934_v32 = vsel %vm1858_vm9, %v10092_v40, %v1923_v4  ;;  %v1935_v44 = vsel %vm1858_vm9, %v1923_v4, %v10483_v25  ;;  %1268 = vrot.lane.b32.xlu1 %v1255_v36, %s13731_s25  ;;  %v3279_v57 = vld [vmem:[#allocation2 + $0xc0] sm:$0xff]  ;;  %v855_v40 = vld [vmem:[%s13626_s0 + $0x28] sm:$0x38]  ;;  %v2556_v36 = vrot.slane %v2540_v9, 5 }
 0x2b7   :  { %1949 = vst [vmem:[#allocation2 + $0x2d0] ss:$-124 sps:$4 sm:$0x83] %v1934_v32   ;;  %1950 = vst [vmem:[#allocation2 + $0x2d8] ss:$-124 sps:$4 sm:$0x83] %v1935_v44   ;;  %1791 = vrot.lane.b32.xlu0 %v1777_v21, %s13730_s27  ;;  %3787 = vmatpush1.msra.mxu0 %v3279_v57 }
 0x2b8   :  { %v10500_v23 = vpop.permute.xlu1 %2060  ;;  %v871_v3 = vrot.slane %v855_v40, 4  ;;  %v454_v21 = vld [vmem:[%s13626_s0 + $0x28] sm:$0x38]  ;;  %v2676_v32 = vld [vmem:[%s13626_s0 + $0x38] sm:$0x38] }
 0x2b9   :  { %v2059_v63 = vpop.permute.xlu0 %2058  ;;  %252 = vst [vmem:[#allocation2 + $0x68] sm:$0x7] %v236_v38  ;;  %v470_v40 = vrot.slane %v454_v21, 5 }
 0x2ba   :  { %v2070_v54 = vsel %vm13798_vm8, %v10107_v52, %v2059_v63  ;;  %v2071_v1 = vsel %vm13799_vm11, %v2059_v63, %v10500_v23  ;;  %1388 = vrot.lane.b32.xlu1 %v1367_v27, %s13732_s21  ;;  %v3264_v30 = vld [vmem:[#allocation2 + $0x48] sm:$0xff]  ;;  %v1368_v52 = vld [vmem:[%s13626_s0 + $0x30] sm:$0x38]  ;;  %vm13800_vm8 = vcmask 261120   ;;  %v2692_v63 = vrot.slane %v2676_v32, 2 }
 0x2bb   :  { %2085 = vst [vmem:[#allocation2 + $0x2d0] sm:$0x1c] %v2070_v54  ;;  %2086 = vst [vmem:[#allocation2 + $0x2d8] sm:$0x1c] %v2071_v1  ;;  %1270 = vrot.lane.b32.xlu0 %v1256_v42, %s13731_s25  ;;  %3788 = vmatprep.subr.mxu0 %v3264_v30  ;;  %v10576_v1 = vld [vmem:[%s13627_s1] sm:$0x3f] }
 0x2bc   :  { %v10511_v59 = vpop.permute.xlu1 %2188  ;;  %vm13801_vm11 = vmmov %vm13800_vm8  ;;  %v455_v30 = vld [vmem:[%s13626_s0 + $0x30] sm:$0x38]  ;;  %s13986_s1 = sld [smem:[#allocation13_spill]] }
 0x2bd   :  { %v2187_v61 = vpop.permute.xlu0 %2186 }
 0x2be   :  { %v2198_v18 = vsel %vm13800_vm8, %v10119_v41, %v2187_v61  ;;  %v2199_v28 = vsel %vm13801_vm11, %v2187_v61, %v10511_v59  ;;  %884 = vrot.lane.b32.xlu1 %v871_v3, %s13746_s10  ;;  %v992_v41 = vld [vmem:[%s13626_s0 + $0x30] sm:$0x38]  ;;  %vm13802_vm8 = vcmask 523264   ;;  %vm13803_vm11 = vcmask 515072  }
 0x2bf   :  { %2213 = vst [vmem:[#allocation2 + $0x2d0] sm:$0xe0] %v2198_v18  ;;  %2214 = vst [vmem:[#allocation2 + $0x2d8] sm:$0xe0] %v2199_v28  ;;  %1390 = vrot.lane.b32.xlu0 %v1368_v52, %s13732_s21  ;;  %v1008_v26 = vrot.slane %v992_v41, 1  ;;  %v10587_v52 = vld [vmem:[#allocation2 + $0x70] sm:$0xff] }
 0x2c0   :  { %v1522_v33 = vpop.permute.xlu1 %1521  ;;  %v471_v18 = vrot.slane %v455_v30, 5 }
 0x2c1   :  { %v1533_v17 = vsel %vm13802_vm8, %v10153_v24, %v1522_v33  ;;  %v337_v49 = vpop.permute.xlu0 %336  ;;  %v1120_v24 = vld [vmem:[%s13626_s0 + $0x30] sm:$0x38] }
 0x2c2   :  { %1548 = vst [vmem:[#allocation2 + $0x250] ss:$-124 sps:$4 sm:$0xc1] %v1533_v17   ;;  %v352_v31 = vsel %vm295_vm1, %v337_v49, %v339_v47  ;;  %1020 = vrot.lane.b32.xlu1 %v1007_v15, %s13747_s22  ;;  %v591_v15 = vld [vmem:[%s13626_s0 + $0x30] sm:$0x38] }
 0x2c3   :  { %367 = vst [vmem:[#allocation2 + $0x40] sm:$0x38] %v352_v31  ;;  %886 = vrot.lane.b32.xlu0 %v872_v53, %s13746_s10  ;;  %v607_v62 = vrot.slane %v591_v15, 2  ;;  %v2283_v17 = vld [vmem:[%s13626_s0 + $0x38] sm:$0x38] }
 0x2c4   :  { %v1658_v6 = vpop.permute.xlu1 %1657  ;;  %v2299_v9 = vrot.slane %v2283_v17, 3 }
 0x2c5   :  { %v1669_v8 = vsel %vm13803_vm11, %v10165_v45, %v1658_v6  ;;  %v10547_v16 = vpop.permute.xlu0 %1523  ;;  %v1136_v45 = vrot.slane %v1120_v24, 6  ;;  %vm13804_vm11 = vcmask 506880  }
 0x2c6   :  { %1684 = vst [vmem:[#allocation2 + $0x250] sm:$0xe] %v1669_v8  ;;  %v1534_v47 = vsel %vm13802_vm8, %v1522_v33, %v10547_v16  ;;  %1148 = vrot.lane.b32.xlu1 %v1135_v12, %s13748_s16  ;;  %v3346_v20 = vld [vmem:[#allocation2 + $0x2d8] sm:$0xff]  ;;  %v3345_v13 = vld [vmem:[#allocation2 + $0x2d0] sm:$0xff]  ;;  %vm13805_vm8 = vcmask 515072  }
 0x2c7   :  { %1549 = vst [vmem:[#allocation2 + $0x258] ss:$-124 sps:$4 sm:$0xc1] %v1534_v47   ;;  %1022 = vrot.lane.b32.xlu0 %v1008_v26, %s13747_s22  ;;  %3849 = vmatprep.subr.mxu1 %v3346_v20 }
 0x2c8   :  { %3850 = vmatpush1.msra.mxu1 %v3345_v13  ;;  %v1786_v4 = vpop.permute.xlu1 %1785  ;;  %v325_v13 = vld [vmem:[%s13626_s0 + $0x28] sm:$0x38] }
 0x2c9   :  { %v1797_v44 = vsel %vm13804_vm11, %v10176_v39, %v1786_v4  ;;  %v10564_v57 = vpop.permute.xlu0 %1659  ;;  %v590_v39 = vld [vmem:[%s13626_s0 + $0x28] sm:$0x38]  ;;  %vm13806_vm11 = vcmask 760832  }
 0x2ca   :  { %1812 = vst [vmem:[#allocation2 + $0x250] sm:$0x70] %v1797_v44  ;;  %v1670_v27 = vsel %vm13805_vm8, %v1658_v6, %v10564_v57  ;;  %2571 = vrot.lane.b32.xlu1 %v2556_v36, %s13736_s15  ;;  %v3263_v42 = vld [vmem:[#allocation2 + $0x40] sm:$0xff]  ;;  %vm13807_vm8 = vcmask 506880   ;;  %v606_v61 = vrot.slane %v590_v39, 2  ;;  %s13988_s15 = sld [smem:[#allocation14_spill]] }
 0x2cb   :  { %1685 = vst [vmem:[#allocation2 + $0x258] sm:$0xe] %v1670_v27  ;;  %1150 = vrot.lane.b32.xlu0 %v1136_v45, %s13748_s16  ;;  %3789 = vmatpush1.msra.mxu0 %v3263_v42  ;;  %v1899_v36 = vld [vmem:[%s13626_s0 + $0x38] sm:$0x38]  ;;  %v326_v42 = vld [vmem:[%s13626_s0 + $0x30] sm:$0x38] }
 0x2cc   :  { %v1265_v54 = vpop.permute.xlu1 %1264  ;;  %7937 = vmatmul.mubr.msk.f32.vlgmr.msra.gmra.mxu0 %vm3421_vm0, %v10576_v1  ;;  %v1915_v32 = vrot.slane %v1899_v36, 4  ;;  %v2163_v27 = vld [vmem:[%s13626_s0 + $0x38] sm:$0x38] }
 0x2cd   :  { %v1276_v3 = vsel %vm13806_vm11, %v10214_v55, %v1265_v54  ;;  %v10585_v34 = vpop.permute.xlu0 %1787  ;;  %3964 = vmatprep.mubr.f32.mxu0 %v10587_v52  ;;  %v718_v55 = vld [vmem:[%s13626_s0 + $0x28] sm:$0x38]  ;;  %vm13808_vm11 = vcmask 752640   ;;  %v2179_v30 = vrot.slane %v2163_v27, 6 }
 0x2ce   :  { %1291 = vst [vmem:[#allocation2 + $0x1d0] sm:$0x7] %v1276_v3  ;;  %v1798_v60 = vsel %vm13807_vm8, %v1786_v4, %v10585_v34  ;;  %483 = vrot.lane.b32.xlu1 %v470_v40, %s13749_s8  ;;  %vm13809_vm8 = vcmask 760832   ;;  %v734_v41 = vrot.slane %v718_v55, 7  ;;  %v2035_v40 = vld [vmem:[%s13626_s0 + $0x38] sm:$0x38] }
 0x2cf   :  { %1813 = vst [vmem:[#allocation2 + $0x258] sm:$0x70] %v1798_v60  ;;  %2707 = vrot.lane.b32.xlu0 %v2692_v63, %s13737_s30  ;;  %v2051_v3 = vrot.slane %v2035_v40, 1  ;;  %v1634_v60 = vld [vmem:[%s13626_s0 + $0x38] sm:$0x38] }
 0x2d0   :  { %v1385_v28 = vpop.permute.xlu1 %1384  ;;  %v1650_v15 = vrot.slane %v1634_v60, 2  ;;  %v456_v40 = vld [vmem:[%s13626_s0 + $0x38] sm:$0x38] }
 0x2d1   :  { %v1396_v53 = vsel %vm13808_vm11, %v10234_v11, %v1385_v28  ;;  %v10602_v56 = vpop.permute.xlu0 %1266  ;;  %v719_v11 = vld [vmem:[%s13626_s0 + $0x30] sm:$0x38] }
 0x2d2   :  { %1411 = vst [vmem:[#allocation2 + $0x1d0] sm:$0x38] %v1396_v53  ;;  %v1277_v33 = vsel %vm13809_vm8, %v1265_v54, %v10602_v56  ;;  %619 = vrot.lane.b32.xlu1 %v606_v61, %s13735_s13  ;;  %v3329_v6 = vld [vmem:[#allocation2 + $0x250] sm:$0xff]  ;;  %v735_v24 = vrot.slane %v719_v11, 7  ;;  %vm13810_vm8 = vcmask 777216  }
 0x2d3   :  { %1292 = vst [vmem:[#allocation2 + $0x1d8] sm:$0x7] %v1277_v33  ;;  %485 = vrot.lane.b32.xlu0 %v471_v18, %s13749_s8  ;;  %v1241_v33 = vld [vmem:[%s13626_s0 + $0x38] sm:$0x38] }
 0x2d4   :  { %v881_v49 = vpop.permute.xlu1 %880 }
 0x2d5   :  { %v892_v5 = vsel %vm816_vm13, %v10305_v7, %v881_v49  ;;  %v10616_v31 = vpop.permute.xlu0 %1386 }
 0x2d6   :  { %907 = vst [vmem:[#allocation2 + $0x150] ss:$-124 sps:$4 sm:$0x83] %v892_v5   ;;  %v1397_v12 = vsel %vm13808_vm11, %v1385_v28, %v10616_v31  ;;  %747 = vrot.lane.b32.xlu1 %v734_v41, %s13733_s24  ;;  %v3330_v26 = vld [vmem:[#allocation2 + $0x258] sm:$0xff]  ;;  %vm13811_vm11 = vcmask 769024   ;;  %v1257_v5 = vrot.slane %v1241_v33, 3 }
 0x2d7   :  { %1412 = vst [vmem:[#allocation2 + $0x1d8] sm:$0x38] %v1397_v12  ;;  %621 = vrot.lane.b32.xlu0 %v607_v62, %s13735_s13  ;;  %3851 = vmatprep.subr.mxu1 %v3330_v26 }
 0x2d8   :  { %3852 = vmatpush1.msra.mxu1 %v3329_v6  ;;  %v1017_v8 = vpop.permute.xlu1 %1016 }
 0x2d9   :  { %v1028_v7 = vsel %vm13810_vm8, %v10323_v2, %v1017_v8  ;;  %v10624_v47 = vpop.permute.xlu0 %882  ;;  %v3313_v44 = vld [vmem:[#allocation2 + $0x1d0] sm:$0xff] }
 0x2da   :  { %1043 = vst [vmem:[#allocation2 + $0x150] sm:$0x1c] %v1028_v7  ;;  %v893_v20 = vsel %vm816_vm13, %v881_v49, %v10624_v47  ;;  %2314 = vrot.lane.b32.xlu1 %v2299_v9, %s13738_s29  ;;  %s8231_s29 = smov 120  }
 0x2db   :  { %908 = vst [vmem:[#allocation2 + $0x158] ss:$-124 sps:$4 sm:$0x83] %v893_v20   ;;  %749 = vrot.lane.b32.xlu0 %v735_v24, %s13733_s24  ;;  %v221_v20 = vld [vmem:[%s13626_s0 + $0x30] sm:$0x38] }
 0x2dc   :  { %v1145_v2 = vpop.permute.xlu1 %1144  ;;  %v237_v36 = vrot.slane %v221_v20, 3 }
 0x2dd   :  { %v1156_v45 = vsel %vm13811_vm11, %v10335_v46, %v1145_v2  ;;  %v10641_v21 = vpop.permute.xlu0 %1018 }
 0x2de   :  { %1171 = vst [vmem:[#allocation2 + $0x150] sm:$0xe0] %v1156_v45  ;;  %v1029_v38 = vsel %vm13810_vm8, %v1017_v8, %v10641_v21  ;;  %346 = vrot.lane.b32.xlu1 %v325_v13, %s13734_s18  ;;  %v3314_v4 = vld [vmem:[#allocation2 + $0x1d8] sm:$0xff]  ;;  %vm13812_vm8 = vcmask 1014784   ;;  %253 = vst [vmem:[#allocation2 + $0x70] sm:$0x7] %v237_v36 }
 0x2df   :  { %1044 = vst [vmem:[#allocation2 + $0x158] sm:$0x1c] %v1029_v38  ;;  %2434 = vrot.lane.b32.xlu0 %v2411_v37, %s13739_s26  ;;  %3853 = vmatprep.subr.mxu1 %v3314_v4  ;;  %v222_v13 = vld [vmem:[%s13626_s0 + $0x38] sm:$0x38] }
 0x2e0   :  { %3854 = vmatpush1.msra.mxu1 %v3313_v44  ;;  %v480_v46 = vpop.permute.xlu1 %479  ;;  %v1369_v45 = vld [vmem:[%s13626_s0 + $0x38] sm:$0x38] }
 0x2e1   :  { %v491_v63 = vsel %vm415_vm2, %v10397_v50, %v480_v46  ;;  %v10658_v39 = vpop.permute.xlu0 %1146  ;;  %v1498_v50 = vld [vmem:[%s13626_s0 + $0x38] sm:$0x38] }
 0x2e2   :  { %506 = vst [vmem:[#allocation2 + $0xd0] ss:$-124 sps:$4 sm:$0xc1] %v491_v63   ;;  %v1157_v54 = vsel %vm13811_vm11, %v1145_v2, %v10658_v39  ;;  %1930 = vrot.lane.b32.xlu1 %v1915_v32, %s13725_s12  ;;  %v1514_v53 = vrot.slane %v1498_v50, 5  ;;  %vm13813_vm11 = vmmov %vm13812_vm8  ;;  %v238_v2 = vrot.slane %v222_v13, 3  ;;  %v472_v50 = vrot.slane %v456_v40, 5 }
 0x2e3   :  { %1172 = vst [vmem:[#allocation2 + $0x158] sm:$0xe0] %v1157_v54  ;;  %348 = vrot.lane.b32.xlu0 %v326_v42, %s13734_s18  ;;  %v993_v38 = vld [vmem:[%s13626_s0 + $0x38] sm:$0x38] }
 0x2e4   :  { %v616_v61 = vpop.permute.xlu1 %615  ;;  %254 = vst [vmem:[#allocation2 + $0x78] sm:$0x7] %v238_v2  ;;  %v592_v42 = vld [vmem:[%s13626_s0 + $0x38] sm:$0x38] }
 0x2e5   :  { %v627_v18 = vsel %vm560_vm4, %v10412_v58, %v616_v61  ;;  %v10672_v55 = vpop.permute.xlu0 %481  ;;  %v1762_v58 = vld [vmem:[%s13626_s0 + $0x38] sm:$0x38]  ;;  %v3297_v12 = vld [vmem:[#allocation2 + $0x150] sm:$0xff]  ;;  %v608_v60 = vrot.slane %v592_v42, 2 }
 0x2e6   :  { %642 = vst [vmem:[#allocation2 + $0xd0] sm:$0xe] %v627_v18  ;;  %v492_v28 = vsel %vm415_vm2, %v480_v46, %v10672_v55  ;;  %2194 = vrot.lane.b32.xlu1 %v2179_v30, %s13727_s14  ;;  %v1778_v26 = vrot.slane %v1762_v58, 7  ;;  %v1009_v46 = vrot.slane %v993_v38, 1 }
 0x2e7   :  { %507 = vst [vmem:[#allocation2 + $0xd8] ss:$-124 sps:$4 sm:$0xc1] %v492_v28   ;;  %2066 = vrot.lane.b32.xlu0 %v2051_v3, %s13726_s23 }
 0x2e8   :  { %v744_v41 = vpop.permute.xlu1 %743 }
 0x2e9   :  { %v755_v62 = vsel %vm13812_vm8, %v10427_v10, %v744_v41  ;;  %v10686_v17 = vpop.permute.xlu0 %617  ;;  %v857_v10 = vld [vmem:[%s13626_s0 + $0x38] sm:$0x38] }
 0x2ea   :  { %770 = vst [vmem:[#allocation2 + $0xd0] sm:$0x70] %v755_v62  ;;  %v628_v49 = vsel %vm560_vm4, %v616_v61, %v10686_v17  ;;  %1665 = vrot.lane.b32.xlu1 %v1650_v15, %s13729_s28  ;;  %v3298_v11 = vld [vmem:[#allocation2 + $0x158] sm:$0xff]  ;;  %v873_v7 = vrot.slane %v857_v10, 4  ;;  %s8232_s28 = smov 122  }
 0x2eb   :  { %643 = vst [vmem:[#allocation2 + $0xd8] sm:$0xe] %v628_v49  ;;  %1529 = vrot.lane.b32.xlu0 %v1514_v53, %s13728_s17  ;;  %3855 = vmatprep.subr.mxu1 %v3298_v11 }
 0x2ec   :  { %3856 = vmatpush1.msra.mxu1 %v3297_v12  ;;  %v343_v9 = vpop.permute.xlu1 %342 }
 0x2ed   :  { %v354_v6 = vsel %vm295_vm1, %v10474_v22, %v343_v9  ;;  %v10697_v24 = vpop.permute.xlu0 %745  ;;  %v1121_v22 = vld [vmem:[%s13626_s0 + $0x38] sm:$0x38] }
 0x2ee   :  { %369 = vst [vmem:[#allocation2 + $0x50] sm:$0x38] %v354_v6  ;;  %v756_v8 = vsel %vm13813_vm11, %v744_v41, %v10697_v24  ;;  %1272 = vrot.lane.b32.xlu1 %v1257_v5, %s13731_s25  ;;  %v1137_v27 = vrot.slane %v1121_v22, 6  ;;  %vm13814_vm11 = vmmov %vm13812_vm8  ;;  %v3414_v41 = vld [vmem:[#allocation2 + $0x4f8] sm:$0x7]  ;;  %s13987_s25 = sld [smem:[#allocation12_spill]] }
 0x2ef   :  { %771 = vst [vmem:[#allocation2 + $0xd8] sm:$0x70] %v756_v8  ;;  %1793 = vrot.lane.b32.xlu0 %v1778_v26, %s13730_s27  ;;  %v3415_v6 = vld [vmem:[%s13628_s2] sm:$0x3f]  ;;  %s8229_s2 = smov 58  }
 0x2f0   :  { %v3231_v37 = vpop.permute.xlu1 %3230 }
 0x2f1   :  { %v3238_v4 = vsel %vm13812_vm8, %v10189_v48, %v3231_v37  ;;  %v10720_v32 = vpop.permute.xlu0 %344  ;;  %vm13815_vm8 = vcmask 1009664   ;;  %v3281_v61 = vld [vmem:[#allocation2 + $0xd0] sm:$0xff] }
 0x2f2   :  { %3251 = vst [vmem:[#allocation2 + $0x4e0] sm:$0x7] %v3238_v4  ;;  %v355_v44 = vsel %vm295_vm1, %v343_v9, %v10720_v32  ;;  %888 = vrot.lane.b32.xlu1 %v873_v7, %s13746_s10 }
 0x2f3   :  { %370 = vst [vmem:[#allocation2 + $0x58] sm:$0x38] %v355_v44  ;;  %1392 = vrot.lane.b32.xlu0 %v1369_v45, %s13732_s21 }
 0x2f4   :  { %v2898_v48 = vpop.permute.xlu1 %2897 }
 0x2f5   :  { %v2905_v63 = vsel %vm295_vm1, %v10246_v29, %v2898_v48  ;;  %v3233_v54 = vpop.permute.xlu0 %3232  ;;  %v720_v29 = vld [vmem:[%s13626_s0 + $0x38] sm:$0x38]  ;;  %v3265_v58 = vld [vmem:[#allocation2 + $0x50] sm:$0xff] }
 0x2f6   :  { %2918 = vst [vmem:[#allocation2 + $0x460] ss:$-124 sps:$4 sm:$0x83] %v2905_v63   ;;  %v3239_v30 = vsel %vm13814_vm11, %v3231_v37, %v3233_v54  ;;  %3253 = vst.msk [vmem:[#allocation2 + $0x4f0] sm:$0x7] %vm13815_vm8, %v3233_v54  ;;  %1152 = vrot.lane.b32.xlu1 %v1137_v27, %s13748_s16  ;;  %v3282_v3 = vld [vmem:[#allocation2 + $0xd8] sm:$0xff] }
 0x2f7   :  { %3252 = vst [vmem:[#allocation2 + $0x4e8] sm:$0x7] %v3239_v30  ;;  %1024 = vrot.lane.b32.xlu0 %v1009_v46, %s13747_s22  ;;  %3857 = vmatprep.subr.mxu1 %v3282_v3  ;;  %vm13816_vm11 = vcmask 1039367   ;;  %vm13817_vm8 = vcmask 1033216   ;;  %v736_v62 = vrot.slane %v720_v29, 7 }
 0x2f8   :  { %3858 = vmatpush1.msra.mxu1 %v3281_v61  ;;  %v3016_v18 = vpop.permute.xlu1 %3015 }
 0x2f9   :  { %v3023_v28 = vsel %vm415_vm2, %v10260_v14, %v3016_v18  ;;  %v2900_v15 = vpop.permute.xlu0 %2899  ;;  %v327_v14 = vld [vmem:[%s13626_s0 + $0x38] sm:$0x38] }
 0x2fa   :  { %3036 = vst [vmem:[#allocation2 + $0x460] sm:$0x1c] %v3023_v28  ;;  %v2906_v53 = vsel %vm295_vm1, %v2898_v48, %v2900_v15  ;;  %2920 = vst.msk [vmem:[#allocation2 + $0x3f0] sm:$0x80] %vm13816_vm11, %v2900_v15  ;;  %623 = vrot.lane.b32.xlu1 %v608_v60, %s13735_s13  ;;  %v3266_v33 = vld [vmem:[#allocation2 + $0x58] sm:$0xff]  ;;  %vm13818_vm11 = vcmask 1028098  }
 0x2fb   :  { %2927 = vst.msk [vmem:[#allocation2 + $0x470] sm:$0x3] %vm13817_vm8, %v2900_v15  ;;  %2919 = vst [vmem:[#allocation2 + $0x468] ss:$-124 sps:$4 sm:$0x83] %v2906_v53   ;;  %487 = vrot.lane.b32.xlu0 %v472_v50, %s13749_s8  ;;  %3859 = vmatprep.subr.mxu1 %v3266_v33  ;;  %vm13819_vm8 = vcmask 1022981  }
 0x2fc   :  { %3860 = vmatpush1.msra.mxu1 %v3265_v58  ;;  %v3127_v49 = vpop.permute.xlu1 %3126 }
 0x2fd   :  { %v3134_v11 = vsel %vm560_vm4, %v10274_v51, %v3127_v49  ;;  %v3018_v5 = vpop.permute.xlu0 %3017  ;;  %7940 = vmatmul.mubr.msk.f32.vlgmr.msra.gmra.mxu1 %vm3421_vm0, %v10576_v1  ;;  %7944 = vmatprep.subr.msk.mxu1 %vm3425_vm3, %v3414_v41  ;;  %v3413_v12 = vld [vmem:[#allocation2 + $0x4f0] sm:$0x7]  ;;  %v3411_v51 = vld [vmem:[#allocation2 + $0x4e0] sm:$0x7] }
 0x2fe   :  { %3147 = vst [vmem:[#allocation2 + $0x460] sm:$0xe0] %v3134_v11  ;;  %v3024_v26 = vsel %vm415_vm2, %v3016_v18, %v3018_v5  ;;  %3038 = vst.msk [vmem:[#allocation2 + $0x470] sm:$0x1c] %vm13818_vm11, %v3018_v5  ;;  %7945 = vmatpush1.msk.msra.mxu1 %vm3425_vm3, %v3413_v12  ;;  %350 = vrot.lane.b32.xlu1 %v327_v14, %s13734_s18  ;;  %v3412_v10 = vld [vmem:[#allocation2 + $0x4e8] sm:$0x7] }
 0x2ff   :  { %3037 = vst [vmem:[#allocation2 + $0x468] sm:$0x1c] %v3024_v26  ;;  %751 = vrot.lane.b32.xlu0 %v736_v62, %s13733_s24  ;;  %7941 = vmatprep.subr.msk.mxu0 %vm3425_vm3, %v3412_v10 }
 0x300   :  { %7942 = vmatpush1.msk.msra.mxu0 %vm3425_vm3, %v3411_v51  ;;  %v2568_v9 = vpop.permute.xlu1 %2567  ;;  %3985 = vmatprep.subr.mxu1 %v10587_v52  ;;  %vm13820_vm3 = vcmask 244736  }
 0x301   :  { %v2577_v8 = vsel %vm2499_vm5, %v10347_v43, %v2568_v9  ;;  %v3129_v7 = vpop.permute.xlu0 %3128  ;;  %4035 = vmatprep.mubr.f32.mxu1 %v10587_v52  ;;  %vm13821_vm11 = vmmov %vm13820_vm3 }
 0x302   :  { %2592 = vst [vmem:[#allocation2 + $0x3e0] ss:$-124 sps:$4 sm:$0xc1] %v2577_v8   ;;  %v3135_v20 = vsel %vm560_vm4, %v3127_v49, %v3129_v7  ;;  %3149 = vst.msk [vmem:[#allocation2 + $0x470] sm:$0xe0] %vm13819_vm8, %v3129_v7  ;;  %vm13822_vm8 = vcmask 490496  }
 0x303   :  { %3148 = vst [vmem:[#allocation2 + $0x468] sm:$0xe0] %v3135_v20  ;;  %3418 = vperm.xlu0 %8135, %v3415_v6  }
 0x304   :  { %v2704_v13 = vpop.permute.xlu1 %2703 }
 0x305   :  { %v2713_v22 = vsel %vm2644_vm6, %v10361_v19, %v2704_v13  ;;  %v10774_v36 = vpop.permute.xlu0 %2569  ;;  %v3395_v4 = vld [vmem:[#allocation2 + $0x460] sm:$0xff] }
 0x306   :  { %2728 = vst [vmem:[#allocation2 + $0x3e0] sm:$0xe] %v2713_v22  ;;  %v2578_v43 = vsel %vm2499_vm5, %v2568_v9, %v10774_v36 }
 0x307   :  { %2593 = vst [vmem:[#allocation2 + $0x3e8] ss:$-124 sps:$4 sm:$0xc1] %v2578_v43  }
 0x308   :  { %v2311_v2 = vpop.permute.xlu1 %2310 }
 0x309   :  { %v2320_v52 = vsel %vm2251_vm7, %v10441_v35, %v2311_v2  ;;  %v10780_v37 = vpop.permute.xlu0 %2705  ;;  %v3397_v45 = vld [vmem:[#allocation2 + $0x470] sm:$0xff] }
 0x30a   :  { %2335 = vst [vmem:[#allocation2 + $0x360] sm:$0x7] %v2320_v52  ;;  %v2714_v38 = vsel %vm2644_vm6, %v2704_v13, %v10780_v37  ;;  %3986 = vmatpush1.msra.mxu1 %v3397_v45  ;;  %v3396_v19 = vld [vmem:[#allocation2 + $0x468] sm:$0xff] }
 0x30b   :  { %2729 = vst [vmem:[#allocation2 + $0x3e8] sm:$0xe] %v2714_v38  ;;  %3914 = vmatprep.subr.mxu0 %v3396_v19 }
 0x30c   :  { %3915 = vmatpush1.msra.mxu0 %v3395_v4  ;;  %v2431_v44 = vpop.permute.xlu1 %2430 }
 0x30d   :  { %v2440_v27 = vsel %vm13820_vm3, %v10454_v0, %v2431_v44  ;;  %v10786_v46 = vpop.permute.xlu0 %2312  ;;  %v3379_v0 = vld [vmem:[#allocation2 + $0x3e0] sm:$0xff]  ;;  %vm13823_vm3 = vcmask 261120  }
 0x30e   :  { %2455 = vst [vmem:[#allocation2 + $0x360] sm:$0x38] %v2440_v27  ;;  %v2321_v35 = vsel %vm2251_vm7, %v2311_v2, %v10786_v46 }
 0x30f   :  { %2336 = vst [vmem:[#allocation2 + $0x368] sm:$0x7] %v2321_v35 }
 0x310   :  { %v1927_v42 = vpop.permute.xlu1 %1926 }
 0x311   :  { %v1936_v48 = vsel %vm1858_vm9, %v10483_v25, %v1927_v42  ;;  %v10792_v40 = vpop.permute.xlu0 %2432 }
 0x312   :  { %1951 = vst [vmem:[#allocation2 + $0x2e0] ss:$-124 sps:$4 sm:$0x83] %v1936_v48   ;;  %v2441_v63 = vsel %vm13821_vm11, %v2431_v44, %v10792_v40  ;;  %v3380_v54 = vld [vmem:[#allocation2 + $0x3e8] sm:$0xff]  ;;  %vm13824_vm11 = vmmov %vm13822_vm8 }
 0x313   :  { %2456 = vst [vmem:[#allocation2 + $0x368] sm:$0x38] %v2441_v63  ;;  %3916 = vmatprep.subr.mxu0 %v3380_v54 }
 0x314   :  { %3917 = vmatpush1.msra.mxu0 %v3379_v0  ;;  %v2063_v30 = vpop.permute.xlu1 %2062 }
 0x315   :  { %v2072_v3 = vsel %vm13822_vm8, %v10500_v23, %v2063_v30  ;;  %v10798_v60 = vpop.permute.xlu0 %1928  ;;  %v3363_v23 = vld [vmem:[#allocation2 + $0x360] sm:$0xff]  ;;  %vm13825_vm8 = vcmask 523264  }
 0x316   :  { %2087 = vst [vmem:[#allocation2 + $0x2e0] sm:$0x1c] %v2072_v3  ;;  %v1937_v25 = vsel %vm1858_vm9, %v1927_v42, %v10798_v60 }
 0x317   :  { %1952 = vst [vmem:[#allocation2 + $0x2e8] ss:$-124 sps:$4 sm:$0x83] %v1937_v25  }
 0x318   :  { %v2191_v61 = vpop.permute.xlu1 %2190 }
 0x319   :  { %v2200_v50 = vsel %vm13823_vm3, %v10511_v59, %v2191_v61  ;;  %v10804_v18 = vpop.permute.xlu0 %2064 }
 0x31a   :  { %2215 = vst [vmem:[#allocation2 + $0x2e0] sm:$0xe0] %v2200_v50  ;;  %v2073_v29 = vsel %vm13824_vm11, %v2063_v30, %v10804_v18  ;;  %v3364_v28 = vld [vmem:[#allocation2 + $0x368] sm:$0xff]  ;;  %vm13827_vm11 = vmmov %vm13825_vm8 }
 0x31b   :  { %2088 = vst [vmem:[#allocation2 + $0x2e8] sm:$0x1c] %v2073_v29  ;;  %3918 = vmatprep.subr.mxu0 %v3364_v28 }
 0x31c   :  { %3919 = vmatpush1.msra.mxu0 %v3363_v23  ;;  %v1526_v15 = vpop.permute.xlu1 %1525 }
 0x31d   :  { %v1535_v53 = vsel %vm13825_vm8, %v10547_v16, %v1526_v15  ;;  %v10810_v33 = vpop.permute.xlu0 %2192  ;;  %vm13828_vm8 = vcmask 506880  }
 0x31e   :  { %1550 = vst [vmem:[#allocation2 + $0x260] ss:$-124 sps:$4 sm:$0xc1] %v1535_v53   ;;  %v2201_v59 = vsel %vm13823_vm3, %v2191_v61, %v10810_v33  ;;  %vm13829_vm3 = vmmov %vm13826_vm10 }
 0x31f   :  { %2216 = vst [vmem:[#allocation2 + $0x2e8] sm:$0xe0] %v2201_v59 }
 0x320   :  { %v1662_v41 = vpop.permute.xlu1 %1661 }
 0x321   :  { %v1671_v58 = vsel %vm13826_vm10, %v10564_v57, %v1662_v41  ;;  %v10816_v14 = vpop.permute.xlu0 %1527  ;;  %v3347_v57 = vld [vmem:[#allocation2 + $0x2e0] sm:$0xff]  ;;  %vm13830_vm10 = vcmask 760832  }
 0x322   :  { %1686 = vst [vmem:[#allocation2 + $0x260] sm:$0xe] %v1671_v58  ;;  %v1536_v62 = vsel %vm13827_vm11, %v1526_v15, %v10816_v14  ;;  %vm13831_vm11 = vmmov %vm13828_vm8 }
 0x323   :  { %1551 = vst [vmem:[#allocation2 + $0x268] ss:$-124 sps:$4 sm:$0xc1] %v1536_v62  }
 0x324   :  { %v1790_v49 = vpop.permute.xlu1 %1789 }
 0x325   :  { %v1799_v16 = vsel %vm13828_vm8, %v10585_v34, %v1790_v49  ;;  %v10822_v11 = vpop.permute.xlu0 %1663  ;;  %vm13832_vm8 = vcmask 752640  }
 0x326   :  { %1814 = vst [vmem:[#allocation2 + $0x260] sm:$0x70] %v1799_v16  ;;  %v1672_v5 = vsel %vm13829_vm3, %v1662_v41, %v10822_v11  ;;  %v3348_v12 = vld [vmem:[#allocation2 + $0x2e8] sm:$0xff]  ;;  %vm13833_vm3 = vmmov %vm13830_vm10 }
 0x327   :  { %1687 = vst [vmem:[#allocation2 + $0x268] sm:$0xe] %v1672_v5  ;;  %3920 = vmatprep.subr.mxu0 %v3348_v12 }
 0x328   :  { %3921 = vmatpush1.msra.mxu0 %v3347_v57  ;;  %v1269_v26 = vpop.permute.xlu1 %1268 }
 0x329   :  { %v1278_v10 = vsel %vm13830_vm10, %v10602_v56, %v1269_v26  ;;  %v10828_v51 = vpop.permute.xlu0 %1791  ;;  %vm13834_vm10 = vmmov %vm13832_vm8 }
 0x32a   :  { %1293 = vst [vmem:[#allocation2 + $0x1e0] sm:$0x7] %v1278_v10  ;;  %v1800_v34 = vsel %vm13831_vm11, %v1790_v49, %v10828_v51  ;;  %vm13835_vm11 = vcmask 777216  }
 0x32b   :  { %1815 = vst [vmem:[#allocation2 + $0x268] sm:$0x70] %v1800_v34 }
 0x32c   :  { %v1389_v9 = vpop.permute.xlu1 %1388 }
 0x32d   :  { %v1398_v6 = vsel %vm13832_vm8, %v10616_v31, %v1389_v9  ;;  %v10834_v8 = vpop.permute.xlu0 %1270  ;;  %v3331_v31 = vld [vmem:[#allocation2 + $0x260] sm:$0xff]  ;;  %vm13836_vm8 = vcmask 769024  }
 0x32e   :  { %1413 = vst [vmem:[#allocation2 + $0x1e0] sm:$0x38] %v1398_v6  ;;  %v1279_v7 = vsel %vm13833_vm3, %v1269_v26, %v10834_v8  ;;  %vm13837_vm3 = vmmov %vm13835_vm11 }
 0x32f   :  { %1294 = vst [vmem:[#allocation2 + $0x1e8] sm:$0x7] %v1279_v7 }
 0x330   :  { %v885_v20 = vpop.permute.xlu1 %884 }
 0x331   :  { %v894_v56 = vsel %vm816_vm13, %v10624_v47, %v885_v20  ;;  %v10840_v13 = vpop.permute.xlu0 %1390 }
 0x332   :  { %909 = vst [vmem:[#allocation2 + $0x160] ss:$-124 sps:$4 sm:$0x83] %v894_v56   ;;  %v1399_v22 = vsel %vm13834_vm10, %v1389_v9, %v10840_v13  ;;  %v3332_v43 = vld [vmem:[#allocation2 + $0x268] sm:$0xff]  ;;  %vm13838_vm10 = vcmask 236550  }
 0x333   :  { %1414 = vst [vmem:[#allocation2 + $0x1e8] sm:$0x38] %v1399_v22  ;;  %3922 = vmatprep.subr.mxu0 %v3332_v43 }
 0x334   :  { %3923 = vmatpush1.msra.mxu0 %v3331_v31  ;;  %v1021_v2 = vpop.permute.xlu1 %1020 }
 0x335   :  { %v1030_v52 = vsel %vm13835_vm11, %v10641_v21, %v1021_v2  ;;  %v10846_v45 = vpop.permute.xlu0 %886  ;;  %v3315_v21 = vld [vmem:[#allocation2 + $0x1e0] sm:$0xff]  ;;  %vm13839_vm11 = vcmask 229376  }
 0x336   :  { %1045 = vst [vmem:[#allocation2 + $0x160] sm:$0x1c] %v1030_v52  ;;  %v895_v47 = vsel %vm816_vm13, %v885_v20, %v10846_v45 }
 0x337   :  { %910 = vst [vmem:[#allocation2 + $0x168] ss:$-124 sps:$4 sm:$0x83] %v895_v47  }
 0x338   :  { %v1149_v38 = vpop.permute.xlu1 %1148 }
 0x339   :  { %v1158_v19 = vsel %vm13836_vm8, %v10658_v39, %v1149_v38  ;;  %v10852_v4 = vpop.permute.xlu0 %1022 }
 0x33a   :  { %1173 = vst [vmem:[#allocation2 + $0x160] sm:$0xe0] %v1158_v19  ;;  %v1031_v44 = vsel %vm13837_vm3, %v1021_v2, %v10852_v4  ;;  %v3316_v27 = vld [vmem:[#allocation2 + $0x1e8] sm:$0xff]  ;;  %vm13842_vm3 = vcmask 247808  }
 0x33b   :  { %1046 = vst [vmem:[#allocation2 + $0x168] sm:$0x1c] %v1031_v44  ;;  %3924 = vmatprep.subr.mxu0 %v3316_v27 }
 0x33c   :  { %3925 = vmatpush1.msra.mxu0 %v3315_v21  ;;  %v2572_v35 = vpop.permute.xlu1 %2571 }
 0x33d   :  { %v2579_v42 = vsel %vm2499_vm5, %v10774_v36, %v2572_v35  ;;  %2595 = vst.msk [vmem:[#allocation2 + $0x378] sm:$0xc0] %vm13838_vm10, %v2572_v35  ;;  %v10860_v39 = vpop.permute.xlu0 %1150  ;;  %vm13840_vm5 = vcmask 224257  }
 0x33e   :  { %2603 = vst.msk [vmem:[#allocation2 + $0x3f8] sm:$0x1] %vm13839_vm11, %v2572_v35  ;;  %2594 = vst [vmem:[#allocation2 + $0x3f0] ss:$-124 sps:$4 sm:$0xc1] %v2579_v42   ;;  %v1159_v48 = vsel %vm13836_vm8, %v1149_v38, %v10860_v39  ;;  %vm13844_vm11 = vcmask 244736  }
 0x33f   :  { %1174 = vst [vmem:[#allocation2 + $0x168] sm:$0xe0] %v1159_v48  ;;  %vm13845_vm8 = vcmask 242691  }
 0x340   :  { %v484_v63 = vpop.permute.xlu1 %483 }
 0x341   :  { %v493_v54 = vsel %vm415_vm2, %v10672_v55, %v484_v63  ;;  %v2708_v0 = vpop.permute.xlu0 %2707  ;;  %v3299_v55 = vld [vmem:[#allocation2 + $0x160] sm:$0xff] }
 0x342   :  { %508 = vst [vmem:[#allocation2 + $0xe0] ss:$-124 sps:$4 sm:$0xc1] %v493_v54   ;;  %v2715_v36 = vsel %vm2644_vm6, %v10780_v37, %v2708_v0  ;;  %2731 = vst.msk [vmem:[#allocation2 + $0x3f8] sm:$0xe] %vm13840_vm5, %v2708_v0  ;;  %vm13841_vm6 = vcmask 1014784  }
 0x343   :  { %2730 = vst [vmem:[#allocation2 + $0x3f0] sm:$0xe] %v2715_v36  ;;  %vm13843_vm10 = vmmov %vm13841_vm6  ;;  %vm13847_vm5 = vcmask 492544  }
 0x344   :  { %v620_v30 = vpop.permute.xlu1 %619 }
 0x345   :  { %v629_v3 = vsel %vm560_vm4, %v10686_v17, %v620_v30  ;;  %v10871_v25 = vpop.permute.xlu0 %485 }
 0x346   :  { %644 = vst [vmem:[#allocation2 + $0xe0] sm:$0xe] %v629_v3  ;;  %v494_v61 = vsel %vm415_vm2, %v484_v63, %v10871_v25  ;;  %v3300_v50 = vld [vmem:[#allocation2 + $0x168] sm:$0xff] }
 0x347   :  { %509 = vst [vmem:[#allocation2 + $0xe8] ss:$-124 sps:$4 sm:$0xc1] %v494_v61   ;;  %3926 = vmatprep.subr.mxu0 %v3300_v50  ;;  %v3540_v61 = vpop.f32.mrf.mxu1 }
 0x348   :  { %3927 = vmatpush1.msra.mxu0 %v3299_v55  ;;  %v748_v29 = vpop.permute.xlu1 %747 }
 0x349   :  { %v757_v37 = vsel %vm13841_vm6, %v10697_v24, %v748_v29  ;;  %v10877_v28 = vpop.permute.xlu0 %621  ;;  %v3382_v23 = vld [vmem:[#allocation2 + $0x3f8] sm:$0xff]  ;;  %vm13848_vm6 = vcmask 261120   ;;  %v3542_v50 = vpop.f32.mrf.mxu1 }
 0x34a   :  { %772 = vst [vmem:[#allocation2 + $0xe0] sm:$0x70] %v757_v37  ;;  %v630_v17 = vsel %vm560_vm4, %v620_v30, %v10877_v28  ;;  %3987 = vmatprep.subr.mxu1 %v3382_v23  ;;  %v3381_v15 = vld [vmem:[#allocation2 + $0x3f0] sm:$0xff] }
 0x34b   :  { %645 = vst [vmem:[#allocation2 + $0xe8] sm:$0xe] %v630_v17  ;;  %3988 = vmatpush1.msra.mxu1 %v3381_v15  ;;  %v3611_v55 = vpop.f32.mrf.mxu1 }
 0x34c   :  { %v2315_v53 = vpop.permute.xlu1 %2314 }
 0x34d   :  { %v2322_v59 = vsel %vm2251_vm7, %v10786_v46, %v2315_v53  ;;  %2338 = vst.msk [vmem:[#allocation2 + $0x378] sm:$0x7] %vm13842_vm3, %v2315_v53  ;;  %v10884_v41 = vpop.permute.xlu0 %749  ;;  %vm13846_vm7 = vcmask 498695   ;;  %vm13850_vm3 = vcmask 490496   ;;  %v3613_v15 = vpop.f32.mrf.mxu1 }
 0x34e   :  { %2337 = vst [vmem:[#allocation2 + $0x370] sm:$0x7] %v2322_v59  ;;  %v758_v24 = vsel %vm13843_vm10, %v748_v29, %v10884_v41  ;;  %vm13851_vm10 = vcmask 487426   ;;  %v3682_v29 = vpop.f32.mrf.mxu0 }
 0x34f   :  { %773 = vst [vmem:[#allocation2 + $0xe8] sm:$0x70] %v758_v24 }
 0x350   :  { %v347_v58 = vpop.permute.xlu1 %346  ;;  %v3684_v53 = vpop.f32.mrf.mxu0 }
 0x351   :  { %v356_v62 = vsel %vm295_vm1, %v10720_v32, %v347_v58  ;;  %v2435_v49 = vpop.permute.xlu0 %2434 }
 0x352   :  { %371 = vst [vmem:[#allocation2 + $0x60] sm:$0x38] %v356_v62  ;;  %v2442_v16 = vsel %vm13844_vm11, %v10792_v40, %v2435_v49  ;;  %2458 = vst.msk [vmem:[#allocation2 + $0x378] sm:$0x38] %vm13845_vm8, %v2435_v49  ;;  %v3283_v40 = vld [vmem:[#allocation2 + $0xe0] sm:$0xff]  ;;  %vm13852_vm11 = vcmask 515072   ;;  %v3753_v62 = vpop.f32.mrf.mxu1 }
 0x353   :  { %2457 = vst [vmem:[#allocation2 + $0x370] sm:$0x38] %v2442_v16  ;;  %vm13853_vm8 = vcmask 523264  }
 0x354   :  { %v1931_v46 = vpop.permute.xlu1 %1930 }
 0x355   :  { %v1938_v5 = vsel %vm1858_vm9, %v10798_v60, %v1931_v46  ;;  %1954 = vst.msk [vmem:[#allocation2 + $0x278] sm:$0x80] %vm13846_vm7, %v1931_v46  ;;  %v10897_v12 = vpop.permute.xlu0 %348  ;;  %vm13849_vm9 = vcmask 261125   ;;  %vm13854_vm7 = vcmask 523270  }
 0x356   :  { %1962 = vst.msk [vmem:[#allocation2 + $0x2f8] sm:$0x3] %vm13847_vm5, %v1931_v46  ;;  %1953 = vst [vmem:[#allocation2 + $0x2f0] ss:$-124 sps:$4 sm:$0x83] %v1938_v5   ;;  %v357_v32 = vsel %vm295_vm1, %v347_v58, %v10897_v12  ;;  %v3284_v57 = vld [vmem:[#allocation2 + $0xe8] sm:$0xff] }
 0x357   :  { %372 = vst [vmem:[#allocation2 + $0x68] sm:$0x38] %v357_v32  ;;  %3928 = vmatprep.subr.mxu0 %v3284_v57  ;;  %vm13855_vm5 = vcmask 516096  }
 0x358   :  { %3929 = vmatpush1.msra.mxu0 %v3283_v40  ;;  %v2195_v26 = vpop.permute.xlu1 %2194  ;;  %v3755_v40 = vpop.f32.mrf.mxu1 }
 0x359   :  { %v2202_v10 = vsel %vm13848_vm6, %v10810_v33, %v2195_v26  ;;  %2218 = vst.msk [vmem:[#allocation2 + $0x2f8] sm:$0xe0] %vm13849_vm9, %v2195_v26  ;;  %v2067_v60 = vpop.permute.xlu0 %2066  ;;  %v3366_v34 = vld [vmem:[#allocation2 + $0x378] sm:$0xff]  ;;  %v3267_v22 = vld [vmem:[#allocation2 + $0x60] sm:$0xff]  ;;  %vm13856_vm6 = vcmask 760832   ;;  %vm13857_vm9 = vcmask 755712  }
 0x35a   :  { %2217 = vst [vmem:[#allocation2 + $0x2f0] sm:$0xe0] %v2202_v10  ;;  %v2074_v9 = vsel %vm13850_vm3, %v10804_v18, %v2067_v60  ;;  %2090 = vst.msk [vmem:[#allocation2 + $0x2f8] sm:$0x1c] %vm13851_vm10, %v2067_v60  ;;  %3989 = vmatprep.subr.mxu1 %v3366_v34  ;;  %v3365_v6 = vld [vmem:[#allocation2 + $0x370] sm:$0xff]  ;;  %vm13859_vm3 = vcmask 505860  }
 0x35b   :  { %2089 = vst [vmem:[#allocation2 + $0x2f0] sm:$0x1c] %v2074_v9  ;;  %3990 = vmatpush1.msra.mxu1 %v3365_v6  ;;  %vm13860_vm10 = vcmask 785415  }
 0x35c   :  { %v1666_v7 = vpop.permute.xlu1 %1665 }
 0x35d   :  { %v1673_v20 = vsel %vm13852_vm11, %v10822_v11, %v1666_v7  ;;  %1689 = vst.msk [vmem:[#allocation2 + $0x278] sm:$0xe] %vm1625_vm15, %v1666_v7  ;;  %v1530_v33 = vpop.permute.xlu0 %1529  ;;  %vm13858_vm15 = vcmask 506880   ;;  %vm13861_vm11 = vcmask 779264  }
 0x35e   :  { %1688 = vst [vmem:[#allocation2 + $0x270] sm:$0xe] %v1673_v20  ;;  %v1537_v56 = vsel %vm13853_vm8, %v10816_v14, %v1530_v33  ;;  %1553 = vst.msk [vmem:[#allocation2 + $0x1f8] sm:$0xc0] %vm13854_vm7, %v1530_v33  ;;  %v3268_v18 = vld [vmem:[#allocation2 + $0x68] sm:$0xff]  ;;  %vm13862_vm8 = vcmask 752640  }
 0x35f   :  { %1561 = vst.msk [vmem:[#allocation2 + $0x278] sm:$0x1] %vm13855_vm5, %v1530_v33  ;;  %1552 = vst [vmem:[#allocation2 + $0x270] ss:$-124 sps:$4 sm:$0xc1] %v1537_v56   ;;  %3930 = vmatprep.subr.mxu0 %v3268_v18  ;;  %vm13863_vm7 = vcmask 750595  }
 0x360   :  { %3931 = vmatpush1.msra.mxu0 %v3267_v22  ;;  %v1273_v43 = vpop.permute.xlu1 %1272  ;;  %vm13864_vm5 = vcmask 769024  }
 0x361   :  { %v1280_v11 = vsel %vm13856_vm6, %v10834_v8, %v1273_v43  ;;  %1296 = vst.msk [vmem:[#allocation2 + $0x1f8] sm:$0x7] %vm13857_vm9, %v1273_v43  ;;  %v1794_v31 = vpop.permute.xlu0 %1793  ;;  %7943 = vmatmul.mubr.msk.f32.vlgmr.msra.gmra.mxu0 %vm3421_vm0, %v10576_v1  ;;  %v3350_v14 = vld [vmem:[#allocation2 + $0x2f8] sm:$0xff]  ;;  %vm13865_vm6 = vcmask 769029   ;;  %vm13866_vm9 = vcmask 777216  }
 0x362   :  { %1295 = vst [vmem:[#allocation2 + $0x1f0] sm:$0x7] %v1280_v11  ;;  %v1801_v2 = vsel %vm13858_vm15, %v10828_v51, %v1794_v31  ;;  %1817 = vst.msk [vmem:[#allocation2 + $0x278] sm:$0x70] %vm13859_vm3, %v1794_v31  ;;  %3991 = vmatprep.subr.mxu1 %v3350_v14  ;;  %v3349_v52 = vld [vmem:[#allocation2 + $0x2f0] sm:$0xff]  ;;  %vm13867_vm15 = vcmask 774146  }
 0x363   :  { %1816 = vst [vmem:[#allocation2 + $0x270] sm:$0x70] %v1801_v2  ;;  %3992 = vmatpush1.msra.mxu1 %v3349_v52  ;;  %vm13868_vm3 = vcmask 1024000  }
 0x364   :  { %v889_v47 = vpop.permute.xlu1 %888 }
 0x365   :  { %v896_v8 = vsel %vm816_vm13, %v10846_v45, %v889_v47  ;;  %912 = vst.msk [vmem:[#allocation2 + $0xf8] sm:$0x80] %vm13860_vm10, %v889_v47  ;;  %v1393_v38 = vpop.permute.xlu0 %1392  ;;  %vm13871_vm10 = vcmask 1013764  }
 0x366   :  { %920 = vst.msk [vmem:[#allocation2 + $0x178] sm:$0x3] %vm13861_vm11, %v889_v47  ;;  %911 = vst [vmem:[#allocation2 + $0x170] ss:$-124 sps:$4 sm:$0x83] %v896_v8   ;;  %v1400_v19 = vsel %vm13862_vm8, %v10840_v13, %v1393_v38  ;;  %vm13872_vm11 = vcmask 490496  }
 0x367   :  { %1416 = vst.msk [vmem:[#allocation2 + $0x1f8] sm:$0x38] %vm13863_vm7, %v1393_v38  ;;  %1415 = vst [vmem:[#allocation2 + $0x1f0] sm:$0x38] %v1400_v19  ;;  %vm4573_vm8 = vcmask 982016  }
 0x368   :  { %v1153_v51 = vpop.permute.xlu1 %1152  ;;  %vm13873_vm7 = vmmov %vm13872_vm11 }
 0x369   :  { %v1160_v44 = vsel %vm13864_vm5, %v10860_v39, %v1153_v51  ;;  %1176 = vst.msk [vmem:[#allocation2 + $0x178] sm:$0xe0] %vm13865_vm6, %v1153_v51  ;;  %v1025_v27 = vpop.permute.xlu0 %1024  ;;  %v3334_v45 = vld [vmem:[#allocation2 + $0x278] sm:$0xff]  ;;  %vm4505_vm5 = vcmask 998400   ;;  %vm13874_vm6 = vcmask 506880  }
 0x36a   :  { %1175 = vst [vmem:[#allocation2 + $0x170] sm:$0xe0] %v1160_v44  ;;  %v1032_v21 = vsel %vm13866_vm9, %v10852_v4, %v1025_v27  ;;  %1048 = vst.msk [vmem:[#allocation2 + $0x178] sm:$0x1c] %vm13867_vm15, %v1025_v27  ;;  %3993 = vmatprep.subr.mxu1 %v3334_v45  ;;  %v3333_v35 = vld [vmem:[#allocation2 + $0x270] sm:$0xff]  ;;  %vm13876_vm15 = vcmask 523264  }
 0x36b   :  { %1047 = vst [vmem:[#allocation2 + $0x170] sm:$0x1c] %v1032_v21  ;;  %3994 = vmatpush1.msra.mxu1 %v3333_v35  ;;  %vm13875_vm9 = vmmov %vm13874_vm6 }
 0x36c   :  { %v624_v13 = vpop.permute.xlu1 %623 }
 0x36d   :  { %v631_v42 = vsel %vm560_vm4, %v10877_v28, %v624_v13  ;;  %647 = vst.msk [vmem:[#allocation2 + $0xf8] sm:$0xe] %vm583_vm14, %v624_v13  ;;  %v488_v39 = vpop.permute.xlu0 %487  ;;  %vm13869_vm4 = vcmask 1037315   ;;  %vm13870_vm14 = vcmask 1014784  }
 0x36e   :  { %v3318_v48 = vld [vmem:[#allocation2 + $0x1f8] sm:$0xff]  ;;  %646 = vst [vmem:[#allocation2 + $0xf0] sm:$0xe] %v631_v42  ;;  %v495_v63 = vsel %vm415_vm2, %v10871_v25, %v488_v39  ;;  %511 = vst.msk [vmem:[#allocation2 + $0x78] sm:$0xc0] %vm438_vm12, %v488_v39  ;;  %v3317_v4 = vld [vmem:[#allocation2 + $0x1f0] sm:$0xff] }
 0x36f   :  { %519 = vst.msk [vmem:[#allocation2 + $0xf8] sm:$0x1] %vm13868_vm3, %v488_v39  ;;  %3995 = vmatprep.subr.mxu1 %v3318_v48  ;;  %510 = vst [vmem:[#allocation2 + $0xf0] ss:$-124 sps:$4 sm:$0xc1] %v495_v63   ;;  %vm4936_vm12 = vcmask 457728  }
 0x370   :  { %3996 = vmatpush1.msra.mxu1 %v3317_v4  ;;  %v351_v54 = vpop.permute.xlu1 %350  ;;  %vm6077_vm3 = vcmask 179200  }
 0x371   :  { %v358_v0 = vsel %vm295_vm1, %v10897_v12, %v351_v54  ;;  %374 = vst.msk [vmem:[#allocation2 + $0x78] sm:$0x38] %vm13869_vm4, %v351_v54  ;;  %v752_v36 = vpop.permute.xlu0 %751  ;;  %v3302_v30 = vld [vmem:[#allocation2 + $0x178] sm:$0xff]  ;;  %vm13877_vm4 = vmmov %vm13876_vm15 }
 0x372   :  { %373 = vst [vmem:[#allocation2 + $0x70] sm:$0x38] %v358_v0  ;;  %v759_v3 = vsel %vm13870_vm14, %v10884_v41, %v752_v36  ;;  %775 = vst.msk [vmem:[#allocation2 + $0xf8] sm:$0x70] %vm13871_vm10, %v752_v36  ;;  %3997 = vmatprep.subr.mxu1 %v3302_v30  ;;  %v3301_v25 = vld [vmem:[#allocation2 + $0x170] sm:$0xff] }
 0x373   :  { %774 = vst [vmem:[#allocation2 + $0xf0] sm:$0x70] %v759_v3  ;;  %3998 = vmatpush1.msra.mxu1 %v3301_v25  ;;  %vm13878_vm10 = vmmov %vm13870_vm14 }
 0x378   :  { %v3270_v28 = vld [vmem:[#allocation2 + $0x78] sm:$0xff] }
 0x379   :  { %v3286_v37 = vld [vmem:[#allocation2 + $0xf8] sm:$0xff]  ;;  %v3269_v17 = vld [vmem:[#allocation2 + $0x70] sm:$0xff] }
 0x37a   :  { %3999 = vmatprep.subr.mxu1 %v3286_v37  ;;  %v3285_v23 = vld [vmem:[#allocation2 + $0xf0] sm:$0xff] }
 0x37b   :  { %4000 = vmatpush1.msra.mxu1 %v3285_v23 }
 0x37c   :  { %4001 = vmatprep.subr.mxu1 %v3270_v28 }
 0x37d   :  { %4002 = vmatpush1.msra.mxu1 %v3269_v17 }
 0x37e   :  { %v10948_v59 = vpop.permute.xlu0 %3418  ;;  %7946 = vmatmul.mubr.msk.f32.vlgmr.msra.gmra.mxu1 %vm3421_vm0, %v10576_v1  ;;  %vm4868_vm0 = vcmask 474112  }
 0x37f   :  { %v3614_v41 = vadd.f32 %v3613_v15, %v10948_v59  ;;  %v3685_v24 = vadd.f32 %v3684_v53, %v10948_v59  ;;  %v3683_v58 = vadd.f32 %v3682_v29, %v10948_v59  ;;  %v3612_v49 = vadd.f32 %v3611_v55, %v10948_v59 }
 0x380   :  { %v10959_v5 = vadd.f32 %v3753_v62, %v10948_v59  ;;  %v10962_v32 = vadd.f32 %v3540_v61, %v10948_v59  ;;  %v3543_v10 = vadd.f32 %v3542_v50, %v10948_v59  ;;  %v3756_v60 = vadd.f32 %v3755_v40, %v10948_v59 }
 0x381   :  { %v4045_v16 = vmax.f32 %v3614_v41, 0.0  ;;  %v4047_v46 = vmax.f32 %v3685_v24, 0.0  ;;  %v4046_v12 = vmax.f32 %v3683_v58, 0.0  ;;  %v4044_v1 = vmax.f32 %v3612_v49, 0.0 }
 0x382   :  { %v4048_v57 = vmax.f32 %v10959_v5, 0.0  ;;  %v4042_v26 = vmax.f32 %v10962_v32, 0.0  ;;  %v4043_v6 = vmax.f32 %v3543_v10, 0.0  ;;  %v4049_v20 = vmax.f32 %v3756_v60, 0.0 }
 0x383   :  { %4084 = vrot.lane.b32.xlu0 %v4047_v46, %s13734_s18  ;;  %4080 = vrot.lane.b32.xlu1 %v4045_v16, %s13734_s18 }
 0x387   :  { %4082 = vrot.lane.b32.xlu1 %v4046_v12, %s13734_s18  ;;  %4078 = vrot.lane.b32.xlu0 %v4044_v1, %s13734_s18 }
 0x38b   :  { %4086 = vrot.lane.b32.xlu1 %v4048_v57, %s13734_s18  ;;  %4074 = vrot.lane.b32.xlu0 %v4042_v26, %s13734_s18 }
 0x38c   :  { %v3824_v34 = vpop.f32.mrf.mxu0 }
 0x38d   :  { %v10975_v9 = vadd.f32 %v3824_v34, %v10948_v59 }
 0x38e   :  { %v3826_v7 = vpop.f32.mrf.mxu0 }
 0x38f   :  { %v4050_v33 = vmax.f32 %v10975_v9, 0.0  ;;  %4076 = vrot.lane.b32.xlu1 %v4043_v6, %s13734_s18  ;;  %v3827_v56 = vadd.f32 %v3826_v7, %v10948_v59 }
 0x391   :  { %4090 = vrot.lane.b32.xlu0 %v4050_v33, %s13734_s18  ;;  %v4051_v18 = vmax.f32 %v3827_v56, 0.0 }
 0x393   :  { %4088 = vrot.lane.b32.xlu1 %v4049_v20, %s13734_s18 }
 0x397   :  { %4092 = vrot.lane.b32.xlu1 %v4051_v18, %s13734_s18 }
 0x3bd   :  { %v3895_v22 = vpop.f32.mrf.mxu1 }
 0x3be   :  { %v10986_v43 = vadd.f32 %v3895_v22, %v10948_v59 }
 0x3bf   :  { %v3897_v51 = vpop.f32.mrf.mxu1 }
 0x3c0   :  { %v4052_v11 = vmax.f32 %v10986_v43, 0.0  ;;  %v11002_v21 = vadd.f32 %v3897_v51, %v10948_v59 }
 0x3c2   :  { %4094 = vrot.lane.b32.xlu0 %v4052_v11, %s13734_s18  ;;  %v4053_v48 = vmax.f32 %v11002_v21, 0.0 }
 0x3f5   :  { %v4085_v31 = vpop.permute.xlu0 %4084  ;;  %v4081_v14 = vpop.permute.xlu1 %4080 }
 0x3f9   :  { %v4083_v2 = vpop.permute.xlu1 %4082  ;;  %v4079_v52 = vpop.permute.xlu0 %4078 }
 0x3fa   :  { %v4109_v47 = vsel %vm295_vm1, %v4081_v14, %v4083_v2  ;;  %v4110_v8 = vsel %vm295_vm1, %v4083_v2, %v4085_v31  ;;  %v4108_v44 = vsel %vm295_vm1, %v4079_v52, %v4081_v14 }
 0x3fb   :  { %v4140_v38 = vmax.f32 %v4045_v16, %v4109_v47  ;;  %v10994_v19 = vmax.f32 %v4046_v12, %v4110_v8  ;;  %v4139_v35 = vmax.f32 %v4044_v1, %v4108_v44 }
 0x3fd   :  { %v4087_v27 = vpop.permute.xlu1 %4086  ;;  %4175 = vrot.lane.b32.xlu1 %v4140_v38, %s13746_s10  ;;  %4177 = vrot.lane.b32.xlu0 %v10994_v19, %s13746_s10  ;;  %v4075_v36 = vpop.permute.xlu0 %4074 }
 0x3fe   :  { %v4111_v45 = vsel %vm295_vm1, %v4085_v31, %v4087_v27 }
 0x3ff   :  { %v11004_v13 = vmax.f32 %v4047_v46, %v4111_v45 }
 0x401   :  { %4179 = vrot.lane.b32.xlu1 %v11004_v13, %s13746_s10  ;;  %v4077_v42 = vpop.permute.xlu1 %4076  ;;  %4173 = vrot.lane.b32.xlu0 %v4139_v35, %s13746_s10 }
 0x402   :  { %v4107_v39 = vsel %vm295_vm1, %v4077_v42, %v4079_v52  ;;  %v4106_v61 = vsel %vm295_vm1, %v4075_v36, %v4077_v42 }
 0x403   :  { %v11011_v63 = vmax.f32 %v4043_v6, %v4107_v39  ;;  %v4091_v55 = vpop.permute.xlu0 %4090  ;;  %v11033_v29 = vmax.f32 %v4042_v26, %v4106_v61 }
 0x405   :  { %4171 = vrot.lane.b32.xlu1 %v11011_v63, %s13746_s10  ;;  %4096 = vrot.lane.b32.xlu0 %v4053_v48, %s13734_s18  ;;  %v4089_v50 = vpop.permute.xlu1 %4088 }
 0x406   :  { %v4113_v37 = vsel %vm295_vm1, %v4089_v50, %v4091_v55  ;;  %v4112_v62 = vsel %vm295_vm1, %v4087_v27, %v4089_v50 }
 0x407   :  { %v11038_v28 = vmax.f32 %v4049_v20, %v4113_v37  ;;  %v11057_v49 = vmax.f32 %v4048_v57, %v4112_v62 }
 0x409   :  { %v4093_v23 = vpop.permute.xlu1 %4092 }
 0x40a   :  { %v4114_v16 = vsel %vm295_vm1, %v4091_v55, %v4093_v23 }
 0x40b   :  { %v11064_v12 = vmax.f32 %v4050_v33, %v4114_v16 }
 0x421   :  { %v3966_v4 = vpop.f32.mrf.mxu0 }
 0x422   :  { %v11019_v54 = vadd.f32 %v3966_v4, %v10948_v59 }
 0x423   :  { %v3968_v0 = vpop.f32.mrf.mxu0 }
 0x424   :  { %v4054_v30 = vmax.f32 %v11019_v54, 0.0  ;;  %v11023_v3 = vadd.f32 %v3968_v0, %v10948_v59 }
 0x426   :  { %v4055_v25 = vmax.f32 %v11023_v3, 0.0  ;;  %4098 = vrot.lane.b32.xlu1 %v4054_v30, %s13734_s18 }
 0x428   :  { %4100 = vrot.lane.b32.xlu0 %v4055_v25, %s13734_s18 }
 0x42c   :  { %4169 = vrot.lane.b32.xlu0 %v11033_v29, %s13746_s10 }
 0x430   :  { %4183 = vrot.lane.b32.xlu0 %v11038_v28, %s13746_s10 }
 0x434   :  { %v4095_v17 = vpop.permute.xlu0 %4094 }
 0x435   :  { %v4115_v15 = vsel %vm295_vm1, %v4093_v23, %v4095_v17 }
 0x436   :  { %v11043_v53 = vmax.f32 %v4051_v18, %v4115_v15 }
 0x438   :  { %4187 = vrot.lane.b32.xlu0 %v11043_v53, %s13746_s10 }
 0x43e   :  { %v4037_v41 = vpop.f32.mrf.mxu1 }
 0x43f   :  { %v11048_v24 = vadd.f32 %v4037_v41, %v10948_v59 }
 0x440   :  { %v4039_v46 = vpop.f32.mrf.mxu1 }
 0x441   :  { %v4056_v58 = vmax.f32 %v11048_v24, 0.0  ;;  %v11067_v1 = vadd.f32 %v4039_v46, %v10948_v59 }
 0x443   :  { %4102 = vrot.lane.b32.xlu1 %v4056_v58, %s13734_s18  ;;  %v4057_v5 = vmax.f32 %v11067_v1, 0.0 }
 0x447   :  { %4181 = vrot.lane.b32.xlu1 %v11057_v49, %s13746_s10 }
 0x44b   :  { %4185 = vrot.lane.b32.xlu1 %v11064_v12, %s13746_s10 }
 0x44f   :  { %4104 = vrot.lane.b32.xlu1 %v4057_v5, %s13734_s18  ;;  %s8230_s18 = smov 56  }
 0x46f   :  { %v4176_v32 = vpop.permute.xlu1 %4175  ;;  %v4178_v57 = vpop.permute.xlu0 %4177 }
 0x470   :  { %v4204_v40 = vsel %vm816_vm13, %v4176_v32, %v4178_v57 }
 0x471   :  { %v11076_v26 = vmax.f32 %v4140_v38, %v4204_v40 }
 0x473   :  { %4251 = vst [vmem:[#allocation3 + $0x18] sm:$0x3f] %v11076_v26  ;;  %5688 = vst [vmem:[#allocation3 + $0x578] sm:$0x3f] %v11076_v26  ;;  %v11080_v59 = vpop.permute.xlu1 %4179  ;;  %v4174_v10 = vpop.permute.xlu0 %4173  ;;  %v11083_v60 = vrot.slane %v11076_v26, 2  ;;  %v11086_v34 = vrot.slane %v11076_v26, 4 }
 0x474   :  { %v4205_v9 = vsel %vm816_vm13, %v4178_v57, %v11080_v59  ;;  %v4203_v6 = vsel %vm816_vm13, %v4174_v10, %v4176_v32  ;;  %v11138_v38 = vrot.slane %v11076_v26, 6 }
 0x475   :  { %v11092_v7 = vmax.f32 %v10994_v19, %v4205_v9  ;;  %v11094_v20 = vmax.f32 %v4139_v35, %v4203_v6  ;;  %4295 = vrot.lane.b32.xlu0 %v11083_v60, %s13749_s8  ;;  %5004 = vst [vmem:[#allocation3 + $0x5a0] ss:$-1012 sps:$4 sm:$0xf3] %v11086_v34  }
 0x477   :  { %4252 = vst [vmem:[#allocation3 + $0x450] sm:$0x3f] %v11092_v7  ;;  %5689 = vst [vmem:[#allocation3 + $0x490] sm:$0x3f] %v11092_v7  ;;  %v4172_v33 = vpop.permute.xlu1 %4171  ;;  %v11104_v56 = vrot.slane %v11092_v7, 2  ;;  %v11107_v18 = vrot.slane %v11094_v20, 2  ;;  %v4097_v47 = vpop.permute.xlu0 %4096 }
 0x478   :  { %4250 = vst [vmem:[#allocation3 + $0x4d8] sm:$0x3f] %v11094_v20  ;;  %5687 = vst [vmem:[#allocation3 + $0x1c8] sm:$0x3f] %v11094_v20  ;;  %v11110_v22 = vrot.slane %v11094_v20, 4  ;;  %v4202_v31 = vsel %vm816_vm13, %v4172_v33, %v4174_v10  ;;  %v11114_v14 = vrot.slane %v11092_v7, 4  ;;  %v4116_v19 = vsel %vm295_vm1, %v4095_v17, %v4097_v47 }
 0x479   :  { %v11117_v2 = vmax.f32 %v11011_v63, %v4202_v31  ;;  %4297 = vrot.lane.b32.xlu1 %v11104_v56, %s13749_s8  ;;  %4293 = vrot.lane.b32.xlu0 %v11107_v18, %s13749_s8  ;;  %v11135_v8 = vrot.slane %v11094_v20, 6  ;;  %v11147_v51 = vmax.f32 %v4052_v11, %v4116_v19 }
 0x47a   :  { %5003 = vst [vmem:[#allocation3 + $0x150] ss:$580 sps:$4 sm:$0xf3] %v11110_v22   ;;  %5005 = vst [vmem:[#allocation3 + $0x2d8] ss:$308 sps:$4 sm:$0xf3] %v11114_v14  }
 0x47b   :  { %4249 = vst [vmem:[#allocation3 + $0x3b0] sm:$0x3f] %v11117_v2  ;;  %v11127_v52 = vrot.slane %v11117_v2, 4  ;;  %v11156_v44 = vrot.slane %v11117_v2, 2  ;;  %v11174_v42 = vrot.slane %v11117_v2, 6 }
 0x47d   :  { %5542 = vrot.lane.b32.xlu1 %v11110_v22, %s8229_s2  ;;  %5544 = vrot.lane.b32.xlu0 %v11086_v34, %s8229_s2  ;;  %5002 = vst [vmem:[#allocation3 + $0x5e8] ss:$-1508 sps:$4 sm:$0xf3] %v11127_v52  }
 0x481   :  { %5622 = vrot.lane.b32.xlu1 %v11135_v8, %s8230_s18  ;;  %5624 = vrot.lane.b32.xlu0 %v11138_v38, %s8230_s18 }
 0x485   :  { %4189 = vrot.lane.b32.xlu1 %v11147_v51, %s13746_s10 }
 0x489   :  { %5540 = vrot.lane.b32.xlu1 %v11127_v52, %s8229_s2 }
 0x48d   :  { %5462 = vrot.lane.b32.xlu1 %v11107_v18, %s13726_s23 }
 0x491   :  { %5460 = vrot.lane.b32.xlu1 %v11156_v44, %s13726_s23 }
 0x495   :  { %5397 = vrot.lane.b32.xlu1 %v11076_v26, %s13730_s27 }
 0x498   :  { %v4099_v43 = vpop.permute.xlu1 %4098 }
 0x499   :  { %v4117_v11 = vsel %vm295_vm1, %v4097_v47, %v4099_v43  ;;  %5248 = vrot.lane.b32.xlu1 %v11110_v22, %s8231_s29 }
 0x49a   :  { %v11167_v27 = vmax.f32 %v4053_v48, %v4117_v11  ;;  %v4101_v45 = vpop.permute.xlu0 %4100 }
 0x49b   :  { %v4118_v15 = vsel %vm295_vm1, %v4099_v43, %v4101_v45 }
 0x49c   :  { %4191 = vrot.lane.b32.xlu0 %v11167_v27, %s13746_s10 }
 0x49d   :  { %5328 = vrot.lane.b32.xlu1 %v11135_v8, %s13728_s17 }
 0x49e   :  { %v4170_v35 = vpop.permute.xlu0 %4169 }
 0x49f   :  { %v4201_v39 = vsel %vm816_vm13, %v4170_v35, %v4172_v33 }
 0x4a0   :  { %v11178_v63 = vmax.f32 %v11033_v29, %v4201_v39  ;;  %5620 = vrot.lane.b32.xlu0 %v11174_v42, %s8230_s18 }
 0x4a1   :  { %5246 = vrot.lane.b32.xlu1 %v11127_v52, %s8231_s29 }
 0x4a2   :  { %4248 = vst [vmem:[#allocation3 + $0x2b0] sm:$0x3f] %v11178_v63  ;;  %v4184_v0 = vpop.permute.xlu0 %4183  ;;  %v4275_v54 = vrot.slane %v11178_v63, 2  ;;  %v4369_v46 = vrot.slane %v11178_v63, 4 }
 0x4a4   :  { %5464 = vrot.lane.b32.xlu0 %v11083_v60, %s13726_s23 }
 0x4a5   :  { %5167 = vrot.lane.b32.xlu1 %v11107_v18, %s8232_s28 }
 0x4a8   :  { %5395 = vrot.lane.b32.xlu0 %v11094_v20, %s13730_s27 }
 0x4a9   :  { %5165 = vrot.lane.b32.xlu1 %v11156_v44, %s8232_s28 }
 0x4ac   :  { %5393 = vrot.lane.b32.xlu0 %v11117_v2, %s13730_s27 }
 0x4ad   :  { %5101 = vrot.lane.b32.xlu1 %v11076_v26, %s13733_s24 }
 0x4b0   :  { %5250 = vrot.lane.b32.xlu0 %v11086_v34, %s8231_s29 }
 0x4b4   :  { %5330 = vrot.lane.b32.xlu0 %v11138_v38, %s13728_s17 }
 0x4b5   :  { %v11201_v21 = vpop.permute.xlu1 %4102 }
 0x4b6   :  { %v4119_v48 = vsel %vm295_vm1, %v4101_v45, %v11201_v21 }
 0x4b7   :  { %v11207_v4 = vmax.f32 %v4055_v25, %v4119_v48  ;;  %v11224_v25 = vpop.permute.xlu0 %4187 }
 0x4b8   :  { %5326 = vrot.lane.b32.xlu0 %v11174_v42, %s13728_s17 }
 0x4b9   :  { %v4182_v36 = vpop.permute.xlu1 %4181  ;;  %4195 = vrot.lane.b32.xlu1 %v11207_v4, %s13746_s10 }
 0x4ba   :  { %v4206_v61 = vsel %vm816_vm13, %v11080_v59, %v4182_v36  ;;  %v4207_v50 = vsel %vm816_vm13, %v4182_v36, %v4184_v0 }
 0x4bb   :  { %v11217_v55 = vmax.f32 %v11004_v13, %v4206_v61  ;;  %v11220_v3 = vmax.f32 %v11057_v49, %v4207_v50  ;;  %v11263_v49 = vmax.f32 %v4054_v30, %v4118_v15  ;;  %v4463_v30 = vrot.slane %v11178_v63, 6 }
 0x4bc   :  { %5169 = vrot.lane.b32.xlu0 %v11083_v60, %s8232_s28 }
 0x4bd   :  { %4253 = vst [vmem:[#allocation3 + $0x768] sm:$0x3f] %v11217_v55  ;;  %4254 = vst [vmem:[#allocation3 + $0x330] sm:$0x3f] %v11220_v3  ;;  %v4186_v29 = vpop.permute.xlu1 %4185  ;;  %5032 = vrot.lane.b32.xlu1 %v11135_v8, %s13749_s8  ;;  %v11233_v13 = vrot.slane %v11217_v55, 4  ;;  %v11239_v17 = vrot.slane %v11220_v3, 4 }
 0x4be   :  { %5690 = vst [vmem:[#allocation3 + $0x6b8] sm:$0x3f] %v11217_v55  ;;  %5691 = vst [vmem:[#allocation3 + $0x698] sm:$0x3f] %v11220_v3  ;;  %v4208_v37 = vsel %vm816_vm13, %v4184_v0, %v4186_v29  ;;  %v4209_v23 = vsel %vm816_vm13, %v4186_v29, %v11224_v25  ;;  %v11333_v31 = vrot.slane %v11217_v55, 2  ;;  %v11367_v39 = vrot.slane %v11220_v3, 2 }
 0x4bf   :  { %v11243_v41 = vmax.f32 %v11038_v28, %v4208_v37  ;;  %v11246_v62 = vmax.f32 %v11064_v12, %v4209_v23  ;;  %5006 = vst [vmem:[#allocation3 + $0x220] ss:$-452 sps:$4 sm:$0xf3] %v11233_v13   ;;  %5007 = vst [vmem:[#allocation3 + $0x358] ss:$-172 sps:$4 sm:$0xf3] %v11239_v17  }
 0x4c0   :  { %5099 = vrot.lane.b32.xlu0 %v11094_v20, %s13733_s24 }
 0x4c1   :  { %4255 = vst [vmem:[#allocation3 + $0x448] sm:$0x3f] %v11243_v41  ;;  %4256 = vst [vmem:[#allocation3 + $0x380] sm:$0x3f] %v11246_v62  ;;  %5030 = vrot.lane.b32.xlu1 %v11174_v42, %s13749_s8  ;;  %v11259_v28 = vrot.slane %v11243_v41, 4  ;;  %v11266_v16 = vrot.slane %v11246_v62, 4  ;;  %v11306_v12 = vpop.permute.xlu1 %4104 }
 0x4c2   :  { %5692 = vst [vmem:[#allocation3 + $0x2e8] sm:$0x3f] %v11243_v41  ;;  %5693 = vst [vmem:[#allocation3 + $0x5c0] sm:$0x3f] %v11246_v62 }
 0x4c3   :  { %5008 = vst [vmem:[#allocation3 + $0x430] ss:$-972 sps:$4 sm:$0xf3] %v11259_v28   ;;  %5009 = vst [vmem:[#allocation3 + $0x798] ss:$-620 sps:$4 sm:$0xf3] %v11266_v16  }
 0x4c4   :  { %4193 = vrot.lane.b32.xlu0 %v11263_v49, %s13746_s10 }
 0x4c5   :  { %4912 = vrot.lane.b32.xlu1 %v11107_v18, %s8230_s18 }
 0x4c8   :  { %5097 = vrot.lane.b32.xlu0 %v11117_v2, %s13733_s24 }
 0x4c9   :  { %4842 = vrot.lane.b32.xlu1 %v11117_v2, %s8229_s2 }
 0x4cc   :  { %5034 = vrot.lane.b32.xlu0 %v11138_v38, %s13749_s8 }
 0x4cd   :  { %4840 = vrot.lane.b32.xlu1 %v11178_v63, %s8229_s2 }
 0x4d0   :  { %4910 = vrot.lane.b32.xlu0 %v11156_v44, %s8230_s18 }
 0x4d1   :  { %4697 = vrot.lane.b32.xlu1 %v11110_v22, %s13730_s27 }
 0x4d4   :  { %4908 = vrot.lane.b32.xlu0 %v4275_v54, %s8230_s18 }
 0x4d5   :  { %4777 = vrot.lane.b32.xlu1 %v11135_v8, %s13726_s23 }
 0x4d8   :  { %4844 = vrot.lane.b32.xlu0 %v11094_v20, %s8229_s2 }
 0x4d9   :  { %4773 = vrot.lane.b32.xlu1 %v4463_v30, %s13726_s23 }
 0x4dc   :  { %4695 = vrot.lane.b32.xlu0 %v11127_v52, %s13730_s27 }
 0x4dd   :  { %4617 = vrot.lane.b32.xlu1 %v11107_v18, %s13728_s17 }
 0x4e0   :  { %4775 = vrot.lane.b32.xlu0 %v11174_v42, %s13726_s23 }
 0x4e1   :  { %4547 = vrot.lane.b32.xlu1 %v11117_v2, %s8231_s29 }
 0x4e4   :  { %4693 = vrot.lane.b32.xlu0 %v4369_v46, %s13730_s27 }
 0x4e5   :  { %4545 = vrot.lane.b32.xlu1 %v11178_v63, %s8231_s29 }
 0x4e7   :  { %v4296_v32 = vpop.permute.xlu0 %4295 }
 0x4e8   :  { %4615 = vrot.lane.b32.xlu0 %v11156_v44, %s13728_s17 }
 0x4e9   :  { %4387 = vrot.lane.b32.xlu1 %v11110_v22, %s13733_s24 }
 0x4eb   :  { %v11312_v57 = vpop.permute.xlu1 %4297  ;;  %v11314_v40 = vpop.permute.xlu0 %4293 }
 0x4ec   :  { %v4320_v59 = vsel %vm415_vm2, %v4296_v32, %v11312_v57  ;;  %v4319_v10 = vsel %vm415_vm2, %v11314_v40, %v4296_v32  ;;  %4613 = vrot.lane.b32.xlu0 %v4275_v54, %s13728_s17 }
 0x4ed   :  { %4346 = vst [vmem:[#allocation3 + $0x6e0] ss:$-1732 sps:$4 sm:$0xcf] %v4320_v59   ;;  %5711 = vst [vmem:[#allocation3 + $0xd8] ss:$1188 sps:$4 sm:$0xcf] %v4320_v59   ;;  %4481 = vrot.lane.b32.xlu1 %v11135_v8, %s8232_s28 }
 0x4ee   :  { %4345 = vst [vmem:[#allocation3 + $0x720] ss:$-580 sps:$4 sm:$0xcf] %v4319_v10   ;;  %5710 = vst [vmem:[#allocation3 + $0x2b8] ss:$-236 sps:$4 sm:$0xcf] %v4319_v10  }
 0x4ef   :  { %v5543_v9 = vpop.permute.xlu1 %5542  ;;  %v11323_v6 = vpop.permute.xlu0 %5544 }
 0x4f0   :  { %v5569_v33 = vsel %vm4868_vm0, %v5543_v9, %v11323_v6  ;;  %4549 = vrot.lane.b32.xlu0 %v11094_v20, %s8231_s29 }
 0x4f1   :  { %5595 = vst [vmem:[#allocation3 + $0x790] ss:$-1532 sps:$4 sm:$0xf3] %v5569_v33   ;;  %4477 = vrot.lane.b32.xlu1 %v4463_v30, %s8232_s28 }
 0x4f3   :  { %v5623_v18 = vpop.permute.xlu1 %5622  ;;  %v11330_v22 = vpop.permute.xlu0 %5624 }
 0x4f4   :  { %v5649_v2 = vsel %vm4936_vm12, %v5623_v18, %v11330_v22  ;;  %4385 = vrot.lane.b32.xlu0 %v11127_v52, %s13733_s24  ;;  %v6014_v47 = vld [vmem:[#allocation3 + $0x578] sm:$0xff] }
 0x4f5   :  { %v6013_v8 = vld [vmem:[#allocation3 + $0x1c8] sm:$0xff]  ;;  %5675 = vst [vmem:[#allocation3 + $0x790] sm:$0xfc] %v5649_v2  ;;  %4299 = vrot.lane.b32.xlu1 %v11333_v31, %s13749_s8  ;;  %6124 = vmatprep.subr.mxu0 %v6014_v47 }
 0x4f6   :  { %6125 = vmatpush1.msra.mxu0 %v6013_v8 }
 0x4f7   :  { %v4190_v20 = vpop.permute.xlu1 %4189 }
 0x4f8   :  { %v4210_v19 = vsel %vm816_vm13, %v11224_v25, %v4190_v20  ;;  %4479 = vrot.lane.b32.xlu0 %v11174_v42, %s8232_s28  ;;  %v11360_v42 = vrot.slane %v11217_v55, 6 }
 0x4f9   :  { %v11346_v43 = vmax.f32 %v11043_v53, %v4210_v19  ;;  %4289 = vrot.lane.b32.xlu1 %v4275_v54, %s13749_s8 }
 0x4fb   :  { %4257 = vst [vmem:[#allocation3 + $0x110] sm:$0x3f] %v11346_v43  ;;  %5694 = vst [vmem:[#allocation3 + $0x718] sm:$0x3f] %v11346_v43  ;;  %v5541_v52 = vpop.permute.xlu1 %5540  ;;  %v11352_v11 = vrot.slane %v11346_v43, 4 }
 0x4fc   :  { %v5568_v45 = vsel %vm4868_vm0, %v5541_v52, %v5543_v9  ;;  %4383 = vrot.lane.b32.xlu0 %v4369_v46, %s13733_s24  ;;  %v6001_v35 = vld [vmem:[#allocation3 + $0x790] sm:$0xff] }
 0x4fd   :  { %5594 = vst [vmem:[#allocation3 + $0x668] ss:$-916 sps:$4 sm:$0xf3] %v5568_v45   ;;  %5548 = vrot.lane.b32.xlu1 %v11233_v13, %s8229_s2  ;;  %6126 = vmatprep.subr.mxu0 %v6001_v35  ;;  %5010 = vst [vmem:[#allocation3 + $0x6a8] ss:$-308 sps:$4 sm:$0xf3] %v11352_v11  }
 0x4ff   :  { %v5463_v53 = vpop.permute.xlu1 %5462 }
 0x500   :  { %4291 = vrot.lane.b32.xlu0 %v11156_v44, %s13749_s8  ;;  %v11381_v44 = vrot.slane %v11092_v7, 6 }
 0x501   :  { %5628 = vrot.lane.b32.xlu1 %v11360_v42, %s8230_s18 }
 0x503   :  { %v5461_v63 = vpop.permute.xlu1 %5460 }
 0x504   :  { %v5488_v48 = vsel %vm13872_vm11, %v5461_v63, %v5463_v53  ;;  %4301 = vrot.lane.b32.xlu0 %v11367_v39, %s13749_s8  ;;  %vm13880_vm11 = vmmov %vm13873_vm7 }
 0x505   :  { %5514 = vst [vmem:[#allocation3 + $0x2d0] ss:$-108 sps:$4 sm:$0xcf] %v5488_v48   ;;  %4553 = vrot.lane.b32.xlu1 %v11092_v7, %s8231_s29 }
 0x507   :  { %v11374_v0 = vpop.permute.xlu1 %5397 }
 0x508   :  { %5546 = vrot.lane.b32.xlu0 %v11114_v14, %s8229_s2 }
 0x509   :  { %5468 = vrot.lane.b32.xlu1 %v11333_v31, %s13726_s23 }
 0x50b   :  { %v5249_v36 = vpop.permute.xlu1 %5248 }
 0x50c   :  { %5626 = vrot.lane.b32.xlu0 %v11381_v44, %s8230_s18  ;;  %v5987_v19 = vld [vmem:[#allocation3 + $0x2d0] sm:$0xff] }
 0x50d   :  { %4391 = vrot.lane.b32.xlu1 %v11114_v14, %s13733_s24 }
 0x50e   :  { %v11387_v61 = vpop.permute.xlu0 %4191 }
 0x50f   :  { %v4211_v50 = vsel %vm816_vm13, %v4190_v20, %v11387_v61  ;;  %v11391_v25 = vpop.permute.xlu1 %5328  ;;  %v11429_v20 = vrot.slane %v11246_v62, 2 }
 0x510   :  { %v11394_v29 = vmax.f32 %v11147_v51, %v4211_v50  ;;  %4551 = vrot.lane.b32.xlu0 %v11076_v26, %s8231_s29 }
 0x511   :  { %4485 = vrot.lane.b32.xlu1 %v11381_v44, %s8232_s28 }
 0x512   :  { %4258 = vst [vmem:[#allocation3 + $0x518] sm:$0x3f] %v11394_v29  ;;  %5695 = vst [vmem:[#allocation3 + $0x710] sm:$0x3f] %v11394_v29  ;;  %v5621_v37 = vpop.permute.xlu0 %5620  ;;  %v11403_v23 = vrot.slane %v11394_v29, 4 }
 0x513   :  { %v5648_v15 = vsel %vm4936_vm12, %v5621_v37, %v5623_v18  ;;  %v5247_v54 = vpop.permute.xlu1 %5246 }
 0x514   :  { %5674 = vst [vmem:[#allocation3 + $0x668] sm:$0xfc] %v5648_v15  ;;  %v5274_v51 = vsel %vm4573_vm8, %v5247_v54, %v5249_v36  ;;  %5466 = vrot.lane.b32.xlu0 %v11104_v56, %s13726_s23  ;;  %5011 = vst [vmem:[#allocation3 + $0x350] ss:$740 sps:$4 sm:$0xf3] %v11403_v23   ;;  %v11462_v15 = vrot.slane %v11243_v41, 2 }
 0x515   :  { %5300 = vst [vmem:[#allocation3 + $0x620] ss:$-76 sps:$4 sm:$0xf3] %v5274_v51   ;;  %5401 = vrot.lane.b32.xlu1 %v11217_v55, %s13730_s27 }
 0x516   :  { %v11412_v30 = vpop.permute.xlu0 %5464 }
 0x517   :  { %v5489_v46 = vsel %vm13873_vm7, %v5463_v53, %v11412_v30  ;;  %v5168_v32 = vpop.permute.xlu1 %5167 }
 0x518   :  { %5515 = vst [vmem:[#allocation3 + $0x190] ss:$1236 sps:$4 sm:$0xcf] %v5489_v46   ;;  %4389 = vrot.lane.b32.xlu0 %v11086_v34, %s13733_s24 }
 0x519   :  { %5254 = vrot.lane.b32.xlu1 %v11233_v13, %s8231_s29 }
 0x51a   :  { %v5396_v59 = vpop.permute.xlu0 %5395 }
 0x51b   :  { %v5422_v10 = vsel %vm13874_vm6, %v5396_v59, %v11374_v0  ;;  %v5166_v9 = vpop.permute.xlu1 %5165  ;;  %v6000_v33 = vld [vmem:[#allocation3 + $0x668] sm:$0xff] }
 0x51c   :  { %5448 = vst [vmem:[#allocation3 + $0x660] sm:$0x3f] %v5422_v10  ;;  %v5193_v18 = vsel %vm4505_vm5, %v5166_v9, %v5168_v32  ;;  %4483 = vrot.lane.b32.xlu0 %v11138_v38, %s8232_s28  ;;  %6127 = vmatpush1.msra.mxu0 %v6000_v33  ;;  %v11479_v33 = vrot.slane %v11243_v41, 6 }
 0x51d   :  { %5219 = vst [vmem:[#allocation3 + $0x5d0] ss:$-692 sps:$4 sm:$0xcf] %v5193_v18   ;;  %5334 = vrot.lane.b32.xlu1 %v11360_v42, %s13728_s17  ;;  %v11488_v18 = vmax.f32 %v4057_v5, %v11306_v12 }
 0x51e   :  { %v5394_v2 = vpop.permute.xlu0 %5393 }
 0x51f   :  { %v5421_v47 = vsel %vm13875_vm9, %v5394_v2, %v5396_v59  ;;  %v5988_v8 = vld [vmem:[#allocation3 + $0x190] sm:$0xff]  ;;  %v11445_v63 = vpop.permute.xlu1 %5101  ;;  %vm13882_vm9 = vmmov %vm13877_vm4 }
 0x520   :  { %5447 = vst [vmem:[#allocation3 + $0x260] sm:$0x3f] %v5421_v47  ;;  %5399 = vrot.lane.b32.xlu0 %v11092_v7, %s13730_s27  ;;  %6128 = vmatprep.subr.mxu0 %v5988_v8 }
 0x521   :  { %4305 = vrot.lane.b32.xlu1 %v11429_v20, %s13749_s8  ;;  %6129 = vmatpush1.msra.mxu0 %v5987_v19 }
 0x522   :  { %v11435_v52 = vpop.permute.xlu0 %5250 }
 0x523   :  { %v5275_v45 = vsel %vm4573_vm8, %v5249_v36, %v11435_v52  ;;  %v5975_v35 = vld [vmem:[#allocation3 + $0x660] sm:$0xff]  ;;  %v11455_v36 = vld [vmem:[%s13629_s3 + $0x8] sm:$0xff] }
 0x524   :  { %5301 = vst [vmem:[#allocation3 + $0x460] ss:$-644 sps:$4 sm:$0xf3] %v5275_v45   ;;  %5252 = vrot.lane.b32.xlu0 %v11114_v14, %s8231_s29  ;;  %6130 = vmatprep.subr.mxu0 %v5975_v35 }
 0x525   :  { %5173 = vrot.lane.b32.xlu1 %v11333_v31, %s8232_s28  ;;  %7949 = vmatprep.mubr.msk.f32.mxu0 %vm6077_vm3, %v11455_v36 }
 0x526   :  { %v11443_v53 = vpop.permute.xlu0 %5330  ;;  %7953 = vmatprep.mubr.msk.f32.mxu1 %vm6077_vm3, %v11455_v36 }
 0x527   :  { %v5355_v48 = vsel %vm13876_vm15, %v11391_v25, %v11443_v53  ;;  %v5974_v50 = vld [vmem:[#allocation3 + $0x260] sm:$0xff]  ;;  %vm13883_vm15 = vmmov %vm13877_vm4 }
 0x528   :  { %5381 = vst [vmem:[#allocation3 + $0x460] sm:$0xfc] %v5355_v48  ;;  %5332 = vrot.lane.b32.xlu0 %v11381_v44, %s13728_s17  ;;  %6131 = vmatpush1.msra.mxu0 %v5974_v50 }
 0x529   :  { %5105 = vrot.lane.b32.xlu1 %v11217_v55, %s13733_s24 }
 0x52a   :  { %v5327_v37 = vpop.permute.xlu0 %5326 }
 0x52b   :  { %v5354_v54 = vsel %vm13877_vm4, %v5327_v37, %v11391_v25  ;;  %v11468_v51 = vpop.permute.xlu1 %4195  ;;  %v5948_v37 = vld [vmem:[#allocation3 + $0x5d0] sm:$0xff]  ;;  %vm13884_vm4 = vmmov %vm13878_vm10 }
 0x52c   :  { %5380 = vst [vmem:[#allocation3 + $0x620] sm:$0xfc] %v5354_v54  ;;  %4303 = vrot.lane.b32.xlu0 %v11462_v15, %s13749_s8  ;;  %v4120_v54 = vsel %vm295_vm1, %v11201_v21, %v11306_v12  ;;  %vm13879_vm1 = vmmov %vm13874_vm6 }
 0x52d   :  { %5552 = vrot.lane.b32.xlu1 %v11259_v28, %s8229_s2  ;;  %v11538_v21 = vmax.f32 %v4056_v58, %v4120_v54  ;;  %vm13881_vm6 = vmmov %vm13879_vm1 }
 0x52e   :  { %v11474_v46 = vpop.permute.xlu0 %5169 }
 0x52f   :  { %v5194_v59 = vsel %vm4505_vm5, %v5168_v32, %v11474_v46  ;;  %v5033_v10 = vpop.permute.xlu1 %5032  ;;  %v5962_v9 = vld [vmem:[#allocation3 + $0x460] sm:$0xff] }
 0x530   :  { %5220 = vst [vmem:[#allocation3 + $0x1d8] ss:$724 sps:$4 sm:$0xcf] %v5194_v59   ;;  %5171 = vrot.lane.b32.xlu0 %v11104_v56, %s8232_s28  ;;  %6132 = vmatprep.subr.mxu0 %v5962_v9 }
 0x531   :  { %5632 = vrot.lane.b32.xlu1 %v11479_v33, %s8230_s18 }
 0x532   :  { %v5100_v25 = vpop.permute.xlu0 %5099 }
 0x533   :  { %v5126_v32 = vsel %vm13870_vm14, %v5100_v25, %v11445_v63  ;;  %v5031_v2 = vpop.permute.xlu1 %5030  ;;  %v5961_v47 = vld [vmem:[#allocation3 + $0x620] sm:$0xff]  ;;  %vm13885_vm14 = vmmov %vm13884_vm4 }
 0x534   :  { %5152 = vst [vmem:[#allocation3 + $0x4a8] sm:$0x3f] %v5126_v32  ;;  %v5058_v8 = vsel %vm415_vm2, %v5031_v2, %v5033_v10  ;;  %5103 = vrot.lane.b32.xlu0 %v11092_v7, %s13733_s24  ;;  %6133 = vmatpush1.msra.mxu0 %v5961_v47 }
 0x535   :  { %5084 = vst [vmem:[#allocation3 + $0x5e8] sm:$0xfc] %v5058_v8  ;;  %4199 = vrot.lane.b32.xlu1 %v11488_v18, %s13746_s10 }
 0x536   :  { %v4194_v19 = vpop.permute.xlu0 %4193 }
 0x537   :  { %v4212_v1 = vsel %vm816_vm13, %v11387_v61, %v4194_v19  ;;  %v4213_v5 = vsel %vm816_vm13, %v4194_v19, %v11468_v51  ;;  %v11501_v45 = vpop.permute.xlu1 %4912  ;;  %v5949_v35 = vld [vmem:[#allocation3 + $0x1d8] sm:$0xff] }
 0x538   :  { %v11504_v48 = vmax.f32 %v11167_v27, %v4212_v1  ;;  %v11507_v50 = vmax.f32 %v11263_v49, %v4213_v5  ;;  %5550 = vrot.lane.b32.xlu0 %v11239_v17, %s8229_s2  ;;  %6134 = vmatprep.subr.mxu0 %v5949_v35  ;;  %v11518_v49 = vrot.slane %v11220_v3, 6 }
 0x539   :  { %5038 = vrot.lane.b32.xlu1 %v11360_v42, %s13749_s8  ;;  %6135 = vmatpush1.msra.mxu0 %v5948_v37 }
 0x53a   :  { %4259 = vst [vmem:[#allocation3 + $0x498] sm:$0x3f] %v11504_v48  ;;  %4260 = vst [vmem:[#allocation3 + $0x320] sm:$0x3f] %v11507_v50  ;;  %v5098_v27 = vpop.permute.xlu0 %5097  ;;  %v11521_v61 = vrot.slane %v11504_v48, 4  ;;  %v11528_v2 = vrot.slane %v11507_v50, 4 }
 0x53b   :  { %5696 = vst [vmem:[#allocation3 + $0x20] sm:$0x3f] %v11504_v48  ;;  %5697 = vst [vmem:[#allocation3 + $0x4e8] sm:$0x3f] %v11507_v50  ;;  %v5125_v59 = vsel %vm13878_vm10, %v5098_v27, %v5100_v25  ;;  %v4843_v9 = vpop.permute.xlu1 %4842  ;;  %v5936_v32 = vld [vmem:[#allocation3 + $0x4a8] sm:$0xff] }
 0x53c   :  { %5151 = vst [vmem:[#allocation3 + $0x318] sm:$0x3f] %v5125_v59  ;;  %5630 = vrot.lane.b32.xlu0 %v11518_v49, %s8230_s18  ;;  %6136 = vmatprep.subr.mxu0 %v5936_v32  ;;  %5012 = vst [vmem:[#allocation3 + $0x200] ss:$644 sps:$4 sm:$0xf3] %v11521_v61   ;;  %v5922_v27 = vld [vmem:[#allocation3 + $0x5e8] sm:$0xff] }
 0x53d   :  { %5472 = vrot.lane.b32.xlu1 %v11462_v15, %s13726_s23  ;;  %5013 = vst [vmem:[#allocation3 + $0xe8] ss:$-76 sps:$4 sm:$0xf3] %v11528_v2   ;;  %vm13886_vm10 = vmmov %vm13873_vm7 }
 0x53e   :  { %v11540_v12 = vpop.permute.xlu0 %5034 }
 0x53f   :  { %v5059_v25 = vsel %vm415_vm2, %v5033_v10, %v11540_v12  ;;  %v4841_v47 = vpop.permute.xlu1 %4840 }
 0x540   :  { %5085 = vst [vmem:[#allocation3 + $0x150] sm:$0xfc] %v5059_v25  ;;  %v4869_v8 = vsel %vm4868_vm0, %v4841_v47, %v4843_v9  ;;  %4197 = vrot.lane.b32.xlu0 %v11538_v21, %s13746_s10 }
 0x541   :  { %4895 = vst [vmem:[#allocation3 + $0x1f0] sm:$0x3f] %v4869_v8  ;;  %4916 = vrot.lane.b32.xlu1 %v11104_v56, %s8230_s18 }
 0x542   :  { %v4911_v19 = vpop.permute.xlu0 %4910 }
 0x543   :  { %v4938_v24 = vsel %vm4936_vm12, %v4911_v19, %v11501_v45  ;;  %v11551_v58 = vpop.permute.xlu1 %4697  ;;  %v5935_v1 = vld [vmem:[#allocation3 + $0x318] sm:$0xff] }
 0x544   :  { %4964 = vst [vmem:[#allocation3 + $0x390] ss:$132 sps:$4 sm:$0xcf] %v4938_v24   ;;  %5036 = vrot.lane.b32.xlu0 %v11381_v44, %s13749_s8  ;;  %6137 = vmatpush1.msra.mxu0 %v5935_v1 }
 0x545   :  { %5405 = vrot.lane.b32.xlu1 %v11243_v41, %s13730_s27 }
 0x546   :  { %v4909_v10 = vpop.permute.xlu0 %4908 }
 0x547   :  { %v4937_v5 = vsel %vm4936_vm12, %v4909_v10, %v4911_v19  ;;  %v11558_v35 = vpop.permute.xlu1 %4777  ;;  %v5923_v37 = vld [vmem:[#allocation3 + $0x150] sm:$0xff] }
 0x548   :  { %4963 = vst [vmem:[#allocation3] ss:$500 sps:$4 sm:$0xcf] %v4937_v5   ;;  %5470 = vrot.lane.b32.xlu0 %v11367_v39, %s13726_s23  ;;  %6138 = vmatprep.subr.mxu0 %v5923_v37 }
 0x549   :  { %4848 = vrot.lane.b32.xlu1 %v11092_v7, %s8229_s2  ;;  %6139 = vmatpush1.msra.mxu0 %v5922_v27 }
 0x54a   :  { %v11564_v54 = vpop.permute.xlu0 %4844 }
 0x54b   :  { %v4870_v59 = vsel %vm4868_vm0, %v4843_v9, %v11564_v54  ;;  %v4774_v32 = vpop.permute.xlu1 %4773  ;;  %v5910_v25 = vld [vmem:[#allocation3 + $0x390] sm:$0xff] }
 0x54c   :  { %4896 = vst [vmem:[#allocation3 + $0x410] sm:$0x3f] %v4870_v59  ;;  %4914 = vrot.lane.b32.xlu0 %v11083_v60, %s8230_s18  ;;  %6140 = vmatprep.subr.mxu0 %v5910_v25 }
 0x54d   :  { %5258 = vrot.lane.b32.xlu1 %v11259_v28, %s8231_s29 }
 0x54e   :  { %v4696_v47 = vpop.permute.xlu0 %4695 }
 0x54f   :  { %v4722_v7 = vsel %vm13879_vm1, %v4696_v47, %v11551_v58  ;;  %v11574_v8 = vpop.permute.xlu1 %4617  ;;  %v5909_v19 = vld [vmem:[#allocation3] sm:$0xff]  ;;  %v5896_v37 = vld [vmem:[#allocation3 + $0x1f0] sm:$0xff]  ;;  %vm13887_vm1 = vmmov %vm13873_vm7 }
 0x550   :  { %4748 = vst [vmem:[#allocation3 + $0x678] ss:$316 sps:$4 sm:$0xf3] %v4722_v7   ;;  %5403 = vrot.lane.b32.xlu0 %v11220_v3, %s13730_s27  ;;  %6141 = vmatpush1.msra.mxu0 %v5909_v19 }
 0x551   :  { %5338 = vrot.lane.b32.xlu1 %v11479_v33, %s13728_s17 }
 0x552   :  { %v4776_v9 = vpop.permute.xlu0 %4775 }
 0x553   :  { %v4801_v24 = vsel %vm13880_vm11, %v4774_v32, %v4776_v9  ;;  %v4802_v1 = vsel %vm13873_vm7, %v4776_v9, %v11558_v35  ;;  %v4548_v10 = vpop.permute.xlu1 %4547  ;;  %v5897_v5 = vld [vmem:[#allocation3 + $0x410] sm:$0xff]  ;;  %vm6084_vm11 = vcmask 1045504   ;;  %vm13888_vm7 = vmmov %vm13884_vm4 }
 0x554   :  { %4827 = vst [vmem:[#allocation3 + $0x88] sm:$0xfc] %v4801_v24  ;;  %4828 = vst [vmem:[#allocation3 + $0x678] sm:$0xfc] %v4802_v1  ;;  %4846 = vrot.lane.b32.xlu0 %v11076_v26, %s8229_s2  ;;  %6142 = vmatprep.subr.mxu0 %v5897_v5 }
 0x555   :  { %4701 = vrot.lane.b32.xlu1 %v11114_v14, %s13730_s27  ;;  %6143 = vmatpush1.msra.mxu0 %v5896_v37 }
 0x556   :  { %v4694_v27 = vpop.permute.xlu0 %4693 }
 0x557   :  { %v4721_v59 = vsel %vm13881_vm6, %v4694_v27, %v4696_v47  ;;  %v4546_v32 = vpop.permute.xlu1 %4545  ;;  %vm13889_vm6 = vmmov %vm13884_vm4 }
 0x558   :  { %4747 = vst [vmem:[#allocation3 + $0x88] ss:$916 sps:$4 sm:$0xf3] %v4721_v59   ;;  %v4574_v25 = vsel %vm4573_vm8, %v4546_v32, %v4548_v10  ;;  %5256 = vrot.lane.b32.xlu0 %v11239_v17, %s8231_s29 }
 0x559   :  { %4600 = vst [vmem:[#allocation3 + $0x3f8] sm:$0x3f] %v4574_v25  ;;  %4781 = vrot.lane.b32.xlu1 %v11381_v44, %s13726_s23 }
 0x55a   :  { %v4616_v26 = vpop.permute.xlu0 %4615 }
 0x55b   :  { %v4642_v7 = vsel %vm13882_vm9, %v4616_v26, %v11574_v8  ;;  %v11595_v14 = vpop.permute.xlu1 %4387  ;;  %v5884_v19 = vld [vmem:[#allocation3 + $0x678] sm:$0xff]  ;;  %vm13890_vm9 = vcmask 506880  }
 0x55c   :  { %4668 = vst [vmem:[#allocation3 + $0x7b0] ss:$-268 sps:$4 sm:$0xcf] %v4642_v7   ;;  %5336 = vrot.lane.b32.xlu0 %v11518_v49, %s13728_s17  ;;  %6144 = vmatprep.subr.mxu0 %v5884_v19 }
 0x55d   :  { %5177 = vrot.lane.b32.xlu1 %v11462_v15, %s8232_s28 }
 0x55e   :  { %v4614_v47 = vpop.permute.xlu0 %4613 }
 0x55f   :  { %v4641_v9 = vsel %vm13883_vm15, %v4614_v47, %v4616_v26  ;;  %v11602_v24 = vpop.permute.xlu1 %4481  ;;  %v5883_v44 = vld [vmem:[#allocation3 + $0x88] sm:$0xff]  ;;  %vm13891_vm15 = vmmov %vm13890_vm9 }
 0x560   :  { %4667 = vst [vmem:[#allocation3 + $0x418] ss:$-28 sps:$4 sm:$0xcf] %v4641_v9   ;;  %4699 = vrot.lane.b32.xlu0 %v11086_v34, %s13730_s27  ;;  %6145 = vmatpush1.msra.mxu0 %v5883_v44 }
 0x561   :  { %4621 = vrot.lane.b32.xlu1 %v11104_v56, %s13728_s17 }
 0x562   :  { %v11608_v1 = vpop.permute.xlu0 %4549 }
 0x563   :  { %v4575_v5 = vsel %vm4573_vm8, %v4548_v10, %v11608_v1  ;;  %v4478_v37 = vpop.permute.xlu1 %4477  ;;  %v5871_v27 = vld [vmem:[#allocation3 + $0x7b0] sm:$0xff] }
 0x564   :  { %4601 = vst [vmem:[#allocation3 + $0x6a0] sm:$0x3f] %v4575_v5  ;;  %4779 = vrot.lane.b32.xlu0 %v11138_v38, %s13726_s23  ;;  %6146 = vmatprep.subr.mxu0 %v5871_v27 }
 0x565   :  { %5109 = vrot.lane.b32.xlu1 %v11243_v41, %s13733_s24 }
 0x566   :  { %v4386_v34 = vpop.permute.xlu0 %4385 }
 0x567   :  { %v4412_v59 = vsel %vm13884_vm4, %v4386_v34, %v11595_v14  ;;  %v4300_v56 = vpop.permute.xlu1 %4299  ;;  %v5870_v32 = vld [vmem:[#allocation3 + $0x418] sm:$0xff]  ;;  %vm13892_vm4 = vcmask 523264  }
 0x568   :  { %4438 = vst [vmem:[#allocation3 + $0x368] ss:$420 sps:$4 sm:$0xf3] %v4412_v59   ;;  %v4321_v10 = vsel %vm415_vm2, %v11312_v57, %v4300_v56  ;;  %5175 = vrot.lane.b32.xlu0 %v11367_v39, %s8232_s28  ;;  %6147 = vmatpush1.msra.mxu0 %v5870_v32  ;;  %v5857_v57 = vld [vmem:[#allocation3 + $0x3f8] sm:$0xff] }
 0x569   :  { %4347 = vst [vmem:[#allocation3 + $0x788] ss:$-820 sps:$4 sm:$0xcf] %v4321_v10   ;;  %5712 = vst [vmem:[#allocation3 + $0xb8] ss:$988 sps:$4 sm:$0xcf] %v4321_v10   ;;  %5042 = vrot.lane.b32.xlu1 %v11479_v33, %s13749_s8 }
 0x56a   :  { %v4480_v38 = vpop.permute.xlu0 %4479 }
 0x56b   :  { %v4506_v25 = vsel %vm4505_vm5, %v4478_v37, %v4480_v38  ;;  %v4507_v26 = vsel %vm4505_vm5, %v4480_v38, %v11602_v24  ;;  %v4290_v7 = vpop.permute.xlu1 %4289  ;;  %v5858_v19 = vld [vmem:[#allocation3 + $0x6a0] sm:$0xff] }
 0x56c   :  { %4532 = vst [vmem:[#allocation3 + $0x690] sm:$0xfc] %v4506_v25  ;;  %4533 = vst [vmem:[#allocation3 + $0x368] sm:$0xfc] %v4507_v26  ;;  %4619 = vrot.lane.b32.xlu0 %v11083_v60, %s13728_s17  ;;  %6148 = vmatprep.subr.mxu0 %v5858_v19 }
 0x56d   :  { %4920 = vrot.lane.b32.xlu1 %v11367_v39, %s8230_s18  ;;  %6149 = vmatpush1.msra.mxu0 %v5857_v57 }
 0x56e   :  { %v4384_v47 = vpop.permute.xlu0 %4383 }
 0x56f   :  { %v4411_v9 = vsel %vm13885_vm14, %v4384_v47, %v4386_v34  ;;  %v11632_v44 = vpop.permute.xlu1 %5548  ;;  %vm13893_vm14 = vmmov %vm13892_vm4 }
 0x570   :  { %4437 = vst [vmem:[#allocation3 + $0x690] ss:$-316 sps:$4 sm:$0xf3] %v4411_v9   ;;  %5107 = vrot.lane.b32.xlu0 %v11220_v3, %s13733_s24 }
 0x571   :  { %4852 = vrot.lane.b32.xlu1 %v11220_v3, %s8229_s2 }
 0x572   :  { %v4292_v5 = vpop.permute.xlu0 %4291 }
 0x573   :  { %v4317_v60 = vsel %vm415_vm2, %v4290_v7, %v4292_v5  ;;  %v4318_v37 = vsel %vm415_vm2, %v4292_v5, %v11314_v40  ;;  %v11641_v27 = vpop.permute.xlu1 %5628  ;;  %v5845_v59 = vld [vmem:[#allocation3 + $0x368] sm:$0xff] }
 0x574   :  { %4343 = vst [vmem:[#allocation3 + $0x550] ss:$-668 sps:$4 sm:$0xcf] %v4317_v60   ;;  %4344 = vst [vmem:[#allocation3 + $0x508] ss:$-340 sps:$4 sm:$0xcf] %v4318_v37   ;;  %5040 = vrot.lane.b32.xlu0 %v11518_v49, %s13749_s8  ;;  %6150 = vmatprep.subr.mxu0 %v5845_v59 }
 0x575   :  { %4705 = vrot.lane.b32.xlu1 %v11239_v17, %s13730_s27 }
 0x576   :  { %v11647_v34 = vpop.permute.xlu0 %4301 }
 0x577   :  { %v4322_v32 = vsel %vm415_vm2, %v4300_v56, %v11647_v34  ;;  %v11651_v10 = vpop.permute.xlu1 %4553  ;;  %v5844_v40 = vld [vmem:[#allocation3 + $0x690] sm:$0xff] }
 0x578   :  { %4348 = vst [vmem:[#allocation3 + $0x338] ss:$1076 sps:$4 sm:$0xcf] %v4322_v32   ;;  %5713 = vst [vmem:[#allocation3 + $0x250] ss:$1132 sps:$4 sm:$0xcf] %v4322_v32   ;;  %4918 = vrot.lane.b32.xlu0 %v11333_v31, %s8230_s18  ;;  %6151 = vmatpush1.msra.mxu0 %v5844_v40 }
 0x579   :  { %4785 = vrot.lane.b32.xlu1 %v11518_v49, %s13726_s23 }
 0x57a   :  { %v5547_v38 = vpop.permute.xlu0 %5546 }
 0x57b   :  { %v5570_v25 = vsel %vm4868_vm0, %v11323_v6, %v5547_v38  ;;  %v5571_v26 = vsel %vm4868_vm0, %v5547_v38, %v11632_v44  ;;  %v11661_v56 = vpop.permute.xlu1 %5468  ;;  %v5832_v7 = vld [vmem:[#allocation3 + $0x508] sm:$0xff]  ;;  %v5831_v19 = vld [vmem:[#allocation3 + $0x550] sm:$0xff] }
 0x57c   :  { %5596 = vst [vmem:[#allocation3 + $0x160] ss:$-84 sps:$4 sm:$0xf3] %v5570_v25   ;;  %5597 = vst [vmem:[#allocation3 + $0x288] ss:$284 sps:$4 sm:$0xf3] %v5571_v26   ;;  %4850 = vrot.lane.b32.xlu0 %v11217_v55, %s8229_s2  ;;  %6152 = vmatprep.subr.mxu0 %v5832_v7 }
 0x57d   :  { %4557 = vrot.lane.b32.xlu1 %v11220_v3, %s8231_s29  ;;  %6153 = vmatpush1.msra.mxu0 %v5831_v19  ;;  %v5819_v57 = vld [vmem:[#allocation3 + $0x3b0] sm:$0xff] }
 0x57e   :  { %6154 = vmatprep.subr.mxu0 %v5819_v57  ;;  %v5627_v6 = vpop.permute.xlu0 %5626  ;;  %v5818_v47 = vld [vmem:[#allocation3 + $0x2b0] sm:$0xff] }
 0x57f   :  { %v5650_v9 = vsel %vm4936_vm12, %v11330_v22, %v5627_v6  ;;  %v5651_v5 = vsel %vm4936_vm12, %v5627_v6, %v11641_v27  ;;  %v11671_v60 = vpop.permute.xlu1 %4391  ;;  %6155 = vmatpush1.msra.mxu0 %v5818_v47  ;;  %v6016_v37 = vld [vmem:[#allocation3 + $0x6b8] sm:$0xff]  ;;  %v6015_v3 = vld [vmem:[#allocation3 + $0x490] sm:$0xff]  ;;  %v11704_v47 = vrot.slane %v11394_v29, 2 }
 0x580   :  { %5676 = vst [vmem:[#allocation3 + $0x160] sm:$0xfc] %v5650_v9  ;;  %5677 = vst [vmem:[#allocation3 + $0x288] sm:$0xfc] %v5651_v5  ;;  %4703 = vrot.lane.b32.xlu0 %v11233_v13, %s13730_s27  ;;  %6201 = vmatprep.subr.mxu1 %v6016_v37 }
 0x581   :  { %4625 = vrot.lane.b32.xlu1 %v11367_v39, %s13728_s17  ;;  %6202 = vmatpush1.msra.mxu1 %v6015_v3 }
 0x582   :  { %v4552_v59 = vpop.permute.xlu0 %4551 }
 0x583   :  { %v4576_v22 = vsel %vm4573_vm8, %v11608_v1, %v4552_v59  ;;  %v4577_v32 = vsel %vm4573_vm8, %v4552_v59, %v11651_v10  ;;  %v11681_v40 = vpop.permute.xlu1 %4485 }
 0x584   :  { %4602 = vst [vmem:[#allocation3 + $0x3f0] sm:$0x3f] %v4576_v22  ;;  %4603 = vst [vmem:[#allocation3 + $0xa0] sm:$0x3f] %v4577_v32  ;;  %4783 = vrot.lane.b32.xlu0 %v11360_v42, %s13726_s23 }
 0x585   :  { %5801 = vst [vmem:[#allocation3 + $0x548] sm:$0x3f] %v4576_v22  ;;  %5802 = vst [vmem:[#allocation3 + $0xc8] sm:$0x3f] %v4577_v32  ;;  %4395 = vrot.lane.b32.xlu1 %v11239_v17, %s13733_s24  ;;  %v11729_v32 = vrot.slane %v11346_v43, 6 }
 0x586   :  { %v5467_v39 = vpop.permute.xlu0 %5466 }
 0x587   :  { %v5490_v38 = vsel %vm13886_vm10, %v11412_v30, %v5467_v39  ;;  %v5491_v1 = vsel %vm13887_vm1, %v5467_v39, %v11661_v56  ;;  %v11691_v25 = vpop.permute.xlu1 %5401  ;;  %v6003_v26 = vld [vmem:[#allocation3 + $0x288] sm:$0xff]  ;;  %v6002_v7 = vld [vmem:[#allocation3 + $0x160] sm:$0xff]  ;;  %v11736_v39 = vrot.slane %v11346_v43, 2  ;;  %vm13894_vm10 = vmmov %vm13889_vm6 }
 0x588   :  { %5516 = vst [vmem:[#allocation3 + $0x108] ss:$404 sps:$4 sm:$0xcf] %v5490_v38   ;;  %5517 = vst [vmem:[#allocation3 + $0x3a0] ss:$868 sps:$4 sm:$0xcf] %v5491_v1   ;;  %4555 = vrot.lane.b32.xlu0 %v11217_v55, %s8231_s29  ;;  %6203 = vmatprep.subr.mxu1 %v6003_v26 }
 0x589   :  { %4489 = vrot.lane.b32.xlu1 %v11518_v49, %s8232_s28  ;;  %6204 = vmatpush1.msra.mxu1 %v6002_v7  ;;  %vm13895_vm1 = vmmov %vm13889_vm6 }
 0x58a   :  { %v4390_v17 = vpop.permute.xlu0 %4389 }
 0x58b   :  { %v4413_v30 = vsel %vm13888_vm7, %v11595_v14, %v4390_v17  ;;  %v4414_v19 = vsel %vm13889_vm6, %v4390_v17, %v11671_v60  ;;  %v11701_v57 = vpop.permute.xlu1 %5254  ;;  %vm13898_vm6 = vmmov %vm13890_vm9 }
 0x58c   :  { %v6053_v6 = vld [vmem:[#allocation3 + $0xc8] sm:$0x3f]  ;;  %4439 = vst [vmem:[#allocation3 + $0x138] ss:$1516 sps:$4 sm:$0xf3] %v4413_v30   ;;  %4623 = vrot.lane.b32.xlu0 %v11333_v31, %s13728_s17 }
 0x58d   :  { %v6052_v55 = vld [vmem:[#allocation3 + $0x548] sm:$0x3f]  ;;  %4440 = vst [vmem:[#allocation3 + $0xc0] ss:$1572 sps:$4 sm:$0xf3] %v4414_v19   ;;  %7947 = vmatprep.subr.msk.mxu0 %vm6084_vm11, %v6053_v6  ;;  %4309 = vrot.lane.b32.xlu1 %v11704_v47, %s13749_s8 }
 0x58e   :  { %5745 = vst [vmem:[#allocation3 + $0x738] ss:$-1148 sps:$4 sm:$0xf3] %v4413_v30   ;;  %5746 = vst [vmem:[#allocation3 + $0x208] ss:$-300 sps:$4 sm:$0xf3] %v4414_v19   ;;  %7948 = vmatpush2.msk.msra.mxu0 %vm6084_vm11, %v6052_v55  ;;  %v4484_v49 = vpop.permute.xlu0 %4483 }
 0x58f   :  { %v4508_v14 = vsel %vm4505_vm5, %v11602_v24, %v4484_v49  ;;  %v4509_v9 = vsel %vm4505_vm5, %v4484_v49, %v11681_v40  ;;  %v11716_v5 = vpop.permute.xlu1 %5334  ;;  %v5990_v37 = vld [vmem:[#allocation3 + $0x3a0] sm:$0xff]  ;;  %v5989_v3 = vld [vmem:[#allocation3 + $0x108] sm:$0xff] }
 0x590   :  { %4534 = vst [vmem:[#allocation3 + $0x138] sm:$0xfc] %v4508_v14  ;;  %4535 = vst [vmem:[#allocation3 + $0xc0] sm:$0xfc] %v4509_v9  ;;  %4393 = vrot.lane.b32.xlu0 %v11233_v13, %s13733_s24  ;;  %6205 = vmatprep.subr.mxu1 %v5990_v37 }
 0x591   :  { %5780 = vst [vmem:[#allocation3 + $0x738] sm:$0xfc] %v4508_v14  ;;  %5781 = vst [vmem:[#allocation3 + $0x208] sm:$0xfc] %v4509_v9  ;;  %5556 = vrot.lane.b32.xlu1 %v11352_v11, %s8229_s2  ;;  %6206 = vmatpush1.msra.mxu1 %v5989_v3  ;;  %v11757_v14 = vld [vmem:[%s13629_s3] sm:$0xff]  ;;  %v11764_v9 = vrot.slane %v11246_v62, 6 }
 0x592   :  { %v5400_v31 = vpop.permute.xlu0 %5399 }
 0x593   :  { %v5423_v24 = vsel %vm13890_vm9, %v11374_v0, %v5400_v31  ;;  %v5424_v59 = vsel %vm13891_vm15, %v5400_v31, %v11691_v25  ;;  %v11726_v22 = vpop.permute.xlu1 %4305  ;;  %vm13899_vm9 = vmmov %vm13898_vm6 }
 0x594   :  { %5449 = vst [vmem:[#allocation3 + $0x298] sm:$0x3f] %v5423_v24  ;;  %5450 = vst [vmem:[#allocation3 + $0x700] sm:$0x3f] %v5424_v59  ;;  %4487 = vrot.lane.b32.xlu0 %v11360_v42, %s8232_s28 }
 0x595   :  { %5636 = vrot.lane.b32.xlu1 %v11729_v32, %s8230_s18  ;;  %v6027_v42 = vld [vmem:[#allocation3 + $0xd8] sm:$0xff]  ;;  %vm13900_vm15 = vmmov %vm13892_vm4 }
 0x596   :  { %v5253_v13 = vpop.permute.xlu0 %5252  ;;  %v6026_v17 = vld [vmem:[#allocation3 + $0x2b8] sm:$0xff] }
 0x597   :  { %v5276_v0 = vsel %vm4573_vm8, %v11435_v52, %v5253_v13  ;;  %v5277_v38 = vsel %vm4573_vm8, %v5253_v13, %v11701_v57  ;;  %v11742_v1 = vpop.permute.xlu1 %5173 }
 0x598   :  { %v6040_v26 = vld [vmem:[#allocation3 + $0x208] sm:$0xff]  ;;  %v6039_v7 = vld [vmem:[#allocation3 + $0x738] sm:$0xff]  ;;  %5302 = vst [vmem:[#allocation3 + $0x4f0] ss:$-1188 sps:$4 sm:$0xf3] %v5276_v0   ;;  %4307 = vrot.lane.b32.xlu0 %v11736_v39, %s13749_s8 }
 0x599   :  { %5303 = vst [vmem:[#allocation3 + $0x310] ss:$-436 sps:$4 sm:$0xf3] %v5277_v38   ;;  %6184 = vmatprep.subr.mxu0 %v6040_v26  ;;  %4561 = vrot.lane.b32.xlu1 %v11246_v62, %s8231_s29 }
 0x59a   :  { %6185 = vmatpush2.msra.mxu0 %v6039_v7  ;;  %v5333_v52 = vpop.permute.xlu0 %5332 }
 0x59b   :  { %6186 = vmatprep.subr.mxu0 %v6027_v42  ;;  %v5356_v30 = vsel %vm13892_vm4, %v11443_v53, %v5333_v52  ;;  %v5357_v19 = vsel %vm13893_vm14, %v5333_v52, %v11716_v5  ;;  %v11752_v6 = vpop.permute.xlu1 %5105  ;;  %v5977_v55 = vld [vmem:[#allocation3 + $0x700] sm:$0xff]  ;;  %v5976_v49 = vld [vmem:[#allocation3 + $0x298] sm:$0xff]  ;;  %vm13901_vm14 = vmmov %vm13898_vm6 }
 0x59c   :  { %6187 = vmatpush2.msra.mxu0 %v6026_v17  ;;  %5382 = vst [vmem:[#allocation3 + $0x4f0] sm:$0xfc] %v5356_v30  ;;  %5383 = vst [vmem:[#allocation3 + $0x310] sm:$0xfc] %v5357_v19  ;;  %5554 = vrot.lane.b32.xlu0 %v11266_v16, %s8229_s2 }
 0x59d   :  { %6207 = vmatprep.subr.mxu1 %v5977_v55  ;;  %5476 = vrot.lane.b32.xlu1 %v11736_v39, %s13726_s23 }
 0x59e   :  { %6208 = vmatpush1.msra.mxu1 %v5976_v49  ;;  %v4304_v53 = vpop.permute.xlu0 %4303  ;;  %6189 = vmatmul.mubr.f32.vlgmr.msra.gmra.mxu0 %v11757_v14 }
 0x59f   :  { %v4323_v37 = vsel %vm415_vm2, %v11647_v34, %v4304_v53  ;;  %v4324_v3 = vsel %vm415_vm2, %v4304_v53, %v11726_v22  ;;  %v11771_v31 = vpop.permute.xlu1 %5552 }
 0x5a0   :  { %4349 = vst [vmem:[#allocation3 + $0x740] ss:$-1036 sps:$4 sm:$0xcf] %v4323_v37   ;;  %4350 = vst [vmem:[#allocation3 + $0x2e0] ss:$364 sps:$4 sm:$0xcf] %v4324_v3   ;;  %5634 = vrot.lane.b32.xlu0 %v11764_v9, %s8230_s18 }
 0x5a1   :  { %5714 = vst [vmem:[#allocation3 + $0x370] ss:$812 sps:$4 sm:$0xcf] %v4323_v37   ;;  %5715 = vst [vmem:[#allocation3 + $0x168] ss:$388 sps:$4 sm:$0xcf] %v4324_v3   ;;  %4399 = vrot.lane.b32.xlu1 %v11266_v16, %s13733_s24 }
 0x5a2   :  { %v5172_v24 = vpop.permute.xlu0 %5171 }
 0x5a3   :  { %v5195_v59 = vsel %vm4505_vm5, %v11474_v46, %v5172_v24  ;;  %v5196_v34 = vsel %vm4505_vm5, %v5172_v24, %v11742_v1  ;;  %v11781_v13 = vpop.permute.xlu1 %5632  ;;  %v5964_v0 = vld [vmem:[#allocation3 + $0x310] sm:$0xff] }
 0x5a4   :  { %v5963_v38 = vld [vmem:[#allocation3 + $0x4f0] sm:$0xff]  ;;  %5221 = vst [vmem:[#allocation3 + $0x48] ss:$604 sps:$4 sm:$0xcf] %v5195_v59   ;;  %4559 = vrot.lane.b32.xlu0 %v11243_v41, %s8231_s29  ;;  %6209 = vmatprep.subr.mxu1 %v5964_v0 }
 0x5a5   :  { %5222 = vst [vmem:[#allocation3 + $0x158] ss:$1524 sps:$4 sm:$0xcf] %v5196_v34   ;;  %4493 = vrot.lane.b32.xlu1 %v11764_v9, %s8232_s28  ;;  %6210 = vmatpush1.msra.mxu1 %v5963_v38 }
 0x5a6   :  { %v5104_v26 = vpop.permute.xlu0 %5103 }
 0x5a7   :  { %v5127_v46 = vsel %vm13894_vm10, %v11445_v63, %v5104_v26  ;;  %v5128_v7 = vsel %vm13895_vm1, %v5104_v26, %v11752_v6  ;;  %v11791_v42 = vpop.permute.xlu1 %4199  ;;  %vm13902_vm10 = vmmov %vm13898_vm6 }
 0x5a8   :  { %v6018_v52 = vld [vmem:[#allocation3 + $0x2e8] sm:$0xff]  ;;  %v6017_v17 = vld [vmem:[#allocation3 + $0x698] sm:$0xff]  ;;  %5153 = vst [vmem:[#allocation3 + $0x2a0] sm:$0x3f] %v5127_v46  ;;  %5154 = vst [vmem:[#allocation3 + $0x748] sm:$0x3f] %v5128_v7  ;;  %5474 = vrot.lane.b32.xlu0 %v11429_v20, %s13726_s23 }
 0x5a9   :  { %6278 = vmatprep.subr.mxu0 %v6018_v52  ;;  %5409 = vrot.lane.b32.xlu1 %v11346_v43, %s13730_s27  ;;  %v11824_v46 = vrot.slane %v11507_v50, 2 }
 0x5aa   :  { %6279 = vmatpush1.msra.mxu0 %v6017_v17  ;;  %v5551_v30 = vpop.permute.xlu0 %5550 }
 0x5ab   :  { %v5572_v63 = vsel %vm4868_vm0, %v11632_v44, %v5551_v30  ;;  %v5573_v19 = vsel %vm4868_vm0, %v5551_v30, %v11771_v31  ;;  %v11801_v55 = vpop.permute.xlu1 %5038  ;;  %v5950_v53 = vld [vmem:[#allocation3 + $0x48] sm:$0xff] }
 0x5ac   :  { %v5951_v49 = vld [vmem:[#allocation3 + $0x158] sm:$0xff]  ;;  %5598 = vst [vmem:[#allocation3 + $0x1d0] ss:$524 sps:$4 sm:$0xf3] %v5572_v63   ;;  %4397 = vrot.lane.b32.xlu0 %v11259_v28, %s13733_s24 }
 0x5ad   :  { %5599 = vst [vmem:[#allocation3 + $0xe0] ss:$268 sps:$4 sm:$0xf3] %v5573_v19   ;;  %6211 = vmatprep.subr.mxu1 %v5951_v49  ;;  %5262 = vrot.lane.b32.xlu1 %v11352_v11, %s8231_s29  ;;  %v11853_v49 = vld [vmem:[%s13629_s3 + $0x18] sm:$0xff] }
 0x5ae   :  { %6212 = vmatpush1.msra.mxu1 %v5950_v53  ;;  %v5631_v37 = vpop.permute.xlu0 %5630  ;;  %7950 = vmatprep.mubr.msk.f32.mxu0 %vm6077_vm3, %v11853_v49 }
 0x5af   :  { %v5652_v44 = vsel %vm4936_vm12, %v11641_v27, %v5631_v37  ;;  %v5653_v3 = vsel %vm4936_vm12, %v5631_v37, %v11781_v13  ;;  %v11811_v24 = vpop.permute.xlu1 %5472  ;;  %v5938_v59 = vld [vmem:[#allocation3 + $0x748] sm:$0xff]  ;;  %v5937_v34 = vld [vmem:[#allocation3 + $0x2a0] sm:$0xff] }
 0x5b0   :  { %5678 = vst [vmem:[#allocation3 + $0x1d0] sm:$0xfc] %v5652_v44  ;;  %5679 = vst [vmem:[#allocation3 + $0xe0] sm:$0xfc] %v5653_v3  ;;  %4491 = vrot.lane.b32.xlu0 %v11479_v33, %s8232_s28  ;;  %6213 = vmatprep.subr.mxu1 %v5938_v59 }
 0x5b1   :  { %5342 = vrot.lane.b32.xlu1 %v11729_v32, %s13728_s17  ;;  %6214 = vmatpush1.msra.mxu1 %v5937_v34 }
 0x5b2   :  { %v4198_v0 = vpop.permute.xlu0 %4197 }
 0x5b3   :  { %v4214_v27 = vsel %vm816_vm13, %v11468_v51, %v4198_v0  ;;  %v4215_v38 = vsel %vm816_vm13, %v4198_v0, %v11791_v42  ;;  %v11821_v26 = vpop.permute.xlu1 %4916  ;;  %vm13896_vm13 = vcmask 490496  }
 0x5b4   :  { %v11827_v7 = vmax.f32 %v11207_v4, %v4214_v27  ;;  %v11830_v52 = vmax.f32 %v11538_v21, %v4215_v38  ;;  %5407 = vrot.lane.b32.xlu0 %v11246_v62, %s13730_s27  ;;  %vm13897_vm7 = vmmov %vm13896_vm13 }
 0x5b5   :  { %4313 = vrot.lane.b32.xlu1 %v11824_v46, %s13749_s8  ;;  %vm13903_vm1 = vmmov %vm13897_vm7 }
 0x5b6   :  { %5699 = vst [vmem:[#allocation3 + $0x80] sm:$0x3f] %v11830_v52  ;;  %5698 = vst [vmem:[#allocation3 + $0x780] sm:$0x3f] %v11827_v7  ;;  %v5037_v51 = vpop.permute.xlu0 %5036  ;;  %v11839_v17 = vrot.slane %v11827_v7, 4 }
 0x5b7   :  { %v5060_v4 = vsel %vm415_vm2, %v11540_v12, %v5037_v51  ;;  %v5061_v21 = vsel %vm415_vm2, %v5037_v51, %v11801_v55  ;;  %v11845_v30 = vpop.permute.xlu1 %5405  ;;  %v6005_v63 = vld [vmem:[#allocation3 + $0xe0] sm:$0xff]  ;;  %v6004_v19 = vld [vmem:[#allocation3 + $0x1d0] sm:$0xff] }
 0x5b8   :  { %5086 = vst [vmem:[#allocation3 + $0x5a0] sm:$0xfc] %v5060_v4  ;;  %5087 = vst [vmem:[#allocation3 + $0x2d8] sm:$0xfc] %v5061_v21  ;;  %5260 = vrot.lane.b32.xlu0 %v11266_v16, %s8231_s29  ;;  %6280 = vmatprep.subr.mxu0 %v6005_v63  ;;  %v11860_v12 = vld [vmem:[%s13629_s3 + $0x10] sm:$0xff] }
 0x5b9   :  { %5014 = vst [vmem:[#allocation3 + $0x598] ss:$-92 sps:$4 sm:$0xf3] %v11839_v17   ;;  %5181 = vrot.lane.b32.xlu1 %v11736_v39, %s8232_s28  ;;  %6281 = vmatpush1.msra.mxu0 %v6004_v19  ;;  %v11897_v19 = vrot.slane %v11504_v48, 6 }
 0x5ba   :  { %v5471_v53 = vpop.permute.xlu0 %5470  ;;  %6195 = vmatmul.mubr.f32.gmra.mxu0 %v11860_v12 }
 0x5bb   :  { %v5492_v37 = vsel %vm13896_vm13, %v11661_v56, %v5471_v53  ;;  %v5493_v44 = vsel %vm13897_vm7, %v5471_v53, %v11811_v24  ;;  %v11868_v3 = vpop.permute.xlu1 %4848  ;;  %7957 = vmatprep.mubr.msk.f32.mxu0 %vm6077_vm3, %v11455_v36  ;;  %v11878_v56 = vrot.slane %v11504_v48, 2  ;;  %vm13904_vm13 = vmmov %vm13903_vm1 }
 0x5bc   :  { %5518 = vst [vmem:[#allocation3 + $0x3d8] ss:$-220 sps:$4 sm:$0xcf] %v5492_v37   ;;  %5519 = vst [vmem:[#allocation3 + $0x1e8] ss:$540 sps:$4 sm:$0xcf] %v5493_v44   ;;  %5340 = vrot.lane.b32.xlu0 %v11764_v9, %s13728_s17 }
 0x5bd   :  { %5113 = vrot.lane.b32.xlu1 %v11346_v43, %s13733_s24  ;;  %vm13905_vm7 = vmmov %vm13892_vm4 }
 0x5be   :  { %v4915_v59 = vpop.permute.xlu0 %4914 }
 0x5bf   :  { %v4939_v34 = vsel %vm4936_vm12, %v11501_v45, %v4915_v59  ;;  %v4940_v0 = vsel %vm4936_vm12, %v4915_v59, %v11821_v26  ;;  %v11884_v27 = vpop.permute.xlu1 %5258  ;;  %v5925_v38 = vld [vmem:[#allocation3 + $0x2d8] sm:$0xff]  ;;  %v5924_v51 = vld [vmem:[#allocation3 + $0x5a0] sm:$0xff] }
 0x5c0   :  { %4965 = vst [vmem:[#allocation3 + $0x1a8] ss:$132 sps:$4 sm:$0xcf] %v4939_v34   ;;  %4966 = vst [vmem:[#allocation3 + $0x408] ss:$-92 sps:$4 sm:$0xcf] %v4940_v0   ;;  %4311 = vrot.lane.b32.xlu0 %v11878_v56, %s13749_s8  ;;  %6215 = vmatprep.subr.mxu1 %v5925_v38 }
 0x5c1   :  { %5560 = vrot.lane.b32.xlu1 %v11521_v61, %s8229_s2  ;;  %6216 = vmatpush1.msra.mxu1 %v5924_v51 }
 0x5c2   :  { %v5404_v36 = vpop.permute.xlu0 %5403 }
 0x5c3   :  { %v5425_v45 = vsel %vm13898_vm6, %v11691_v25, %v5404_v36  ;;  %v5426_v4 = vsel %vm13899_vm9, %v5404_v36, %v11845_v30  ;;  %v11894_v21 = vpop.permute.xlu1 %5338  ;;  %v5992_v63 = vld [vmem:[#allocation3 + $0x1e8] sm:$0xff]  ;;  %v5991_v53 = vld [vmem:[#allocation3 + $0x3d8] sm:$0xff]  ;;  %vm13906_vm6 = vmmov %vm13892_vm4  ;;  %vm13907_vm9 = vcmask 1014784  }
 0x5c4   :  { %5451 = vst [vmem:[#allocation3 + $0x2f8] sm:$0x3f] %v5425_v45  ;;  %5452 = vst [vmem:[#allocation3 + $0x400] sm:$0x3f] %v5426_v4  ;;  %5179 = vrot.lane.b32.xlu0 %v11429_v20, %s8232_s28  ;;  %6282 = vmatprep.subr.mxu0 %v5992_v63 }
 0x5c5   :  { %5640 = vrot.lane.b32.xlu1 %v11897_v19, %s8230_s18  ;;  %6283 = vmatpush1.msra.mxu0 %v5991_v53 }
 0x5c6   :  { %v4847_v25 = vpop.permute.xlu0 %4846 }
 0x5c7   :  { %v4871_v37 = vsel %vm4868_vm0, %v11564_v54, %v4847_v25  ;;  %v4872_v44 = vsel %vm4868_vm0, %v4847_v25, %v11868_v3  ;;  %v11907_v59 = vpop.permute.xlu1 %4701  ;;  %v5912_v34 = vld [vmem:[#allocation3 + $0x408] sm:$0xff] }
 0x5c8   :  { %v5911_v0 = vld [vmem:[#allocation3 + $0x1a8] sm:$0xff]  ;;  %4897 = vst [vmem:[#allocation3 + $0x228] sm:$0x3f] %v4871_v37  ;;  %4898 = vst [vmem:[#allocation3 + $0x3a8] sm:$0x3f] %v4872_v44  ;;  %5111 = vrot.lane.b32.xlu0 %v11246_v62, %s13733_s24  ;;  %6217 = vmatprep.subr.mxu1 %v5912_v34 }
 0x5c9   :  { %5046 = vrot.lane.b32.xlu1 %v11729_v32, %s13749_s8  ;;  %6218 = vmatpush1.msra.mxu1 %v5911_v0 }
 0x5ca   :  { %v5257_v38 = vpop.permute.xlu0 %5256 }
 0x5cb   :  { %v5278_v54 = vsel %vm4573_vm8, %v11701_v57, %v5257_v38  ;;  %v5279_v51 = vsel %vm4573_vm8, %v5257_v38, %v11884_v27  ;;  %v11917_v36 = vpop.permute.xlu1 %4781  ;;  %v5979_v45 = vld [vmem:[#allocation3 + $0x400] sm:$0xff]  ;;  %v5978_v4 = vld [vmem:[#allocation3 + $0x2f8] sm:$0xff]  ;;  %v11924_v57 = vrot.slane %v11394_v29, 6 }
 0x5cc   :  { %5304 = vst [vmem:[#allocation3 + $0x5f8] ss:$-364 sps:$4 sm:$0xf3] %v5278_v54   ;;  %5305 = vst [vmem:[#allocation3 + $0x4d0] ss:$-260 sps:$4 sm:$0xf3] %v5279_v51   ;;  %5558 = vrot.lane.b32.xlu0 %v11403_v23, %s8229_s2  ;;  %6284 = vmatprep.subr.mxu0 %v5979_v45 }
 0x5cd   :  { %5480 = vrot.lane.b32.xlu1 %v11878_v56, %s13726_s23  ;;  %6285 = vmatpush1.msra.mxu0 %v5978_v4 }
 0x5ce   :  { %v5337_v63 = vpop.permute.xlu0 %5336 }
 0x5cf   :  { %v5358_v53 = vsel %vm13900_vm15, %v11716_v5, %v5337_v63  ;;  %v5359_v25 = vsel %vm13892_vm4, %v5337_v63, %v11894_v21  ;;  %v11930_v37 = vpop.permute.xlu1 %5177  ;;  %v5899_v44 = vld [vmem:[#allocation3 + $0x3a8] sm:$0xff]  ;;  %vm13908_vm15 = vmmov %vm13907_vm9 }
 0x5d0   :  { %v5898_v34 = vld [vmem:[#allocation3 + $0x228] sm:$0xff]  ;;  %5384 = vst [vmem:[#allocation3 + $0x5f8] sm:$0xfc] %v5358_v53  ;;  %5385 = vst [vmem:[#allocation3 + $0x4d0] sm:$0xfc] %v5359_v25  ;;  %5638 = vrot.lane.b32.xlu0 %v11924_v57, %s8230_s18  ;;  %6219 = vmatprep.subr.mxu1 %v5899_v44 }
 0x5d1   :  { %4924 = vrot.lane.b32.xlu1 %v11429_v20, %s8230_s18  ;;  %6220 = vmatpush1.msra.mxu1 %v5898_v34  ;;  %vm13909_vm4 = vmmov %vm13902_vm10 }
 0x5d2   :  { %v4700_v0 = vpop.permute.xlu0 %4699 }
 0x5d3   :  { %v4723_v5 = vsel %vm13901_vm14, %v11551_v58, %v4700_v0  ;;  %v4724_v38 = vsel %vm13902_vm10, %v4700_v0, %v11907_v59  ;;  %v11940_v54 = vpop.permute.xlu1 %4621  ;;  %vm13910_vm14 = vmmov %vm13909_vm4 }
 0x5d4   :  { %4749 = vst [vmem:[#allocation3 + $0x560] ss:$-1084 sps:$4 sm:$0xf3] %v4723_v5   ;;  %4750 = vst [vmem:[#allocation3 + $0x610] ss:$-1228 sps:$4 sm:$0xf3] %v4724_v38   ;;  %5044 = vrot.lane.b32.xlu0 %v11764_v9, %s13749_s8 }
 0x5d5   :  { %5413 = vrot.lane.b32.xlu1 %v11504_v48, %s13730_s27  ;;  %vm13911_vm10 = vmmov %vm13903_vm1 }
 0x5d6   :  { %v4780_v51 = vpop.permute.xlu0 %4779 }
 0x5d7   :  { %v4803_v45 = vsel %vm13903_vm1, %v11558_v35, %v4780_v51  ;;  %v4804_v58 = vsel %vm13904_vm13, %v4780_v51, %v11917_v36  ;;  %v11950_v4 = vpop.permute.xlu1 %5109  ;;  %v5966_v63 = vld [vmem:[#allocation3 + $0x4d0] sm:$0xff]  ;;  %v5965_v53 = vld [vmem:[#allocation3 + $0x5f8] sm:$0xff]  ;;  %vm13912_vm13 = vmmov %vm13906_vm6 }
 0x5d8   :  { %4829 = vst [vmem:[#allocation3 + $0x560] sm:$0xfc] %v4803_v45  ;;  %4830 = vst [vmem:[#allocation3 + $0x610] sm:$0xfc] %v4804_v58  ;;  %5478 = vrot.lane.b32.xlu0 %v11704_v47, %s13726_s23  ;;  %6286 = vmatprep.subr.mxu0 %v5966_v63 }
 0x5d9   :  { %4856 = vrot.lane.b32.xlu1 %v11246_v62, %s8229_s2  ;;  %6287 = vmatpush1.msra.mxu0 %v5965_v53 }
 0x5da   :  { %v5176_v25 = vpop.permute.xlu0 %5175 }
 0x5db   :  { %v5197_v35 = vsel %vm4505_vm5, %v11742_v1, %v5176_v25  ;;  %v5198_v44 = vsel %vm4505_vm5, %v5176_v25, %v11930_v37  ;;  %v11960_v34 = vpop.permute.xlu1 %5042 }
 0x5dc   :  { %5223 = vst [vmem:[#allocation3 + $0x488] ss:$-316 sps:$4 sm:$0xcf] %v5197_v35   ;;  %5224 = vst [vmem:[#allocation3 + $0x3c8] ss:$-556 sps:$4 sm:$0xcf] %v5198_v44   ;;  %4922 = vrot.lane.b32.xlu0 %v11462_v15, %s8230_s18 }
 0x5dd   :  { %5266 = vrot.lane.b32.xlu1 %v11521_v61, %s8231_s29 }
 0x5de   :  { %v4620_v0 = vpop.permute.xlu0 %4619 }
 0x5df   :  { %v4643_v62 = vsel %vm13905_vm7, %v11574_v8, %v4620_v0  ;;  %v4644_v1 = vsel %vm13906_vm6, %v4620_v0, %v11940_v54  ;;  %v11970_v5 = vpop.permute.xlu1 %4920  ;;  %v5886_v38 = vld [vmem:[#allocation3 + $0x610] sm:$0xff]  ;;  %v5885_v51 = vld [vmem:[#allocation3 + $0x560] sm:$0xff]  ;;  %vm13913_vm7 = vmmov %vm13906_vm6 }
 0x5e0   :  { %4669 = vst [vmem:[#allocation3 + $0x120] ss:$724 sps:$4 sm:$0xcf] %v4643_v62   ;;  %4670 = vst [vmem:[#allocation3 + $0x140] ss:$-156 sps:$4 sm:$0xcf] %v4644_v1   ;;  %5411 = vrot.lane.b32.xlu0 %v11394_v29, %s13730_s27  ;;  %6221 = vmatprep.subr.mxu1 %v5886_v38 }
 0x5e1   :  { %5346 = vrot.lane.b32.xlu1 %v11897_v19, %s13728_s17  ;;  %6222 = vmatpush1.msra.mxu1 %v5885_v51  ;;  %vm13914_vm6 = vmmov %vm13907_vm9 }
 0x5e2   :  { %v5108_v45 = vpop.permute.xlu0 %5107 }
 0x5e3   :  { %v5129_v8 = vsel %vm13907_vm9, %v11752_v6, %v5108_v45  ;;  %v5130_v58 = vsel %vm13908_vm15, %v5108_v45, %v11950_v4  ;;  %v11980_v63 = vpop.permute.xlu1 %4852  ;;  %v5953_v53 = vld [vmem:[#allocation3 + $0x3c8] sm:$0xff]  ;;  %vm13915_vm9 = vmmov %vm13914_vm6 }
 0x5e4   :  { %v5952_v25 = vld [vmem:[#allocation3 + $0x488] sm:$0xff]  ;;  %5155 = vst [vmem:[#allocation3 + $0x348] sm:$0x3f] %v5129_v8  ;;  %5156 = vst [vmem:[#allocation3 + $0x198] sm:$0x3f] %v5130_v58  ;;  %4854 = vrot.lane.b32.xlu0 %v11243_v41, %s8229_s2  ;;  %6288 = vmatprep.subr.mxu0 %v5953_v53  ;;  %v5847_v8 = vld [vmem:[#allocation3 + $0xc0] sm:$0xff] }
 0x5e5   :  { %4709 = vrot.lane.b32.xlu1 %v11266_v16, %s13730_s27  ;;  %6289 = vmatpush1.msra.mxu0 %v5952_v25  ;;  %vm13916_vm15 = vmmov %vm13903_vm1 }
 0x5e6   :  { %v5041_v35 = vpop.permute.xlu0 %5040 }
 0x5e7   :  { %v5062_v6 = vsel %vm415_vm2, %v11801_v55, %v5041_v35  ;;  %v5063_v44 = vsel %vm415_vm2, %v5041_v35, %v11960_v34  ;;  %v11990_v0 = vpop.permute.xlu1 %4705  ;;  %v5873_v62 = vld [vmem:[#allocation3 + $0x140] sm:$0xff]  ;;  %v5859_v55 = vld [vmem:[#allocation3 + $0x3f0] sm:$0xff] }
 0x5e8   :  { %v5872_v1 = vld [vmem:[#allocation3 + $0x120] sm:$0xff]  ;;  %5088 = vst [vmem:[#allocation3 + $0x220] sm:$0xfc] %v5062_v6  ;;  %5089 = vst [vmem:[#allocation3 + $0x358] sm:$0xfc] %v5063_v44  ;;  %5264 = vrot.lane.b32.xlu0 %v11403_v23, %s8231_s29  ;;  %6223 = vmatprep.subr.mxu1 %v5873_v62 }
 0x5e9   :  { %4789 = vrot.lane.b32.xlu1 %v11764_v9, %s13726_s23  ;;  %6224 = vmatpush1.msra.mxu1 %v5872_v1  ;;  %v5860_v41 = vld [vmem:[#allocation3 + $0xa0] sm:$0xff]  ;;  %v5846_v9 = vld [vmem:[#allocation3 + $0x138] sm:$0xff] }
 0x5ea   :  { %6225 = vmatprep.subr.mxu1 %v5860_v41  ;;  %v4919_v16 = vpop.permute.xlu0 %4918  ;;  %v5833_v62 = vld [vmem:[#allocation3 + $0x720] sm:$0xff]  ;;  %v5821_v41 = vld [vmem:[#allocation3 + $0x18] sm:$0xff] }
 0x5eb   :  { %v4941_v38 = vsel %vm4936_vm12, %v11821_v26, %v4919_v16  ;;  %v4942_v51 = vsel %vm4936_vm12, %v4919_v16, %v11970_v5  ;;  %v12000_v45 = vpop.permute.xlu1 %4785  ;;  %6226 = vmatpush1.msra.mxu1 %v5859_v55  ;;  %v5940_v58 = vld [vmem:[#allocation3 + $0x198] sm:$0xff]  ;;  %v5939_v53 = vld [vmem:[#allocation3 + $0x348] sm:$0xff]  ;;  %v5834_v26 = vld [vmem:[#allocation3 + $0x6e0] sm:$0xff] }
 0x5ec   :  { %4967 = vst [vmem:[#allocation3 + $0x58] ss:$1396 sps:$4 sm:$0xcf] %v4941_v38   ;;  %4968 = vst [vmem:[#allocation3 + $0x2a8] ss:$860 sps:$4 sm:$0xcf] %v4942_v51   ;;  %5344 = vrot.lane.b32.xlu0 %v11924_v57, %s13728_s17  ;;  %6227 = vmatprep.subr.mxu1 %v5847_v8 }
 0x5ed   :  { %6290 = vmatprep.subr.mxu0 %v5940_v58  ;;  %5185 = vrot.lane.b32.xlu1 %v11878_v56, %s8232_s28  ;;  %v5820_v55 = vld [vmem:[#allocation3 + $0x4d8] sm:$0xff] }
 0x5ee   :  { %6228 = vmatpush1.msra.mxu1 %v5846_v9  ;;  %6291 = vmatpush1.msra.mxu0 %v5939_v53  ;;  %v4851_v25 = vpop.permute.xlu0 %4850 }
 0x5ef   :  { %6229 = vmatprep.subr.mxu1 %v5834_v26  ;;  %v4873_v35 = vsel %vm4868_vm0, %v11868_v3, %v4851_v25  ;;  %v4874_v6 = vsel %vm4868_vm0, %v4851_v25, %v11980_v63  ;;  %v12010_v44 = vpop.permute.xlu1 %4557  ;;  %v5927_v1 = vld [vmem:[#allocation3 + $0x358] sm:$0xff]  ;;  %v5926_v16 = vld [vmem:[#allocation3 + $0x220] sm:$0xff] }
 0x5f0   :  { %4899 = vst [vmem:[#allocation3 + $0x5c8] sm:$0x3f] %v4873_v35  ;;  %4900 = vst [vmem:[#allocation3 + $0x600] sm:$0x3f] %v4874_v6  ;;  %6230 = vmatpush1.msra.mxu1 %v5833_v62  ;;  %4707 = vrot.lane.b32.xlu0 %v11259_v28, %s13730_s27 }
 0x5f1   :  { %6231 = vmatprep.subr.mxu1 %v5821_v41  ;;  %6292 = vmatprep.subr.mxu0 %v5927_v1 }
 0x5f2   :  { %4629 = vrot.lane.b32.xlu1 %v11429_v20, %s13728_s17  ;;  %6232 = vmatpush1.msra.mxu1 %v5820_v55  ;;  %v4704_v3 = vpop.permute.xlu0 %4703 }
 0x5f3   :  { %6293 = vmatpush1.msra.mxu0 %v5926_v16  ;;  %v4725_v38 = vsel %vm13909_vm4, %v11907_v59, %v4704_v3  ;;  %v4726_v51 = vsel %vm13910_vm14, %v4704_v3, %v11990_v0  ;;  %v12020_v8 = vpop.permute.xlu1 %4625  ;;  %v5914_v28 = vld [vmem:[#allocation3 + $0x2a8] sm:$0xff]  ;;  %v5913_v58 = vld [vmem:[#allocation3 + $0x58] sm:$0xff]  ;;  %vm13917_vm4 = vmmov %vm13903_vm1 }
 0x5f4   :  { %4751 = vst [vmem:[#allocation3 + $0x688] ss:$-748 sps:$4 sm:$0xf3] %v4725_v38   ;;  %4752 = vst [vmem:[#allocation3 + $0x378] ss:$364 sps:$4 sm:$0xf3] %v4726_v51   ;;  %4787 = vrot.lane.b32.xlu0 %v11479_v33, %s13726_s23  ;;  %6294 = vmatprep.subr.mxu0 %v5914_v28 }
 0x5f5   :  { %6295 = vmatpush1.msra.mxu0 %v5913_v58  ;;  %vm13918_vm14 = vmmov %vm13914_vm6 }
 0x5f6   :  { %5117 = vrot.lane.b32.xlu1 %v11504_v48, %s13733_s24  ;;  %v4784_v20 = vpop.permute.xlu0 %4783 }
 0x5f7   :  { %v4805_v59 = vsel %vm13911_vm10, %v11917_v36, %v4784_v20  ;;  %v4806_v53 = vsel %vm13903_vm1, %v4784_v20, %v12000_v45  ;;  %v12030_v9 = vpop.permute.xlu1 %4395  ;;  %v5901_v26 = vld [vmem:[#allocation3 + $0x600] sm:$0xff]  ;;  %v5900_v25 = vld [vmem:[#allocation3 + $0x5c8] sm:$0xff]  ;;  %vm13919_vm10 = vmmov %vm13914_vm6  ;;  %vm13920_vm1 = vcmask 506880  }
 0x5f8   :  { %4831 = vst [vmem:[#allocation3 + $0x688] sm:$0xfc] %v4805_v59  ;;  %4832 = vst [vmem:[#allocation3 + $0x378] sm:$0xfc] %v4806_v53  ;;  %5183 = vrot.lane.b32.xlu0 %v11704_v47, %s8232_s28  ;;  %6296 = vmatprep.subr.mxu0 %v5901_v26 }
 0x5f9   :  { %6297 = vmatpush1.msra.mxu0 %v5900_v25 }
 0x5fa   :  { %5050 = vrot.lane.b32.xlu1 %v11897_v19, %s13749_s8  ;;  %v4556_v33 = vpop.permute.xlu0 %4555 }
 0x5fb   :  { %v4578_v36 = vsel %vm4573_vm8, %v11651_v10, %v4556_v33  ;;  %v4579_v35 = vsel %vm4573_vm8, %v4556_v33, %v12010_v44  ;;  %v12040_v6 = vpop.permute.xlu1 %4489 }
 0x5fc   :  { %4604 = vst [vmem:[#allocation3 + $0x6c0] sm:$0x3f] %v4578_v36  ;;  %4605 = vst [vmem:[#allocation3 + $0xb0] sm:$0x3f] %v4579_v35  ;;  %4627 = vrot.lane.b32.xlu0 %v11462_v15, %s13728_s17 }
 0x5fd   :  { %5803 = vst [vmem:[#allocation3 + $0x4b8] sm:$0x3f] %v4578_v36  ;;  %5804 = vst [vmem:[#allocation3 + $0xa8] sm:$0x3f] %v4579_v35 }
 0x5fe   :  { %4928 = vrot.lane.b32.xlu1 %v11704_v47, %s8230_s18  ;;  %v4624_v62 = vpop.permute.xlu0 %4623 }
 0x5ff   :  { %v4645_v1 = vsel %vm13912_vm13, %v11940_v54, %v4624_v62  ;;  %v4646_v10 = vsel %vm13913_vm7, %v4624_v62, %v12020_v8  ;;  %v12050_v41 = vpop.permute.xlu1 %4309  ;;  %v5888_v16 = vld [vmem:[#allocation3 + $0x378] sm:$0xff]  ;;  %v5887_v55 = vld [vmem:[#allocation3 + $0x688] sm:$0xff]  ;;  %vm13921_vm13 = vmmov %vm13920_vm1 }
 0x600   :  { %4671 = vst [vmem:[#allocation3 + $0x398] ss:$812 sps:$4 sm:$0xcf] %v4645_v1   ;;  %4672 = vst [vmem:[#allocation3 + $0x4e0] ss:$-1068 sps:$4 sm:$0xcf] %v4646_v10   ;;  %5115 = vrot.lane.b32.xlu0 %v11394_v29, %s13733_s24  ;;  %6298 = vmatprep.subr.mxu0 %v5888_v16 }
 0x601   :  { %6299 = vmatpush1.msra.mxu0 %v5887_v55 }
 0x602   :  { %4860 = vrot.lane.b32.xlu1 %v11394_v29, %s8229_s2  ;;  %v4394_v15 = vpop.permute.xlu0 %4393 }
 0x603   :  { %v4415_v54 = vsel %vm13914_vm6, %v11671_v60, %v4394_v15  ;;  %v4416_v3 = vsel %vm13915_vm9, %v4394_v15, %v12030_v9  ;;  %v12060_v38 = vpop.permute.xlu1 %5556  ;;  %vm13922_vm6 = vmmov %vm13913_vm7 }
 0x604   :  { %v6055_v51 = vld [vmem:[#allocation3 + $0xa8] sm:$0x3f]  ;;  %v6054_v28 = vld [vmem:[#allocation3 + $0x4b8] sm:$0x3f]  ;;  %5048 = vrot.lane.b32.xlu0 %v11924_v57, %s13749_s8 }
 0x605   :  { %4441 = vst [vmem:[#allocation3 + $0x1c0] ss:$1484 sps:$4 sm:$0xf3] %v4415_v54   ;;  %4442 = vst [vmem:[#allocation3 + $0x280] ss:$188 sps:$4 sm:$0xf3] %v4416_v3   ;;  %7951 = vmatprep.subr.msk.mxu1 %vm6084_vm11, %v6055_v51 }
 0x606   :  { %5747 = vst [vmem:[#allocation3 + $0x420] ss:$-868 sps:$4 sm:$0xf3] %v4415_v54   ;;  %5748 = vst [vmem:[#allocation3 + $0x728] ss:$-1236 sps:$4 sm:$0xf3] %v4416_v3   ;;  %7952 = vmatpush2.msk.msra.mxu1 %vm6084_vm11, %v6054_v28  ;;  %4713 = vrot.lane.b32.xlu1 %v11403_v23, %s13730_s27  ;;  %v4488_v60 = vpop.permute.xlu0 %4487 }
 0x607   :  { %v4510_v58 = vsel %vm4505_vm5, %v11681_v40, %v4488_v60  ;;  %v4511_v20 = vsel %vm4505_vm5, %v4488_v60, %v12040_v6  ;;  %v12072_v59 = vpop.permute.xlu1 %5636  ;;  %v5875_v53 = vld [vmem:[#allocation3 + $0x4e0] sm:$0xff]  ;;  %v5874_v26 = vld [vmem:[#allocation3 + $0x398] sm:$0xff]  ;;  %v5862_v25 = vld [vmem:[#allocation3 + $0xb0] sm:$0xff] }
 0x608   :  { %4536 = vst [vmem:[#allocation3 + $0x1c0] sm:$0xfc] %v4510_v58  ;;  %4537 = vst [vmem:[#allocation3 + $0x280] sm:$0xfc] %v4511_v20  ;;  %4926 = vrot.lane.b32.xlu0 %v11736_v39, %s8230_s18  ;;  %6300 = vmatprep.subr.mxu0 %v5875_v53  ;;  %v5861_v33 = vld [vmem:[#allocation3 + $0x6c0] sm:$0xff] }
 0x609   :  { %5782 = vst [vmem:[#allocation3 + $0x420] sm:$0xfc] %v4510_v58  ;;  %5783 = vst [vmem:[#allocation3 + $0x728] sm:$0xfc] %v4511_v20  ;;  %6301 = vmatpush1.msra.mxu0 %v5874_v26 }
 0x60a   :  { %4793 = vrot.lane.b32.xlu1 %v11924_v57, %s13726_s23  ;;  %6302 = vmatprep.subr.mxu0 %v5862_v25  ;;  %v4308_v40 = vpop.permute.xlu0 %4307 }
 0x60b   :  { %v4325_v36 = vsel %vm415_vm2, %v11726_v22, %v4308_v40  ;;  %v4326_v35 = vsel %vm415_vm2, %v4308_v40, %v12050_v41  ;;  %v12082_v62 = vpop.permute.xlu1 %4561  ;;  %6303 = vmatpush1.msra.mxu0 %v5861_v33 }
 0x60c   :  { %4351 = vst [vmem:[#allocation3 + $0x5a8] ss:$-548 sps:$4 sm:$0xcf] %v4325_v36   ;;  %4352 = vst [vmem:[#allocation3 + $0x5b8] ss:$-1188 sps:$4 sm:$0xcf] %v4326_v35   ;;  %4858 = vrot.lane.b32.xlu0 %v11346_v43, %s8229_s2 }
 0x60d   :  { %5716 = vst [vmem:[#allocation3 + $0x500] ss:$196 sps:$4 sm:$0xcf] %v4325_v36   ;;  %5717 = vst [vmem:[#allocation3 + $0x680] ss:$156 sps:$4 sm:$0xcf] %v4326_v35  }
 0x60e   :  { %4565 = vrot.lane.b32.xlu1 %v11394_v29, %s8231_s29  ;;  %v5555_v1 = vpop.permute.xlu0 %5554  ;;  %v6029_v29 = vld [vmem:[#allocation3 + $0x250] sm:$0xff]  ;;  %v6028_v20 = vld [vmem:[#allocation3 + $0xb8] sm:$0xff]  ;;  %v5835_v53 = vld [vmem:[#allocation3 + $0x788] sm:$0xff] }
 0x60f   :  { %v5574_v22 = vsel %vm4868_vm0, %v11771_v31, %v5555_v1  ;;  %v5575_v10 = vsel %vm4868_vm0, %v5555_v1, %v12060_v38  ;;  %v12092_v16 = vpop.permute.xlu1 %5476  ;;  %v5849_v15 = vld [vmem:[#allocation3 + $0x280] sm:$0xff]  ;;  %v5836_v31 = vld [vmem:[#allocation3 + $0x338] sm:$0xff] }
 0x610   :  { %v6042_v55 = vld [vmem:[#allocation3 + $0x728] sm:$0xff]  ;;  %v6041_v54 = vld [vmem:[#allocation3 + $0x420] sm:$0xff]  ;;  %5600 = vst [vmem:[#allocation3 + $0x130] ss:$356 sps:$4 sm:$0xf3] %v5574_v22   ;;  %4711 = vrot.lane.b32.xlu0 %v11352_v11, %s13730_s27  ;;  %6304 = vmatprep.subr.mxu0 %v5849_v15 }
 0x611   :  { %5601 = vst [vmem:[#allocation3 + $0x4a0] ss:$-316 sps:$4 sm:$0xf3] %v5575_v10   ;;  %6261 = vmatprep.subr.mxu1 %v6042_v55  ;;  %v5848_v3 = vld [vmem:[#allocation3 + $0x1c0] sm:$0xff] }
 0x612   :  { %6262 = vmatpush2.msra.mxu1 %v6041_v54  ;;  %4633 = vrot.lane.b32.xlu1 %v11704_v47, %s13728_s17  ;;  %v5635_v51 = vpop.permute.xlu0 %5634  ;;  %v5823_v47 = vld [vmem:[#allocation3 + $0x768] sm:$0xff] }
 0x613   :  { %6305 = vmatpush1.msra.mxu0 %v5848_v3  ;;  %6263 = vmatprep.subr.mxu1 %v6029_v29  ;;  %v5654_v28 = vsel %vm4936_vm12, %v11781_v13, %v5635_v51  ;;  %v5655_v60 = vsel %vm4936_vm12, %v5635_v51, %v12072_v59  ;;  %v12102_v58 = vpop.permute.xlu1 %4399  ;;  %v5822_v13 = vld [vmem:[#allocation3 + $0x450] sm:$0xff] }
 0x614   :  { %6306 = vmatprep.subr.mxu0 %v5836_v31  ;;  %v6020_v26 = vld [vmem:[#allocation3 + $0x718] sm:$0xff]  ;;  %5680 = vst [vmem:[#allocation3 + $0x130] sm:$0xfc] %v5654_v28  ;;  %5681 = vst [vmem:[#allocation3 + $0x4a0] sm:$0xfc] %v5655_v60  ;;  %6264 = vmatpush2.msra.mxu1 %v6028_v20  ;;  %v6019_v25 = vld [vmem:[#allocation3 + $0x5c0] sm:$0xff] }
 0x615   :  { %6307 = vmatpush1.msra.mxu0 %v5835_v53  ;;  %4791 = vrot.lane.b32.xlu0 %v11729_v32, %s13726_s23 }
 0x616   :  { %6308 = vmatprep.subr.mxu0 %v5823_v47  ;;  %6355 = vmatprep.subr.mxu1 %v6020_v26  ;;  %v4560_v40 = vpop.permute.xlu0 %4559 }
 0x617   :  { %4403 = vrot.lane.b32.xlu1 %v11403_v23, %s13733_s24  ;;  %6266 = vmatmul.mubr.f32.vlgmr.msra.gmra.mxu1 %v11757_v14  ;;  %v4580_v33 = vsel %vm4573_vm8, %v12010_v44, %v4560_v40  ;;  %v4581_v36 = vsel %vm4573_vm8, %v4560_v40, %v12082_v62  ;;  %v12113_v35 = vpop.permute.xlu1 %4493 }
 0x618   :  { %6309 = vmatpush1.msra.mxu0 %v5822_v13  ;;  %6356 = vmatpush1.msra.mxu1 %v6019_v25  ;;  %4606 = vst [vmem:[#allocation3 + $0x5e0] sm:$0x3f] %v4580_v33  ;;  %4607 = vst [vmem:[#allocation3 + $0x5f0] sm:$0x3f] %v4581_v36  ;;  %v12174_v25 = vrot.slane %v11827_v7, 2 }
 0x619   :  { %5805 = vst [vmem:[#allocation3 + $0x328] sm:$0x3f] %v4580_v33  ;;  %5806 = vst [vmem:[#allocation3 + $0x628] sm:$0x3f] %v4581_v36  ;;  %7954 = vmatprep.mubr.msk.f32.mxu1 %vm6077_vm3, %v11853_v49  ;;  %4563 = vrot.lane.b32.xlu0 %v11346_v43, %s8231_s29  ;;  %v12129_v43 = vrot.slane %v11830_v52, 2 }
 0x61a   :  { %v5475_v23 = vpop.permute.xlu0 %5474 }
 0x61b   :  { %4497 = vrot.lane.b32.xlu1 %v11924_v57, %s8232_s28  ;;  %v5494_v44 = vsel %vm13916_vm15, %v11811_v24, %v5475_v23  ;;  %v5495_v1 = vsel %vm13917_vm4, %v5475_v23, %v12092_v16  ;;  %v12125_v22 = vpop.permute.xlu1 %5409  ;;  %v6007_v10 = vld [vmem:[#allocation3 + $0x4a0] sm:$0xff]  ;;  %v6006_v55 = vld [vmem:[#allocation3 + $0x130] sm:$0xff]  ;;  %6272 = vmatmul.mubr.f32.gmra.mxu1 %v11860_v12  ;;  %v12134_v57 = vld [vmem:[%s13629_s3 + $0x8] sm:$0xff] }
 0x61c   :  { %5520 = vst [vmem:[#allocation3 + $0x290] ss:$1228 sps:$4 sm:$0xcf] %v5494_v44   ;;  %5521 = vst [vmem:[#allocation3 + $0x360] ss:$-652 sps:$4 sm:$0xcf] %v5495_v1   ;;  %6357 = vmatprep.subr.mxu1 %v6007_v10  ;;  %7961 = vmatprep.mubr.msk.f32.mxu1 %vm6077_vm3, %v12134_v57 }
 0x61d   :  { %4631 = vrot.lane.b32.xlu0 %v11736_v39, %s13728_s17  ;;  %6358 = vmatpush1.msra.mxu1 %v6006_v55  ;;  %vm13923_vm15 = vmmov %vm13915_vm9 }
 0x61e   :  { %v4398_v24 = vpop.permute.xlu0 %4397 }
 0x61f   :  { %5702 = vrot.lane.b32.xlu1 %v12129_v43, %s13749_s8  ;;  %v4417_v15 = vsel %vm13918_vm14, %v12030_v9, %v4398_v24  ;;  %v4418_v54 = vsel %vm13919_vm10, %v4398_v24, %v12102_v58  ;;  %v12146_v3 = vpop.permute.xlu1 %5262  ;;  %v12197_v24 = vrot.slane %v11507_v50, 6  ;;  %vm13924_vm14 = vmmov %vm13917_vm4 }
 0x620   :  { %v6057_v29 = vld [vmem:[#allocation3 + $0x628] sm:$0x3f]  ;;  %4443 = vst [vmem:[#allocation3 + $0x100] ss:$1604 sps:$4 sm:$0xf3] %v4417_v15   ;;  %vm13925_vm10 = vmmov %vm13920_vm1 }
 0x621   :  { %v6056_v31 = vld [vmem:[#allocation3 + $0x328] sm:$0x3f]  ;;  %4444 = vst [vmem:[#allocation3 + $0x3c0] ss:$-220 sps:$4 sm:$0xf3] %v4418_v54   ;;  %7955 = vmatprep.subr.msk.mxu0 %vm6084_vm11, %v6057_v29  ;;  %4401 = vrot.lane.b32.xlu0 %v11352_v11, %s13733_s24  ;;  %v12161_v11 = vrot.slane %v11827_v7, 6 }
 0x622   :  { %5749 = vst [vmem:[#allocation3 + $0x7a0] ss:$-1068 sps:$4 sm:$0xf3] %v4417_v15   ;;  %5750 = vst [vmem:[#allocation3 + $0x278] ss:$-268 sps:$4 sm:$0xf3] %v4418_v54   ;;  %7956 = vmatpush2.msk.msra.mxu0 %vm6084_vm11, %v6056_v31  ;;  %v4492_v39 = vpop.permute.xlu0 %4491 }
 0x623   :  { %5564 = vrot.lane.b32.xlu1 %v11839_v17, %s8229_s2  ;;  %v4512_v9 = vsel %vm4505_vm5, %v12040_v6, %v4492_v39  ;;  %v4513_v51 = vsel %vm4505_vm5, %v4492_v39, %v12113_v35  ;;  %v12158_v28 = vpop.permute.xlu1 %5342  ;;  %v5994_v60 = vld [vmem:[#allocation3 + $0x360] sm:$0xff]  ;;  %v5993_v20 = vld [vmem:[#allocation3 + $0x290] sm:$0xff] }
 0x624   :  { %4538 = vst [vmem:[#allocation3 + $0x100] sm:$0xfc] %v4512_v9  ;;  %4539 = vst [vmem:[#allocation3 + $0x3c0] sm:$0xfc] %v4513_v51  ;;  %6359 = vmatprep.subr.mxu1 %v5994_v60 }
 0x625   :  { %5784 = vst [vmem:[#allocation3 + $0x7a0] sm:$0xfc] %v4512_v9  ;;  %5785 = vst [vmem:[#allocation3 + $0x278] sm:$0xfc] %v4513_v51  ;;  %4495 = vrot.lane.b32.xlu0 %v11729_v32, %s8232_s28  ;;  %6360 = vmatpush1.msra.mxu1 %v5993_v20 }
 0x626   :  { %v5408_v6 = vpop.permute.xlu0 %5407 }
 0x627   :  { %5644 = vrot.lane.b32.xlu1 %v12161_v11, %s8230_s18  ;;  %v5427_v53 = vsel %vm13920_vm1, %v11845_v30, %v5408_v6  ;;  %v5428_v26 = vsel %vm13921_vm13, %v5408_v6, %v12125_v22  ;;  %v12171_v47 = vpop.permute.xlu1 %4313  ;;  %vm13926_vm13 = vmmov %vm13922_vm6 }
 0x628   :  { %5453 = vst [vmem:[#allocation3 + $0x758] sm:$0x3f] %v5427_v53  ;;  %5454 = vst [vmem:[#allocation3 + $0xd0] sm:$0x3f] %v5428_v26 }
 0x629   :  { %4315 = vrot.lane.b32.xlu0 %v12174_v25, %s13749_s8  ;;  %v6031_v23 = vld [vmem:[#allocation3 + $0x168] sm:$0xff]  ;;  %v6030_v44 = vld [vmem:[#allocation3 + $0x370] sm:$0xff] }
 0x62a   :  { %v5261_v32 = vpop.permute.xlu0 %5260 }
 0x62b   :  { %4569 = vrot.lane.b32.xlu1 %v11507_v50, %s8231_s29  ;;  %v5280_v30 = vsel %vm4573_vm8, %v11884_v27, %v5261_v32  ;;  %v5281_v13 = vsel %vm4573_vm8, %v5261_v32, %v12146_v3  ;;  %v12184_v40 = vpop.permute.xlu1 %5181 }
 0x62c   :  { %v6044_v33 = vld [vmem:[#allocation3 + $0x278] sm:$0xff]  ;;  %v6043_v36 = vld [vmem:[#allocation3 + $0x7a0] sm:$0xff]  ;;  %5306 = vst [vmem:[#allocation3 + $0x4f8] ss:$-972 sps:$4 sm:$0xf3] %v5280_v30  }
 0x62d   :  { %5307 = vst [vmem:[#allocation3 + $0x78] ss:$300 sps:$4 sm:$0xf3] %v5281_v13   ;;  %6338 = vmatprep.subr.mxu0 %v6044_v33  ;;  %5562 = vrot.lane.b32.xlu0 %v11528_v2, %s8229_s2 }
 0x62e   :  { %6339 = vmatpush2.msra.mxu0 %v6043_v36  ;;  %v5341_v27 = vpop.permute.xlu0 %5340 }
 0x62f   :  { %5484 = vrot.lane.b32.xlu1 %v12174_v25, %s13726_s23  ;;  %6340 = vmatprep.subr.mxu0 %v6031_v23  ;;  %v5360_v1 = vsel %vm13913_vm7, %v11894_v21, %v5341_v27  ;;  %v5361_v10 = vsel %vm13922_vm6, %v5341_v27, %v12158_v28  ;;  %v12194_v55 = vpop.permute.xlu1 %5113  ;;  %v5981_v15 = vld [vmem:[#allocation3 + $0xd0] sm:$0xff]  ;;  %v5980_v54 = vld [vmem:[#allocation3 + $0x758] sm:$0xff]  ;;  %vm13927_vm7 = vmmov %vm13922_vm6 }
 0x630   :  { %6341 = vmatpush2.msra.mxu0 %v6030_v44  ;;  %5386 = vst [vmem:[#allocation3 + $0x4f8] sm:$0xfc] %v5360_v1  ;;  %5387 = vst [vmem:[#allocation3 + $0x78] sm:$0xfc] %v5361_v10  ;;  %6361 = vmatprep.subr.mxu1 %v5981_v15 }
 0x631   :  { %6343 = vmatmul.mubr.f32.vlgmr.msra.gmra.mxu0 %v11757_v14  ;;  %5642 = vrot.lane.b32.xlu0 %v12197_v24, %s8230_s18  ;;  %vm13928_vm6 = vmmov %vm13920_vm1 }
 0x632   :  { %6362 = vmatpush1.msra.mxu1 %v5980_v54  ;;  %v4312_v21 = vpop.permute.xlu0 %4311  ;;  %7958 = vmatprep.mubr.msk.f32.mxu0 %vm6077_vm3, %v11853_v49 }
 0x633   :  { %4407 = vrot.lane.b32.xlu1 %v11528_v2, %s13733_s24  ;;  %v4327_v29 = vsel %vm415_vm2, %v12050_v41, %v4312_v21  ;;  %v4328_v31 = vsel %vm415_vm2, %v4312_v21, %v12171_v47  ;;  %v12210_v39 = vpop.permute.xlu1 %5560 }
 0x634   :  { %4353 = vst [vmem:[#allocation3 + $0x568] ss:$-76 sps:$4 sm:$0xcf] %v4327_v29   ;;  %4354 = vst [vmem:[#allocation3 + $0x3e8] ss:$180 sps:$4 sm:$0xcf] %v4328_v31  }
 0x635   :  { %5718 = vst [vmem:[#allocation3 + $0x540] ss:$468 sps:$4 sm:$0xcf] %v4327_v29   ;;  %5719 = vst [vmem:[#allocation3 + $0x118] ss:$-244 sps:$4 sm:$0xcf] %v4328_v31   ;;  %6349 = vmatmul.mubr.f32.gmra.mxu0 %v11860_v12  ;;  %4567 = vrot.lane.b32.xlu0 %v11504_v48, %s8231_s29 }
 0x636   :  { %7965 = vmatprep.mubr.msk.f32.mxu0 %vm6077_vm3, %v12134_v57  ;;  %v5180_v14 = vpop.permute.xlu0 %5179 }
 0x637   :  { %4501 = vrot.lane.b32.xlu1 %v12197_v24, %s8232_s28  ;;  %v5199_v49 = vsel %vm4505_vm5, %v11930_v37, %v5180_v14  ;;  %v5200_v41 = vsel %vm4505_vm5, %v5180_v14, %v12184_v40  ;;  %v12223_v9 = vpop.permute.xlu1 %5640  ;;  %v5968_v51 = vld [vmem:[#allocation3 + $0x78] sm:$0xff] }
 0x638   :  { %v5967_v12 = vld [vmem:[#allocation3 + $0x4f8] sm:$0xff]  ;;  %5225 = vst [vmem:[#allocation3 + $0x128] ss:$1596 sps:$4 sm:$0xcf] %v5199_v49   ;;  %6363 = vmatprep.subr.mxu1 %v5968_v51  ;;  %v12276_v51 = vrot.slane %v11830_v52, 4 }
 0x639   :  { %5226 = vst [vmem:[#allocation3 + $0x1a0] ss:$540 sps:$4 sm:$0xcf] %v5200_v41   ;;  %5482 = vrot.lane.b32.xlu0 %v11824_v46, %s13726_s23  ;;  %6364 = vmatpush1.msra.mxu1 %v5967_v12  ;;  %v12284_v12 = vmax.f32 %v11488_v18, %v11791_v42 }
 0x63a   :  { %v5112_v60 = vpop.permute.xlu0 %5111 }
 0x63b   :  { %5417 = vrot.lane.b32.xlu1 %v11827_v7, %s13730_s27  ;;  %v5131_v37 = vsel %vm13915_vm9, %v11950_v4, %v5112_v60  ;;  %v5132_v20 = vsel %vm13923_vm15, %v5112_v60, %v12194_v55  ;;  %v12233_v6 = vpop.permute.xlu1 %5046  ;;  %vm13929_vm9 = vmmov %vm13920_vm1 }
 0x63c   :  { %v6022_v53 = vld [vmem:[#allocation3 + $0x20] sm:$0xff]  ;;  %v6021_v26 = vld [vmem:[#allocation3 + $0x710] sm:$0xff]  ;;  %5157 = vst [vmem:[#allocation3 + $0x760] sm:$0x3f] %v5131_v37  ;;  %5158 = vst [vmem:[#allocation3 + $0x3b8] sm:$0x3f] %v5132_v20 }
 0x63d   :  { %6430 = vmatprep.subr.mxu0 %v6022_v53  ;;  %4405 = vrot.lane.b32.xlu0 %v11521_v61, %s13733_s24  ;;  %vm13930_vm15 = vmmov %vm13917_vm4 }
 0x63e   :  { %6431 = vmatpush1.msra.mxu0 %v6021_v26  ;;  %v5559_v32 = vpop.permute.xlu0 %5558 }
 0x63f   :  { %5270 = vrot.lane.b32.xlu1 %v11839_v17, %s8231_s29  ;;  %v5576_v4 = vsel %vm4868_vm0, %v12060_v38, %v5559_v32  ;;  %v5577_v30 = vsel %vm4868_vm0, %v5559_v32, %v12210_v39  ;;  %v12243_v13 = vpop.permute.xlu1 %5480  ;;  %v5954_v36 = vld [vmem:[#allocation3 + $0x128] sm:$0xff] }
 0x640   :  { %v5955_v33 = vld [vmem:[#allocation3 + $0x1a0] sm:$0xff]  ;;  %5602 = vst [vmem:[#allocation3 + $0x68] ss:$380 sps:$4 sm:$0xf3] %v5576_v4   ;;  %v5701_v4 = vrot.slane %v12284_v12, 2 }
 0x641   :  { %5603 = vst [vmem:[#allocation3 + $0x30] ss:$340 sps:$4 sm:$0xf3] %v5577_v30   ;;  %6365 = vmatprep.subr.mxu1 %v5955_v33  ;;  %4499 = vrot.lane.b32.xlu0 %v11897_v19, %s8232_s28 }
 0x642   :  { %6366 = vmatpush1.msra.mxu1 %v5954_v36  ;;  %v5639_v23 = vpop.permute.xlu0 %5638 }
 0x643   :  { %5350 = vrot.lane.b32.xlu1 %v12161_v11, %s13728_s17  ;;  %v5656_v38 = vsel %vm4936_vm12, %v12072_v59, %v5639_v23  ;;  %v5657_v27 = vsel %vm4936_vm12, %v5639_v23, %v12223_v9  ;;  %v12253_v44 = vpop.permute.xlu1 %4924  ;;  %v5942_v1 = vld [vmem:[#allocation3 + $0x3b8] sm:$0xff]  ;;  %v5941_v10 = vld [vmem:[#allocation3 + $0x760] sm:$0xff] }
 0x644   :  { %5682 = vst [vmem:[#allocation3 + $0x68] sm:$0xfc] %v5656_v38  ;;  %5683 = vst [vmem:[#allocation3 + $0x30] sm:$0xfc] %v5657_v27  ;;  %6367 = vmatprep.subr.mxu1 %v5942_v1 }
 0x645   :  { %5415 = vrot.lane.b32.xlu0 %v11507_v50, %s13730_s27  ;;  %6368 = vmatpush1.msra.mxu1 %v5941_v10 }
 0x646   :  { %v5045_v15 = vpop.permute.xlu0 %5044 }
 0x647   :  { %5189 = vrot.lane.b32.xlu1 %v12174_v25, %s8232_s28  ;;  %v5064_v59 = vsel %vm415_vm2, %v11960_v34, %v5045_v15  ;;  %v5065_v54 = vsel %vm415_vm2, %v5045_v15, %v12233_v6  ;;  %v12263_v21 = vpop.permute.xlu1 %5413 }
 0x648   :  { %5090 = vst [vmem:[#allocation3 + $0x430] sm:$0xfc] %v5064_v59  ;;  %5091 = vst [vmem:[#allocation3 + $0x798] sm:$0xfc] %v5065_v54  ;;  %v12323_v54 = vrot.slane %v11830_v52, 6 }
 0x649   :  { %5268 = vrot.lane.b32.xlu0 %v11528_v2, %s8231_s29 }
 0x64a   :  { %v5479_v29 = vpop.permute.xlu0 %5478 }
 0x64b   :  { %5119 = vrot.lane.b32.xlu1 %v11507_v50, %s13733_s24  ;;  %v5496_v31 = vsel %vm13917_vm4, %v12092_v16, %v5479_v29  ;;  %v5497_v34 = vsel %vm13924_vm14, %v5479_v29, %v12243_v13  ;;  %v12273_v14 = vpop.permute.xlu1 %4856  ;;  %v6009_v49 = vld [vmem:[#allocation3 + $0x30] sm:$0xff]  ;;  %v6008_v41 = vld [vmem:[#allocation3 + $0x68] sm:$0xff]  ;;  %vm13931_vm14 = vmmov %vm13927_vm7 }
 0x64c   :  { %5522 = vst [vmem:[#allocation3 + $0x1e0] ss:$60 sps:$4 sm:$0xcf] %v5496_v31   ;;  %5523 = vst [vmem:[#allocation3 + $0x180] ss:$1036 sps:$4 sm:$0xcf] %v5497_v34   ;;  %6432 = vmatprep.subr.mxu0 %v6009_v49 }
 0x64d   :  { %5348 = vrot.lane.b32.xlu0 %v12197_v24, %s13728_s17  ;;  %6433 = vmatpush1.msra.mxu0 %v6008_v41 }
 0x64e   :  { %v4923_v16 = vpop.permute.xlu0 %4922 }
 0x64f   :  { %5566 = vrot.lane.b32.xlu1 %v12276_v51, %s8229_s2  ;;  %v4943_v60 = vsel %vm4936_vm12, %v11970_v5, %v4923_v16  ;;  %v4944_v37 = vsel %vm4936_vm12, %v4923_v16, %v12253_v44  ;;  %v12290_v20 = vpop.permute.xlu1 %5266  ;;  %v5929_v53 = vld [vmem:[#allocation3 + $0x798] sm:$0xff]  ;;  %v5928_v26 = vld [vmem:[#allocation3 + $0x430] sm:$0xff] }
 0x650   :  { %4969 = vst [vmem:[#allocation3 + $0x60] ss:$1556 sps:$4 sm:$0xcf] %v4943_v60   ;;  %4970 = vst [vmem:[#allocation3 + $0x528] ss:$-548 sps:$4 sm:$0xcf] %v4944_v37   ;;  %6369 = vmatprep.subr.mxu1 %v5929_v53 }
 0x651   :  { %5187 = vrot.lane.b32.xlu0 %v11824_v46, %s8232_s28  ;;  %6370 = vmatpush1.msra.mxu1 %v5928_v26 }
 0x652   :  { %v5412_v18 = vpop.permute.xlu0 %5411 }
 0x653   :  { %5052 = vrot.lane.b32.xlu1 %v12197_v24, %s13749_s8  ;;  %v5429_v42 = vsel %vm13925_vm10, %v12125_v22, %v5412_v18  ;;  %v5430_v5 = vsel %vm13920_vm1, %v5412_v18, %v12263_v21  ;;  %v12300_v32 = vpop.permute.xlu1 %5346  ;;  %v5996_v30 = vld [vmem:[#allocation3 + $0x180] sm:$0xff]  ;;  %vm13932_vm10 = vmmov %vm13927_vm7  ;;  %vm13933_vm1 = vcmask 1014784  }
 0x654   :  { %v5995_v33 = vld [vmem:[#allocation3 + $0x1e0] sm:$0xff]  ;;  %5455 = vst [vmem:[#allocation3 + $0x218] sm:$0x3f] %v5429_v42  ;;  %5456 = vst [vmem:[#allocation3 + $0x588] sm:$0x3f] %v5430_v5  ;;  %6434 = vmatprep.subr.mxu0 %v5996_v30 }
 0x655   :  { %5704 = vrot.lane.b32.xlu0 %v5701_v4, %s13749_s8  ;;  %6435 = vmatpush1.msra.mxu0 %v5995_v33 }
 0x656   :  { %v4855_v36 = vpop.permute.xlu0 %4854 }
 0x657   :  { %5486 = vrot.lane.b32.xlu1 %v12129_v43, %s13726_s23  ;;  %v4875_v22 = vsel %vm4868_vm0, %v11980_v63, %v4855_v36  ;;  %v4876_v23 = vsel %vm4868_vm0, %v4855_v36, %v12273_v14  ;;  %v12310_v38 = vpop.permute.xlu1 %4709  ;;  %v5916_v27 = vld [vmem:[#allocation3 + $0x528] sm:$0xff]  ;;  %v5915_v1 = vld [vmem:[#allocation3 + $0x60] sm:$0xff] }
 0x658   :  { %4901 = vst [vmem:[#allocation3 + $0x670] sm:$0x3f] %v4875_v22  ;;  %4902 = vst [vmem:[#allocation3 + $0x300] sm:$0x3f] %v4876_v23  ;;  %6371 = vmatprep.subr.mxu1 %v5916_v27 }
 0x659   :  { %5121 = vrot.lane.b32.xlu0 %v11827_v7, %s13733_s24  ;;  %6372 = vmatpush1.msra.mxu1 %v5915_v1 }
 0x65a   :  { %v5265_v10 = vpop.permute.xlu0 %5264 }
 0x65b   :  { %4932 = vrot.lane.b32.xlu1 %v11824_v46, %s8230_s18  ;;  %v5282_v63 = vsel %vm4573_vm8, %v12146_v3, %v5265_v10  ;;  %v5283_v15 = vsel %vm4573_vm8, %v5265_v10, %v12290_v20  ;;  %v12320_v59 = vpop.permute.xlu1 %4789  ;;  %v5983_v29 = vld [vmem:[#allocation3 + $0x588] sm:$0xff]  ;;  %v5982_v31 = vld [vmem:[#allocation3 + $0x218] sm:$0xff] }
 0x65c   :  { %5308 = vst [vmem:[#allocation3 + $0x5d8] ss:$252 sps:$4 sm:$0xf3] %v5282_v63   ;;  %5309 = vst [vmem:[#allocation3 + $0x10] ss:$236 sps:$4 sm:$0xf3] %v5283_v15   ;;  %6436 = vmatprep.subr.mxu0 %v5983_v29 }
 0x65d   :  { %5646 = vrot.lane.b32.xlu0 %v12323_v54, %s8230_s18  ;;  %6437 = vmatpush1.msra.mxu0 %v5982_v31 }
 0x65e   :  { %v5345_v3 = vpop.permute.xlu0 %5344 }
 0x65f   :  { %4862 = vrot.lane.b32.xlu1 %v11504_v48, %s8229_s2  ;;  %v5362_v34 = vsel %vm13926_vm13, %v12158_v28, %v5345_v3  ;;  %v5363_v49 = vsel %vm13927_vm7, %v5345_v3, %v12300_v32  ;;  %v12333_v41 = vpop.permute.xlu1 %5185  ;;  %v5903_v16 = vld [vmem:[#allocation3 + $0x300] sm:$0xff]  ;;  %v5902_v60 = vld [vmem:[#allocation3 + $0x670] sm:$0xff]  ;;  %vm13934_vm13 = vmmov %vm13933_vm1 }
 0x660   :  { %5388 = vst [vmem:[#allocation3 + $0x5d8] sm:$0xfc] %v5362_v34  ;;  %5389 = vst [vmem:[#allocation3 + $0x10] sm:$0xfc] %v5363_v49  ;;  %6373 = vmatprep.subr.mxu1 %v5903_v16 }
 0x661   :  { %5054 = vrot.lane.b32.xlu0 %v12161_v11, %s13749_s8  ;;  %6374 = vmatpush1.msra.mxu1 %v5902_v60  ;;  %v5851_v60 = vld [vmem:[#allocation3 + $0x3c0] sm:$0xff]  ;;  %vm13935_vm7 = vmmov %vm13928_vm6 }
 0x662   :  { %v4708_v48 = vpop.permute.xlu0 %4707 }
 0x663   :  { %5272 = vrot.lane.b32.xlu1 %v12276_v51, %s8231_s29  ;;  %v4727_v28 = vsel %vm13928_vm6, %v11990_v0, %v4708_v48  ;;  %v4728_v37 = vsel %vm13929_vm9, %v4708_v48, %v12310_v38  ;;  %vm13936_vm9 = vmmov %vm13917_vm4 }
 0x664   :  { %4753 = vst [vmem:[#allocation3 + $0x6e8] ss:$-988 sps:$4 sm:$0xf3] %v4727_v28   ;;  %4754 = vst [vmem:[#allocation3 + $0x2f0] ss:$340 sps:$4 sm:$0xf3] %v4728_v37   ;;  %v12343_v53 = vpop.permute.xlu1 %4629 }
 0x665   :  { %4930 = vrot.lane.b32.xlu0 %v11878_v56, %s8230_s18  ;;  %v5850_v37 = vld [vmem:[#allocation3 + $0x100] sm:$0xff] }
 0x666   :  { %v4788_v26 = vpop.permute.xlu0 %4787 }
 0x667   :  { %4715 = vrot.lane.b32.xlu1 %v11521_v61, %s13730_s27  ;;  %v4807_v18 = vsel %vm13930_vm15, %v12000_v45, %v4788_v26  ;;  %v4808_v0 = vsel %vm13917_vm4, %v4788_v26, %v12320_v59  ;;  %v5970_v42 = vld [vmem:[#allocation3 + $0x10] sm:$0xff]  ;;  %v5969_v5 = vld [vmem:[#allocation3 + $0x5d8] sm:$0xff]  ;;  %vm13937_vm15 = vmmov %vm13917_vm4 }
 0x668   :  { %4833 = vst [vmem:[#allocation3 + $0x6e8] sm:$0xfc] %v4807_v18  ;;  %4834 = vst [vmem:[#allocation3 + $0x2f0] sm:$0xfc] %v4808_v0  ;;  %v12353_v4 = vpop.permute.xlu1 %5117  ;;  %6438 = vmatprep.subr.mxu0 %v5970_v42  ;;  %v5837_v42 = vld [vmem:[#allocation3 + $0x740] sm:$0xff] }
 0x669   :  { %5419 = vrot.lane.b32.xlu0 %v11830_v52, %s13730_s27  ;;  %6439 = vmatpush1.msra.mxu0 %v5969_v5  ;;  %vm13938_vm4 = vmmov %vm13932_vm10 }
 0x66a   :  { %v5184_v61 = vpop.permute.xlu0 %5183 }
 0x66b   :  { %4795 = vrot.lane.b32.xlu1 %v11897_v19, %s13726_s23  ;;  %v5201_v45 = vsel %vm4505_vm5, %v12184_v40, %v5184_v61  ;;  %v5202_v30 = vsel %vm4505_vm5, %v5184_v61, %v12333_v41 }
 0x66c   :  { %5227 = vst [vmem:[#allocation3 + $0x6d0] ss:$36 sps:$4 sm:$0xcf] %v5201_v45   ;;  %5228 = vst [vmem:[#allocation3 + $0xf8] ss:$1468 sps:$4 sm:$0xcf] %v5202_v30   ;;  %v12363_v33 = vpop.permute.xlu1 %5050 }
 0x66d   :  { %4864 = vrot.lane.b32.xlu0 %v11507_v50, %s8229_s2  ;;  %v5824_v30 = vld [vmem:[#allocation3 + $0x330] sm:$0xff] }
 0x66e   :  { %v4628_v36 = vpop.permute.xlu0 %4627 }
 0x66f   :  { %5191 = vrot.lane.b32.xlu1 %v12129_v43, %s8232_s28  ;;  %v4647_v19 = vsel %vm13931_vm14, %v12020_v8, %v4628_v36  ;;  %v4648_v40 = vsel %vm13932_vm10, %v4628_v36, %v12343_v53  ;;  %v5890_v22 = vld [vmem:[#allocation3 + $0x2f0] sm:$0xff]  ;;  %v5889_v23 = vld [vmem:[#allocation3 + $0x6e8] sm:$0xff]  ;;  %vm13939_vm14 = vmmov %vm13938_vm4 }
 0x670   :  { %4673 = vst [vmem:[#allocation3 + $0x308] ss:$732 sps:$4 sm:$0xcf] %v4647_v19   ;;  %4674 = vst [vmem:[#allocation3 + $0x440] ss:$436 sps:$4 sm:$0xcf] %v4648_v40   ;;  %v12373_v27 = vpop.permute.xlu1 %4928  ;;  %6375 = vmatprep.subr.mxu1 %v5890_v22 }
 0x671   :  { %5352 = vrot.lane.b32.xlu0 %v12323_v54, %s13728_s17  ;;  %6376 = vmatpush1.msra.mxu1 %v5889_v23  ;;  %vm13941_vm10 = vmmov %vm13933_vm1 }
 0x672   :  { %v5116_v50 = vpop.permute.xlu0 %5115 }
 0x673   :  { %4637 = vrot.lane.b32.xlu1 %v11824_v46, %s13728_s17  ;;  %v5133_v8 = vsel %vm13933_vm1, %v12194_v55, %v5116_v50  ;;  %v5134_v43 = vsel %vm13934_vm13, %v5116_v50, %v12353_v4  ;;  %v5957_v1 = vld [vmem:[#allocation3 + $0xf8] sm:$0xff]  ;;  %v5956_v10 = vld [vmem:[#allocation3 + $0x6d0] sm:$0xff]  ;;  %vm13942_vm13 = vmmov %vm13936_vm9 }
 0x674   :  { %5159 = vst [vmem:[#allocation3 + $0x6f0] sm:$0x3f] %v5133_v8  ;;  %5160 = vst [vmem:[#allocation3 + $0x6b0] sm:$0x3f] %v5134_v43  ;;  %v12383_v63 = vpop.permute.xlu1 %4860  ;;  %6440 = vmatprep.subr.mxu0 %v5957_v1 }
 0x675   :  { %4717 = vrot.lane.b32.xlu0 %v11528_v2, %s13730_s27  ;;  %6441 = vmatpush1.msra.mxu0 %v5956_v10 }
 0x676   :  { %v5049_v46 = vpop.permute.xlu0 %5048 }
 0x677   :  { %5056 = vrot.lane.b32.xlu1 %v12323_v54, %s13749_s8  ;;  %v5066_v55 = vsel %vm415_vm2, %v12233_v6, %v5049_v46  ;;  %v5067_v15 = vsel %vm415_vm2, %v5049_v46, %v12363_v33  ;;  %v5877_v29 = vld [vmem:[#allocation3 + $0x440] sm:$0xff]  ;;  %v5876_v31 = vld [vmem:[#allocation3 + $0x308] sm:$0xff]  ;;  %v5864_v2 = vld [vmem:[#allocation3 + $0x5f0] sm:$0xff] }
 0x678   :  { %5092 = vst [vmem:[#allocation3 + $0x6a8] sm:$0xfc] %v5066_v55  ;;  %5093 = vst [vmem:[#allocation3 + $0x350] sm:$0xfc] %v5067_v15  ;;  %v12393_v3 = vpop.permute.xlu1 %4713  ;;  %6377 = vmatprep.subr.mxu1 %v5877_v29  ;;  %v5863_v34 = vld [vmem:[#allocation3 + $0x5e0] sm:$0xff] }
 0x679   :  { %4797 = vrot.lane.b32.xlu0 %v12197_v24, %s13726_s23  ;;  %6378 = vmatpush1.msra.mxu1 %v5876_v31  ;;  %v5771_v31 = vrot.slane %v12284_v12, 6 }
 0x67a   :  { %6379 = vmatprep.subr.mxu1 %v5864_v2  ;;  %v4927_v6 = vpop.permute.xlu0 %4926 }
 0x67b   :  { %4866 = vrot.lane.b32.xlu1 %v11827_v7, %s8229_s2  ;;  %v4945_v49 = vsel %vm4936_vm12, %v12253_v44, %v4927_v6  ;;  %v4946_v16 = vsel %vm4936_vm12, %v4927_v6, %v12373_v27  ;;  %6380 = vmatpush1.msra.mxu1 %v5863_v34  ;;  %v5944_v48 = vld [vmem:[#allocation3 + $0x6b0] sm:$0xff]  ;;  %v5838_v44 = vld [vmem:[#allocation3 + $0x2e0] sm:$0xff] }
 0x67c   :  { %v5943_v28 = vld [vmem:[#allocation3 + $0x6f0] sm:$0xff]  ;;  %4971 = vst [vmem:[#allocation3 + $0x570] ss:$-956 sps:$4 sm:$0xcf] %v4945_v49   ;;  %v12403_v24 = vpop.permute.xlu1 %4793  ;;  %6381 = vmatprep.subr.mxu1 %v5851_v60  ;;  %6442 = vmatprep.subr.mxu0 %v5944_v48 }
 0x67d   :  { %4972 = vst [vmem:[#allocation3 + $0x630] ss:$-1516 sps:$4 sm:$0xcf] %v4946_v16   ;;  %4635 = vrot.lane.b32.xlu0 %v11878_v56, %s13728_s17  ;;  %6382 = vmatpush1.msra.mxu1 %v5850_v37  ;;  %v5825_v56 = vld [vmem:[#allocation3 + $0x448] sm:$0xff] }
 0x67e   :  { %6443 = vmatpush1.msra.mxu0 %v5943_v28  ;;  %v4859_v26 = vpop.permute.xlu0 %4858  ;;  %6383 = vmatprep.subr.mxu1 %v5838_v44 }
 0x67f   :  { %4799 = vrot.lane.b32.xlu1 %v12161_v11, %s13726_s23  ;;  %v4877_v18 = vsel %vm4868_vm0, %v12273_v14, %v4859_v26  ;;  %v4878_v0 = vsel %vm4868_vm0, %v4859_v26, %v12383_v63  ;;  %v5931_v5 = vld [vmem:[#allocation3 + $0x350] sm:$0xff]  ;;  %6384 = vmatpush1.msra.mxu1 %v5837_v42  ;;  %v5930_v45 = vld [vmem:[#allocation3 + $0x6a8] sm:$0xff]  ;;  %s8240_s23 = smov [#allocation5]  }
 0x680   :  { %4903 = vst [vmem:[#allocation3 + $0x1b0] sm:$0x3f] %v4877_v18  ;;  %4904 = vst [vmem:[#allocation3 + $0x40] sm:$0x3f] %v4878_v0  ;;  %v12413_v61 = vpop.permute.xlu1 %4565  ;;  %6444 = vmatprep.subr.mxu0 %v5931_v5  ;;  %6385 = vmatprep.subr.mxu1 %v5825_v56  ;;  %v5736_v18 = vrot.slane %v12284_v12, 4 }
 0x681   :  { %5123 = vrot.lane.b32.xlu0 %v11830_v52, %s13733_s24  ;;  %6386 = vmatpush1.msra.mxu1 %v5824_v30 }
 0x682   :  { %v4712_v14 = vpop.permute.xlu0 %4711  ;;  %6445 = vmatpush1.msra.mxu0 %v5930_v45 }
 0x683   :  { %5793 = vrot.lane.b32.xlu1 %v11830_v52, %s8231_s29  ;;  %v4729_v36 = vsel %vm13935_vm7, %v12310_v38, %v4712_v14  ;;  %v4730_v19 = vsel %vm13928_vm6, %v4712_v14, %v12393_v3  ;;  %v5917_v22 = vld [vmem:[#allocation3 + $0x570] sm:$0xff]  ;;  %vm13943_vm7 = vmmov %vm13936_vm9 }
 0x684   :  { %v5918_v40 = vld [vmem:[#allocation3 + $0x630] sm:$0xff]  ;;  %4755 = vst [vmem:[#allocation3 + $0x750] ss:$-788 sps:$4 sm:$0xf3] %v4729_v36   ;;  %v12423_v23 = vpop.permute.xlu1 %4633  ;;  %vm13944_vm6 = vmmov %vm13933_vm1 }
 0x685   :  { %4756 = vst [vmem:[#allocation3 + $0x170] ss:$932 sps:$4 sm:$0xf3] %v4730_v19   ;;  %6446 = vmatprep.subr.mxu0 %v5918_v40  ;;  %4934 = vrot.lane.b32.xlu0 %v12174_v25, %s8230_s18  ;;  %s8236_s18 = smov 112  }
 0x686   :  { %6447 = vmatpush1.msra.mxu0 %v5917_v22 }
 0x687   :  { %4409 = vrot.lane.b32.xlu1 %v11839_v17, %s13733_s24  ;;  %v4792_v52 = vpop.permute.xlu0 %4791  ;;  %v5905_v50 = vld [vmem:[#allocation3 + $0x40] sm:$0xff]  ;;  %v5904_v38 = vld [vmem:[#allocation3 + $0x1b0] sm:$0xff] }
 0x688   :  { %v4809_v8 = vsel %vm13936_vm9, %v12320_v59, %v4792_v52  ;;  %v4810_v43 = vsel %vm13937_vm15, %v4792_v52, %v12403_v24  ;;  %6448 = vmatprep.subr.mxu0 %v5905_v50  ;;  %vm13945_vm9 = vmmov %vm13933_vm1  ;;  %vm13946_vm15 = vcmask 506880  }
 0x689   :  { %v12433_v1 = vpop.permute.xlu1 %4403  ;;  %4835 = vst [vmem:[#allocation3 + $0x750] sm:$0xfc] %v4809_v8  ;;  %4836 = vst [vmem:[#allocation3 + $0x170] sm:$0xfc] %v4810_v43  ;;  %4719 = vrot.lane.b32.xlu0 %v11839_v17, %s13730_s27  ;;  %6449 = vmatpush1.msra.mxu0 %v5904_v38  ;;  %s13984_s27 = sld [smem:[#allocation11_spill]] }
 0x68b   :  { %5737 = vrot.lane.b32.xlu1 %v12276_v51, %s13733_s24  ;;  %v4564_v10 = vpop.permute.xlu0 %4563 }
 0x68c   :  { %v4582_v46 = vsel %vm4573_vm8, %v12082_v62, %v4564_v10  ;;  %v4583_v59 = vsel %vm4573_vm8, %v4564_v10, %v12413_v61 }
 0x68d   :  { %v12443_v55 = vpop.permute.xlu1 %4497  ;;  %4608 = vst [vmem:[#allocation3 + $0x28] sm:$0x3f] %v4582_v46  ;;  %4609 = vst [vmem:[#allocation3 + $0x50] sm:$0x3f] %v4583_v59  ;;  %4571 = vrot.lane.b32.xlu0 %v11827_v7, %s8231_s29 }
 0x68e   :  { %5807 = vst [vmem:[#allocation3 + $0x5b0] sm:$0x3f] %v4582_v46  ;;  %5808 = vst [vmem:[#allocation3 + $0x478] sm:$0x3f] %v4583_v59  ;;  %v12506_v59 = vld [vmem:[%s13629_s3] sm:$0xff] }
 0x68f   :  { %5795 = vrot.lane.b32.xlu1 %v12284_v12, %s8231_s29  ;;  %v4632_v17 = vpop.permute.xlu0 %4631 }
 0x690   :  { %v4649_v51 = vsel %vm13938_vm4, %v12343_v53, %v4632_v17  ;;  %v4650_v62 = vsel %vm13939_vm14, %v4632_v17, %v12423_v23  ;;  %v5892_v29 = vld [vmem:[#allocation3 + $0x170] sm:$0xff]  ;;  %v6066_v53 = vld [vmem:[%s13940_s4 + $0x8] sm:$0xff]  ;;  %v5826_v17 = vld [vmem:[#allocation3 + $0x380] sm:$0xff] }
 0x691   :  { %v12453_v15 = vpop.permute.xlu1 %5702  ;;  %v5891_v2 = vld [vmem:[#allocation3 + $0x750] sm:$0xff]  ;;  %4675 = vst [vmem:[#allocation3 + $0x438] ss:$-1036 sps:$4 sm:$0xcf] %v4649_v51   ;;  %4639 = vrot.lane.b32.xlu0 %v12174_v25, %s13728_s17  ;;  %6450 = vmatprep.subr.mxu0 %v5892_v29  ;;  %vm13947_vm4 = vmmov %vm13946_vm15 }
 0x692   :  { %4676 = vst [vmem:[#allocation3 + $0x510] ss:$-1212 sps:$4 sm:$0xcf] %v4650_v62   ;;  %6451 = vmatpush1.msra.mxu0 %v5891_v2  ;;  %v12518_v2 = vld [vmem:[%s13629_s3 + $0x18] sm:$0xff]  ;;  %vm13948_vm14 = vmmov %vm13933_vm1 }
 0x693   :  { %5774 = vrot.lane.b32.xlu1 %v5771_v31, %s8232_s28  ;;  %v4402_v7 = vpop.permute.xlu0 %4401 }
 0x694   :  { %v4419_v6 = vsel %vm13941_vm10, %v12102_v58, %v4402_v7  ;;  %v4420_v34 = vsel %vm13933_vm1, %v4402_v7, %v12433_v1  ;;  %vm13949_vm10 = vcmask 523264  }
 0x695   :  { %v12466_v49 = vpop.permute.xlu1 %5564  ;;  %v6059_v16 = vld [vmem:[#allocation3 + $0x478] sm:$0x3f]  ;;  %v6058_v60 = vld [vmem:[#allocation3 + $0x5b0] sm:$0x3f]  ;;  %4503 = vrot.lane.b32.xlu0 %v12161_v11, %s8232_s28  ;;  %vm13950_vm1 = vmmov %vm13949_vm10 }
 0x696   :  { %4445 = vst [vmem:[#allocation3 + $0x558] ss:$84 sps:$4 sm:$0xf3] %v4419_v6   ;;  %4446 = vst [vmem:[#allocation3 + $0x3e0] ss:$476 sps:$4 sm:$0xf3] %v4420_v34   ;;  %7959 = vmatprep.subr.msk.mxu1 %vm6084_vm11, %v6059_v16 }
 0x697   :  { %5751 = vst [vmem:[#allocation3 + $0x648] ss:$-324 sps:$4 sm:$0xf3] %v4419_v6   ;;  %5752 = vst [vmem:[#allocation3 + $0x3d0] ss:$692 sps:$4 sm:$0xf3] %v4420_v34   ;;  %7960 = vmatpush2.msk.msra.mxu1 %vm6084_vm11, %v6058_v60  ;;  %6074 = vperm.xlu1 %8136, %v6066_v53   ;;  %v4496_v58 = vpop.permute.xlu0 %4495 }
 0x698   :  { %v4514_v25 = vsel %vm4505_vm5, %v12113_v35, %v4496_v58  ;;  %v4515_v48 = vsel %vm4505_vm5, %v4496_v58, %v12443_v55  ;;  %v5878_v44 = vld [vmem:[#allocation3 + $0x438] sm:$0xff]  ;;  %v5865_v35 = vld [vmem:[#allocation3 + $0x28] sm:$0xff] }
 0x699   :  { %v12476_v28 = vpop.permute.xlu1 %5644  ;;  %v5879_v37 = vld [vmem:[#allocation3 + $0x510] sm:$0xff]  ;;  %4540 = vst [vmem:[#allocation3 + $0x558] sm:$0xfc] %v4514_v25  ;;  %4541 = vst [vmem:[#allocation3 + $0x3e0] sm:$0xfc] %v4515_v48  ;;  %5772 = vrot.lane.b32.xlu0 %v12323_v54, %s8232_s28  ;;  %v6065_v54 = vld [vmem:[%s13940_s4] sm:$0xff] }
 0x69a   :  { %5786 = vst [vmem:[#allocation3 + $0x648] sm:$0xfc] %v4514_v25  ;;  %5787 = vst [vmem:[#allocation3 + $0x3d0] sm:$0xfc] %v4515_v48  ;;  %6452 = vmatprep.subr.mxu0 %v5879_v37  ;;  %v5866_v11 = vld [vmem:[#allocation3 + $0x50] sm:$0xff]  ;;  %s8237_s28 = smov 113  }
 0x69b   :  { %6453 = vmatpush1.msra.mxu0 %v5878_v44  ;;  %v4316_v26 = vpop.permute.xlu0 %4315  ;;  %s13985_s4 = sld [smem:[#allocation10_spill]] }
 0x69c   :  { %6454 = vmatprep.subr.mxu0 %v5866_v11  ;;  %v4329_v0 = vsel %vm415_vm2, %v12171_v47, %v4316_v26  ;;  %v5706_v42 = vsel %vm415_vm2, %v4316_v26, %v12453_v15 }
 0x69d   :  { %v12485_v5 = vpop.permute.xlu1 %4569  ;;  %6455 = vmatpush1.msra.mxu0 %v5865_v35  ;;  %4355 = vst [vmem:[#allocation3 + $0x6f8] ss:$-980 sps:$4 sm:$0xcf] %v4329_v0   ;;  %5720 = vst [vmem:[#allocation3 + $0x520] ss:$-52 sps:$4 sm:$0xcf] %v4329_v0   ;;  %5739 = vrot.lane.b32.xlu0 %v5736_v18, %s13733_s24 }
 0x69e   :  { %5721 = vst [vmem:[#allocation3 + $0x238] ss:$1356 sps:$4 sm:$0xcf] %v5706_v42   ;;  %v6033_v40 = vld [vmem:[#allocation3 + $0x680] sm:$0xff]  ;;  %v5840_v22 = vld [vmem:[#allocation3 + $0x5b8] sm:$0xff]  ;;  %v5839_v43 = vld [vmem:[#allocation3 + $0x5a8] sm:$0xff] }
 0x69f   :  { %v5563_v56 = vpop.permute.xlu0 %5562  ;;  %v6032_v52 = vld [vmem:[#allocation3 + $0x500] sm:$0xff] }
 0x6a0   :  { %v5578_v12 = vsel %vm4868_vm0, %v12210_v39, %v5563_v56  ;;  %v5579_v47 = vsel %vm4868_vm0, %v5563_v56, %v12466_v49  ;;  %v5853_v14 = vld [vmem:[#allocation3 + $0x3e0] sm:$0xff]  ;;  %v5852_v19 = vld [vmem:[#allocation3 + $0x558] sm:$0xff] }
 0x6a1   :  { %v12495_v45 = vpop.permute.xlu1 %5484  ;;  %v6046_v30 = vld [vmem:[#allocation3 + $0x3d0] sm:$0xff]  ;;  %v6045_v36 = vld [vmem:[#allocation3 + $0x648] sm:$0xff]  ;;  %5604 = vst [vmem:[#allocation3 + $0x188] ss:$316 sps:$4 sm:$0xf3] %v5578_v12   ;;  %6069 = vperm.xlu0 %8135, %v6065_v54   ;;  %6456 = vmatprep.subr.mxu0 %v5853_v14 }
 0x6a2   :  { %5605 = vst [vmem:[#allocation3 + $0x178] ss:$1380 sps:$4 sm:$0xf3] %v5579_v47   ;;  %6415 = vmatprep.subr.mxu1 %v6046_v30  ;;  %6457 = vmatpush1.msra.mxu0 %v5852_v19 }
 0x6a3   :  { %6416 = vmatpush2.msra.mxu1 %v6045_v36  ;;  %v5643_v39 = vpop.permute.xlu0 %5642  ;;  %6458 = vmatprep.subr.mxu0 %v5840_v22 }
 0x6a4   :  { %6417 = vmatprep.subr.mxu1 %v6033_v40  ;;  %v5658_v50 = vsel %vm4936_vm12, %v12223_v9, %v5643_v39  ;;  %v5659_v38 = vsel %vm4936_vm12, %v5643_v39, %v12476_v28  ;;  %v6023_v46 = vld [vmem:[#allocation3 + $0x4e8] sm:$0xff]  ;;  %6459 = vmatpush1.msra.mxu0 %v5839_v43  ;;  %v5827_v9 = vld [vmem:[#allocation3 + $0x110] sm:$0xff]  ;;  %v12569_v43 = vld [vmem:[#allocation2 + $0x438] sm:$0xff] }
 0x6a5   :  { %v12501_v8 = vpop.permute.xlu1 %4407  ;;  %6418 = vmatpush2.msra.mxu1 %v6032_v52  ;;  %v6024_v10 = vld [vmem:[#allocation3 + $0x780] sm:$0xff]  ;;  %5684 = vst [vmem:[#allocation3 + $0x188] sm:$0xfc] %v5658_v50  ;;  %5685 = vst [vmem:[#allocation3 + $0x178] sm:$0xfc] %v5659_v38  ;;  %6460 = vmatprep.subr.mxu0 %v5827_v9 }
 0x6a6   :  { %6420 = vmatmul.mubr.f32.vlgmr.msra.gmra.mxu1 %v12506_v59  ;;  %6507 = vmatprep.subr.mxu1 %v6024_v10 }
 0x6a7   :  { %6461 = vmatpush1.msra.mxu0 %v5826_v17  ;;  %6508 = vmatpush1.msra.mxu1 %v6023_v46  ;;  %v4568_v51 = vpop.permute.xlu0 %4567  ;;  %v8184_v17 = vld [vmem:[%s13629_s3 + $0x8] sm:$0xff] }
 0x6a8   :  { %v4584_v62 = vsel %vm4573_vm8, %v12413_v61, %v4568_v51  ;;  %v4585_v29 = vsel %vm4573_vm8, %v4568_v51, %v12485_v5  ;;  %7962 = vmatprep.mubr.msk.f32.mxu1 %vm6077_vm3, %v12518_v2  ;;  %v12525_v61 = vld [vmem:[%s13629_s3 + $0x10] sm:$0xff]  ;;  %s8233_s3 = smov 116  }
 0x6a9   :  { %v12513_v31 = vpop.permute.xlu1 %4501  ;;  %4610 = vst [vmem:[#allocation3 + $0x638] sm:$0x3f] %v4584_v62  ;;  %4611 = vst [vmem:[#allocation3 + $0x248] sm:$0x3f] %v4585_v29 }
 0x6aa   :  { %5809 = vst [vmem:[#allocation3 + $0x8] sm:$0x3f] %v4584_v62  ;;  %5810 = vst [vmem:[#allocation3 + $0x580] sm:$0x3f] %v4585_v29  ;;  %6425 = vmatmul.mubr.f32.gmra.mxu1 %v12525_v61 }
 0x6ab   :  { %7969 = vmatprep.mubr.msk.f32.mxu1 %vm6077_vm3, %v12134_v57  ;;  %v5483_v7 = vpop.permute.xlu0 %5482 }
 0x6ac   :  { %v5498_v53 = vsel %vm13942_vm13, %v12243_v13, %v5483_v7  ;;  %v5499_v6 = vsel %vm13943_vm7, %v5483_v7, %v12495_v45  ;;  %v6011_v16 = vld [vmem:[#allocation3 + $0x178] sm:$0xff]  ;;  %v6010_v60 = vld [vmem:[#allocation3 + $0x188] sm:$0xff]  ;;  %vm13951_vm13 = vmmov %vm13943_vm7 }
 0x6ad   :  { %v12534_v34 = vpop.permute.xlu1 %5417  ;;  %5524 = vst [vmem:[#allocation3 + $0x2c0] ss:$-644 sps:$4 sm:$0xcf] %v5498_v53   ;;  %5525 = vst [vmem:[#allocation3 + $0x6d8] ss:$-132 sps:$4 sm:$0xcf] %v5499_v6   ;;  %6509 = vmatprep.subr.mxu1 %v6011_v16 }
 0x6ae   :  { %6510 = vmatpush1.msra.mxu1 %v6010_v60  ;;  %vm13952_vm7 = vmmov %vm13944_vm6 }
 0x6af   :  { %v4406_v58 = vpop.permute.xlu0 %4405 }
 0x6b0   :  { %v4421_v25 = vsel %vm13944_vm6, %v12433_v1, %v4406_v58  ;;  %v4422_v57 = vsel %vm13945_vm9, %v4406_v58, %v12501_v8  ;;  %vm13953_vm6 = vmmov %vm13947_vm4 }
 0x6b1   :  { %v12540_v48 = vpop.permute.xlu1 %5270  ;;  %v6061_v13 = vld [vmem:[#allocation3 + $0x580] sm:$0x3f]  ;;  %v6060_v37 = vld [vmem:[#allocation3 + $0x8] sm:$0x3f]  ;;  %vm13954_vm9 = vmmov %vm13947_vm4 }
 0x6b2   :  { %4447 = vst [vmem:[#allocation3 + $0x618] ss:$-172 sps:$4 sm:$0xf3] %v4421_v25   ;;  %4448 = vst [vmem:[#allocation3 + $0x4c0] ss:$-212 sps:$4 sm:$0xf3] %v4422_v57   ;;  %7963 = vmatprep.subr.msk.mxu0 %vm6084_vm11, %v6061_v13 }
 0x6b3   :  { %5753 = vst [vmem:[#allocation3 + $0x428] ss:$284 sps:$4 sm:$0xf3] %v4421_v25   ;;  %5754 = vst [vmem:[#allocation3 + $0x148] ss:$-44 sps:$4 sm:$0xf3] %v4422_v57   ;;  %7964 = vmatpush2.msk.msra.mxu0 %vm6084_vm11, %v6060_v37  ;;  %v4500_v44 = vpop.permute.xlu0 %4499 }
 0x6b4   :  { %v4516_v11 = vsel %vm4505_vm5, %v12443_v55, %v4500_v44  ;;  %v4517_v1 = vsel %vm4505_vm5, %v4500_v44, %v12513_v31  ;;  %v5998_v35 = vld [vmem:[#allocation3 + $0x6d8] sm:$0xff]  ;;  %v5997_v18 = vld [vmem:[#allocation3 + $0x2c0] sm:$0xff] }
 0x6b5   :  { %v12548_v26 = vpop.permute.xlu1 %5350  ;;  %4542 = vst [vmem:[#allocation3 + $0x618] sm:$0xfc] %v4516_v11  ;;  %4543 = vst [vmem:[#allocation3 + $0x4c0] sm:$0xfc] %v4517_v1  ;;  %6511 = vmatprep.subr.mxu1 %v5998_v35 }
 0x6b6   :  { %5788 = vst [vmem:[#allocation3 + $0x428] sm:$0xfc] %v4516_v11  ;;  %5789 = vst [vmem:[#allocation3 + $0x148] sm:$0xfc] %v4517_v1  ;;  %6512 = vmatpush1.msra.mxu1 %v5997_v18 }
 0x6b7   :  { %v5416_v0 = vpop.permute.xlu0 %5415 }
 0x6b8   :  { %v5431_v42 = vsel %vm13946_vm15, %v12263_v21, %v5416_v0  ;;  %v5432_v55 = vsel %vm13947_vm4, %v5416_v0, %v12534_v34  ;;  %vm13955_vm15 = vmmov %vm13951_vm13 }
 0x6b9   :  { %v12554_v54 = vpop.permute.xlu1 %5189  ;;  %5457 = vst [vmem:[#allocation3 + $0x38] sm:$0x3f] %v5431_v42  ;;  %5458 = vst [vmem:[#allocation3 + $0x650] sm:$0x3f] %v5432_v55 }
 0x6ba   :  { %v6035_v19 = vld [vmem:[#allocation3 + $0x118] sm:$0xff]  ;;  %v6034_v22 = vld [vmem:[#allocation3 + $0x540] sm:$0xff]  ;;  %vm13956_vm4 = vmmov %vm13950_vm1 }
 0x6bb   :  { %v5269_v56 = vpop.permute.xlu0 %5268 }
 0x6bc   :  { %v5284_v12 = vsel %vm4573_vm8, %v12290_v20, %v5269_v56  ;;  %v5285_v47 = vsel %vm4573_vm8, %v5269_v56, %v12540_v48 }
 0x6bd   :  { %v5120_v30 = vpop.permute.xlu1 %5119  ;;  %v6048_v14 = vld [vmem:[#allocation3 + $0x148] sm:$0xff]  ;;  %5310 = vst [vmem:[#allocation3 + $0x778] ss:$-1308 sps:$4 sm:$0xf3] %v5284_v12  }
 0x6be   :  { %v6047_v36 = vld [vmem:[#allocation3 + $0x428] sm:$0xff]  ;;  %5311 = vst [vmem:[#allocation3 + $0x7a8] ss:$-332 sps:$4 sm:$0xf3] %v5285_v47   ;;  %v5135_v21 = vsel %vm13948_vm14, %v12353_v4, %v5120_v30  ;;  %6490 = vmatprep.subr.mxu0 %v6048_v14  ;;  %vm13957_vm14 = vmmov %vm13953_vm6 }
 0x6bf   :  { %5161 = vst [vmem:[#allocation3 + $0x210] sm:$0x3f] %v5135_v21  ;;  %6491 = vmatpush2.msra.mxu0 %v6047_v36  ;;  %v5349_v40 = vpop.permute.xlu0 %5348 }
 0x6c0   :  { %6492 = vmatprep.subr.mxu0 %v6035_v19  ;;  %v5364_v20 = vsel %vm13949_vm10, %v12300_v32, %v5349_v40  ;;  %v5365_v39 = vsel %vm13950_vm1, %v5349_v40, %v12548_v26  ;;  %v5985_v50 = vld [vmem:[#allocation3 + $0x650] sm:$0xff]  ;;  %v5984_v38 = vld [vmem:[#allocation3 + $0x38] sm:$0xff]  ;;  %vm13958_vm10 = vmmov %vm13951_vm13 }
 0x6c1   :  { %v5567_v52 = vpop.permute.xlu1 %5566  ;;  %6493 = vmatpush2.msra.mxu0 %v6034_v22  ;;  %5390 = vst [vmem:[#allocation3 + $0x778] sm:$0xfc] %v5364_v20  ;;  %5391 = vst [vmem:[#allocation3 + $0x7a8] sm:$0xfc] %v5365_v39  ;;  %6513 = vmatprep.subr.mxu1 %v5985_v50 }
 0x6c2   :  { %v5580_v4 = vsel %vm4868_vm0, %v12466_v49, %v5567_v52  ;;  %6495 = vmatmul.mubr.f32.vlgmr.msra.gmra.mxu0 %v12506_v59  ;;  %6514 = vmatpush1.msra.mxu1 %v5984_v38 }
 0x6c3   :  { %5606 = vst [vmem:[#allocation3 + $0x640] ss:$308 sps:$4 sm:$0xf3] %v5580_v4   ;;  %6584 = vmatprep.subr.mxu0 %v12569_v43  ;;  %v5188_v32 = vpop.permute.xlu0 %5187  ;;  %7966 = vmatprep.mubr.msk.f32.mxu0 %vm6077_vm3, %v12518_v2 }
 0x6c4   :  { %v5203_v10 = vsel %vm4505_vm5, %v12333_v41, %v5188_v32  ;;  %v5204_v46 = vsel %vm4505_vm5, %v5188_v32, %v12554_v54 }
 0x6c5   :  { %v5053_v49 = vpop.permute.xlu1 %5052  ;;  %5229 = vst [vmem:[#allocation3 + $0x258] ss:$-68 sps:$4 sm:$0xcf] %v5203_v10   ;;  %5230 = vst [vmem:[#allocation3 + $0x658] ss:$-996 sps:$4 sm:$0xcf] %v5204_v46  }
 0x6c6   :  { %v5068_v9 = vsel %vm415_vm2, %v12363_v33, %v5053_v49  ;;  %6501 = vmatmul.mubr.f32.gmra.mxu0 %v12525_v61 }
 0x6c7   :  { %5094 = vst [vmem:[#allocation3 + $0x200] sm:$0xfc] %v5068_v9  ;;  %7972 = vmatprep.mubr.msk.f32.mxu0 %vm6077_vm3, %v8184_v17  ;;  %v5705_v51 = vpop.permute.xlu0 %5704 }
 0x6c8   :  { %v5707_v41 = vsel %vm415_vm2, %v12453_v15, %v5705_v51  ;;  %v5972_v29 = vld [vmem:[#allocation3 + $0x7a8] sm:$0xff]  ;;  %v5971_v7 = vld [vmem:[#allocation3 + $0x778] sm:$0xff] }
 0x6c9   :  { %v5487_v62 = vpop.permute.xlu1 %5486  ;;  %5722 = vst [vmem:[#allocation3 + $0x2c8] ss:$-580 sps:$4 sm:$0xcf] %v5707_v41   ;;  %6515 = vmatprep.subr.mxu1 %v5972_v29 }
 0x6ca   :  { %v5500_v33 = vsel %vm13951_vm13, %v12495_v45, %v5487_v62  ;;  %6516 = vmatpush1.msra.mxu1 %v5971_v7  ;;  %vm13959_vm13 = vmmov %vm13950_vm1 }
 0x6cb   :  { %5526 = vst [vmem:[#allocation3 + $0x770] ss:$-356 sps:$4 sm:$0xcf] %v5500_v33   ;;  %v12589_v53 = vpop.permute.xlu0 %5121 }
 0x6cc   :  { %v5136_v6 = vsel %vm13952_vm7, %v5120_v30, %v12589_v53  ;;  %v5959_v60 = vld [vmem:[#allocation3 + $0x658] sm:$0xff]  ;;  %vm13960_vm7 = vmmov %vm13958_vm10 }
 0x6cd   :  { %v12593_v16 = vpop.permute.xlu1 %4932  ;;  %v5958_v58 = vld [vmem:[#allocation3 + $0x258] sm:$0xff]  ;;  %5162 = vst [vmem:[#allocation3 + $0x270] sm:$0x3f] %v5136_v6  ;;  %6517 = vmatprep.subr.mxu1 %v5959_v60 }
 0x6ce   :  { %6518 = vmatpush1.msra.mxu1 %v5958_v58 }
 0x6cf   :  { %v5647_v15 = vpop.permute.xlu0 %5646 }
 0x6d0   :  { %v5660_v25 = vsel %vm4936_vm12, %v12476_v28, %v5647_v15  ;;  %v6025_v57 = vld [vmem:[#allocation3 + $0x80] sm:$0xff]  ;;  %v5945_v28 = vld [vmem:[#allocation3 + $0x210] sm:$0xff] }
 0x6d1   :  { %v4863_v45 = vpop.permute.xlu1 %4862  ;;  %5686 = vst [vmem:[#allocation3 + $0x640] sm:$0xfc] %v5660_v25  ;;  %6585 = vmatpush1.msra.mxu0 %v6025_v57 }
 0x6d2   :  { %v4879_v13 = vsel %vm4868_vm0, %v12383_v63, %v4863_v45  ;;  %6586 = vmatprep.subr.mxu0 %v12569_v43 }
 0x6d3   :  { %4905 = vst [vmem:[#allocation3 + $0x230] sm:$0x3f] %v4879_v13  ;;  %v5055_v37 = vpop.permute.xlu0 %5054 }
 0x6d4   :  { %v5069_v44 = vsel %vm415_vm2, %v5053_v49, %v5055_v37  ;;  %v5946_v1 = vld [vmem:[#allocation3 + $0x270] sm:$0xff] }
 0x6d5   :  { %v5273_v11 = vpop.permute.xlu1 %5272  ;;  %5095 = vst [vmem:[#allocation3 + $0xe8] sm:$0xfc] %v5069_v44  ;;  %6519 = vmatprep.subr.mxu1 %v5946_v1 }
 0x6d6   :  { %v5286_v35 = vsel %vm4573_vm8, %v12540_v48, %v5273_v11  ;;  %6520 = vmatpush1.msra.mxu1 %v5945_v28  ;;  %v5999_v48 = vld [vmem:[#allocation3 + $0x770] sm:$0xff] }
 0x6d7   :  { %5312 = vst [vmem:[#allocation3 + $0x1f8] ss:$612 sps:$4 sm:$0xf3] %v5286_v35   ;;  %v4931_v18 = vpop.permute.xlu0 %4930 }
 0x6d8   :  { %v4947_v63 = vsel %vm4936_vm12, %v12373_v27, %v4931_v18  ;;  %v4948_v0 = vsel %vm4936_vm12, %v4931_v18, %v12593_v16  ;;  %v6012_v55 = vld [vmem:[#allocation3 + $0x640] sm:$0xff] }
 0x6d9   :  { %v4716_v42 = vpop.permute.xlu1 %4715  ;;  %4973 = vst [vmem:[#allocation3 + $0x480] ss:$-588 sps:$4 sm:$0xcf] %v4947_v63   ;;  %4974 = vst [vmem:[#allocation3 + $0x98] ss:$468 sps:$4 sm:$0xcf] %v4948_v0   ;;  %6587 = vmatpush1.msra.mxu0 %v6012_v55 }
 0x6da   :  { %v4731_v56 = vsel %vm13953_vm6, %v12393_v3, %v4716_v42  ;;  %6588 = vmatprep.subr.mxu0 %v12569_v43  ;;  %v5932_v3 = vld [vmem:[#allocation3 + $0x200] sm:$0xff]  ;;  %v5842_v0 = vld [vmem:[#allocation3 + $0x3e8] sm:$0xff] }
 0x6db   :  { %4757 = vst [vmem:[#allocation3 + $0x730] ss:$-932 sps:$4 sm:$0xf3] %v4731_v56   ;;  %6589 = vmatpush1.msra.mxu0 %v5999_v48  ;;  %v5420_v12 = vpop.permute.xlu0 %5419  ;;  %v5841_v56 = vld [vmem:[#allocation3 + $0x568] sm:$0xff] }
 0x6dc   :  { %v5433_v27 = vsel %vm13954_vm9, %v12534_v34, %v5420_v12  ;;  %v5933_v30 = vld [vmem:[#allocation3 + $0xe8] sm:$0xff]  ;;  %6590 = vmatprep.subr.mxu0 %v12569_v43 }
 0x6dd   :  { %v4796_v47 = vpop.permute.xlu1 %4795  ;;  %5459 = vst [vmem:[#allocation3 + $0x608] sm:$0x3f] %v5433_v27  ;;  %6521 = vmatprep.subr.mxu1 %v5933_v30 }
 0x6de   :  { %v4811_v14 = vsel %vm13955_vm15, %v12403_v24, %v4796_v47  ;;  %6522 = vmatpush1.msra.mxu1 %v5932_v3  ;;  %v5828_v3 = vld [vmem:[#allocation3 + $0x518] sm:$0xff]  ;;  %vm13964_vm15 = vmmov %vm13950_vm1 }
 0x6df   :  { %4837 = vst [vmem:[#allocation3 + $0x730] sm:$0xfc] %v4811_v14  ;;  %v4865_v36 = vpop.permute.xlu0 %4864 }
 0x6e0   :  { %v4880_v21 = vsel %vm4868_vm0, %v4863_v45, %v4865_v36  ;;  %v5920_v40 = vld [vmem:[#allocation3 + $0x98] sm:$0xff]  ;;  %v5919_v22 = vld [vmem:[#allocation3 + $0x480] sm:$0xff]  ;;  %v5906_v10 = vld [vmem:[#allocation3 + $0x230] sm:$0xff] }
 0x6e1   :  { %v5192_v19 = vpop.permute.xlu1 %5191  ;;  %4906 = vst [vmem:[#allocation3 + $0x268] sm:$0x3f] %v4880_v21  ;;  %6523 = vmatprep.subr.mxu1 %v5920_v40 }
 0x6e2   :  { %v5205_v34 = vsel %vm4505_vm5, %v12554_v54, %v5192_v19  ;;  %6524 = vmatpush1.msra.mxu1 %v5919_v22 }
 0x6e3   :  { %5231 = vst [vmem:[#allocation3 + $0x458] ss:$92 sps:$4 sm:$0xcf] %v5205_v34   ;;  %v5353_v20 = vpop.permute.xlu0 %5352 }
 0x6e4   :  { %v5366_v24 = vsel %vm13956_vm4, %v12548_v26, %v5353_v20  ;;  %v5986_v52 = vld [vmem:[#allocation3 + $0x608] sm:$0xff] }
 0x6e5   :  { %v12620_v39 = vpop.permute.xlu1 %4637  ;;  %5392 = vst [vmem:[#allocation3 + $0x1f8] sm:$0xfc] %v5366_v24  ;;  %6591 = vmatpush1.msra.mxu0 %v5986_v52 }
 0x6e6   :  { %6592 = vmatprep.subr.mxu0 %v12569_v43 }
 0x6e7   :  { %v4718_v50 = vpop.permute.xlu0 %4717 }
 0x6e8   :  { %v4732_v38 = vsel %vm13957_vm14, %v4716_v42, %v4718_v50  ;;  %v5907_v32 = vld [vmem:[#allocation3 + $0x268] sm:$0xff]  ;;  %vm13969_vm14 = vmmov %vm13950_vm1 }
 0x6e9   :  { %v5057_v4 = vpop.permute.xlu1 %5056  ;;  %4758 = vst [vmem:[#allocation3 + $0x590] ss:$-92 sps:$4 sm:$0xf3] %v4732_v38   ;;  %6525 = vmatprep.subr.mxu1 %v5907_v32 }
 0x6ea   :  { %v5070_v54 = vsel %vm415_vm2, %v5055_v37, %v5057_v4  ;;  %6526 = vmatpush1.msra.mxu1 %v5906_v10  ;;  %v5960_v51 = vld [vmem:[#allocation3 + $0x458] sm:$0xff] }
 0x6eb   :  { %5096 = vst [vmem:[#allocation3 + $0x598] sm:$0xfc] %v5070_v54  ;;  %v4798_v26 = vpop.permute.xlu0 %4797 }
 0x6ec   :  { %v4812_v46 = vsel %vm13958_vm10, %v4796_v47, %v4798_v26  ;;  %v5973_v9 = vld [vmem:[#allocation3 + $0x1f8] sm:$0xff]  ;;  %vm13970_vm10 = vmmov %vm13950_vm1 }
 0x6ed   :  { %v4867_v49 = vpop.permute.xlu1 %4866  ;;  %4838 = vst [vmem:[#allocation3 + $0x590] sm:$0xfc] %v4812_v46  ;;  %6593 = vmatpush1.msra.mxu0 %v5973_v9  ;;  %v5829_v47 = vld [vmem:[#allocation3 + $0x498] sm:$0xff]  ;;  %v5830_v46 = vld [vmem:[#allocation3 + $0x320] sm:$0xff] }
 0x6ee   :  { %v4881_v17 = vsel %vm4868_vm0, %v4865_v36, %v4867_v49  ;;  %6594 = vmatprep.subr.mxu0 %v12569_v43  ;;  %vm13961_vm0 = vcmask 1014784  }
 0x6ef   :  { %4907 = vst [vmem:[#allocation3 + $0x468] sm:$0x3f] %v4881_v17  ;;  %6595 = vmatpush1.msra.mxu0 %v5960_v51  ;;  %v4636_v41 = vpop.permute.xlu0 %4635  ;;  %vm13962_vm6 = vmmov %vm13961_vm0  ;;  %v12669_v51 = vpop.f32.mrf.mxu0 }
 0x6f0   :  { %v4651_v62 = vsel %vm13950_vm1, %v12423_v23, %v4636_v41  ;;  %v4652_v29 = vsel %vm13959_vm13, %v4636_v41, %v12620_v39  ;;  %6596 = vmatprep.subr.mxu0 %v12569_v43  ;;  %v5893_v23 = vld [vmem:[#allocation3 + $0x730] sm:$0xff]  ;;  %vm13965_vm4 = vmmov %vm13961_vm0 }
 0x6f1   :  { %v4800_v7 = vpop.permute.xlu1 %4799  ;;  %4677 = vst [vmem:[#allocation3 + $0x388] ss:$692 sps:$4 sm:$0xcf] %v4651_v62   ;;  %4678 = vst [vmem:[#allocation3 + $0x530] ss:$-740 sps:$4 sm:$0xcf] %v4652_v29   ;;  %v6267_v29 = vpop.f32.mrf.mxu1 }
 0x6f2   :  { %v4813_v33 = vsel %vm13960_vm7, %v4798_v26, %v4800_v7  ;;  %v5934_v42 = vld [vmem:[#allocation3 + $0x598] sm:$0xff]  ;;  %vm13971_vm13 = vmmov %vm13950_vm1 }
 0x6f3   :  { %4839 = vst [vmem:[#allocation3 + $0x6c8] sm:$0xfc] %v4813_v33  ;;  %v5124_v6 = vpop.permute.xlu0 %5123  ;;  %v6192_v33 = vpop.f32.mrf.mxu0  ;;  %vm13972_vm7 = vmmov %vm13950_vm1 }
 0x6f4   :  { %v5137_v60 = vsel %vm13961_vm0, %v12589_v53, %v5124_v6  ;;  %v5894_v15 = vld [vmem:[#allocation3 + $0x590] sm:$0xff]  ;;  %v6269_v6 = vpop.f32.mrf.mxu1 }
 0x6f5   :  { %v5794_v58 = vpop.permute.xlu1 %5793  ;;  %5163 = vst [vmem:[#allocation3 + $0x4b0] sm:$0x3f] %v5137_v60  ;;  %6527 = vmatprep.subr.mxu1 %v5894_v15 }
 0x6f6   :  { %6528 = vmatpush1.msra.mxu1 %v5893_v23 }
 0x6f7   :  { %v4935_v25 = vpop.permute.xlu0 %4934 }
 0x6f8   :  { %v4949_v45 = vsel %vm4936_vm12, %v12593_v16, %v4935_v25  ;;  %v5881_v13 = vld [vmem:[#allocation3 + $0x530] sm:$0xff]  ;;  %v5880_v37 = vld [vmem:[#allocation3 + $0x388] sm:$0xff]  ;;  %v5867_v1 = vld [vmem:[#allocation3 + $0x638] sm:$0xff] }
 0x6f9   :  { %v4410_v57 = vpop.permute.xlu1 %4409  ;;  %4975 = vst [vmem:[#allocation3 + $0x538] ss:$-204 sps:$4 sm:$0xcf] %v4949_v45   ;;  %6529 = vmatprep.subr.mxu1 %v5881_v13  ;;  %v5868_v53 = vld [vmem:[#allocation3 + $0x248] sm:$0xff]  ;;  %v5855_v16 = vld [vmem:[#allocation3 + $0x4c0] sm:$0xff]  ;;  %vm13963_vm12 = vmmov %vm13961_vm0 }
 0x6fa   :  { %v4423_v44 = vsel %vm13962_vm6, %v12501_v8, %v4410_v57  ;;  %6530 = vmatpush1.msra.mxu1 %v5880_v37  ;;  %v5854_v8 = vld [vmem:[#allocation3 + $0x618] sm:$0xff]  ;;  %v6196_v37 = vpop.f32.mrf.mxu0  ;;  %vm13973_vm0 = vmmov %vm13950_vm1 }
 0x6fb   :  { %4449 = vst [vmem:[#allocation3 + $0x70] ss:$1676 sps:$4 sm:$0xf3] %v4423_v44   ;;  %5755 = vst [vmem:[#allocation3 + $0x240] ss:$740 sps:$4 sm:$0xf3] %v4423_v44   ;;  %6531 = vmatprep.subr.mxu1 %v5868_v53  ;;  %v4720_v11 = vpop.permute.xlu0 %4719 }
 0x6fc   :  { %v4733_v35 = vsel %vm13954_vm9, %v4718_v50, %v4720_v11  ;;  %6532 = vmatpush1.msra.mxu1 %v5867_v1  ;;  %v5947_v18 = vld [vmem:[#allocation3 + $0x4b0] sm:$0xff]  ;;  %v6198_v53 = vpop.f32.mrf.mxu0  ;;  %vm13974_vm6 = vmmov %vm13973_vm0 }
 0x6fd   :  { %v12641_v28 = vpop.permute.xlu1 %5737  ;;  %4759 = vst [vmem:[#allocation3 + $0x6c8] ss:$-1292 sps:$4 sm:$0xf3] %v4733_v35   ;;  %6533 = vmatprep.subr.mxu1 %v5855_v16  ;;  %6597 = vmatpush1.msra.mxu0 %v5947_v18  ;;  %vm13975_vm9 = vmmov %vm13973_vm0 }
 0x6fe   :  { %v5741_v63 = vsel %vm13963_vm12, %v4410_v57, %v12641_v28  ;;  %6534 = vmatpush1.msra.mxu1 %v5854_v8  ;;  %6598 = vmatprep.subr.mxu0 %v12569_v43  ;;  %v6344_v11 = vpop.f32.mrf.mxu0  ;;  %vm13976_vm12 = vmmov %vm13973_vm0 }
 0x6ff   :  { %5756 = vst [vmem:[#allocation3 + $0x470] ss:$-564 sps:$4 sm:$0xf3] %v5741_v63   ;;  %6535 = vmatprep.subr.mxu1 %v5842_v0  ;;  %6599 = vmatpush1.msra.mxu0 %v5934_v42  ;;  %v4572_v55 = vpop.permute.xlu0 %4571 }
 0x700   :  { %v4586_v48 = vsel %vm4573_vm8, %v12485_v5, %v4572_v55  ;;  %v5797_v12 = vsel %vm4573_vm8, %v4572_v55, %v5794_v58  ;;  %6536 = vmatpush1.msra.mxu1 %v5841_v56  ;;  %6600 = vmatprep.subr.mxu0 %v12569_v43  ;;  %v5921_v30 = vld [vmem:[#allocation3 + $0x538] sm:$0xff]  ;;  %v5908_v5 = vld [vmem:[#allocation3 + $0x468] sm:$0xff]  ;;  %v12710_v1 = vpop.f32.mrf.mxu0 }
 0x701   :  { %v5796_v27 = vpop.permute.xlu1 %5795  ;;  %4612 = vst [vmem:[#allocation3 + $0x340] sm:$0x3f] %v4586_v48  ;;  %5811 = vst [vmem:[#allocation3 + $0x708] sm:$0x3f] %v4586_v48  ;;  %6537 = vmatprep.subr.mxu1 %v5829_v47  ;;  %6601 = vmatpush1.msra.mxu0 %v5921_v30 }
 0x702   :  { %5812 = vst [vmem:[#allocation3 + $0x4c8] sm:$0x3f] %v5797_v12  ;;  %v5798_v14 = vsel %vm4573_vm8, %v5794_v58, %v5796_v27  ;;  %6538 = vmatpush1.msra.mxu1 %v5828_v3  ;;  %6602 = vmatprep.subr.mxu0 %v12569_v43  ;;  %v5843_v10 = vld [vmem:[#allocation3 + $0x6f8] sm:$0xff]  ;;  %v6036_v41 = vld [vmem:[#allocation3 + $0x520] sm:$0xff]  ;;  %v6350_v35 = vpop.f32.mrf.mxu0 }
 0x703   :  { %5813 = vst [vmem:[#allocation3 + $0xf0] sm:$0x3f] %v5798_v14  ;;  %6603 = vmatpush1.msra.mxu0 %v5908_v5  ;;  %v4640_v36 = vpop.permute.xlu0 %4639 }
 0x704   :  { %v4653_v21 = vsel %vm13964_vm15, %v12620_v39, %v4640_v36  ;;  %6604 = vmatprep.subr.mxu0 %v12569_v43  ;;  %v5895_v19 = vld [vmem:[#allocation3 + $0x6c8] sm:$0xff]  ;;  %vm13977_vm15 = vmmov %vm13973_vm0 }
 0x705   :  { %4679 = vst [vmem:[#allocation3 + $0x1b8] ss:$396 sps:$4 sm:$0xcf] %v4653_v21   ;;  %6605 = vmatpush1.msra.mxu0 %v5895_v19  ;;  %v5775_v24 = vpop.permute.xlu1 %5774 }
 0x706   :  { %6606 = vmatprep.subr.mxu0 %v12569_v43  ;;  %v6037_v9 = vld [vmem:[#allocation3 + $0x238] sm:$0xff] }
 0x707   :  { %v4504_v40 = vpop.permute.xlu0 %4503 }
 0x708   :  { %v4518_v22 = vsel %vm4505_vm5, %v12513_v31, %v4504_v40  ;;  %v6062_v20 = vld [vmem:[#allocation3 + $0x708] sm:$0x3f] }
 0x709   :  { %v6063_v34 = vld [vmem:[#allocation3 + $0x4c8] sm:$0x3f]  ;;  %4544 = vst [vmem:[#allocation3 + $0x70] sm:$0xfc] %v4518_v22  ;;  %5790 = vst [vmem:[#allocation3 + $0x240] sm:$0xfc] %v4518_v22 }
 0x70a   :  { %7967 = vmatprep.subr.msk.mxu1 %vm6084_vm11, %v6063_v34  ;;  %v6064_v17 = vld [vmem:[#allocation3 + $0xf0] sm:$0x3f] }
 0x70b   :  { %7968 = vmatpush2.msk.msra.mxu1 %vm6084_vm11, %v6062_v20  ;;  %v5773_v39 = vpop.permute.xlu0 %5772 }
 0x70c   :  { %v5776_v52 = vsel %vm4505_vm5, %v4504_v40, %v5773_v39  ;;  %v5777_v50 = vsel %vm4505_vm5, %v5773_v39, %v5775_v24  ;;  %v5882_v38 = vld [vmem:[#allocation3 + $0x1b8] sm:$0xff]  ;;  %v5869_v31 = vld [vmem:[#allocation3 + $0x340] sm:$0xff]  ;;  %vm13966_vm5 = vmmov %vm13950_vm1 }
 0x70d   :  { %5791 = vst [vmem:[#allocation3 + $0x470] sm:$0xfc] %v5776_v52  ;;  %5792 = vst [vmem:[#allocation3 + $0x90] sm:$0xfc] %v5777_v50  ;;  %6607 = vmatpush1.msra.mxu0 %v5882_v38 }
 0x70e   :  { %6608 = vmatprep.subr.mxu0 %v12569_v43 }
 0x70f   :  { %6609 = vmatpush1.msra.mxu0 %v5869_v31  ;;  %v5740_v4 = vpop.permute.xlu0 %5739 }
 0x710   :  { %v5742_v32 = vsel %vm13965_vm4, %v12641_v28, %v5740_v4  ;;  %6610 = vmatprep.subr.mxu0 %v12569_v43  ;;  %v5856_v54 = vld [vmem:[#allocation3 + $0x70] sm:$0xff]  ;;  %v6049_v49 = vld [vmem:[#allocation3 + $0x240] sm:$0xff]  ;;  %v12712_v28 = vpop.f32.mrf.mxu0  ;;  %vm13978_vm4 = vmmov %vm13973_vm0 }
 0x711   :  { %5757 = vst [vmem:[#allocation3 + $0x90] ss:$572 sps:$4 sm:$0xf3] %v5742_v32   ;;  %6611 = vmatpush1.msra.mxu0 %v5856_v54 }
 0x712   :  { %6612 = vmatprep.subr.mxu0 %v12569_v43  ;;  %v6075_v14 = vpop.permute.xlu1 %6074 }
 0x713   :  { %6613 = vmatpush1.msra.mxu0 %v5843_v10  ;;  %v12735_v36 = vadd.f32 %v6198_v53, %v6075_v14 }
 0x714   :  { %6614 = vmatprep.subr.mxu0 %v12569_v43  ;;  %v6050_v26 = vld [vmem:[#allocation3 + $0x470] sm:$0xff] }
 0x715   :  { %6567 = vmatprep.subr.mxu1 %v6050_v26  ;;  %6615 = vmatpush1.msra.mxu0 %v5830_v46  ;;  %v6672_v34 = vmax.f32 %v12735_v36, 0.0 }
 0x716   :  { %6568 = vmatpush2.msra.mxu1 %v6049_v49  ;;  %6642 = vmatprep.subr.mxu0 %v12569_v43 }
 0x717   :  { %6569 = vmatprep.subr.mxu1 %v6037_v9  ;;  %7971 = vmatpush2.msk.msra.mxu0 %vm6084_vm11, %v6064_v17  ;;  %v12785_v9 = vadd.f32 %v6196_v37, %v6075_v14  ;;  %vm13968_vm11 = vmmov %vm13950_vm1 }
 0x718   :  { %6570 = vmatpush2.msra.mxu1 %v6036_v41  ;;  %6644 = vmatprep.subr.mxu0 %v12569_v43  ;;  %v6051_v62 = vld [vmem:[#allocation3 + $0x90] sm:$0xff]  ;;  %v6038_v7 = vld [vmem:[#allocation3 + $0x2c8] sm:$0xff] }
 0x719   :  { %6572 = vmatmul.mubr.f32.vlgmr.msra.gmra.mxu1 %v12506_v59  ;;  %6645 = vmatpush2.msra.mxu0 %v6051_v62 }
 0x71a   :  { %6646 = vmatprep.subr.mxu0 %v12569_v43  ;;  %7970 = vmatprep.mubr.msk.f32.mxu1 %vm6077_vm3, %v12518_v2 }
 0x71b   :  { %6647 = vmatpush2.msra.mxu0 %v6038_v7 }
 0x71c   :  { %6649 = vmatmul.mubr.f32.vlgmr.msra.gmra.mxu0 %v12506_v59  ;;  %v12678_v60 = vpop.permute.xlu0 %6069  ;;  %8044 = vmatprep.subr.mxu0 %v12569_v43  ;;  %v6273_v43 = vpop.f32.mrf.mxu1 }
 0x71d   :  { %6578 = vmatmul.mubr.f32.gmra.mxu1 %v12525_v61  ;;  %7973 = vmatprep.mubr.msk.f32.mxu0 %vm6077_vm3, %v12518_v2  ;;  %v12685_v58 = vadd.f32 %v6267_v29, %v12678_v60  ;;  %v12688_v15 = vadd.f32 %v6192_v33, %v12678_v60  ;;  %v12693_v59 = vadd.f32 %v6269_v6, %v12678_v60  ;;  %vm6943_vm3 = vcmask 7168  }
 0x71e   :  { %v6275_v45 = vpop.f32.mrf.mxu1  ;;  %v12741_v40 = vadd.f32 %v6273_v43, %v6075_v14  ;;  %v12779_v46 = vadd.f32 %v12669_v51, %v12678_v60  ;;  %v6671_v51 = vmax.f32 %v12785_v9, 0.0  ;;  %v12805_v7 = vadd.f32 %v6344_v11, %v12678_v60 }
 0x71f   :  { %v6661_v23 = vmax.f32 %v12685_v58, 0.0  ;;  %v6660_v25 = vmax.f32 %v12688_v15, 0.0  ;;  %v6662_v2 = vmax.f32 %v12693_v59, 0.0  ;;  %v12747_v20 = vadd.f32 %v6275_v45, %v6075_v14 }
 0x720   :  { %6654 = vmatmul.mubr.f32.gmra.mxu0 %v12525_v61  ;;  %v6673_v52 = vmax.f32 %v12741_v40, 0.0  ;;  %v6659_v41 = vmax.f32 %v12779_v46, 0.0  ;;  %v12811_v6 = vadd.f32 %v6350_v35, %v6075_v14  ;;  %v6663_v43 = vmax.f32 %v12805_v7, 0.0 }
 0x721   :  { %6709 = vrot.lane.b32.xlu1 %v6661_v23, %s13749_s8  ;;  %6707 = vrot.lane.b32.xlu0 %v6660_v25, %s13749_s8  ;;  %v6674_v31 = vmax.f32 %v12747_v20, 0.0  ;;  %v12819_v45 = vadd.f32 %v12710_v1, %v12678_v60 }
 0x722   :  { %v6675_v37 = vmax.f32 %v12811_v6, 0.0 }
 0x723   :  { %v6664_v11 = vmax.f32 %v12819_v45, 0.0 }
 0x725   :  { %6711 = vrot.lane.b32.xlu0 %v6662_v2, %s13749_s8 }
 0x766   :  { %v12706_v57 = vpop.f32.mrf.mxu1 }
 0x767   :  { %v6422_v53 = vadd.f32 %v12706_v57, %v12678_v60 }
 0x768   :  { %v6423_v13 = vpop.f32.mrf.mxu1 }
 0x76a   :  { %v12708_v61 = vpop.f32.mrf.mxu1 }
 0x76b   :  { %v6427_v35 = vadd.f32 %v12708_v61, %v6075_v14 }
 0x76c   :  { %v6428_v44 = vpop.f32.mrf.mxu1 }
 0x76d   :  { %v12826_v44 = vadd.f32 %v12712_v28, %v6075_v14  ;;  %v6665_v28 = vmax.f32 %v6422_v53, 0.0  ;;  %v6677_v57 = vmax.f32 %v6427_v35, 0.0 }
 0x782   :  { %v6496_v16 = vpop.f32.mrf.mxu0 }
 0x783   :  { %v12725_v12 = vadd.f32 %v6496_v16, %v12678_v60  ;;  %v6676_v16 = vmax.f32 %v12826_v44, 0.0 }
 0x784   :  { %v6498_v18 = vpop.f32.mrf.mxu0 }
 0x785   :  { %v12715_v63 = vadd.f32 %v6498_v18, %v12678_v60  ;;  %v6666_v21 = vmax.f32 %v12725_v12, 0.0 }
 0x786   :  { %v6502_v0 = vpop.f32.mrf.mxu0 }
 0x787   :  { %v6667_v8 = vmax.f32 %v12715_v63, 0.0  ;;  %v12767_v54 = vadd.f32 %v6502_v0, %v6075_v14 }
 0x788   :  { %v6504_v42 = vpop.f32.mrf.mxu0 }
 0x789   :  { %6719 = vrot.lane.b32.xlu1 %v6667_v8, %s13749_s8  ;;  %v12749_v39 = vadd.f32 %v6504_v42, %v6075_v14  ;;  %v6678_v49 = vmax.f32 %v12767_v54, 0.0 }
 0x78b   :  { %v6679_v4 = vmax.f32 %v12749_v39, 0.0 }
 0x793   :  { %v6708_v13 = vpop.permute.xlu0 %6707  ;;  %v6710_v1 = vpop.permute.xlu1 %6709 }
 0x797   :  { %v12839_v18 = vpop.permute.xlu0 %6711 }
 0x798   :  { %v6751_v61 = vsel %vm415_vm2, %v6710_v1, %v12839_v18 }
 0x799   :  { %v12855_v42 = vmax.f32 %v6661_v23, %v6751_v61 }
 0x7d9   :  { %v6573_v55 = vpop.f32.mrf.mxu1 }
 0x7da   :  { %v12722_v56 = vadd.f32 %v6573_v55, %v12678_v60 }
 0x7db   :  { %v6575_v48 = vpop.f32.mrf.mxu1 }
 0x7dc   :  { %v6668_v27 = vmax.f32 %v12722_v56, 0.0  ;;  %v12729_v47 = vadd.f32 %v6575_v48, %v12678_v60  ;;  %v6650_v30 = vpop.f32.mrf.mxu0 }
 0x7dd   :  { %v6579_v22 = vpop.f32.mrf.mxu1  ;;  %v12788_v17 = vadd.f32 %v6650_v30, %v12678_v60  ;;  %v6750_v60 = vsel %vm415_vm2, %v6708_v13, %v6710_v1 }
 0x7de   :  { %v6669_v3 = vmax.f32 %v12729_v47, 0.0  ;;  %6721 = vrot.lane.b32.xlu0 %v6668_v27, %s13749_s8  ;;  %v6652_v5 = vpop.f32.mrf.mxu0  ;;  %v12755_v38 = vadd.f32 %v6579_v22, %v6075_v14  ;;  %v12850_v0 = vmax.f32 %v6660_v25, %v6750_v60 }
 0x7df   :  { %v6581_v50 = vpop.f32.mrf.mxu1  ;;  %v6670_v29 = vmax.f32 %v12788_v17, 0.0 }
 0x7e0   :  { %6723 = vrot.lane.b32.xlu1 %v6669_v3, %s13749_s8  ;;  %v6655_v19 = vpop.f32.mrf.mxu0  ;;  %v12762_v32 = vadd.f32 %v6581_v50, %v6075_v14  ;;  %v6680_v10 = vmax.f32 %v12755_v38, 0.0 }
 0x7e1   :  { %v12794_v62 = vadd.f32 %v6655_v19, %v6075_v14 }
 0x7e2   :  { %6717 = vrot.lane.b32.xlu0 %v6666_v21, %s13749_s8  ;;  %v6657_v24 = vpop.f32.mrf.mxu0  ;;  %v6681_v26 = vmax.f32 %v12762_v32, 0.0 }
 0x7e3   :  { %v6682_v33 = vmax.f32 %v12794_v62, 0.0 }
 0x7e4   :  { %6729 = vrot.lane.b32.xlu1 %v6672_v34, %s13749_s8 }
 0x7e6   :  { %6731 = vrot.lane.b32.xlu0 %v6673_v52, %s13749_s8 }
 0x7e8   :  { %6733 = vrot.lane.b32.xlu1 %v6674_v31, %s13749_s8 }
 0x7ea   :  { %6741 = vrot.lane.b32.xlu0 %v6679_v4, %s13749_s8 }
 0x7ec   :  { %6743 = vrot.lane.b32.xlu1 %v6680_v10, %s13749_s8 }
 0x7ee   :  { %6745 = vrot.lane.b32.xlu0 %v6681_v26, %s13749_s8 }
 0x7f0   :  { %6739 = vrot.lane.b32.xlu1 %v6678_v49, %s13749_s8 }
 0x7f2   :  { %6705 = vrot.lane.b32.xlu0 %v6659_v41, %s13749_s8 }
 0x7f4   :  { %6727 = vrot.lane.b32.xlu1 %v6671_v51, %s13749_s8 }
 0x7f6   :  { %6725 = vrot.lane.b32.xlu0 %v6670_v29, %s13749_s8 }
 0x7f8   :  { %6747 = vrot.lane.b32.xlu1 %v6682_v33, %s13749_s8 }
 0x7fa   :  { %6713 = vrot.lane.b32.xlu0 %v6663_v43, %s13749_s8 }
 0x7fb   :  { %v6720_v55 = vpop.permute.xlu1 %6719 }
 0x7fc   :  { %6735 = vrot.lane.b32.xlu1 %v6675_v37, %s13749_s8 }
 0x7fe   :  { %6715 = vrot.lane.b32.xlu0 %v6664_v11, %s13749_s8 }
 0x800   :  { %6737 = vrot.lane.b32.xlu1 %v6676_v16, %s13749_s8 }
 0x802   :  { %6809 = vrot.lane.b32.xlu0 %v6665_v28, %s13749_s8 }
 0x804   :  { %6811 = vrot.lane.b32.xlu1 %v6677_v57, %s13749_s8  ;;  %s8235_s8 = smov 1  }
 0x806   :  { %6843 = vrot.lane.b32.xlu0 %v12850_v0, %s13728_s17 }
 0x808   :  { %6845 = vrot.lane.b32.xlu1 %v12855_v42, %s13728_s17 }
 0x850   :  { %v6722_v48 = vpop.permute.xlu0 %6721 }
 0x851   :  { %v6755_v30 = vsel %vm415_vm2, %v6720_v55, %v6722_v48 }
 0x852   :  { %v12864_v15 = vmax.f32 %v6667_v8, %v6755_v30  ;;  %v6724_v25 = vpop.permute.xlu1 %6723 }
 0x853   :  { %v6756_v14 = vsel %vm415_vm2, %v6722_v48, %v6724_v25 }
 0x854   :  { %v12869_v58 = vmax.f32 %v6668_v27, %v6756_v14  ;;  %v6718_v23 = vpop.permute.xlu0 %6717  ;;  %6855 = vrot.lane.b32.xlu0 %v12864_v15, %s13728_s17 }
 0x855   :  { %v6754_v5 = vsel %vm415_vm2, %v6718_v23, %v6720_v55 }
 0x856   :  { %v12876_v19 = vmax.f32 %v6666_v21, %v6754_v5  ;;  %v6730_v63 = vpop.permute.xlu1 %6729  ;;  %6857 = vrot.lane.b32.xlu1 %v12869_v58, %s13728_s17 }
 0x858   :  { %v6732_v8 = vpop.permute.xlu0 %6731  ;;  %6853 = vrot.lane.b32.xlu0 %v12876_v19, %s13728_s17 }
 0x859   :  { %v6759_v56 = vsel %vm415_vm2, %v6730_v63, %v6732_v8 }
 0x85a   :  { %v12885_v27 = vmax.f32 %v6672_v34, %v6759_v56  ;;  %v6734_v22 = vpop.permute.xlu1 %6733 }
 0x85b   :  { %v6760_v24 = vsel %vm415_vm2, %v6732_v8, %v6734_v22 }
 0x85c   :  { %v12890_v12 = vmax.f32 %v6673_v52, %v6760_v24  ;;  %6865 = vrot.lane.b32.xlu1 %v12885_v27, %s13728_s17  ;;  %v6742_v21 = vpop.permute.xlu0 %6741 }
 0x85e   :  { %v6744_v50 = vpop.permute.xlu1 %6743  ;;  %6867 = vrot.lane.b32.xlu0 %v12890_v12, %s13728_s17 }
 0x85f   :  { %v6764_v53 = vsel %vm415_vm2, %v6742_v21, %v6744_v50 }
 0x860   :  { %v12899_v36 = vmax.f32 %v6679_v4, %v6764_v53  ;;  %v6746_v34 = vpop.permute.xlu0 %6745 }
 0x861   :  { %v6765_v1 = vsel %vm415_vm2, %v6744_v50, %v6746_v34 }
 0x862   :  { %v12904_v40 = vmax.f32 %v6680_v10, %v6765_v1  ;;  %v6740_v52 = vpop.permute.xlu1 %6739  ;;  %6877 = vrot.lane.b32.xlu1 %v12899_v36, %s13728_s17 }
 0x863   :  { %v6763_v35 = vsel %vm415_vm2, %v6740_v52, %v6742_v21 }
 0x864   :  { %v12911_v28 = vmax.f32 %v6678_v49, %v6763_v35  ;;  %6879 = vrot.lane.b32.xlu0 %v12904_v40, %s13728_s17  ;;  %v6706_v39 = vpop.permute.xlu0 %6705 }
 0x865   :  { %v6749_v4 = vsel %vm415_vm2, %v6706_v39, %v6708_v13 }
 0x866   :  { %v12918_v38 = vmax.f32 %v6659_v41, %v6749_v4  ;;  %v6728_v10 = vpop.permute.xlu1 %6727  ;;  %6875 = vrot.lane.b32.xlu1 %v12911_v28, %s13728_s17 }
 0x867   :  { %v6758_v60 = vsel %vm415_vm2, %v6728_v10, %v6730_v63 }
 0x868   :  { %v12925_v54 = vmax.f32 %v6671_v51, %v6758_v60  ;;  %6841 = vrot.lane.b32.xlu0 %v12918_v38, %s13728_s17  ;;  %v6726_v49 = vpop.permute.xlu0 %6725 }
 0x869   :  { %v6757_v13 = vsel %vm415_vm2, %v6724_v25, %v6726_v49 }
 0x86a   :  { %v12932_v46 = vmax.f32 %v6669_v3, %v6757_v13  ;;  %v6748_v41 = vpop.permute.xlu1 %6747  ;;  %6863 = vrot.lane.b32.xlu1 %v12925_v54, %s13728_s17 }
 0x86b   :  { %v6766_v57 = vsel %vm415_vm2, %v6746_v34, %v6748_v41  ;;  %v12967_v48 = vmax.f32 %v6682_v33, %v6748_v41 }
 0x86c   :  { %v12939_v9 = vmax.f32 %v6681_v26, %v6766_v57  ;;  %6859 = vrot.lane.b32.xlu0 %v12932_v46, %s13728_s17  ;;  %v6714_v51 = vpop.permute.xlu0 %6713 }
 0x86d   :  { %v6752_v61 = vsel %vm415_vm2, %v12839_v18, %v6714_v51  ;;  %v12960_v18 = vmax.f32 %v6670_v29, %v6726_v49 }
 0x86e   :  { %v12947_v47 = vmax.f32 %v6662_v2, %v6752_v61  ;;  %v6736_v3 = vpop.permute.xlu1 %6735  ;;  %6881 = vrot.lane.b32.xlu1 %v12939_v9, %s13728_s17 }
 0x86f   :  { %v6761_v55 = vsel %vm415_vm2, %v6734_v22, %v6736_v3 }
 0x870   :  { %v12954_v32 = vmax.f32 %v6674_v31, %v6761_v55  ;;  %6847 = vrot.lane.b32.xlu0 %v12947_v47, %s13728_s17  ;;  %v6716_v26 = vpop.permute.xlu0 %6715 }
 0x871   :  { %v6753_v2 = vsel %vm415_vm2, %v6714_v51, %v6716_v26 }
 0x872   :  { %v6738_v59 = vpop.permute.xlu1 %6737  ;;  %6869 = vrot.lane.b32.xlu1 %v12954_v32, %s13728_s17  ;;  %v12974_v17 = vmax.f32 %v6663_v43, %v6753_v2 }
 0x873   :  { %v6762_v31 = vsel %vm415_vm2, %v6736_v3, %v6738_v59 }
 0x874   :  { %6861 = vrot.lane.b32.xlu0 %v12960_v18, %s13728_s17  ;;  %v6810_v20 = vpop.permute.xlu0 %6809  ;;  %v12981_v62 = vmax.f32 %v6675_v37, %v6762_v31 }
 0x875   :  { %v6813_v30 = vsel %vm415_vm2, %v6716_v26, %v6810_v20 }
 0x876   :  { %v6812_v29 = vpop.permute.xlu1 %6811  ;;  %6883 = vrot.lane.b32.xlu1 %v12967_v48, %s13728_s17  ;;  %v6817_v7 = vmax.f32 %v6664_v11, %v6813_v30 }
 0x877   :  { %v6814_v33 = vsel %vm415_vm2, %v6738_v59, %v6812_v29  ;;  %vm13967_vm2 = vmmov %vm13950_vm1 }
 0x878   :  { %6849 = vrot.lane.b32.xlu0 %v12974_v17, %s13728_s17  ;;  %v6844_v43 = vpop.permute.xlu0 %6843  ;;  %v6818_v6 = vmax.f32 %v6676_v16, %v6814_v33 }
 0x87a   :  { %v6846_v25 = vpop.permute.xlu1 %6845  ;;  %6871 = vrot.lane.b32.xlu1 %v12981_v62, %s13728_s17 }
 0x87b   :  { %v6886_v14 = vsel %vm13966_vm5, %v6844_v43, %v6846_v25  ;;  %vm13979_vm5 = vmmov %vm13973_vm0 }
 0x87c   :  { %v12994_v37 = vmax.f32 %v12850_v0, %v6886_v14  ;;  %6851 = vrot.lane.b32.xlu0 %v6817_v7, %s13728_s17 }
 0x87e   :  { %6873 = vrot.lane.b32.xlu1 %v6818_v6, %s13728_s17  ;;  %7023 = vst.msk [vmem:[#allocation4 + $0x50] sm:$0xff] %vm6943_vm3, %v12994_v37  ;;  %s8234_s17 = smov 117  }
 0x880   :  { %7069 = vrot.lane.b32.xlu0 %v12994_v37, %s8233_s3 }
 0x8c6   :  { %v6856_v45 = vpop.permute.xlu0 %6855 }
 0x8c8   :  { %v6858_v11 = vpop.permute.xlu1 %6857 }
 0x8c9   :  { %v6891_v23 = vsel %vm13967_vm2, %v6856_v45, %v6858_v11  ;;  %vm13980_vm2 = vmmov %vm13973_vm0 }
 0x8ca   :  { %v13004_v44 = vmax.f32 %v12864_v15, %v6891_v23  ;;  %v6854_v16 = vpop.permute.xlu0 %6853 }
 0x8cb   :  { %v6890_v0 = vsel %vm13968_vm11, %v6854_v16, %v6856_v45  ;;  %vm13981_vm11 = vmmov %vm13973_vm0 }
 0x8cc   :  { %v13008_v5 = vmax.f32 %v12876_v19, %v6890_v0  ;;  %7077 = vrot.lane.b32.xlu1 %v13004_v44, %s8234_s17 }
 0x8ce   :  { %6948 = vrot.lane.b32.xlu0 %v13008_v5, %s8235_s8  ;;  %v6866_v63 = vpop.permute.xlu1 %6865 }
 0x8d0   :  { %v6868_v8 = vpop.permute.xlu0 %6867 }
 0x8d1   :  { %v6895_v56 = vsel %vm13969_vm14, %v6866_v63, %v6868_v8  ;;  %vm13982_vm14 = vmmov %vm13973_vm0 }
 0x8d2   :  { %v13016_v15 = vmax.f32 %v12885_v27, %v6895_v56 }
 0x8d4   :  { %v6878_v22 = vpop.permute.xlu1 %6877  ;;  %7071 = vrot.lane.b32.xlu1 %v13016_v15, %s8233_s3  ;;  %7024 = vst.msk [vmem:[#allocation4 + $0x58] sm:$0xff] %vm6943_vm3, %v13016_v15 }
 0x8d6   :  { %v6880_v19 = vpop.permute.xlu0 %6879 }
 0x8d7   :  { %v6900_v24 = vsel %vm13970_vm10, %v6878_v22, %v6880_v19  ;;  %vm6954_vm10 = vcmask 15368  }
 0x8d8   :  { %v13024_v21 = vmax.f32 %v12899_v36, %v6900_v24  ;;  %v6876_v50 = vpop.permute.xlu1 %6875 }
 0x8d9   :  { %v6899_v53 = vsel %vm13950_vm1, %v6876_v50, %v6878_v22  ;;  %vm8239_vm1 = vmmov 0  }
 0x8da   :  { %v13028_v34 = vmax.f32 %v12911_v28, %v6899_v53  ;;  %7079 = vrot.lane.b32.xlu0 %v13024_v21, %s8234_s17  ;;  %v6842_v27 = vpop.permute.xlu0 %6841 }
 0x8db   :  { %v6885_v1 = vsel %vm13971_vm13, %v6842_v27, %v6844_v43  ;;  %vm7833_vm13 = vcmask 1043456  }
 0x8dc   :  { %v13034_v52 = vmax.f32 %v12918_v38, %v6885_v1  ;;  %v6864_v35 = vpop.permute.xlu1 %6863  ;;  %6950 = vrot.lane.b32.xlu1 %v13028_v34, %s8235_s8 }
 0x8dd   :  { %v6894_v36 = vsel %vm13972_vm7, %v6864_v35, %v6866_v63  ;;  %vm7907_vm7 = vcmask 74752  }
 0x8de   :  { %v13040_v39 = vmax.f32 %v12925_v54, %v6894_v36  ;;  %7085 = vrot.lane.b32.xlu0 %v12994_v37, %s8236_s18  ;;  %v13044_v28 = vpop.permute.xlu0 %6859  ;;  %6944 = vst.msk [vmem:[#allocation4] sm:$0xff] %vm6943_vm3, %v13034_v52 }
 0x8e0   :  { %v13048_v4 = vpop.permute.xlu1 %6881  ;;  %6959 = vrot.lane.b32.xlu1 %v13034_v52, %s13733_s24  ;;  %6945 = vst.msk [vmem:[#allocation4 + $0x8] sm:$0xff] %vm6943_vm3, %v13040_v39 }
 0x8e2   :  { %7093 = vrot.lane.b32.xlu0 %v13004_v44, %s8237_s28  ;;  %v6848_v38 = vpop.permute.xlu0 %6847 }
 0x8e3   :  { %v6887_v10 = vsel %vm13973_vm0, %v6846_v25, %v6848_v38 }
 0x8e4   :  { %v13058_v60 = vmax.f32 %v12855_v42, %v6887_v10  ;;  %v6870_v54 = vpop.permute.xlu1 %6869  ;;  %6967 = vrot.lane.b32.xlu1 %v13008_v5, %s13735_s13 }
 0x8e5   :  { %v6896_v49 = vsel %vm13974_vm6, %v6868_v8, %v6870_v54 }
 0x8e6   :  { %v13064_v13 = vmax.f32 %v12890_v12, %v6896_v49  ;;  %7087 = vrot.lane.b32.xlu0 %v13016_v15, %s8236_s18  ;;  %v13068_v41 = vpop.permute.xlu0 %6861  ;;  %7101 = vst.msk [vmem:[#allocation4 + $0xa0] sm:$0xff] %vm6943_vm3, %v13058_v60  ;;  %v6892_v12 = vsel %vm13975_vm9, %v6858_v11, %v13044_v28 }
 0x8e7   :  { %v6930_v26 = vmax.f32 %v12869_v58, %v6892_v12  ;;  %v6901_v58 = vsel %vm13979_vm5, %v6880_v19, %v13048_v4 }
 0x8e8   :  { %v13072_v57 = vpop.permute.xlu1 %6883  ;;  %6961 = vrot.lane.b32.xlu1 %v13040_v39, %s13733_s24  ;;  %7102 = vst.msk [vmem:[#allocation4 + $0xa8] sm:$0xff] %vm6943_vm3, %v13064_v13  ;;  %v6940_v30 = vmax.f32 %v12904_v40, %v6901_v58  ;;  %v6893_v40 = vsel %vm13981_vm11, %v13044_v28, %v13068_v41 }
 0x8e9   :  { %v6902_v33 = vsel %vm13982_vm14, %v13048_v4, %v13072_v57  ;;  %v6942_v8 = vmax.f32 %v12967_v48, %v13072_v57 }
 0x8ea   :  { %7095 = vrot.lane.b32.xlu0 %v13024_v21, %s8237_s28  ;;  %v6850_v42 = vpop.permute.xlu0 %6849  ;;  %v6941_v7 = vmax.f32 %v12939_v9, %v6902_v33 }
 0x8eb   :  { %v6888_v51 = vsel %vm13976_vm12, %v6848_v38, %v6850_v42 }
 0x8ec   :  { %v13084_v61 = vmax.f32 %v12947_v47, %v6888_v51  ;;  %v6872_v3 = vpop.permute.xlu1 %6871  ;;  %6969 = vrot.lane.b32.xlu1 %v13028_v34, %s13735_s13 }
 0x8ed   :  { %v6897_v55 = vsel %vm13977_vm15, %v6870_v54, %v6872_v3 }
 0x8ee   :  { %v13091_v59 = vmax.f32 %v12954_v32, %v6897_v55  ;;  %6975 = vrot.lane.b32.xlu0 %v13034_v52, %s8231_s29  ;;  %v6852_v2 = vpop.permute.xlu0 %6851  ;;  %7179 = vst.msk [vmem:[#allocation4 + $0xf0] sm:$0xff] %vm6943_vm3, %v13084_v61 }
 0x8ef   :  { %v6889_v47 = vsel %vm13978_vm4, %v6850_v42, %v6852_v2 }
 0x8f0   :  { %v13099_v20 = vmax.f32 %v12974_v17, %v6889_v47  ;;  %v6874_v31 = vpop.permute.xlu1 %6873  ;;  %7105 = vrot.lane.b32.xlu1 %v6930_v26, %s8235_s8  ;;  %7180 = vst.msk [vmem:[#allocation4 + $0xf8] sm:$0xff] %vm6943_vm3, %v13091_v59 }
 0x8f1   :  { %v6898_v32 = vsel %vm13980_vm2, %v6872_v3, %v6874_v31 }
 0x8f2   :  { %v13108_v29 = vmax.f32 %v12981_v62, %v6898_v32  ;;  %6983 = vrot.lane.b32.xlu0 %v13008_v5, %s8238_s9  ;;  %v7070_v17 = vpop.permute.xlu0 %7069  ;;  %7257 = vst.msk [vmem:[#allocation4 + $0x140] sm:$0xff] %vm6943_vm3, %v13099_v20  ;;  %v6931_v62 = vmax.f32 %v12932_v46, %v6893_v40 }
 0x8f3   :  { %7075 = vst.msk [vmem:[#allocation4 + $0x80] sm:$0xff] %vm6943_vm3, %v7070_v17 }
 0x8f4   :  { %7258 = vst.msk [vmem:[#allocation4 + $0x148] sm:$0xff] %vm6943_vm3, %v13108_v29  ;;  %6977 = vrot.lane.b32.xlu1 %v13040_v39, %s8231_s29 }
 0x8f6   :  { %7107 = vrot.lane.b32.xlu0 %v6940_v30, %s8235_s8 }
 0x8f8   :  { %6985 = vrot.lane.b32.xlu1 %v13028_v34, %s8238_s9 }
 0x8fa   :  { %7115 = vrot.lane.b32.xlu0 %v13058_v60, %s13733_s24 }
 0x8fc   :  { %6991 = vrot.lane.b32.xlu1 %v13034_v52, %s8233_s3 }
 0x8fe   :  { %7123 = vrot.lane.b32.xlu0 %v6930_v26, %s13735_s13 }
 0x900   :  { %6999 = vrot.lane.b32.xlu1 %v13008_v5, %s8234_s17 }
 0x902   :  { %7117 = vrot.lane.b32.xlu0 %v13064_v13, %s13733_s24 }
 0x904   :  { %6993 = vrot.lane.b32.xlu1 %v13040_v39, %s8233_s3 }
 0x906   :  { %7125 = vrot.lane.b32.xlu0 %v6940_v30, %s13735_s13 }
 0x908   :  { %7001 = vrot.lane.b32.xlu1 %v13028_v34, %s8234_s17 }
 0x90a   :  { %7131 = vrot.lane.b32.xlu0 %v13058_v60, %s8231_s29 }
 0x90c   :  { %7007 = vrot.lane.b32.xlu1 %v13034_v52, %s8236_s18 }
 0x90e   :  { %7139 = vrot.lane.b32.xlu0 %v6930_v26, %s8238_s9 }
 0x910   :  { %7015 = vrot.lane.b32.xlu1 %v13008_v5, %s8237_s28  ;;  %v6932_v5 = vmax.f32 %v12960_v18, %v13068_v41 }
 0x912   :  { %7133 = vrot.lane.b32.xlu0 %v13064_v13, %s8231_s29 }
 0x914   :  { %7009 = vrot.lane.b32.xlu1 %v13040_v39, %s8236_s18 }
 0x916   :  { %7141 = vrot.lane.b32.xlu0 %v6940_v30, %s8238_s9 }
 0x918   :  { %7017 = vrot.lane.b32.xlu1 %v13028_v34, %s8237_s28 }
 0x91a   :  { %7147 = vrot.lane.b32.xlu0 %v13058_v60, %s8233_s3 }
 0x91c   :  { %7155 = vrot.lane.b32.xlu1 %v6930_v26, %s8234_s17 }
 0x91e   :  { %7027 = vrot.lane.b32.xlu0 %v13004_v44, %s8235_s8 }
 0x920   :  { %7149 = vrot.lane.b32.xlu1 %v13064_v13, %s8233_s3 }
 0x922   :  { %7157 = vrot.lane.b32.xlu0 %v6940_v30, %s8234_s17 }
 0x924   :  { %7029 = vrot.lane.b32.xlu1 %v13024_v21, %s8235_s8 }
 0x926   :  { %7163 = vrot.lane.b32.xlu0 %v13058_v60, %s8236_s18 }
 0x928   :  { %7037 = vrot.lane.b32.xlu1 %v12994_v37, %s13733_s24 }
 0x92a   :  { %7171 = vrot.lane.b32.xlu0 %v6930_v26, %s8237_s28 }
 0x92c   :  { %7045 = vrot.lane.b32.xlu1 %v13004_v44, %s13735_s13 }
 0x92e   :  { %7165 = vrot.lane.b32.xlu0 %v13064_v13, %s8236_s18 }
 0x930   :  { %7039 = vrot.lane.b32.xlu1 %v13016_v15, %s13733_s24 }
 0x932   :  { %7173 = vrot.lane.b32.xlu0 %v6940_v30, %s8237_s28 }
 0x934   :  { %7047 = vrot.lane.b32.xlu1 %v13024_v21, %s13735_s13 }
 0x936   :  { %7053 = vrot.lane.b32.xlu0 %v12994_v37, %s8231_s29 }
 0x938   :  { %7183 = vrot.lane.b32.xlu1 %v6931_v62, %s8235_s8 }
 0x93a   :  { %7061 = vrot.lane.b32.xlu0 %v13004_v44, %s8238_s9 }
 0x93c   :  { %7055 = vrot.lane.b32.xlu1 %v13016_v15, %s8231_s29 }
 0x93e   :  { %v7078_v43 = vpop.permute.xlu1 %7077  ;;  %7185 = vrot.lane.b32.xlu0 %v6941_v7, %s8235_s8 }
 0x93f   :  { %7083 = vst.msk [vmem:[#allocation4 + $0x80] sm:$0xff] %vm6954_vm10, %v7078_v43 }
 0x940   :  { %7063 = vrot.lane.b32.xlu1 %v13024_v21, %s8238_s9  ;;  %v6949_v46 = vpop.permute.xlu0 %6948 }
 0x941   :  { %6955 = vst.msk [vmem:[#allocation4] sm:$0xff] %vm6954_vm10, %v6949_v46 }
 0x942   :  { %7193 = vrot.lane.b32.xlu0 %v13084_v61, %s13733_s24 }
 0x944   :  { %7201 = vrot.lane.b32.xlu1 %v6931_v62, %s13735_s13 }
 0x946   :  { %v7072_v9 = vpop.permute.xlu1 %7071  ;;  %7195 = vrot.lane.b32.xlu0 %v13091_v59, %s13733_s24  ;;  %v7351_v3 = vld [vmem:[#allocation4 + $0x80] sm:$0xff] }
 0x947   :  { %7076 = vst.msk [vmem:[#allocation4 + $0x88] sm:$0xff] %vm6943_vm3, %v7072_v9 }
 0x948   :  { %7203 = vrot.lane.b32.xlu1 %v6941_v7, %s13735_s13  ;;  %v7335_v51 = vld [vmem:[#allocation4] sm:$0xff] }
 0x949   :  { %v8137_v26 = vpack.i.bf16 %v7335_v51, %v7351_v3 }
 0x94a   :  { %7209 = vrot.lane.b32.xlu0 %v13084_v61, %s8231_s29 }
 0x94c   :  { %7217 = vrot.lane.b32.xlu1 %v6931_v62, %s8238_s9  ;;  %v7080_v25 = vpop.permute.xlu0 %7079 }
 0x94d   :  { %7084 = vst.msk [vmem:[#allocation4 + $0x88] sm:$0xff] %vm6954_vm10, %v7080_v25 }
 0x94e   :  { %v6951_v14 = vpop.permute.xlu1 %6950  ;;  %7211 = vrot.lane.b32.xlu0 %v13091_v59, %s8231_s29 }
 0x94f   :  { %6956 = vst.msk [vmem:[#allocation4 + $0x8] sm:$0xff] %vm6954_vm10, %v6951_v14 }
 0x950   :  { %7219 = vrot.lane.b32.xlu1 %v6941_v7, %s8238_s9  ;;  %v7086_v6 = vpop.permute.xlu0 %7085 }
 0x951   :  { %7091 = vst.msk [vmem:[#allocation4 + $0x90] sm:$0xff] %vm6943_vm3, %v7086_v6 }
 0x952   :  { %v6960_v37 = vpop.permute.xlu1 %6959  ;;  %7225 = vrot.lane.b32.xlu0 %v13084_v61, %s8233_s3 }
 0x953   :  { %6965 = vst.msk [vmem:[#allocation4 + $0x10] sm:$0xff] %vm6943_vm3, %v6960_v37 }
 0x954   :  { %7233 = vrot.lane.b32.xlu1 %v6931_v62, %s8234_s17  ;;  %v7094_v45 = vpop.permute.xlu0 %7093  ;;  %v7352_v47 = vld [vmem:[#allocation4 + $0x88] sm:$0xff] }
 0x955   :  { %7099 = vst.msk [vmem:[#allocation4 + $0x90] sm:$0xff] %vm6954_vm10, %v7094_v45 }
 0x956   :  { %v6968_v11 = vpop.permute.xlu1 %6967  ;;  %7227 = vrot.lane.b32.xlu0 %v13091_v59, %s8233_s3 }
 0x957   :  { %6973 = vst.msk [vmem:[#allocation4 + $0x10] sm:$0xff] %vm6954_vm10, %v6968_v11 }
 0x958   :  { %7235 = vrot.lane.b32.xlu1 %v6941_v7, %s8234_s17  ;;  %v7088_v23 = vpop.permute.xlu0 %7087 }
 0x959   :  { %7092 = vst.msk [vmem:[#allocation4 + $0x98] sm:$0xff] %vm6943_vm3, %v7088_v23 }
 0x95a   :  { %v6962_v44 = vpop.permute.xlu1 %6961  ;;  %7241 = vrot.lane.b32.xlu0 %v13084_v61, %s8236_s18 }
 0x95b   :  { %6966 = vst.msk [vmem:[#allocation4 + $0x18] sm:$0xff] %vm6943_vm3, %v6962_v44 }
 0x95c   :  { %7249 = vrot.lane.b32.xlu1 %v6931_v62, %s8237_s28  ;;  %v7096_v16 = vpop.permute.xlu0 %7095 }
 0x95d   :  { %7100 = vst.msk [vmem:[#allocation4 + $0x98] sm:$0xff] %vm6954_vm10, %v7096_v16 }
 0x95e   :  { %v6970_v0 = vpop.permute.xlu1 %6969  ;;  %7243 = vrot.lane.b32.xlu0 %v13091_v59, %s8236_s18  ;;  %v7336_v59 = vld [vmem:[#allocation4 + $0x8] sm:$0xff]  ;;  %v7337_v58 = vld [vmem:[#allocation4 + $0x10] sm:$0xff] }
 0x95f   :  { %6974 = vst.msk [vmem:[#allocation4 + $0x18] sm:$0xff] %vm6954_vm10, %v6970_v0  ;;  %v8139_v31 = vpack.i.bf16 %v7336_v59, %v7352_v47 }
 0x960   :  { %7251 = vrot.lane.b32.xlu1 %v6941_v7, %s8237_s28  ;;  %v6976_v63 = vpop.permute.xlu0 %6975 }
 0x961   :  { %6981 = vst.msk [vmem:[#allocation4 + $0x20] sm:$0xff] %vm6943_vm3, %v6976_v63 }
 0x962   :  { %v7106_v56 = vpop.permute.xlu1 %7105  ;;  %7261 = vrot.lane.b32.xlu0 %v6932_v5, %s8235_s8 }
 0x963   :  { %7111 = vst.msk [vmem:[#allocation4 + $0xa0] sm:$0xff] %vm6954_vm10, %v7106_v56 }
 0x964   :  { %7263 = vrot.lane.b32.xlu1 %v6942_v8, %s8235_s8  ;;  %v6984_v15 = vpop.permute.xlu0 %6983  ;;  %v7354_v33 = vld [vmem:[#allocation4 + $0x98] sm:$0xff] }
 0x965   :  { %6989 = vst.msk [vmem:[#allocation4 + $0x20] sm:$0xff] %vm6954_vm10, %v6984_v15 }
 0x966   :  { %v6978_v22 = vpop.permute.xlu1 %6977  ;;  %7271 = vrot.lane.b32.xlu0 %v13099_v20, %s13733_s24  ;;  %v7338_v40 = vld [vmem:[#allocation4 + $0x18] sm:$0xff] }
 0x967   :  { %6982 = vst.msk [vmem:[#allocation4 + $0x28] sm:$0xff] %vm6943_vm3, %v6978_v22  ;;  %v8143_v43 = vpack.i.bf16 %v7338_v40, %v7354_v33 }
 0x968   :  { %7279 = vrot.lane.b32.xlu1 %v6932_v5, %s13735_s13  ;;  %v7108_v18 = vpop.permute.xlu0 %7107 }
 0x969   :  { %7112 = vst.msk [vmem:[#allocation4 + $0xa8] sm:$0xff] %vm6954_vm10, %v7108_v18 }
 0x96a   :  { %v6986_v48 = vpop.permute.xlu1 %6985  ;;  %7273 = vrot.lane.b32.xlu0 %v13108_v29, %s13733_s24  ;;  %v7355_v25 = vld [vmem:[#allocation4 + $0xa0] sm:$0xff] }
 0x96b   :  { %6990 = vst.msk [vmem:[#allocation4 + $0x28] sm:$0xff] %vm6954_vm10, %v6986_v48 }
 0x96c   :  { %7281 = vrot.lane.b32.xlu1 %v6942_v8, %s13735_s13  ;;  %v7116_v19 = vpop.permute.xlu0 %7115  ;;  %v7339_v46 = vld [vmem:[#allocation4 + $0x20] sm:$0xff] }
 0x96d   :  { %7121 = vst.msk [vmem:[#allocation4 + $0xb0] sm:$0xff] %vm6943_vm3, %v7116_v19  ;;  %v8145_v6 = vpack.i.bf16 %v7339_v46, %v7355_v25 }
 0x96e   :  { %v6992_v24 = vpop.permute.xlu1 %6991  ;;  %7287 = vrot.lane.b32.xlu0 %v13099_v20, %s8231_s29 }
 0x96f   :  { %6997 = vst.msk [vmem:[#allocation4 + $0x30] sm:$0xff] %vm6943_vm3, %v6992_v24 }
 0x970   :  { %7295 = vrot.lane.b32.xlu1 %v6932_v5, %s8238_s9  ;;  %v7124_v21 = vpop.permute.xlu0 %7123  ;;  %v7356_v11 = vld [vmem:[#allocation4 + $0xa8] sm:$0xff] }
 0x971   :  { %7129 = vst.msk [vmem:[#allocation4 + $0xb0] sm:$0xff] %vm6954_vm10, %v7124_v21 }
 0x972   :  { %v7000_v50 = vpop.permute.xlu1 %6999  ;;  %7289 = vrot.lane.b32.xlu0 %v13108_v29, %s8231_s29  ;;  %v7340_v37 = vld [vmem:[#allocation4 + $0x28] sm:$0xff]  ;;  %s13983_s29 = sld [smem:[#allocation9_spill]] }
 0x973   :  { %7005 = vst.msk [vmem:[#allocation4 + $0x30] sm:$0xff] %vm6954_vm10, %v7000_v50  ;;  %v8147_v44 = vpack.i.bf16 %v7340_v37, %v7356_v11 }
 0x974   :  { %7297 = vrot.lane.b32.xlu1 %v6942_v8, %s8238_s9  ;;  %v7118_v53 = vpop.permute.xlu0 %7117 }
 0x975   :  { %7122 = vst.msk [vmem:[#allocation4 + $0xb8] sm:$0xff] %vm6943_vm3, %v7118_v53 }
 0x976   :  { %v6994_v34 = vpop.permute.xlu1 %6993  ;;  %7319 = vrot.lane.b32.xlu0 %v13099_v20, %s8236_s18 }
 0x977   :  { %6998 = vst.msk [vmem:[#allocation4 + $0x38] sm:$0xff] %vm6943_vm3, %v6994_v34 }
 0x978   :  { %7303 = vrot.lane.b32.xlu1 %v13099_v20, %s8233_s3  ;;  %v7126_v27 = vpop.permute.xlu0 %7125  ;;  %v7416_v63 = vld [vmem:[%s13983_s29 + $0xf8] sm:$0xff]  ;;  %v7415_v19 = vld [vmem:[%s13983_s29 + $0xf0] sm:$0xff]  ;;  %v7414_v21 = vld [vmem:[%s13983_s29 + $0xe8] sm:$0xff] }
 0x979   :  { %7130 = vst.msk [vmem:[#allocation4 + $0xb8] sm:$0xff] %vm6954_vm10, %v7126_v27  ;;  %7981 = vmatprep.subr.mxu1 %v7416_v63  ;;  %v7399_v24 = vld [vmem:[%s13983_s29 + $0x70] sm:$0xff]  ;;  %v7398_v34 = vld [vmem:[%s13983_s29 + $0x68] sm:$0xff]  ;;  %v7408_v59 = vld [vmem:[%s13983_s29 + $0xb8] sm:$0xff] }
 0x97a   :  { %v7002_v1 = vpop.permute.xlu1 %7001  ;;  %7327 = vrot.lane.b32.xlu0 %v6932_v5, %s8237_s28  ;;  %v7341_v16 = vld [vmem:[#allocation4 + $0x30] sm:$0xff] }
 0x97b   :  { %7006 = vst.msk [vmem:[#allocation4 + $0x38] sm:$0xff] %vm6954_vm10, %v7002_v1  ;;  %v7390_v33 = vld [vmem:[%s13983_s29 + $0x28] sm:$0xff] }
 0x97c   :  { %7311 = vrot.lane.b32.xlu1 %v6932_v5, %s8234_s17  ;;  %v7132_v52 = vpop.permute.xlu0 %7131  ;;  %v7357_v5 = vld [vmem:[#allocation4 + $0xb0] sm:$0xff] }
 0x97d   :  { %7137 = vst.msk [vmem:[#allocation4 + $0xc0] sm:$0xff] %vm6943_vm3, %v7132_v52  ;;  %v8149_v15 = vpack.i.bf16 %v7341_v16, %v7357_v5  ;;  %v7387_v16 = vld [vmem:[%s13983_s29 + $0x10] sm:$0xff]  ;;  %v7402_v5 = vld [vmem:[%s13983_s29 + $0x88] sm:$0xff] }
 0x97e   :  { %v7008_v35 = vpop.permute.xlu1 %7007  ;;  %7321 = vrot.lane.b32.xlu0 %v13108_v29, %s8236_s18 }
 0x97f   :  { %7013 = vst.msk [vmem:[#allocation4 + $0x40] sm:$0xff] %vm6943_vm3, %v7008_v35  ;;  %v7413_v35 = vld [vmem:[%s13983_s29 + $0xe0] sm:$0xff] }
 0x980   :  { %7305 = vrot.lane.b32.xlu1 %v13108_v29, %s8233_s3  ;;  %v7140_v36 = vpop.permute.xlu0 %7139  ;;  %v7353_v29 = vld [vmem:[#allocation4 + $0x90] sm:$0xff]  ;;  %v7358_v48 = vld [vmem:[#allocation4 + $0xb8] sm:$0xff] }
 0x981   :  { %7145 = vst.msk [vmem:[#allocation4 + $0xc0] sm:$0xff] %vm6954_vm10, %v7140_v36  ;;  %v8141_v30 = vpack.i.bf16 %v7337_v58, %v7353_v29  ;;  %v7397_v36 = vld [vmem:[%s13983_s29 + $0x60] sm:$0xff]  ;;  %v7407_v58 = vld [vmem:[%s13983_s29 + $0xb0] sm:$0xff] }
 0x982   :  { %v7016_v39 = vpop.permute.xlu1 %7015  ;;  %7329 = vrot.lane.b32.xlu0 %v6942_v8, %s8237_s28  ;;  %v7342_v22 = vld [vmem:[#allocation4 + $0x38] sm:$0xff] }
 0x983   :  { %7021 = vst.msk [vmem:[#allocation4 + $0x40] sm:$0xff] %vm6954_vm10, %v7016_v39  ;;  %v8151_v53 = vpack.i.bf16 %v7342_v22, %v7358_v48  ;;  %v7412_v39 = vld [vmem:[%s13983_s29 + $0xd8] sm:$0xff]  ;;  %v7391_v29 = vld [vmem:[%s13983_s29 + $0x30] sm:$0xff]  ;;  %v7401_v22 = vld [vmem:[%s13983_s29 + $0x80] sm:$0xff] }
 0x984   :  { %7313 = vrot.lane.b32.xlu1 %v6942_v8, %s8234_s17  ;;  %v7134_v28 = vpop.permute.xlu0 %7133  ;;  %v7400_v8 = vld [vmem:[%s13983_s29 + $0x78] sm:$0xff]  ;;  %v7385_v48 = vld [vmem:[%s13983_s29] sm:$0xff] }
 0x985   :  { %7138 = vst.msk [vmem:[#allocation4 + $0xc8] sm:$0xff] %vm6943_vm3, %v7134_v28  ;;  %7982 = vmatpush3.msra.mxu1 %v7400_v8 }
 0x986   :  { %v7010_v4 = vpop.permute.xlu1 %7009  ;;  %7983 = vmatprep.subr.mxu1 %v7415_v19 }
 0x987   :  { %7014 = vst.msk [vmem:[#allocation4 + $0x48] sm:$0xff] %vm6943_vm3, %v7010_v4  ;;  %7984 = vmatpush3.msra.mxu1 %v7399_v24 }
 0x988   :  { %v7142_v38 = vpop.permute.xlu0 %7141  ;;  %v7359_v52 = vld [vmem:[#allocation4 + $0xc0] sm:$0xff]  ;;  %7985 = vmatprep.subr.mxu1 %v7414_v21 }
 0x989   :  { %7146 = vst.msk [vmem:[#allocation4 + $0xc8] sm:$0xff] %vm6954_vm10, %v7142_v38  ;;  %7986 = vmatpush3.msra.mxu1 %v7398_v34  ;;  %v7396_v38 = vld [vmem:[%s13983_s29 + $0x58] sm:$0xff] }
 0x98a   :  { %v7018_v10 = vpop.permute.xlu1 %7017  ;;  %v7343_v27 = vld [vmem:[#allocation4 + $0x40] sm:$0xff]  ;;  %7987 = vmatprep.subr.mxu1 %v7413_v35 }
 0x98b   :  { %7022 = vst.msk [vmem:[#allocation4 + $0x48] sm:$0xff] %vm6954_vm10, %v7018_v10  ;;  %v8153_v4 = vpack.i.bf16 %v7343_v27, %v7359_v52  ;;  %7988 = vmatpush3.msra.mxu1 %v7397_v36  ;;  %v13416_v34 = vld [vmem:[#allocation2 + $0x438] sm:$0xff] }
 0x98c   :  { %v7148_v60 = vpop.permute.xlu0 %7147  ;;  %7989 = vmatprep.subr.mxu1 %v7412_v39  ;;  %8074 = vmatprep.mubr.msk.f32.mxu0 %vm8239_vm1, %v13416_v34 }
 0x98d   :  { %7153 = vst.msk [vmem:[#allocation4 + $0xd0] sm:$0xff] %vm6943_vm3, %v7148_v60  ;;  %v7411_v60 = vld [vmem:[%s13983_s29 + $0xd0] sm:$0xff]  ;;  %7990 = vmatpush3.msra.mxu1 %v7396_v38 }
 0x98e   :  { %v7156_v54 = vpop.permute.xlu1 %7155  ;;  %7991 = vmatprep.subr.mxu1 %v7411_v60 }
 0x98f   :  { %7161 = vst.msk [vmem:[#allocation4 + $0xd0] sm:$0xff] %vm6954_vm10, %v7156_v54 }
 0x990   :  { %v7028_v49 = vpop.permute.xlu0 %7027 }
 0x991   :  { %7033 = vst.msk [vmem:[#allocation4 + $0x50] sm:$0xff] %vm6954_vm10, %v7028_v49  ;;  %v7395_v49 = vld [vmem:[%s13983_s29 + $0x50] sm:$0xff] }
 0x992   :  { %v7150_v13 = vpop.permute.xlu1 %7149  ;;  %v7344_v10 = vld [vmem:[#allocation4 + $0x48] sm:$0xff]  ;;  %7992 = vmatpush3.msra.mxu1 %v7395_v49 }
 0x993   :  { %7154 = vst.msk [vmem:[#allocation4 + $0xd8] sm:$0xff] %vm6943_vm3, %v7150_v13  ;;  %v7360_v13 = vld [vmem:[#allocation4 + $0xc8] sm:$0xff] }
 0x994   :  { %v7158_v41 = vpop.permute.xlu0 %7157 }
 0x995   :  { %7162 = vst.msk [vmem:[#allocation4 + $0xd8] sm:$0xff] %vm6954_vm10, %v7158_v41  ;;  %v7410_v41 = vld [vmem:[%s13983_s29 + $0xc8] sm:$0xff] }
 0x996   :  { %v7030_v57 = vpop.permute.xlu1 %7029  ;;  %7993 = vmatprep.subr.mxu1 %v7410_v41 }
 0x997   :  { %7034 = vst.msk [vmem:[#allocation4 + $0x58] sm:$0xff] %vm6954_vm10, %v7030_v57 }
 0x998   :  { %v7164_v42 = vpop.permute.xlu0 %7163  ;;  %v7345_v51 = vld [vmem:[#allocation4 + $0x50] sm:$0xff] }
 0x999   :  { %7169 = vst.msk [vmem:[#allocation4 + $0xe0] sm:$0xff] %vm6943_vm3, %v7164_v42  ;;  %v8155_v42 = vpack.i.bf16 %v7344_v10, %v7360_v13 }
 0x99a   :  { %v7038_v12 = vpop.permute.xlu1 %7037 }
 0x99b   :  { %7043 = vst.msk [vmem:[#allocation4 + $0x60] sm:$0xff] %vm6943_vm3, %v7038_v12  ;;  %v7394_v12 = vld [vmem:[%s13983_s29 + $0x48] sm:$0xff] }
 0x99c   :  { %v7172_v61 = vpop.permute.xlu0 %7171  ;;  %7994 = vmatpush3.msra.mxu1 %v7394_v12 }
 0x99d   :  { %7177 = vst.msk [vmem:[#allocation4 + $0xe0] sm:$0xff] %vm6954_vm10, %v7172_v61  ;;  %v7409_v61 = vld [vmem:[%s13983_s29 + $0xc0] sm:$0xff] }
 0x99e   :  { %v7046_v55 = vpop.permute.xlu1 %7045  ;;  %7995 = vmatprep.subr.mxu1 %v7409_v61 }
 0x99f   :  { %7051 = vst.msk [vmem:[#allocation4 + $0x60] sm:$0xff] %vm6954_vm10, %v7046_v55  ;;  %v7393_v55 = vld [vmem:[%s13983_s29 + $0x40] sm:$0xff] }
 0x9a0   :  { %8138 = vxpose.xlu0.b32.start [1/16] (narrow) %v8137_v26, 8  ;;  %v7166_v2 = vpop.permute.xlu0 %7165  ;;  %v7361_v26 = vld [vmem:[#allocation4 + $0xd0] sm:$0xff]  ;;  %7996 = vmatpush3.msra.mxu1 %v7393_v55 }
 0x9a1   :  { %7170 = vst.msk [vmem:[#allocation4 + $0xe8] sm:$0xff] %vm6943_vm3, %v7166_v2  ;;  %v8157_v47 = vpack.i.bf16 %v7345_v51, %v7361_v26  ;;  %7997 = vmatprep.subr.mxu1 %v7408_v59 }
 0x9a2   :  { %v7040_v20 = vpop.permute.xlu1 %7039 }
 0x9a3   :  { %7044 = vst.msk [vmem:[#allocation4 + $0x68] sm:$0xff] %vm6943_vm3, %v7040_v20  ;;  %v7392_v20 = vld [vmem:[%s13983_s29 + $0x38] sm:$0xff] }
 0x9a4   :  { %8140 = vxpose.xlu0.b32.cont [2/16] (narrow) %v8139_v31, 8  ;;  %v7174_v32 = vpop.permute.xlu0 %7173  ;;  %v7346_v31 = vld [vmem:[#allocation4 + $0x58] sm:$0xff]  ;;  %7998 = vmatpush3.msra.mxu1 %v7392_v20  ;;  %v7363_v25 = vld [vmem:[#allocation4 + $0xe0] sm:$0xff] }
 0x9a5   :  { %7178 = vst.msk [vmem:[#allocation4 + $0xe8] sm:$0xff] %vm6954_vm10, %v7174_v32  ;;  %7999 = vmatprep.subr.mxu1 %v7407_v58 }
 0x9a6   :  { %v7048_v17 = vpop.permute.xlu1 %7047  ;;  %8000 = vmatpush3.msra.mxu1 %v7391_v29  ;;  %v7432_v29 = vld [vmem:[%s13983_s29 + $0x178] sm:$0xff] }
 0x9a7   :  { %7052 = vst.msk [vmem:[#allocation4 + $0x68] sm:$0xff] %vm6954_vm10, %v7048_v17  ;;  %v7362_v17 = vld [vmem:[#allocation4 + $0xd8] sm:$0xff] }
 0x9a8   :  { %8142 = vxpose.xlu0.b32.cont [3/16] (narrow) %v8141_v30, 8  ;;  %v7054_v62 = vpop.permute.xlu0 %7053  ;;  %v7406_v30 = vld [vmem:[%s13983_s29 + $0xa8] sm:$0xff] }
 0x9a9   :  { %7059 = vst.msk [vmem:[#allocation4 + $0x70] sm:$0xff] %vm6943_vm3, %v7054_v62  ;;  %v8159_v62 = vpack.i.bf16 %v7346_v31, %v7362_v17  ;;  %8001 = vmatprep.subr.mxu1 %v7406_v30  ;;  %v7431_v30 = vld [vmem:[%s13983_s29 + $0x170] sm:$0xff] }
 0x9aa   :  { %v7184_v7 = vpop.permute.xlu1 %7183  ;;  %8002 = vmatpush3.msra.mxu1 %v7390_v33  ;;  %v7429_v33 = vld [vmem:[%s13983_s29 + $0x160] sm:$0xff] }
 0x9ab   :  { %7189 = vst.msk [vmem:[#allocation4 + $0xf0] sm:$0xff] %vm6954_vm10, %v7184_v7  ;;  %v7347_v7 = vld [vmem:[#allocation4 + $0x60] sm:$0xff] }
 0x9ac   :  { %8144 = vxpose.xlu0.b32.cont [4/16] (narrow) %v8143_v43, 8  ;;  %v7062_v9 = vpop.permute.xlu0 %7061  ;;  %v7405_v43 = vld [vmem:[%s13983_s29 + $0xa0] sm:$0xff]  ;;  %v8161_v37 = vpack.i.bf16 %v7347_v7, %v7363_v25  ;;  %v7428_v7 = vld [vmem:[%s13983_s29 + $0x158] sm:$0xff] }
 0x9ad   :  { %7067 = vst.msk [vmem:[#allocation4 + $0x70] sm:$0xff] %vm6954_vm10, %v7062_v9  ;;  %v7389_v9 = vld [vmem:[%s13983_s29 + $0x20] sm:$0xff]  ;;  %8003 = vmatprep.subr.mxu1 %v7405_v43 }
 0x9ae   :  { %v7056_v14 = vpop.permute.xlu1 %7055  ;;  %v7348_v11 = vld [vmem:[#allocation4 + $0x68] sm:$0xff]  ;;  %8004 = vmatpush3.msra.mxu1 %v7389_v9  ;;  %v7426_v9 = vld [vmem:[%s13983_s29 + $0x148] sm:$0xff] }
 0x9af   :  { %7060 = vst.msk [vmem:[#allocation4 + $0x78] sm:$0xff] %vm6943_vm3, %v7056_v14  ;;  %v7404_v14 = vld [vmem:[%s13983_s29 + $0x98] sm:$0xff] }
 0x9b0   :  { %8146 = vxpose.xlu0.b32.cont [5/16] (narrow) %v8145_v6, 8  ;;  %v7186_v45 = vpop.permute.xlu0 %7185  ;;  %8005 = vmatprep.subr.mxu1 %v7404_v14  ;;  %v7425_v14 = vld [vmem:[%s13983_s29 + $0x140] sm:$0xff] }
 0x9b1   :  { %7190 = vst.msk [vmem:[#allocation4 + $0xf8] sm:$0xff] %vm6954_vm10, %v7186_v45  ;;  %v7388_v45 = vld [vmem:[%s13983_s29 + $0x18] sm:$0xff] }
 0x9b2   :  { %v7064_v23 = vpop.permute.xlu1 %7063  ;;  %8006 = vmatpush3.msra.mxu1 %v7388_v45  ;;  %v7365_v19 = vld [vmem:[#allocation4 + $0xf0] sm:$0xff]  ;;  %v7423_v45 = vld [vmem:[%s13983_s29 + $0x130] sm:$0xff] }
 0x9b3   :  { %7068 = vst.msk [vmem:[#allocation4 + $0x78] sm:$0xff] %vm6954_vm10, %v7064_v23  ;;  %v7403_v23 = vld [vmem:[%s13983_s29 + $0x90] sm:$0xff] }
 0x9b4   :  { %8148 = vxpose.xlu0.b32.cont [6/16] (narrow) %v8147_v44, 8  ;;  %v7194_v0 = vpop.permute.xlu0 %7193  ;;  %8007 = vmatprep.subr.mxu1 %v7403_v23 }
 0x9b5   :  { %7199 = vst.msk [vmem:[#allocation4 + $0x100] sm:$0xff] %vm6943_vm3, %v7194_v0  ;;  %v7364_v0 = vld [vmem:[#allocation4 + $0xe8] sm:$0xff]  ;;  %8008 = vmatpush3.msra.mxu1 %v7387_v16  ;;  %v7420_v16 = vld [vmem:[%s13983_s29 + $0x118] sm:$0xff] }
 0x9b6   :  { %v7202_v56 = vpop.permute.xlu1 %7201  ;;  %v8163_v8 = vpack.i.bf16 %v7348_v11, %v7364_v0  ;;  %8009 = vmatprep.subr.mxu1 %v7402_v5  ;;  %v7422_v11 = vld [vmem:[%s13983_s29 + $0x128] sm:$0xff]  ;;  %v7419_v5 = vld [vmem:[%s13983_s29 + $0x110] sm:$0xff] }
 0x9b7   :  { %7207 = vst.msk [vmem:[#allocation4 + $0x100] sm:$0xff] %vm6954_vm10, %v7202_v56  ;;  %v7386_v56 = vld [vmem:[%s13983_s29 + $0x8] sm:$0xff] }
 0x9b8   :  { %8150 = vxpose.xlu0.b32.cont [7/16] (narrow) %v8149_v15, 8  ;;  %v7196_v18 = vpop.permute.xlu0 %7195  ;;  %v7349_v15 = vld [vmem:[#allocation4 + $0x70] sm:$0xff]  ;;  %8010 = vmatpush3.msra.mxu1 %v7386_v56  ;;  %v7366_v27 = vld [vmem:[#allocation4 + $0xf8] sm:$0xff]  ;;  %v7417_v56 = vld [vmem:[%s13983_s29 + $0x100] sm:$0xff] }
 0x9b9   :  { %7200 = vst.msk [vmem:[#allocation4 + $0x108] sm:$0xff] %vm6943_vm3, %v7196_v18  ;;  %v8165_v21 = vpack.i.bf16 %v7349_v15, %v7365_v19  ;;  %8011 = vmatprep.subr.mxu1 %v7401_v22  ;;  %v7434_v15 = vld [vmem:[%s13983_s29 + $0x188] sm:$0xff]  ;;  %v7433_v22 = vld [vmem:[%s13983_s29 + $0x180] sm:$0xff] }
 0x9ba   :  { %v7204_v50 = vpop.permute.xlu1 %7203  ;;  %8012 = vmatpush3.msra.mxu1 %v7385_v48  ;;  %v7728_v48 = vld [vmem:[%s13984_s27 + $0x68] sm:$0xff]  ;;  %v7727_v19 = vld [vmem:[%s13984_s27 + $0x60] sm:$0xff] }
 0x9bb   :  { %7208 = vst.msk [vmem:[#allocation4 + $0x108] sm:$0xff] %vm6954_vm10, %v7204_v50  ;;  %v7350_v50 = vld [vmem:[#allocation4 + $0x78] sm:$0xff]  ;;  %7644 = vmatprep.subr.mxu1 %v13416_v34 }
 0x9bc   :  { %8152 = vxpose.xlu0.b32.cont [8/16] (narrow) %v8151_v53, 8  ;;  %v7210_v1 = vpop.permute.xlu0 %7209  ;;  %v8167_v52 = vpack.i.bf16 %v7350_v50, %v7366_v27  ;;  %v7724_v50 = vld [vmem:[%s13984_s27 + $0x48] sm:$0xff]  ;;  %v7722_v27 = vld [vmem:[%s13984_s27 + $0x38] sm:$0xff] }
 0x9bd   :  { %7215 = vst.msk [vmem:[#allocation4 + $0x110] sm:$0xff] %vm6943_vm3, %v7210_v1 }
 0x9be   :  { %v7218_v28 = vpop.permute.xlu1 %7217  ;;  %v7367_v61 = vld [vmem:[#allocation4 + $0x100] sm:$0xff] }
 0x9bf   :  { %7223 = vst.msk [vmem:[#allocation4 + $0x110] sm:$0xff] %vm6954_vm10, %v7218_v28 }
 0x9c0   :  { %8154 = vxpose.xlu0.b32.cont [9/16] (narrow) %v8153_v4, 8  ;;  %v7212_v54 = vpop.permute.xlu0 %7211 }
 0x9c1   :  { %7216 = vst.msk [vmem:[#allocation4 + $0x118] sm:$0xff] %vm6943_vm3, %v7212_v54 }
 0x9c2   :  { %v7220_v57 = vpop.permute.xlu1 %7219 }
 0x9c3   :  { %7224 = vst.msk [vmem:[#allocation4 + $0x118] sm:$0xff] %vm6954_vm10, %v7220_v57 }
 0x9c4   :  { %8156 = vxpose.xlu0.b32.cont [10/16] (narrow) %v8155_v42, 8  ;;  %v7226_v3 = vpop.permute.xlu0 %7225 }
 0x9c5   :  { %7231 = vst.msk [vmem:[#allocation4 + $0x120] sm:$0xff] %vm6943_vm3, %v7226_v3  ;;  %v7368_v3 = vld [vmem:[#allocation4 + $0x108] sm:$0xff] }
 0x9c6   :  { %v7234_v2 = vpop.permute.xlu1 %7233  ;;  %v7369_v55 = vld [vmem:[#allocation4 + $0x110] sm:$0xff] }
 0x9c7   :  { %7239 = vst.msk [vmem:[#allocation4 + $0x120] sm:$0xff] %vm6954_vm10, %v7234_v2 }
 0x9c8   :  { %8158 = vxpose.xlu0.b32.cont [11/16] (narrow) %v8157_v47, 8  ;;  %v7228_v32 = vpop.permute.xlu0 %7227 }
 0x9c9   :  { %7232 = vst.msk [vmem:[#allocation4 + $0x128] sm:$0xff] %vm6943_vm3, %v7228_v32 }
 0x9ca   :  { %v7236_v40 = vpop.permute.xlu1 %7235  ;;  %v7370_v26 = vld [vmem:[#allocation4 + $0x118] sm:$0xff] }
 0x9cb   :  { %7240 = vst.msk [vmem:[#allocation4 + $0x128] sm:$0xff] %vm6954_vm10, %v7236_v40  ;;  %v7430_v40 = vld [vmem:[%s13983_s29 + $0x168] sm:$0xff] }
 0x9cc   :  { %8160 = vxpose.xlu0.b32.cont [12/16] (narrow) %v8159_v62, 8  ;;  %v7242_v46 = vpop.permute.xlu0 %7241 }
 0x9cd   :  { %7247 = vst.msk [vmem:[#allocation4 + $0x130] sm:$0xff] %vm6943_vm3, %v7242_v46  ;;  %v7427_v46 = vld [vmem:[%s13983_s29 + $0x150] sm:$0xff] }
 0x9ce   :  { %v7250_v6 = vpop.permute.xlu1 %7249  ;;  %v7371_v59 = vld [vmem:[#allocation4 + $0x120] sm:$0xff] }
 0x9cf   :  { %7255 = vst.msk [vmem:[#allocation4 + $0x130] sm:$0xff] %vm6954_vm10, %v7250_v6  ;;  %v7424_v6 = vld [vmem:[%s13983_s29 + $0x138] sm:$0xff] }
 0x9d0   :  { %8162 = vxpose.xlu0.b32.cont [13/16] (narrow) %v8161_v37, 8  ;;  %v7244_v44 = vpop.permute.xlu0 %7243 }
 0x9d1   :  { %7248 = vst.msk [vmem:[#allocation4 + $0x138] sm:$0xff] %vm6943_vm3, %v7244_v44  ;;  %v7421_v44 = vld [vmem:[%s13983_s29 + $0x120] sm:$0xff] }
 0x9d2   :  { %v7252_v63 = vpop.permute.xlu1 %7251  ;;  %v7372_v2 = vld [vmem:[#allocation4 + $0x128] sm:$0xff] }
 0x9d3   :  { %7256 = vst.msk [vmem:[#allocation4 + $0x138] sm:$0xff] %vm6954_vm10, %v7252_v63  ;;  %v7418_v63 = vld [vmem:[%s13983_s29 + $0x108] sm:$0xff] }
 0x9d4   :  { %8164 = vxpose.xlu0.b32.cont [14/16] (narrow) %v8163_v8, 8  ;;  %v7262_v18 = vpop.permute.xlu0 %7261 }
 0x9d5   :  { %7267 = vst.msk [vmem:[#allocation4 + $0x140] sm:$0xff] %vm6954_vm10, %v7262_v18  ;;  %v7729_v18 = vld [vmem:[%s13984_s27 + $0x70] sm:$0xff] }
 0x9d6   :  { %v7264_v24 = vpop.permute.xlu1 %7263  ;;  %v7373_v47 = vld [vmem:[#allocation4 + $0x130] sm:$0xff]  ;;  %8045 = vmatpush3.msra.mxu0 %v7729_v18 }
 0x9d7   :  { %7268 = vst.msk [vmem:[#allocation4 + $0x148] sm:$0xff] %vm6954_vm10, %v7264_v24  ;;  %8046 = vmatprep.subr.mxu0 %v13416_v34  ;;  %v7726_v24 = vld [vmem:[%s13984_s27 + $0x58] sm:$0xff] }
 0x9d8   :  { %8166 = vxpose.xlu0.b32.cont [15/16] (narrow) %v8165_v21, 8  ;;  %v7272_v53 = vpop.permute.xlu0 %7271  ;;  %8047 = vmatpush3.msra.mxu0 %v7728_v48  ;;  %v7725_v21 = vld [vmem:[%s13984_s27 + $0x50] sm:$0xff] }
 0x9d9   :  { %7277 = vst.msk [vmem:[#allocation4 + $0x150] sm:$0xff] %vm6943_vm3, %v7272_v53  ;;  %8048 = vmatprep.subr.mxu0 %v13416_v34  ;;  %v7723_v53 = vld [vmem:[%s13984_s27 + $0x40] sm:$0xff] }
 0x9da   :  { %v7280_v1 = vpop.permute.xlu1 %7279  ;;  %v7374_v20 = vld [vmem:[#allocation4 + $0x138] sm:$0xff]  ;;  %8049 = vmatpush3.msra.mxu0 %v7727_v19 }
 0x9db   :  { %7285 = vst.msk [vmem:[#allocation4 + $0x150] sm:$0xff] %vm6954_vm10, %v7280_v1  ;;  %8050 = vmatprep.subr.mxu0 %v13416_v34  ;;  %v7721_v1 = vld [vmem:[%s13984_s27 + $0x30] sm:$0xff] }
 0x9dc   :  { %8168 = vxpose.xlu0.b32.end [16/16] (narrow) %v8167_v52, 8  ;;  %v7274_v35 = vpop.permute.xlu0 %7273  ;;  %v7375_v17 = vld [vmem:[#allocation4 + $0x140] sm:$0xff]  ;;  %8051 = vmatpush3.msra.mxu0 %v7726_v24  ;;  %v7720_v52 = vld [vmem:[%s13984_s27 + $0x28] sm:$0xff] }
 0x9dd   :  { %7278 = vst.msk [vmem:[#allocation4 + $0x158] sm:$0xff] %vm6943_vm3, %v7274_v35  ;;  %8052 = vmatprep.subr.mxu0 %v13416_v34 }
 0x9de   :  { %v7282_v36 = vpop.permute.xlu1 %7281  ;;  %v7376_v62 = vld [vmem:[#allocation4 + $0x148] sm:$0xff]  ;;  %8053 = vmatpush3.msra.mxu0 %v7725_v21 }
 0x9df   :  { %7286 = vst.msk [vmem:[#allocation4 + $0x158] sm:$0xff] %vm6954_vm10, %v7282_v36  ;;  %8054 = vmatprep.subr.mxu0 %v13416_v34  ;;  %v7719_v36 = vld [vmem:[%s13984_s27 + $0x20] sm:$0xff] }
 0x9e0   :  { %v7288_v39 = vpop.permute.xlu0 %7287  ;;  %8055 = vmatpush3.msra.mxu0 %v7724_v50 }
 0x9e1   :  { %7293 = vst.msk [vmem:[#allocation4 + $0x160] sm:$0xff] %vm6943_vm3, %v7288_v39  ;;  %8056 = vmatprep.subr.mxu0 %v13416_v34  ;;  %v7718_v39 = vld [vmem:[%s13984_s27 + $0x18] sm:$0xff] }
 0x9e2   :  { %v7296_v28 = vpop.permute.xlu1 %7295  ;;  %v7377_v43 = vld [vmem:[#allocation4 + $0x150] sm:$0xff]  ;;  %8057 = vmatpush3.msra.mxu0 %v7723_v53 }
 0x9e3   :  { %7301 = vst.msk [vmem:[#allocation4 + $0x160] sm:$0xff] %vm6954_vm10, %v7296_v28  ;;  %8058 = vmatprep.subr.mxu0 %v13416_v34 }
 0x9e4   :  { %v7290_v4 = vpop.permute.xlu0 %7289  ;;  %8059 = vmatpush3.msra.mxu0 %v7722_v27 }
 0x9e5   :  { %7294 = vst.msk [vmem:[#allocation4 + $0x168] sm:$0xff] %vm6943_vm3, %v7290_v4  ;;  %8060 = vmatprep.subr.mxu0 %v13416_v34  ;;  %v7717_v4 = vld [vmem:[%s13984_s27 + $0x10] sm:$0xff] }
 0x9e6   :  { %v7298_v38 = vpop.permute.xlu1 %7297  ;;  %v7378_v25 = vld [vmem:[#allocation4 + $0x158] sm:$0xff]  ;;  %8061 = vmatpush3.msra.mxu0 %v7721_v1 }
 0x9e7   :  { %7302 = vst.msk [vmem:[#allocation4 + $0x168] sm:$0xff] %vm6954_vm10, %v7298_v38  ;;  %8062 = vmatprep.subr.mxu0 %v13416_v34  ;;  %v7716_v38 = vld [vmem:[%s13984_s27 + $0x8] sm:$0xff] }
 0x9e8   :  { %v7320_v10 = vpop.permute.xlu0 %7319  ;;  %8063 = vmatpush3.msra.mxu0 %v7720_v52 }
 0x9e9   :  { %7325 = vst.msk [vmem:[#allocation4 + $0x180] sm:$0xff] %vm6943_vm3, %v7320_v10  ;;  %8064 = vmatprep.subr.mxu0 %v13416_v34  ;;  %v7715_v10 = vld [vmem:[%s13984_s27] sm:$0xff] }
 0x9ea   :  { %v7304_v60 = vpop.permute.xlu1 %7303  ;;  %v7379_v37 = vld [vmem:[#allocation4 + $0x160] sm:$0xff]  ;;  %8065 = vmatpush3.msra.mxu0 %v7719_v36 }
 0x9eb   :  { %7309 = vst.msk [vmem:[#allocation4 + $0x170] sm:$0xff] %vm6943_vm3, %v7304_v60  ;;  %8066 = vmatprep.subr.mxu0 %v13416_v34 }
 0x9ec   :  { %v7328_v54 = vpop.permute.xlu0 %7327  ;;  %8067 = vmatpush3.msra.mxu0 %v7718_v39 }
 0x9ed   :  { %7333 = vst.msk [vmem:[#allocation4 + $0x180] sm:$0xff] %vm6954_vm10, %v7328_v54  ;;  %8068 = vmatprep.subr.mxu0 %v13416_v34 }
 0x9ee   :  { %v7312_v49 = vpop.permute.xlu1 %7311  ;;  %v7380_v23 = vld [vmem:[#allocation4 + $0x168] sm:$0xff]  ;;  %8069 = vmatpush3.msra.mxu0 %v7717_v4 }
 0x9ef   :  { %7317 = vst.msk [vmem:[#allocation4 + $0x170] sm:$0xff] %vm6954_vm10, %v7312_v49  ;;  %8070 = vmatprep.subr.mxu0 %v13416_v34 }
 0x9f0   :  { %v7322_v13 = vpop.permute.xlu0 %7321  ;;  %8071 = vmatpush3.msra.mxu0 %v7716_v38 }
 0x9f1   :  { %7326 = vst.msk [vmem:[#allocation4 + $0x188] sm:$0xff] %vm6943_vm3, %v7322_v13  ;;  %8072 = vmatprep.subr.mxu0 %v13416_v34  ;;  %v7974_v13 = vld [vmem:[%s13985_s4] ss:$0 sm:$0xff]  ;;  %s7915_s4 = sshll.u32 %s8240_s23, 4  ;;  %s7916_s4 = int_to_ptr.vmem [resolvable:$true] %s7915_s4 }
 0x9f2   :  { %v7306_v41 = vpop.permute.xlu1 %7305  ;;  %8073 = vmatpush3.msra.mxu0 %v7715_v10  ;;  %s8186_s27 = scalar_lea.vmem %s7916_s4, 32  ;;  %p8191_p1 = scmp.lt.s32.totalorder %s7916_s4, %s7916_s4 }
 0x9f3   :  { %7310 = vst.msk [vmem:[#allocation4 + $0x178] sm:$0xff] %vm6943_vm3, %v7306_v41  ;;  %vm7570_vm3 = vcmask 130048   ;;  %8077 = vmatprep.subr.mxu0 %v13416_v34  ;;  %p8187_p0 = scmp.ne.s32.totalorder %s7916_s4, %s8186_s27  ;;  %p8192_p2 = scmp.lt.s32.totalorder %s8186_s27, %s8186_s27 }
 0x9f4   :  { %v7330_v57 = vpop.permute.xlu0 %7329  ;;  %v7383_v42 = vld [vmem:[#allocation4 + $0x180] sm:$0xff] }
 0x9f5   :  { %7334 = vst.msk [vmem:[#allocation4 + $0x188] sm:$0xff] %vm6954_vm10, %v7330_v57  ;;  %7538 = vxpose.xlu1.b32.start [1/2] (short) (narrow) %v7383_v42, 8  ;;  %p8193_p3 = por %p8192_p2, %p8191_p1 }
 0x9f6   :  { %v7314_v12 = vpop.permute.xlu1 %7313  ;;  %v7381_v0 = vld [vmem:[#allocation4 + $0x170] sm:$0xff] }
 0x9f7   :  { %7318 = vst.msk [vmem:[#allocation4 + $0x178] sm:$0xff] %vm6954_vm10, %v7314_v12  ;;  %p8194_p4 = pnand %p8193_p3, %p8187_p0 }
 0x9fc   :  { %v7384_v51 = vld [vmem:[#allocation4 + $0x188] sm:$0xff] }
 0x9fd   :  { %7539 = vxpose.xlu1.b32.end [2/2] (short) (narrow) %v7384_v51, 8 }
 0x9fe   :  { %v7382_v8 = vld [vmem:[#allocation4 + $0x178] sm:$0xff] }
 0xa01   :  { %7506 = vxpose.xlu1.b32.start [1/16] (narrow) %v7367_v61, 8  ;;  %v7821_v61 = vld [vmem:[%s13986_s1 + $0x50] sm:$0xf] }
 0xa05   :  { %7507 = vxpose.xlu1.b32.cont [2/16] (narrow) %v7368_v3, 8  ;;  %v7820_v3 = vld [vmem:[%s13986_s1 + $0x48] sm:$0xff] }
 0xa09   :  { %7508 = vxpose.xlu1.b32.cont [3/16] (narrow) %v7369_v55, 8  ;;  %v7819_v55 = vld [vmem:[%s13986_s1 + $0x40] sm:$0xff] }
 0xa0d   :  { %7509 = vxpose.xlu1.b32.cont [4/16] (narrow) %v7370_v26, 8  ;;  %v7818_v26 = vld [vmem:[%s13986_s1 + $0x38] sm:$0xff] }
 0xa11   :  { %7510 = vxpose.xlu1.b32.cont [5/16] (narrow) %v7371_v59, 8  ;;  %v7817_v59 = vld [vmem:[%s13986_s1 + $0x30] sm:$0xff] }
 0xa15   :  { %7511 = vxpose.xlu1.b32.cont [6/16] (narrow) %v7372_v2, 8  ;;  %v7816_v2 = vld [vmem:[%s13986_s1 + $0x28] sm:$0xff] }
 0xa19   :  { %7512 = vxpose.xlu1.b32.cont [7/16] (narrow) %v7373_v47, 8  ;;  %v7815_v47 = vld [vmem:[%s13986_s1 + $0x20] sm:$0xff] }
 0xa1c   :  { %v8169_v31 = vpop.trf.xlu0 }
 0xa1d   :  { %7513 = vxpose.xlu1.b32.cont [8/16] (narrow) %v7374_v20, 8  ;;  %v8173_v58 = vunpack.i.h.bf16 %v8169_v31  ;;  %v8170_v32 = vunpack.i.l.bf16 %v8169_v31  ;;  %v7814_v20 = vld [vmem:[%s13986_s1 + $0x18] sm:$0xff]  ;;  %v7813_v31 = vld [vmem:[%s13986_s1 + $0x10] sm:$0xff] }
 0xa1f   :  { %7638 = vmatprep.mubr.f32.mxu1 %v8170_v32  ;;  %v7811_v32 = vld [vmem:[%s13986_s1] sm:$0xff] }
 0xa20   :  { %7639 = vmatmul.mubr.f32.vlgmr.msra.gmra.mxu1 %v8173_v58  ;;  %v7812_v58 = vld [vmem:[%s13986_s1 + $0x8] sm:$0xff] }
 0xa21   :  { %7514 = vxpose.xlu1.b32.cont [9/16] (narrow) %v7375_v17, 8  ;;  %7645 = vmatpush1.msra.mxu1 %v7432_v29  ;;  %v7976_v29 = vld [vmem:[%s13987_s25] ss:$0 sm:$0xff] }
 0xa22   :  { %7646 = vmatprep.subr.mxu1 %v13416_v34 }
 0xa23   :  { %7647 = vmatpush1.msra.mxu1 %v7431_v30 }
 0xa24   :  { %7648 = vmatprep.subr.mxu1 %v13416_v34 }
 0xa25   :  { %7515 = vxpose.xlu1.b32.cont [10/16] (narrow) %v7376_v62, 8  ;;  %7649 = vmatpush1.msra.mxu1 %v7430_v40 }
 0xa26   :  { %7650 = vmatprep.subr.mxu1 %v13416_v34 }
 0xa27   :  { %7651 = vmatpush1.msra.mxu1 %v7429_v33  ;;  %v7978_v33 = vld [vmem:[%s13988_s15] ss:$0 sm:$0xff] }
 0xa28   :  { %7652 = vmatprep.subr.mxu1 %v13416_v34 }
 0xa29   :  { %7516 = vxpose.xlu1.b32.cont [11/16] (narrow) %v7377_v43, 8  ;;  %7653 = vmatpush1.msra.mxu1 %v7428_v7 }
 0xa2a   :  { %7654 = vmatprep.subr.mxu1 %v13416_v34 }
 0xa2b   :  { %7655 = vmatpush1.msra.mxu1 %v7427_v46 }
 0xa2c   :  { %7656 = vmatprep.subr.mxu1 %v13416_v34 }
 0xa2d   :  { %7517 = vxpose.xlu1.b32.cont [12/16] (narrow) %v7378_v25, 8  ;;  %7657 = vmatpush1.msra.mxu1 %v7426_v9 }
 0xa2e   :  { %7658 = vmatprep.subr.mxu1 %v13416_v34 }
 0xa2f   :  { %7659 = vmatpush1.msra.mxu1 %v7425_v14 }
 0xa30   :  { %7660 = vmatprep.subr.mxu1 %v13416_v34 }
 0xa31   :  { %7518 = vxpose.xlu1.b32.cont [13/16] (narrow) %v7379_v37, 8  ;;  %7661 = vmatpush1.msra.mxu1 %v7424_v6 }
 0xa32   :  { %7662 = vmatprep.subr.mxu1 %v13416_v34 }
 0xa33   :  { %7663 = vmatpush1.msra.mxu1 %v7423_v45 }
 0xa34   :  { %7664 = vmatprep.subr.mxu1 %v13416_v34 }
 0xa35   :  { %7519 = vxpose.xlu1.b32.cont [14/16] (narrow) %v7380_v23, 8  ;;  %7665 = vmatpush1.msra.mxu1 %v7422_v11 }
 0xa36   :  { %7666 = vmatprep.subr.mxu1 %v13416_v34 }
 0xa37   :  { %7667 = vmatpush1.msra.mxu1 %v7421_v44 }
 0xa38   :  { %7668 = vmatprep.subr.mxu1 %v13416_v34 }
 0xa39   :  { %7520 = vxpose.xlu1.b32.cont [15/16] (narrow) %v7381_v0, 8  ;;  %7669 = vmatpush1.msra.mxu1 %v7420_v16 }
 0xa3a   :  { %7670 = vmatprep.subr.mxu1 %v13416_v34 }
 0xa3b   :  { %7671 = vmatpush1.msra.mxu1 %v7419_v5 }
 0xa3c   :  { %7672 = vmatprep.subr.mxu1 %v13416_v34 }
 0xa3d   :  { %7521 = vxpose.xlu1.b32.end [16/16] (narrow) %v7382_v8, 8  ;;  %7673 = vmatpush1.msra.mxu1 %v7418_v63 }
 0xa3e   :  { %7674 = vmatprep.subr.mxu1 %v13416_v34 }
 0xa3f   :  { %7675 = vmatpush1.msra.mxu1 %v7417_v56 }
 0xa40   :  { %7704 = vmatprep.subr.mxu1 %v13416_v34 }
 0xa41   :  { %7705 = vmatpush2.msra.mxu1 %v7434_v15 }
 0xa42   :  { %7706 = vmatprep.subr.mxu1 %v13416_v34 }
 0xa43   :  { %7707 = vmatpush2.msra.mxu1 %v7433_v22 }
 0xa75   :  { %v7554_v35 = vpop.trf.xlu1 }
 0xa76   :  { %7975 = vmatprep.mubr.msk.f32.mxu1 %vm7570_vm3, %v7554_v35 }
 0xa7d   :  { %v7522_v28 = vpop.trf.xlu1 }
 0xa7e   :  { %7709 = vmatmul.mubr.f32.vlgmr.msra.gmra.mxu1 %v7522_v28 }
 0xae0   :  { %v8013_v60 = vpop.f32.mrf.mxu1 }
 0xae2   :  { %v8014_v54 = vpop.f32.mrf.mxu1 }
 0xae3   :  { %v8015_v49 = vadd.f32 %v8014_v54, %v8013_v60 }
 0xae5   :  { %v7641_v41 = vadd.f32 %v8015_v49, %v7974_v13 }
 0xb3e   :  { %v7710_v57 = vpop.f32.mrf.mxu1 }
 0xb3f   :  { %v7711_v42 = vadd.f32 %v7710_v57, %v7641_v41 }
 0xb40   :  { %v7712_v12 = vpop.f32.mrf.mxu1 }
 0xb41   :  { %v7714_v51 = vmax.f32 %v7711_v42, 0.0 }
 0xb43   :  { %8075 = vmatmul.mubr.msk.f32.vlgmr.msra.gmra.mxu0 %vm4573_vm8, %v7714_v51  ;;  %vm7829_vm8 = vcmask 687104  }
 0xb44   :  { %8078 = vmatpush3.msk.msra.mxu0 %vm7833_vm13, %v7821_v61  ;;  %8099 = vmatprep.mubr.msk.f32.mxu0 %vm8239_vm1, %v13416_v34 }
 0xb45   :  { %8079 = vmatprep.subr.mxu0 %v13416_v34 }
 0xb46   :  { %8080 = vmatpush3.msra.mxu0 %v7820_v3 }
 0xb47   :  { %8081 = vmatprep.subr.mxu0 %v13416_v34 }
 0xb48   :  { %8082 = vmatpush3.msra.mxu0 %v7819_v55 }
 0xb49   :  { %8083 = vmatprep.subr.mxu0 %v13416_v34 }
 0xb4a   :  { %8084 = vmatpush3.msra.mxu0 %v7818_v26 }
 0xb4b   :  { %8085 = vmatprep.subr.mxu0 %v13416_v34 }
 0xb4c   :  { %8086 = vmatpush3.msra.mxu0 %v7817_v59 }
 0xb4d   :  { %8087 = vmatprep.subr.mxu0 %v13416_v34 }
 0xb4e   :  { %8088 = vmatpush3.msra.mxu0 %v7816_v2 }
 0xb4f   :  { %8089 = vmatprep.subr.mxu0 %v13416_v34 }
 0xb50   :  { %8090 = vmatpush3.msra.mxu0 %v7815_v47 }
 0xb51   :  { %8091 = vmatprep.subr.mxu0 %v13416_v34 }
 0xb52   :  { %8092 = vmatpush3.msra.mxu0 %v7814_v20 }
 0xb53   :  { %8093 = vmatprep.subr.mxu0 %v13416_v34 }
 0xb54   :  { %8094 = vmatpush3.msra.mxu0 %v7813_v31 }
 0xb55   :  { %8095 = vmatprep.subr.mxu0 %v13416_v34 }
 0xb56   :  { %8096 = vmatpush3.msra.mxu0 %v7812_v58 }
 0xb57   :  { %8097 = vmatprep.subr.mxu0 %v13416_v34 }
 0xb58   :  { %8098 = vmatpush3.msra.mxu0 %v7811_v32 }
 0xc03   :  { %v7806_v17 = vpop.f32.mrf.mxu0 }
 0xc04   :  { %v7807_v30 = vadd.f32 %v7976_v29, %v7806_v17 }
 0xc05   :  { %v8076_v40 = vpop.f32.mrf.mxu0 }
 0xc06   :  { %v7810_v62 = vmax.f32 %v7807_v30, 0.0 }
 0xc08   :  { %8100 = vmatmul.mubr.msk.f32.vlgmr.msra.gmra.mxu0 %vm7829_vm8, %v7810_v62 }
 0xcc8   :  { %v7903_v7 = vpop.f32.mrf.mxu0 }
 0xcc9   :  { %v7904_v34 = vadd.f32 %v7978_v33, %v7903_v7 }
 0xcca   :  { %v8101_v43 = vpop.f32.mrf.mxu0 }
 0xccb   :  { %7908 = vst.msk [vmem:[#allocation5] sm:$0x3] %vm7907_vm7, %v7904_v34 }
 0xccc   :  { %8197 = shalt.err (!%p8194_p4)
}
 0xccd   :  { %s13989_s7 = sld [smem:[#allocation15_spill]] }
 0xcd3   :  { %7918 = dma.vmem_to_hbm [thread:$0]  %s7916_s4, 32, %s13989_s7, [#allocation6]  }
 0xcd4   :  { %8206 = dma.done.wait [#allocation6], 32  }
 0xcd5   :  { %8207 = vsyncadd [#allocation6], 4294967264 }
 0xcd6   :  { %7922 = vsyncpa [#allocation6], 1 }

</bundles_post_ra>
